<compile_context>
chip_gen: v7x
topology: tpu7x:2x2x1
jax: 0.10.0
libtpu: 0.0.40
codegen_flags: <defaults>
</compile_context>

<pallas_src>
import numpy as np
import jax
import jax.numpy as jnp
from jax import lax
from jax.experimental import pallas as pl
from jax.experimental.pallas import tpu as pltpu

F_IN = 1152  # 30*30 = 900 valid flat positions, zero-padded to 9*128 lanes


# ----------------------------------------------------------------------------
# Fused kernel: one grid step == one image, everything VMEM-resident.
# ----------------------------------------------------------------------------
def _tsr_fused_kernel(
    x_ref,
    w1, b1, w2, b2, w3, b3, w4, b4, w5, b5, w6, b6, w7, b7, w8, b8, w9, b9,
    wf, bfc,
    o_ref,
    ping, pong,
):
    f32, bf16 = jnp.float32, jnp.bfloat16

    def conv3x3(src, dst, w_ref, b_ref, cin, cout, g, sh, sw, relu):
        # VALID 3x3 conv == 9 lane-shifted (Cout,Cin)@(Cin,G) matmuls.
        acc = jnp.zeros((cout, g), f32)
        for dy in range(3):
            for dx in range(3):
                s = dy * sh + dx * sw
                win = src[0:cin, s:s + g].astype(bf16)
                acc = acc + jnp.dot(w_ref[dy * 3 + dx], win,
                                    preferred_element_type=f32)
        y = acc + b_ref[...]
        if relu:
            y = jnp.maximum(y, 0.0)
        dst[0:cout, 0:g] = y

    def conv1x1(src, dst, w_ref, b_ref, cin, cout, g):
        y = jnp.dot(w_ref[...], src[0:cin, 0:g].astype(bf16),
                    preferred_element_type=f32)
        dst[0:cout, 0:g] = y + b_ref[...]

    def maxpool2x2(src, dst, c, g, sh, sw):
        # 2x2/2 max pool == elementwise max of 4 lane-shifted slabs.
        p = jnp.maximum(
            jnp.maximum(src[0:c, 0:g], src[0:c, sw:sw + g]),
            jnp.maximum(src[0:c, sh:sh + g], src[0:c, sh + sw:sh + sw + g]))
        dst[0:c, 0:g] = p

    # Stage the image (3, F_IN) into VMEM scratch.
    ping[0:3, :] = x_ref[0]

    conv3x3(ping, pong, w1, b1, 3, 40, 1024, 30, 1, relu=True)    # conv1+relu
    maxpool2x2(pong, ping, 40, 896, 30, 1)                        # pool1
    conv1x1(ping, pong, w2, b2, 40, 20, 896)                      # conv2
    conv3x3(pong, ping, w3, b3, 20, 48, 768, 60, 2, relu=False)   # conv3
    conv1x1(ping, pong, w4, b4, 48, 24, 768)                      # conv4
    conv3x3(pong, ping, w5, b5, 24, 48, 640, 60, 2, relu=True)    # conv5+relu
    maxpool2x2(ping, pong, 48, 512, 60, 2)                        # pool2
    conv1x1(pong, ping, w6, b6, 48, 24, 512)                      # conv6
    conv3x3(ping, pong, w7, b7, 24, 48, 256, 120, 4, relu=False)  # conv7
    conv1x1(pong, ping, w8, b8, 48, 32, 256)                      # conv8

    # conv9 (3x3, 32->64) + ReLU: only flat position 0 is spatially valid.
    # Compute a small row-oriented (8, 64) tile (one 2-D transpose of the
    # (32, 256) input slab) so the feature comes out as a lane-major row.
    xt = ping[0:32, 0:256].T                                      # (256, 32) f32
    acc = jnp.zeros((8, 64), f32)
    for dy in range(3):
        for dx in range(3):
            s = dy * 120 + dx * 4
            acc = acc + jnp.dot(xt[s:s + 8, :].astype(bf16), w9[dy * 3 + dx],
                                preferred_element_type=f32)
    y9 = jnp.maximum(acc + b9[...], 0.0)                          # (8, 64)
    feat = y9[0:1, :]                                             # (1, 64)

    # Dropout(0.15) is identity at inference; fc + log_softmax.
    logits = jnp.dot(feat.astype(bf16), wf[...],
                     preferred_element_type=f32) + bfc[...]       # (1, 43)
    m = jnp.max(logits, axis=1, keepdims=True)
    z = logits - m
    lse = jnp.log(jnp.sum(jnp.exp(z), axis=1, keepdims=True))
    o_ref[0] = z - lse


# ----------------------------------------------------------------------------
# Parameters (torch layouts) + kernel-layout prep
# ----------------------------------------------------------------------------
_CONV_SPECS = {
    "conv1": (40, 3, 3, 3), "conv2": (20, 40, 1, 1), "conv3": (48, 20, 3, 3),
    "conv4": (24, 48, 1, 1), "conv5": (48, 24, 3, 3), "conv6": (24, 48, 1, 1),
    "conv7": (48, 24, 3, 3), "conv8": (32, 48, 1, 1), "conv9": (64, 32, 3, 3),
}


def init_params(key):
    params = {}
    for name, shp in _CONV_SPECS.items():
        key, kw, kb = jax.random.split(key, 3)
        fan_in = shp[1] * shp[2] * shp[3]
        params[name] = (
            jax.random.normal(kw, shp, jnp.float32) / np.sqrt(fan_in),
            0.01 * jax.random.normal(kb, (shp[0],), jnp.float32),
        )
    key, kw, kb = jax.random.split(key, 3)
    params["fc"] = (
        jax.random.normal(kw, (43, 64), jnp.float32) / 8.0,  # torch Linear (out, in)
        0.01 * jax.random.normal(kb, (43,), jnp.float32),
    )
    return params


def _prep_params(params):
    """Torch-layout params -> kernel operands (bf16 weights, f32 column biases)."""
    def conv3(name):
        w, b = params[name]
        cout, cin = w.shape[0], w.shape[1]
        wt = jnp.transpose(w, (2, 3, 0, 1)).reshape(9, cout, cin)  # [t, o, i]
        return [wt.astype(jnp.bfloat16), b.reshape(cout, 1).astype(jnp.float32)]

    def conv1(name):
        w, b = params[name]
        cout, cin = w.shape[0], w.shape[1]
        return [w.reshape(cout, cin).astype(jnp.bfloat16),
                b.reshape(cout, 1).astype(jnp.float32)]

    ops = []
    ops += conv3("conv1"); ops += conv1("conv2")
    ops += conv3("conv3"); ops += conv1("conv4")
    ops += conv3("conv5"); ops += conv1("conv6")
    ops += conv3("conv7"); ops += conv1("conv8")
    w9, b9 = params["conv9"]  # conv9 is consumed row-oriented: (9, Cin, Cout)
    ops.append(jnp.transpose(w9, (2, 3, 1, 0)).reshape(9, 32, 64).astype(jnp.bfloat16))
    ops.append(b9.reshape(1, 64).astype(jnp.float32))
    wf, bf_ = params["fc"]
    ops.append(jnp.transpose(wf, (1, 0)).astype(jnp.bfloat16))  # (64, 43)
    ops.append(bf_.reshape(1, 43).astype(jnp.float32))
    return ops


def _replicated_spec(shape):
    zeros = (0,) * len(shape)
    return pl.BlockSpec(tuple(shape), lambda n, _z=zeros: _z)


@jax.jit
def forward(params, x_nchw):
    """x_nchw: (N, 3, 30, 30) float32 -> (N, 43) log-probabilities."""
    n = x_nchw.shape[0]
    x_flat = jnp.pad(x_nchw.reshape(n, 3, 900).astype(jnp.float32),
                     ((0, 0), (0, 0), (0, F_IN - 900)))
    ops = _prep_params(params)
    in_specs = [pl.BlockSpec((1, 3, F_IN), lambda i: (i, 0, 0))]
    in_specs += [_replicated_spec(a.shape) for a in ops]

    out = pl.pallas_call(
        _tsr_fused_kernel,
        out_shape=jax.ShapeDtypeStruct((n, 1, 43), jnp.float32),
        grid=(n,),
        in_specs=in_specs,
        out_specs=pl.BlockSpec((1, 1, 43), lambda i: (i, 0, 0)),
        scratch_shapes=[pltpu.VMEM((64, F_IN), jnp.float32),
                        pltpu.VMEM((64, F_IN), jnp.float32)],
        compiler_params=pltpu.CompilerParams(
            dimension_semantics=("parallel",)),
        cost_estimate=pl.CostEstimate(
            flops=40_000_000 * n, transcendentals=64 * n,
            bytes_accessed=n * (3 * 900 * 4 + 43 * 4) + 60_000),
    )(x_flat, *ops)
    return out.reshape(n, 43)


# ----------------------------------------------------------------------------
# Pure-JAX f32 reference (for correctness checking only)
# ----------------------------------------------------------------------------
def reference_forward(params, x_nchw):
    hi = lax.Precision.HIGHEST

    def conv(x, w, b, relu=False):
        y = lax.conv_general_dilated(
            x, w, (1, 1), "VALID",
            dimension_numbers=("NCHW", "OIHW", "NCHW"), precision=hi)
        y = y + b.reshape(1, -1, 1, 1)
        return jnp.maximum(y, 0.0) if relu else y

    def pool(x):
        return lax.reduce_window(
            x, -jnp.inf, lax.max, (1, 1, 2, 2), (1, 1, 2, 2), "VALID")

    x = conv(x_nchw, *params["conv1"], relu=True); x = pool(x)
    x = conv(x, *params["conv2"]); x = conv(x, *params["conv3"]); x = conv(x, *params["conv4"])
    x = conv(x, *params["conv5"], relu=True); x = pool(x)
    x = conv(x, *params["conv6"]); x = conv(x, *params["conv7"]); x = conv(x, *params["conv8"])
    x = conv(x, *params["conv9"], relu=True)
    feat = x.reshape(x.shape[0], 64)
    wf, bf_ = params["fc"]
    logits = jnp.dot(feat, wf.T, precision=hi) + bf_
    return jax.nn.log_softmax(logits, axis=1)


if __name__ == "__main__":
    key = jax.random.PRNGKey(0)
    pkey, xkey = jax.random.split(key)
    params = init_params(pkey)

    # 30x30 input => 1x1x64 feature map at the flatten, as the module's
    # x.view(-1, 64*1*1) implies.  Batch = 2, NCHW like PyTorch.
    x = jax.random.normal(xkey, (2, 3, 30, 30), jnp.float32)

    out = jax.block_until_ready(forward(params, x))
    assert out.shape == (2, 43), out.shape
    assert bool(jnp.all(jnp.isfinite(out)))

    # Kernel uses bf16 MXU operands with f32 accumulation -> compare against
    # the f32 reference with a correspondingly loose tolerance.
    ref = jax.block_until_ready(reference_forward(params, x))
    np.testing.assert_allclose(np.asarray(out), np.asarray(ref),
                               atol=5e-2, rtol=2e-2)

    print("KERNEL_OK")
</pallas_src>

<mosaic_0001>
module attributes {stable_mosaic.version = 11 : i64} {
  func.func @_tsr_fused_kernel(%arg0: i32, %arg1: memref<1x3x1152xf32, #tpu.memory_space<vmem>>, %arg2: memref<9x40x3xbf16, #tpu.memory_space<vmem>>, %arg3: memref<40x1xf32, #tpu.memory_space<vmem>>, %arg4: memref<20x40xbf16, #tpu.memory_space<vmem>>, %arg5: memref<20x1xf32, #tpu.memory_space<vmem>>, %arg6: memref<9x48x20xbf16, #tpu.memory_space<vmem>>, %arg7: memref<48x1xf32, #tpu.memory_space<vmem>>, %arg8: memref<24x48xbf16, #tpu.memory_space<vmem>>, %arg9: memref<24x1xf32, #tpu.memory_space<vmem>>, %arg10: memref<9x48x24xbf16, #tpu.memory_space<vmem>>, %arg11: memref<48x1xf32, #tpu.memory_space<vmem>>, %arg12: memref<24x48xbf16, #tpu.memory_space<vmem>>, %arg13: memref<24x1xf32, #tpu.memory_space<vmem>>, %arg14: memref<9x48x24xbf16, #tpu.memory_space<vmem>>, %arg15: memref<48x1xf32, #tpu.memory_space<vmem>>, %arg16: memref<32x48xbf16, #tpu.memory_space<vmem>>, %arg17: memref<32x1xf32, #tpu.memory_space<vmem>>, %arg18: memref<9x32x64xbf16, #tpu.memory_space<vmem>>, %arg19: memref<1x64xf32, #tpu.memory_space<vmem>>, %arg20: memref<64x43xbf16, #tpu.memory_space<vmem>>, %arg21: memref<1x43xf32, #tpu.memory_space<vmem>>, %arg22: memref<1x1x43xf32, #tpu.memory_space<vmem>>, %arg23: memref<64x1152xf32, #tpu.memory_space<vmem>>, %arg24: memref<64x1152xf32, #tpu.memory_space<vmem>>) attributes {dimension_semantics = [#tpu.dimension_semantics<parallel>], iteration_bounds = array<i64: 2>, scalar_prefetch = 0 : i64, scratch_operands = 2 : i64, tpu.core_type = #tpu.core_type<tc>, window_params = [{transform_indices = @transform_0, window_bounds = array<i64: 1, 3, 1152>}, {pipeline_mode = #tpu.pipeline_mode<synchronous>, transform_indices = @transform_1, window_bounds = array<i64: 9, 40, 3>}, {pipeline_mode = #tpu.pipeline_mode<synchronous>, transform_indices = @transform_2, window_bounds = array<i64: 40, 1>}, {pipeline_mode = #tpu.pipeline_mode<synchronous>, transform_indices = @transform_3, window_bounds = array<i64: 20, 40>}, {pipeline_mode = #tpu.pipeline_mode<synchronous>, transform_indices = @transform_4, window_bounds = array<i64: 20, 1>}, {pipeline_mode = #tpu.pipeline_mode<synchronous>, transform_indices = @transform_5, window_bounds = array<i64: 9, 48, 20>}, {pipeline_mode = #tpu.pipeline_mode<synchronous>, transform_indices = @transform_6, window_bounds = array<i64: 48, 1>}, {pipeline_mode = #tpu.pipeline_mode<synchronous>, transform_indices = @transform_7, window_bounds = array<i64: 24, 48>}, {pipeline_mode = #tpu.pipeline_mode<synchronous>, transform_indices = @transform_8, window_bounds = array<i64: 24, 1>}, {pipeline_mode = #tpu.pipeline_mode<synchronous>, transform_indices = @transform_9, window_bounds = array<i64: 9, 48, 24>}, {pipeline_mode = #tpu.pipeline_mode<synchronous>, transform_indices = @transform_10, window_bounds = array<i64: 48, 1>}, {pipeline_mode = #tpu.pipeline_mode<synchronous>, transform_indices = @transform_11, window_bounds = array<i64: 24, 48>}, {pipeline_mode = #tpu.pipeline_mode<synchronous>, transform_indices = @transform_12, window_bounds = array<i64: 24, 1>}, {pipeline_mode = #tpu.pipeline_mode<synchronous>, transform_indices = @transform_13, window_bounds = array<i64: 9, 48, 24>}, {pipeline_mode = #tpu.pipeline_mode<synchronous>, transform_indices = @transform_14, window_bounds = array<i64: 48, 1>}, {pipeline_mode = #tpu.pipeline_mode<synchronous>, transform_indices = @transform_15, window_bounds = array<i64: 32, 48>}, {pipeline_mode = #tpu.pipeline_mode<synchronous>, transform_indices = @transform_16, window_bounds = array<i64: 32, 1>}, {pipeline_mode = #tpu.pipeline_mode<synchronous>, transform_indices = @transform_17, window_bounds = array<i64: 9, 32, 64>}, {pipeline_mode = #tpu.pipeline_mode<synchronous>, transform_indices = @transform_18, window_bounds = array<i64: 1, 64>}, {pipeline_mode = #tpu.pipeline_mode<synchronous>, transform_indices = @transform_19, window_bounds = array<i64: 64, 43>}, {pipeline_mode = #tpu.pipeline_mode<synchronous>, transform_indices = @transform_20, window_bounds = array<i64: 1, 43>}, {transform_indices = @transform_21, window_bounds = array<i64: 1, 1, 43>}]} {
    %c0 = arith.constant 0 : index
    %c0_0 = arith.constant 0 : index
    %c0_1 = arith.constant 0 : index
    %0 = vector.load %arg1[%c0, %c0_0, %c0_1] : memref<1x3x1152xf32, #tpu.memory_space<vmem>>, vector<1x3x1152xf32>
    %1 = vector.shape_cast %0 : vector<1x3x1152xf32> to vector<3x1152xf32>
    %c0_2 = arith.constant 0 : index
    %c0_3 = arith.constant 0 : index
    %2 = vector.load %arg23[%c0_2, %c0_3] : memref<64x1152xf32, #tpu.memory_space<vmem>>, vector<3x1152xf32>
    tpu.vector_store %arg23[%c0_2, %c0_3], %1 {strides = array<i32>} : memref<64x1152xf32, #tpu.memory_space<vmem>>, vector<3x1152xf32>,
    %cst = arith.constant 0.000000e+00 : f32
    %3 = vector.broadcast %cst : f32 to vector<40x1024xf32>
    %c0_4 = arith.constant 0 : index
    %c0_5 = arith.constant 0 : index
    %4 = vector.load %arg23[%c0_4, %c0_5] : memref<64x1152xf32, #tpu.memory_space<vmem>>, vector<3x1024xf32>
    %5 = arith.truncf %4 : vector<3x1024xf32> to vector<3x1024xbf16>
    %c0_6 = arith.constant 0 : index
    %c0_7 = arith.constant 0 : index
    %c0_8 = arith.constant 0 : index
    %6 = vector.load %arg2[%c0_6, %c0_7, %c0_8] : memref<9x40x3xbf16, #tpu.memory_space<vmem>>, vector<1x40x3xbf16>
    %7 = vector.shape_cast %6 : vector<1x40x3xbf16> to vector<40x3xbf16>
    %cst_9 = arith.constant dense<0.000000e+00> : vector<40x1024xf32>
    %8 = tpu.matmul %7, %5, %cst_9 {dimension_numbers = #tpu.dot_dimension_numbers<[1], [0], [0], [1], [0, 0, 1, 1], [], []>} : vector<40x3xbf16>, vector<3x1024xbf16>, vector<40x1024xf32> -> vector<40x1024xf32>
    %9 = arith.addf %3, %8 : vector<40x1024xf32>
    %c0_10 = arith.constant 0 : index
    %c1 = arith.constant 1 : index
    %10 = vector.load %arg23[%c0_10, %c1] : memref<64x1152xf32, #tpu.memory_space<vmem>>, vector<3x1024xf32>
    %11 = arith.truncf %10 : vector<3x1024xf32> to vector<3x1024xbf16>
    %c1_11 = arith.constant 1 : index
    %c0_12 = arith.constant 0 : index
    %c0_13 = arith.constant 0 : index
    %12 = vector.load %arg2[%c1_11, %c0_12, %c0_13] : memref<9x40x3xbf16, #tpu.memory_space<vmem>>, vector<1x40x3xbf16>
    %13 = vector.shape_cast %12 : vector<1x40x3xbf16> to vector<40x3xbf16>
    %cst_14 = arith.constant dense<0.000000e+00> : vector<40x1024xf32>
    %14 = tpu.matmul %13, %11, %cst_14 {dimension_numbers = #tpu.dot_dimension_numbers<[1], [0], [0], [1], [0, 0, 1, 1], [], []>} : vector<40x3xbf16>, vector<3x1024xbf16>, vector<40x1024xf32> -> vector<40x1024xf32>
    %15 = arith.addf %9, %14 : vector<40x1024xf32>
    %c0_15 = arith.constant 0 : index
    %c2 = arith.constant 2 : index
    %16 = vector.load %arg23[%c0_15, %c2] : memref<64x1152xf32, #tpu.memory_space<vmem>>, vector<3x1024xf32>
    %17 = arith.truncf %16 : vector<3x1024xf32> to vector<3x1024xbf16>
    %c2_16 = arith.constant 2 : index
    %c0_17 = arith.constant 0 : index
    %c0_18 = arith.constant 0 : index
    %18 = vector.load %arg2[%c2_16, %c0_17, %c0_18] : memref<9x40x3xbf16, #tpu.memory_space<vmem>>, vector<1x40x3xbf16>
    %19 = vector.shape_cast %18 : vector<1x40x3xbf16> to vector<40x3xbf16>
    %cst_19 = arith.constant dense<0.000000e+00> : vector<40x1024xf32>
    %20 = tpu.matmul %19, %17, %cst_19 {dimension_numbers = #tpu.dot_dimension_numbers<[1], [0], [0], [1], [0, 0, 1, 1], [], []>} : vector<40x3xbf16>, vector<3x1024xbf16>, vector<40x1024xf32> -> vector<40x1024xf32>
    %21 = arith.addf %15, %20 : vector<40x1024xf32>
    %c0_20 = arith.constant 0 : index
    %c30 = arith.constant 30 : index
    %22 = vector.load %arg23[%c0_20, %c30] : memref<64x1152xf32, #tpu.memory_space<vmem>>, vector<3x1024xf32>
    %23 = arith.truncf %22 : vector<3x1024xf32> to vector<3x1024xbf16>
    %c3 = arith.constant 3 : index
    %c0_21 = arith.constant 0 : index
    %c0_22 = arith.constant 0 : index
    %24 = vector.load %arg2[%c3, %c0_21, %c0_22] : memref<9x40x3xbf16, #tpu.memory_space<vmem>>, vector<1x40x3xbf16>
    %25 = vector.shape_cast %24 : vector<1x40x3xbf16> to vector<40x3xbf16>
    %cst_23 = arith.constant dense<0.000000e+00> : vector<40x1024xf32>
    %26 = tpu.matmul %25, %23, %cst_23 {dimension_numbers = #tpu.dot_dimension_numbers<[1], [0], [0], [1], [0, 0, 1, 1], [], []>} : vector<40x3xbf16>, vector<3x1024xbf16>, vector<40x1024xf32> -> vector<40x1024xf32>
    %27 = arith.addf %21, %26 : vector<40x1024xf32>
    %c0_24 = arith.constant 0 : index
    %c31 = arith.constant 31 : index
    %28 = vector.load %arg23[%c0_24, %c31] : memref<64x1152xf32, #tpu.memory_space<vmem>>, vector<3x1024xf32>
    %29 = arith.truncf %28 : vector<3x1024xf32> to vector<3x1024xbf16>
    %c4 = arith.constant 4 : index
    %c0_25 = arith.constant 0 : index
    %c0_26 = arith.constant 0 : index
    %30 = vector.load %arg2[%c4, %c0_25, %c0_26] : memref<9x40x3xbf16, #tpu.memory_space<vmem>>, vector<1x40x3xbf16>
    %31 = vector.shape_cast %30 : vector<1x40x3xbf16> to vector<40x3xbf16>
    %cst_27 = arith.constant dense<0.000000e+00> : vector<40x1024xf32>
    %32 = tpu.matmul %31, %29, %cst_27 {dimension_numbers = #tpu.dot_dimension_numbers<[1], [0], [0], [1], [0, 0, 1, 1], [], []>} : vector<40x3xbf16>, vector<3x1024xbf16>, vector<40x1024xf32> -> vector<40x1024xf32>
    %33 = arith.addf %27, %32 : vector<40x1024xf32>
    %c0_28 = arith.constant 0 : index
    %c32 = arith.constant 32 : index
    %34 = vector.load %arg23[%c0_28, %c32] : memref<64x1152xf32, #tpu.memory_space<vmem>>, vector<3x1024xf32>
    %35 = arith.truncf %34 : vector<3x1024xf32> to vector<3x1024xbf16>
    %c5 = arith.constant 5 : index
    %c0_29 = arith.constant 0 : index
    %c0_30 = arith.constant 0 : index
    %36 = vector.load %arg2[%c5, %c0_29, %c0_30] : memref<9x40x3xbf16, #tpu.memory_space<vmem>>, vector<1x40x3xbf16>
    %37 = vector.shape_cast %36 : vector<1x40x3xbf16> to vector<40x3xbf16>
    %cst_31 = arith.constant dense<0.000000e+00> : vector<40x1024xf32>
    %38 = tpu.matmul %37, %35, %cst_31 {dimension_numbers = #tpu.dot_dimension_numbers<[1], [0], [0], [1], [0, 0, 1, 1], [], []>} : vector<40x3xbf16>, vector<3x1024xbf16>, vector<40x1024xf32> -> vector<40x1024xf32>
    %39 = arith.addf %33, %38 : vector<40x1024xf32>
    %c0_32 = arith.constant 0 : index
    %c60 = arith.constant 60 : index
    %40 = vector.load %arg23[%c0_32, %c60] : memref<64x1152xf32, #tpu.memory_space<vmem>>, vector<3x1024xf32>
    %41 = arith.truncf %40 : vector<3x1024xf32> to vector<3x1024xbf16>
    %c6 = arith.constant 6 : index
    %c0_33 = arith.constant 0 : index
    %c0_34 = arith.constant 0 : index
    %42 = vector.load %arg2[%c6, %c0_33, %c0_34] : memref<9x40x3xbf16, #tpu.memory_space<vmem>>, vector<1x40x3xbf16>
    %43 = vector.shape_cast %42 : vector<1x40x3xbf16> to vector<40x3xbf16>
    %cst_35 = arith.constant dense<0.000000e+00> : vector<40x1024xf32>
    %44 = tpu.matmul %43, %41, %cst_35 {dimension_numbers = #tpu.dot_dimension_numbers<[1], [0], [0], [1], [0, 0, 1, 1], [], []>} : vector<40x3xbf16>, vector<3x1024xbf16>, vector<40x1024xf32> -> vector<40x1024xf32>
    %45 = arith.addf %39, %44 : vector<40x1024xf32>
    %c0_36 = arith.constant 0 : index
    %c61 = arith.constant 61 : index
    %46 = vector.load %arg23[%c0_36, %c61] : memref<64x1152xf32, #tpu.memory_space<vmem>>, vector<3x1024xf32>
    %47 = arith.truncf %46 : vector<3x1024xf32> to vector<3x1024xbf16>
    %c7 = arith.constant 7 : index
    %c0_37 = arith.constant 0 : index
    %c0_38 = arith.constant 0 : index
    %48 = vector.load %arg2[%c7, %c0_37, %c0_38] : memref<9x40x3xbf16, #tpu.memory_space<vmem>>, vector<1x40x3xbf16>
    %49 = vector.shape_cast %48 : vector<1x40x3xbf16> to vector<40x3xbf16>
    %cst_39 = arith.constant dense<0.000000e+00> : vector<40x1024xf32>
    %50 = tpu.matmul %49, %47, %cst_39 {dimension_numbers = #tpu.dot_dimension_numbers<[1], [0], [0], [1], [0, 0, 1, 1], [], []>} : vector<40x3xbf16>, vector<3x1024xbf16>, vector<40x1024xf32> -> vector<40x1024xf32>
    %51 = arith.addf %45, %50 : vector<40x1024xf32>
    %c0_40 = arith.constant 0 : index
    %c62 = arith.constant 62 : index
    %52 = vector.load %arg23[%c0_40, %c62] : memref<64x1152xf32, #tpu.memory_space<vmem>>, vector<3x1024xf32>
    %53 = arith.truncf %52 : vector<3x1024xf32> to vector<3x1024xbf16>
    %c8 = arith.constant 8 : index
    %c0_41 = arith.constant 0 : index
    %c0_42 = arith.constant 0 : index
    %54 = vector.load %arg2[%c8, %c0_41, %c0_42] : memref<9x40x3xbf16, #tpu.memory_space<vmem>>, vector<1x40x3xbf16>
    %55 = vector.shape_cast %54 : vector<1x40x3xbf16> to vector<40x3xbf16>
    %cst_43 = arith.constant dense<0.000000e+00> : vector<40x1024xf32>
    %56 = tpu.matmul %55, %53, %cst_43 {dimension_numbers = #tpu.dot_dimension_numbers<[1], [0], [0], [1], [0, 0, 1, 1], [], []>} : vector<40x3xbf16>, vector<3x1024xbf16>, vector<40x1024xf32> -> vector<40x1024xf32>
    %57 = arith.addf %51, %56 : vector<40x1024xf32>
    %c0_44 = arith.constant 0 : index
    %c0_45 = arith.constant 0 : index
    %58 = vector.load %arg3[%c0_44, %c0_45] : memref<40x1xf32, #tpu.memory_space<vmem>>, vector<40x1xf32>
    %59 = vector.broadcast %58 : vector<40x1xf32> to vector<40x1024xf32>
    %60 = arith.addf %57, %59 : vector<40x1024xf32>
    %cst_46 = arith.constant 0.000000e+00 : f32
    %61 = vector.broadcast %cst_46 : f32 to vector<40x1024xf32>
    %62 = arith.maximumf %60, %61 : vector<40x1024xf32>
    %c0_47 = arith.constant 0 : index
    %c0_48 = arith.constant 0 : index
    %63 = vector.load %arg24[%c0_47, %c0_48] : memref<64x1152xf32, #tpu.memory_space<vmem>>, vector<40x1024xf32>
    tpu.vector_store %arg24[%c0_47, %c0_48], %62 {strides = array<i32>} : memref<64x1152xf32, #tpu.memory_space<vmem>>, vector<40x1024xf32>,
    %c0_49 = arith.constant 0 : index
    %c0_50 = arith.constant 0 : index
    %64 = vector.load %arg24[%c0_49, %c0_50] : memref<64x1152xf32, #tpu.memory_space<vmem>>, vector<40x896xf32>
    %c0_51 = arith.constant 0 : index
    %c1_52 = arith.constant 1 : index
    %65 = vector.load %arg24[%c0_51, %c1_52] : memref<64x1152xf32, #tpu.memory_space<vmem>>, vector<40x896xf32>
    %66 = arith.maximumf %64, %65 : vector<40x896xf32>
    %c0_53 = arith.constant 0 : index
    %c30_54 = arith.constant 30 : index
    %67 = vector.load %arg24[%c0_53, %c30_54] : memref<64x1152xf32, #tpu.memory_space<vmem>>, vector<40x896xf32>
    %c0_55 = arith.constant 0 : index
    %c31_56 = arith.constant 31 : index
    %68 = vector.load %arg24[%c0_55, %c31_56] : memref<64x1152xf32, #tpu.memory_space<vmem>>, vector<40x896xf32>
    %69 = arith.maximumf %67, %68 : vector<40x896xf32>
    %70 = arith.maximumf %66, %69 : vector<40x896xf32>
    %c0_57 = arith.constant 0 : index
    %c0_58 = arith.constant 0 : index
    %71 = vector.load %arg23[%c0_57, %c0_58] : memref<64x1152xf32, #tpu.memory_space<vmem>>, vector<40x896xf32>
    tpu.vector_store %arg23[%c0_57, %c0_58], %70 {strides = array<i32>} : memref<64x1152xf32, #tpu.memory_space<vmem>>, vector<40x896xf32>,
    %c0_59 = arith.constant 0 : index
    %c0_60 = arith.constant 0 : index
    %72 = vector.load %arg4[%c0_59, %c0_60] : memref<20x40xbf16, #tpu.memory_space<vmem>>, vector<20x40xbf16>
    %c0_61 = arith.constant 0 : index
    %c0_62 = arith.constant 0 : index
    %73 = vector.load %arg23[%c0_61, %c0_62] : memref<64x1152xf32, #tpu.memory_space<vmem>>, vector<40x896xf32>
    %74 = arith.truncf %73 : vector<40x896xf32> to vector<40x896xbf16>
    %cst_63 = arith.constant dense<0.000000e+00> : vector<20x896xf32>
    %75 = tpu.matmul %72, %74, %cst_63 {dimension_numbers = #tpu.dot_dimension_numbers<[1], [0], [0], [1], [0, 0, 1, 1], [], []>} : vector<20x40xbf16>, vector<40x896xbf16>, vector<20x896xf32> -> vector<20x896xf32>
    %c0_64 = arith.constant 0 : index
    %c0_65 = arith.constant 0 : index
    %76 = vector.load %arg5[%c0_64, %c0_65] : memref<20x1xf32, #tpu.memory_space<vmem>>, vector<20x1xf32>
    %77 = vector.broadcast %76 : vector<20x1xf32> to vector<20x896xf32>
    %78 = arith.addf %75, %77 : vector<20x896xf32>
    %c0_66 = arith.constant 0 : index
    %c0_67 = arith.constant 0 : index
    %79 = vector.load %arg24[%c0_66, %c0_67] : memref<64x1152xf32, #tpu.memory_space<vmem>>, vector<20x896xf32>
    tpu.vector_store %arg24[%c0_66, %c0_67], %78 {strides = array<i32>} : memref<64x1152xf32, #tpu.memory_space<vmem>>, vector<20x896xf32>,
    %cst_68 = arith.constant 0.000000e+00 : f32
    %80 = vector.broadcast %cst_68 : f32 to vector<48x768xf32>
    %c0_69 = arith.constant 0 : index
    %c0_70 = arith.constant 0 : index
    %81 = vector.load %arg24[%c0_69, %c0_70] : memref<64x1152xf32, #tpu.memory_space<vmem>>, vector<20x768xf32>
    %82 = arith.truncf %81 : vector<20x768xf32> to vector<20x768xbf16>
    %c0_71 = arith.constant 0 : index
    %c0_72 = arith.constant 0 : index
    %c0_73 = arith.constant 0 : index
    %83 = vector.load %arg6[%c0_71, %c0_72, %c0_73] : memref<9x48x20xbf16, #tpu.memory_space<vmem>>, vector<1x48x20xbf16>
    %84 = vector.shape_cast %83 : vector<1x48x20xbf16> to vector<48x20xbf16>
    %cst_74 = arith.constant dense<0.000000e+00> : vector<48x768xf32>
    %85 = tpu.matmul %84, %82, %cst_74 {dimension_numbers = #tpu.dot_dimension_numbers<[1], [0], [0], [1], [0, 0, 1, 1], [], []>} : vector<48x20xbf16>, vector<20x768xbf16>, vector<48x768xf32> -> vector<48x768xf32>
    %86 = arith.addf %80, %85 : vector<48x768xf32>
    %c0_75 = arith.constant 0 : index
    %c2_76 = arith.constant 2 : index
    %87 = vector.load %arg24[%c0_75, %c2_76] : memref<64x1152xf32, #tpu.memory_space<vmem>>, vector<20x768xf32>
    %88 = arith.truncf %87 : vector<20x768xf32> to vector<20x768xbf16>
    %c1_77 = arith.constant 1 : index
    %c0_78 = arith.constant 0 : index
    %c0_79 = arith.constant 0 : index
    %89 = vector.load %arg6[%c1_77, %c0_78, %c0_79] : memref<9x48x20xbf16, #tpu.memory_space<vmem>>, vector<1x48x20xbf16>
    %90 = vector.shape_cast %89 : vector<1x48x20xbf16> to vector<48x20xbf16>
    %cst_80 = arith.constant dense<0.000000e+00> : vector<48x768xf32>
    %91 = tpu.matmul %90, %88, %cst_80 {dimension_numbers = #tpu.dot_dimension_numbers<[1], [0], [0], [1], [0, 0, 1, 1], [], []>} : vector<48x20xbf16>, vector<20x768xbf16>, vector<48x768xf32> -> vector<48x768xf32>
    %92 = arith.addf %86, %91 : vector<48x768xf32>
    %c0_81 = arith.constant 0 : index
    %c4_82 = arith.constant 4 : index
    %93 = vector.load %arg24[%c0_81, %c4_82] : memref<64x1152xf32, #tpu.memory_space<vmem>>, vector<20x768xf32>
    %94 = arith.truncf %93 : vector<20x768xf32> to vector<20x768xbf16>
    %c2_83 = arith.constant 2 : index
    %c0_84 = arith.constant 0 : index
    %c0_85 = arith.constant 0 : index
    %95 = vector.load %arg6[%c2_83, %c0_84, %c0_85] : memref<9x48x20xbf16, #tpu.memory_space<vmem>>, vector<1x48x20xbf16>
    %96 = vector.shape_cast %95 : vector<1x48x20xbf16> to vector<48x20xbf16>
    %cst_86 = arith.constant dense<0.000000e+00> : vector<48x768xf32>
    %97 = tpu.matmul %96, %94, %cst_86 {dimension_numbers = #tpu.dot_dimension_numbers<[1], [0], [0], [1], [0, 0, 1, 1], [], []>} : vector<48x20xbf16>, vector<20x768xbf16>, vector<48x768xf32> -> vector<48x768xf32>
    %98 = arith.addf %92, %97 : vector<48x768xf32>
    %c0_87 = arith.constant 0 : index
    %c60_88 = arith.constant 60 : index
    %99 = vector.load %arg24[%c0_87, %c60_88] : memref<64x1152xf32, #tpu.memory_space<vmem>>, vector<20x768xf32>
    %100 = arith.truncf %99 : vector<20x768xf32> to vector<20x768xbf16>
    %c3_89 = arith.constant 3 : index
    %c0_90 = arith.constant 0 : index
    %c0_91 = arith.constant 0 : index
    %101 = vector.load %arg6[%c3_89, %c0_90, %c0_91] : memref<9x48x20xbf16, #tpu.memory_space<vmem>>, vector<1x48x20xbf16>
    %102 = vector.shape_cast %101 : vector<1x48x20xbf16> to vector<48x20xbf16>
    %cst_92 = arith.constant dense<0.000000e+00> : vector<48x768xf32>
    %103 = tpu.matmul %102, %100, %cst_92 {dimension_numbers = #tpu.dot_dimension_numbers<[1], [0], [0], [1], [0, 0, 1, 1], [], []>} : vector<48x20xbf16>, vector<20x768xbf16>, vector<48x768xf32> -> vector<48x768xf32>
    %104 = arith.addf %98, %103 : vector<48x768xf32>
    %c0_93 = arith.constant 0 : index
    %c62_94 = arith.constant 62 : index
    %105 = vector.load %arg24[%c0_93, %c62_94] : memref<64x1152xf32, #tpu.memory_space<vmem>>, vector<20x768xf32>
    %106 = arith.truncf %105 : vector<20x768xf32> to vector<20x768xbf16>
    %c4_95 = arith.constant 4 : index
    %c0_96 = arith.constant 0 : index
    %c0_97 = arith.constant 0 : index
    %107 = vector.load %arg6[%c4_95, %c0_96, %c0_97] : memref<9x48x20xbf16, #tpu.memory_space<vmem>>, vector<1x48x20xbf16>
    %108 = vector.shape_cast %107 : vector<1x48x20xbf16> to vector<48x20xbf16>
    %cst_98 = arith.constant dense<0.000000e+00> : vector<48x768xf32>
    %109 = tpu.matmul %108, %106, %cst_98 {dimension_numbers = #tpu.dot_dimension_numbers<[1], [0], [0], [1], [0, 0, 1, 1], [], []>} : vector<48x20xbf16>, vector<20x768xbf16>, vector<48x768xf32> -> vector<48x768xf32>
    %110 = arith.addf %104, %109 : vector<48x768xf32>
    %c0_99 = arith.constant 0 : index
    %c64 = arith.constant 64 : index
    %111 = vector.load %arg24[%c0_99, %c64] : memref<64x1152xf32, #tpu.memory_space<vmem>>, vector<20x768xf32>
    %112 = arith.truncf %111 : vector<20x768xf32> to vector<20x768xbf16>
    %c5_100 = arith.constant 5 : index
    %c0_101 = arith.constant 0 : index
    %c0_102 = arith.constant 0 : index
    %113 = vector.load %arg6[%c5_100, %c0_101, %c0_102] : memref<9x48x20xbf16, #tpu.memory_space<vmem>>, vector<1x48x20xbf16>
    %114 = vector.shape_cast %113 : vector<1x48x20xbf16> to vector<48x20xbf16>
    %cst_103 = arith.constant dense<0.000000e+00> : vector<48x768xf32>
    %115 = tpu.matmul %114, %112, %cst_103 {dimension_numbers = #tpu.dot_dimension_numbers<[1], [0], [0], [1], [0, 0, 1, 1], [], []>} : vector<48x20xbf16>, vector<20x768xbf16>, vector<48x768xf32> -> vector<48x768xf32>
    %116 = arith.addf %110, %115 : vector<48x768xf32>
    %c0_104 = arith.constant 0 : index
    %c120 = arith.constant 120 : index
    %117 = vector.load %arg24[%c0_104, %c120] : memref<64x1152xf32, #tpu.memory_space<vmem>>, vector<20x768xf32>
    %118 = arith.truncf %117 : vector<20x768xf32> to vector<20x768xbf16>
    %c6_105 = arith.constant 6 : index
    %c0_106 = arith.constant 0 : index
    %c0_107 = arith.constant 0 : index
    %119 = vector.load %arg6[%c6_105, %c0_106, %c0_107] : memref<9x48x20xbf16, #tpu.memory_space<vmem>>, vector<1x48x20xbf16>
    %120 = vector.shape_cast %119 : vector<1x48x20xbf16> to vector<48x20xbf16>
    %cst_108 = arith.constant dense<0.000000e+00> : vector<48x768xf32>
    %121 = tpu.matmul %120, %118, %cst_108 {dimension_numbers = #tpu.dot_dimension_numbers<[1], [0], [0], [1], [0, 0, 1, 1], [], []>} : vector<48x20xbf16>, vector<20x768xbf16>, vector<48x768xf32> -> vector<48x768xf32>
    %122 = arith.addf %116, %121 : vector<48x768xf32>
    %c0_109 = arith.constant 0 : index
    %c122 = arith.constant 122 : index
    %123 = vector.load %arg24[%c0_109, %c122] : memref<64x1152xf32, #tpu.memory_space<vmem>>, vector<20x768xf32>
    %124 = arith.truncf %123 : vector<20x768xf32> to vector<20x768xbf16>
    %c7_110 = arith.constant 7 : index
    %c0_111 = arith.constant 0 : index
    %c0_112 = arith.constant 0 : index
    %125 = vector.load %arg6[%c7_110, %c0_111, %c0_112] : memref<9x48x20xbf16, #tpu.memory_space<vmem>>, vector<1x48x20xbf16>
    %126 = vector.shape_cast %125 : vector<1x48x20xbf16> to vector<48x20xbf16>
    %cst_113 = arith.constant dense<0.000000e+00> : vector<48x768xf32>
    %127 = tpu.matmul %126, %124, %cst_113 {dimension_numbers = #tpu.dot_dimension_numbers<[1], [0], [0], [1], [0, 0, 1, 1], [], []>} : vector<48x20xbf16>, vector<20x768xbf16>, vector<48x768xf32> -> vector<48x768xf32>
    %128 = arith.addf %122, %127 : vector<48x768xf32>
    %c0_114 = arith.constant 0 : index
    %c124 = arith.constant 124 : index
    %129 = vector.load %arg24[%c0_114, %c124] : memref<64x1152xf32, #tpu.memory_space<vmem>>, vector<20x768xf32>
    %130 = arith.truncf %129 : vector<20x768xf32> to vector<20x768xbf16>
    %c8_115 = arith.constant 8 : index
    %c0_116 = arith.constant 0 : index
    %c0_117 = arith.constant 0 : index
    %131 = vector.load %arg6[%c8_115, %c0_116, %c0_117] : memref<9x48x20xbf16, #tpu.memory_space<vmem>>, vector<1x48x20xbf16>
    %132 = vector.shape_cast %131 : vector<1x48x20xbf16> to vector<48x20xbf16>
    %cst_118 = arith.constant dense<0.000000e+00> : vector<48x768xf32>
    %133 = tpu.matmul %132, %130, %cst_118 {dimension_numbers = #tpu.dot_dimension_numbers<[1], [0], [0], [1], [0, 0, 1, 1], [], []>} : vector<48x20xbf16>, vector<20x768xbf16>, vector<48x768xf32> -> vector<48x768xf32>
    %134 = arith.addf %128, %133 : vector<48x768xf32>
    %c0_119 = arith.constant 0 : index
    %c0_120 = arith.constant 0 : index
    %135 = vector.load %arg7[%c0_119, %c0_120] : memref<48x1xf32, #tpu.memory_space<vmem>>, vector<48x1xf32>
    %136 = vector.broadcast %135 : vector<48x1xf32> to vector<48x768xf32>
    %137 = arith.addf %134, %136 : vector<48x768xf32>
    %c0_121 = arith.constant 0 : index
    %c0_122 = arith.constant 0 : index
    %138 = vector.load %arg23[%c0_121, %c0_122] : memref<64x1152xf32, #tpu.memory_space<vmem>>, vector<48x768xf32>
    tpu.vector_store %arg23[%c0_121, %c0_122], %137 {strides = array<i32>} : memref<64x1152xf32, #tpu.memory_space<vmem>>, vector<48x768xf32>,
    %c0_123 = arith.constant 0 : index
    %c0_124 = arith.constant 0 : index
    %139 = vector.load %arg8[%c0_123, %c0_124] : memref<24x48xbf16, #tpu.memory_space<vmem>>, vector<24x48xbf16>
    %c0_125 = arith.constant 0 : index
    %c0_126 = arith.constant 0 : index
    %140 = vector.load %arg23[%c0_125, %c0_126] : memref<64x1152xf32, #tpu.memory_space<vmem>>, vector<48x768xf32>
    %141 = arith.truncf %140 : vector<48x768xf32> to vector<48x768xbf16>
    %cst_127 = arith.constant dense<0.000000e+00> : vector<24x768xf32>
    %142 = tpu.matmul %139, %141, %cst_127 {dimension_numbers = #tpu.dot_dimension_numbers<[1], [0], [0], [1], [0, 0, 1, 1], [], []>} : vector<24x48xbf16>, vector<48x768xbf16>, vector<24x768xf32> -> vector<24x768xf32>
    %c0_128 = arith.constant 0 : index
    %c0_129 = arith.constant 0 : index
    %143 = vector.load %arg9[%c0_128, %c0_129] : memref<24x1xf32, #tpu.memory_space<vmem>>, vector<24x1xf32>
    %144 = vector.broadcast %143 : vector<24x1xf32> to vector<24x768xf32>
    %145 = arith.addf %142, %144 : vector<24x768xf32>
    %c0_130 = arith.constant 0 : index
    %c0_131 = arith.constant 0 : index
    %146 = vector.load %arg24[%c0_130, %c0_131] : memref<64x1152xf32, #tpu.memory_space<vmem>>, vector<24x768xf32>
    tpu.vector_store %arg24[%c0_130, %c0_131], %145 {strides = array<i32>} : memref<64x1152xf32, #tpu.memory_space<vmem>>, vector<24x768xf32>,
    %cst_132 = arith.constant 0.000000e+00 : f32
    %147 = vector.broadcast %cst_132 : f32 to vector<48x640xf32>
    %c0_133 = arith.constant 0 : index
    %c0_134 = arith.constant 0 : index
    %148 = vector.load %arg24[%c0_133, %c0_134] : memref<64x1152xf32, #tpu.memory_space<vmem>>, vector<24x640xf32>
    %149 = arith.truncf %148 : vector<24x640xf32> to vector<24x640xbf16>
    %c0_135 = arith.constant 0 : index
    %c0_136 = arith.constant 0 : index
    %c0_137 = arith.constant 0 : index
    %150 = vector.load %arg10[%c0_135, %c0_136, %c0_137] : memref<9x48x24xbf16, #tpu.memory_space<vmem>>, vector<1x48x24xbf16>
    %151 = vector.shape_cast %150 : vector<1x48x24xbf16> to vector<48x24xbf16>
    %cst_138 = arith.constant dense<0.000000e+00> : vector<48x640xf32>
    %152 = tpu.matmul %151, %149, %cst_138 {dimension_numbers = #tpu.dot_dimension_numbers<[1], [0], [0], [1], [0, 0, 1, 1], [], []>} : vector<48x24xbf16>, vector<24x640xbf16>, vector<48x640xf32> -> vector<48x640xf32>
    %153 = arith.addf %147, %152 : vector<48x640xf32>
    %c0_139 = arith.constant 0 : index
    %c2_140 = arith.constant 2 : index
    %154 = vector.load %arg24[%c0_139, %c2_140] : memref<64x1152xf32, #tpu.memory_space<vmem>>, vector<24x640xf32>
    %155 = arith.truncf %154 : vector<24x640xf32> to vector<24x640xbf16>
    %c1_141 = arith.constant 1 : index
    %c0_142 = arith.constant 0 : index
    %c0_143 = arith.constant 0 : index
    %156 = vector.load %arg10[%c1_141, %c0_142, %c0_143] : memref<9x48x24xbf16, #tpu.memory_space<vmem>>, vector<1x48x24xbf16>
    %157 = vector.shape_cast %156 : vector<1x48x24xbf16> to vector<48x24xbf16>
    %cst_144 = arith.constant dense<0.000000e+00> : vector<48x640xf32>
    %158 = tpu.matmul %157, %155, %cst_144 {dimension_numbers = #tpu.dot_dimension_numbers<[1], [0], [0], [1], [0, 0, 1, 1], [], []>} : vector<48x24xbf16>, vector<24x640xbf16>, vector<48x640xf32> -> vector<48x640xf32>
    %159 = arith.addf %153, %158 : vector<48x640xf32>
    %c0_145 = arith.constant 0 : index
    %c4_146 = arith.constant 4 : index
    %160 = vector.load %arg24[%c0_145, %c4_146] : memref<64x1152xf32, #tpu.memory_space<vmem>>, vector<24x640xf32>
    %161 = arith.truncf %160 : vector<24x640xf32> to vector<24x640xbf16>
    %c2_147 = arith.constant 2 : index
    %c0_148 = arith.constant 0 : index
    %c0_149 = arith.constant 0 : index
    %162 = vector.load %arg10[%c2_147, %c0_148, %c0_149] : memref<9x48x24xbf16, #tpu.memory_space<vmem>>, vector<1x48x24xbf16>
    %163 = vector.shape_cast %162 : vector<1x48x24xbf16> to vector<48x24xbf16>
    %cst_150 = arith.constant dense<0.000000e+00> : vector<48x640xf32>
    %164 = tpu.matmul %163, %161, %cst_150 {dimension_numbers = #tpu.dot_dimension_numbers<[1], [0], [0], [1], [0, 0, 1, 1], [], []>} : vector<48x24xbf16>, vector<24x640xbf16>, vector<48x640xf32> -> vector<48x640xf32>
    %165 = arith.addf %159, %164 : vector<48x640xf32>
    %c0_151 = arith.constant 0 : index
    %c60_152 = arith.constant 60 : index
    %166 = vector.load %arg24[%c0_151, %c60_152] : memref<64x1152xf32, #tpu.memory_space<vmem>>, vector<24x640xf32>
    %167 = arith.truncf %166 : vector<24x640xf32> to vector<24x640xbf16>
    %c3_153 = arith.constant 3 : index
    %c0_154 = arith.constant 0 : index
    %c0_155 = arith.constant 0 : index
    %168 = vector.load %arg10[%c3_153, %c0_154, %c0_155] : memref<9x48x24xbf16, #tpu.memory_space<vmem>>, vector<1x48x24xbf16>
    %169 = vector.shape_cast %168 : vector<1x48x24xbf16> to vector<48x24xbf16>
    %cst_156 = arith.constant dense<0.000000e+00> : vector<48x640xf32>
    %170 = tpu.matmul %169, %167, %cst_156 {dimension_numbers = #tpu.dot_dimension_numbers<[1], [0], [0], [1], [0, 0, 1, 1], [], []>} : vector<48x24xbf16>, vector<24x640xbf16>, vector<48x640xf32> -> vector<48x640xf32>
    %171 = arith.addf %165, %170 : vector<48x640xf32>
    %c0_157 = arith.constant 0 : index
    %c62_158 = arith.constant 62 : index
    %172 = vector.load %arg24[%c0_157, %c62_158] : memref<64x1152xf32, #tpu.memory_space<vmem>>, vector<24x640xf32>
    %173 = arith.truncf %172 : vector<24x640xf32> to vector<24x640xbf16>
    %c4_159 = arith.constant 4 : index
    %c0_160 = arith.constant 0 : index
    %c0_161 = arith.constant 0 : index
    %174 = vector.load %arg10[%c4_159, %c0_160, %c0_161] : memref<9x48x24xbf16, #tpu.memory_space<vmem>>, vector<1x48x24xbf16>
    %175 = vector.shape_cast %174 : vector<1x48x24xbf16> to vector<48x24xbf16>
    %cst_162 = arith.constant dense<0.000000e+00> : vector<48x640xf32>
    %176 = tpu.matmul %175, %173, %cst_162 {dimension_numbers = #tpu.dot_dimension_numbers<[1], [0], [0], [1], [0, 0, 1, 1], [], []>} : vector<48x24xbf16>, vector<24x640xbf16>, vector<48x640xf32> -> vector<48x640xf32>
    %177 = arith.addf %171, %176 : vector<48x640xf32>
    %c0_163 = arith.constant 0 : index
    %c64_164 = arith.constant 64 : index
    %178 = vector.load %arg24[%c0_163, %c64_164] : memref<64x1152xf32, #tpu.memory_space<vmem>>, vector<24x640xf32>
    %179 = arith.truncf %178 : vector<24x640xf32> to vector<24x640xbf16>
    %c5_165 = arith.constant 5 : index
    %c0_166 = arith.constant 0 : index
    %c0_167 = arith.constant 0 : index
    %180 = vector.load %arg10[%c5_165, %c0_166, %c0_167] : memref<9x48x24xbf16, #tpu.memory_space<vmem>>, vector<1x48x24xbf16>
    %181 = vector.shape_cast %180 : vector<1x48x24xbf16> to vector<48x24xbf16>
    %cst_168 = arith.constant dense<0.000000e+00> : vector<48x640xf32>
    %182 = tpu.matmul %181, %179, %cst_168 {dimension_numbers = #tpu.dot_dimension_numbers<[1], [0], [0], [1], [0, 0, 1, 1], [], []>} : vector<48x24xbf16>, vector<24x640xbf16>, vector<48x640xf32> -> vector<48x640xf32>
    %183 = arith.addf %177, %182 : vector<48x640xf32>
    %c0_169 = arith.constant 0 : index
    %c120_170 = arith.constant 120 : index
    %184 = vector.load %arg24[%c0_169, %c120_170] : memref<64x1152xf32, #tpu.memory_space<vmem>>, vector<24x640xf32>
    %185 = arith.truncf %184 : vector<24x640xf32> to vector<24x640xbf16>
    %c6_171 = arith.constant 6 : index
    %c0_172 = arith.constant 0 : index
    %c0_173 = arith.constant 0 : index
    %186 = vector.load %arg10[%c6_171, %c0_172, %c0_173] : memref<9x48x24xbf16, #tpu.memory_space<vmem>>, vector<1x48x24xbf16>
    %187 = vector.shape_cast %186 : vector<1x48x24xbf16> to vector<48x24xbf16>
    %cst_174 = arith.constant dense<0.000000e+00> : vector<48x640xf32>
    %188 = tpu.matmul %187, %185, %cst_174 {dimension_numbers = #tpu.dot_dimension_numbers<[1], [0], [0], [1], [0, 0, 1, 1], [], []>} : vector<48x24xbf16>, vector<24x640xbf16>, vector<48x640xf32> -> vector<48x640xf32>
    %189 = arith.addf %183, %188 : vector<48x640xf32>
    %c0_175 = arith.constant 0 : index
    %c122_176 = arith.constant 122 : index
    %190 = vector.load %arg24[%c0_175, %c122_176] : memref<64x1152xf32, #tpu.memory_space<vmem>>, vector<24x640xf32>
    %191 = arith.truncf %190 : vector<24x640xf32> to vector<24x640xbf16>
    %c7_177 = arith.constant 7 : index
    %c0_178 = arith.constant 0 : index
    %c0_179 = arith.constant 0 : index
    %192 = vector.load %arg10[%c7_177, %c0_178, %c0_179] : memref<9x48x24xbf16, #tpu.memory_space<vmem>>, vector<1x48x24xbf16>
    %193 = vector.shape_cast %192 : vector<1x48x24xbf16> to vector<48x24xbf16>
    %cst_180 = arith.constant dense<0.000000e+00> : vector<48x640xf32>
    %194 = tpu.matmul %193, %191, %cst_180 {dimension_numbers = #tpu.dot_dimension_numbers<[1], [0], [0], [1], [0, 0, 1, 1], [], []>} : vector<48x24xbf16>, vector<24x640xbf16>, vector<48x640xf32> -> vector<48x640xf32>
    %195 = arith.addf %189, %194 : vector<48x640xf32>
    %c0_181 = arith.constant 0 : index
    %c124_182 = arith.constant 124 : index
    %196 = vector.load %arg24[%c0_181, %c124_182] : memref<64x1152xf32, #tpu.memory_space<vmem>>, vector<24x640xf32>
    %197 = arith.truncf %196 : vector<24x640xf32> to vector<24x640xbf16>
    %c8_183 = arith.constant 8 : index
    %c0_184 = arith.constant 0 : index
    %c0_185 = arith.constant 0 : index
    %198 = vector.load %arg10[%c8_183, %c0_184, %c0_185] : memref<9x48x24xbf16, #tpu.memory_space<vmem>>, vector<1x48x24xbf16>
    %199 = vector.shape_cast %198 : vector<1x48x24xbf16> to vector<48x24xbf16>
    %cst_186 = arith.constant dense<0.000000e+00> : vector<48x640xf32>
    %200 = tpu.matmul %199, %197, %cst_186 {dimension_numbers = #tpu.dot_dimension_numbers<[1], [0], [0], [1], [0, 0, 1, 1], [], []>} : vector<48x24xbf16>, vector<24x640xbf16>, vector<48x640xf32> -> vector<48x640xf32>
    %201 = arith.addf %195, %200 : vector<48x640xf32>
    %c0_187 = arith.constant 0 : index
    %c0_188 = arith.constant 0 : index
    %202 = vector.load %arg11[%c0_187, %c0_188] : memref<48x1xf32, #tpu.memory_space<vmem>>, vector<48x1xf32>
    %203 = vector.broadcast %202 : vector<48x1xf32> to vector<48x640xf32>
    %204 = arith.addf %201, %203 : vector<48x640xf32>
    %cst_189 = arith.constant 0.000000e+00 : f32
    %205 = vector.broadcast %cst_189 : f32 to vector<48x640xf32>
    %206 = arith.maximumf %204, %205 : vector<48x640xf32>
    %c0_190 = arith.constant 0 : index
    %c0_191 = arith.constant 0 : index
    %207 = vector.load %arg23[%c0_190, %c0_191] : memref<64x1152xf32, #tpu.memory_space<vmem>>, vector<48x640xf32>
    tpu.vector_store %arg23[%c0_190, %c0_191], %206 {strides = array<i32>} : memref<64x1152xf32, #tpu.memory_space<vmem>>, vector<48x640xf32>,
    %c0_192 = arith.constant 0 : index
    %c0_193 = arith.constant 0 : index
    %208 = vector.load %arg23[%c0_192, %c0_193] : memref<64x1152xf32, #tpu.memory_space<vmem>>, vector<48x512xf32>
    %c0_194 = arith.constant 0 : index
    %c2_195 = arith.constant 2 : index
    %209 = vector.load %arg23[%c0_194, %c2_195] : memref<64x1152xf32, #tpu.memory_space<vmem>>, vector<48x512xf32>
    %210 = arith.maximumf %208, %209 : vector<48x512xf32>
    %c0_196 = arith.constant 0 : index
    %c60_197 = arith.constant 60 : index
    %211 = vector.load %arg23[%c0_196, %c60_197] : memref<64x1152xf32, #tpu.memory_space<vmem>>, vector<48x512xf32>
    %c0_198 = arith.constant 0 : index
    %c62_199 = arith.constant 62 : index
    %212 = vector.load %arg23[%c0_198, %c62_199] : memref<64x1152xf32, #tpu.memory_space<vmem>>, vector<48x512xf32>
    %213 = arith.maximumf %211, %212 : vector<48x512xf32>
    %214 = arith.maximumf %210, %213 : vector<48x512xf32>
    %c0_200 = arith.constant 0 : index
    %c0_201 = arith.constant 0 : index
    %215 = vector.load %arg24[%c0_200, %c0_201] : memref<64x1152xf32, #tpu.memory_space<vmem>>, vector<48x512xf32>
    tpu.vector_store %arg24[%c0_200, %c0_201], %214 {strides = array<i32>} : memref<64x1152xf32, #tpu.memory_space<vmem>>, vector<48x512xf32>,
    %c0_202 = arith.constant 0 : index
    %c0_203 = arith.constant 0 : index
    %216 = vector.load %arg12[%c0_202, %c0_203] : memref<24x48xbf16, #tpu.memory_space<vmem>>, vector<24x48xbf16>
    %c0_204 = arith.constant 0 : index
    %c0_205 = arith.constant 0 : index
    %217 = vector.load %arg24[%c0_204, %c0_205] : memref<64x1152xf32, #tpu.memory_space<vmem>>, vector<48x512xf32>
    %218 = arith.truncf %217 : vector<48x512xf32> to vector<48x512xbf16>
    %cst_206 = arith.constant dense<0.000000e+00> : vector<24x512xf32>
    %219 = tpu.matmul %216, %218, %cst_206 {dimension_numbers = #tpu.dot_dimension_numbers<[1], [0], [0], [1], [0, 0, 1, 1], [], []>} : vector<24x48xbf16>, vector<48x512xbf16>, vector<24x512xf32> -> vector<24x512xf32>
    %c0_207 = arith.constant 0 : index
    %c0_208 = arith.constant 0 : index
    %220 = vector.load %arg13[%c0_207, %c0_208] : memref<24x1xf32, #tpu.memory_space<vmem>>, vector<24x1xf32>
    %221 = vector.broadcast %220 : vector<24x1xf32> to vector<24x512xf32>
    %222 = arith.addf %219, %221 : vector<24x512xf32>
    %c0_209 = arith.constant 0 : index
    %c0_210 = arith.constant 0 : index
    %223 = vector.load %arg23[%c0_209, %c0_210] : memref<64x1152xf32, #tpu.memory_space<vmem>>, vector<24x512xf32>
    tpu.vector_store %arg23[%c0_209, %c0_210], %222 {strides = array<i32>} : memref<64x1152xf32, #tpu.memory_space<vmem>>, vector<24x512xf32>,
    %cst_211 = arith.constant 0.000000e+00 : f32
    %224 = vector.broadcast %cst_211 : f32 to vector<48x256xf32>
    %c0_212 = arith.constant 0 : index
    %c0_213 = arith.constant 0 : index
    %225 = vector.load %arg23[%c0_212, %c0_213] : memref<64x1152xf32, #tpu.memory_space<vmem>>, vector<24x256xf32>
    %226 = arith.truncf %225 : vector<24x256xf32> to vector<24x256xbf16>
    %c0_214 = arith.constant 0 : index
    %c0_215 = arith.constant 0 : index
    %c0_216 = arith.constant 0 : index
    %227 = vector.load %arg14[%c0_214, %c0_215, %c0_216] : memref<9x48x24xbf16, #tpu.memory_space<vmem>>, vector<1x48x24xbf16>
    %228 = vector.shape_cast %227 : vector<1x48x24xbf16> to vector<48x24xbf16>
    %cst_217 = arith.constant dense<0.000000e+00> : vector<48x256xf32>
    %229 = tpu.matmul %228, %226, %cst_217 {dimension_numbers = #tpu.dot_dimension_numbers<[1], [0], [0], [1], [0, 0, 1, 1], [], []>} : vector<48x24xbf16>, vector<24x256xbf16>, vector<48x256xf32> -> vector<48x256xf32>
    %230 = arith.addf %224, %229 : vector<48x256xf32>
    %c0_218 = arith.constant 0 : index
    %c4_219 = arith.constant 4 : index
    %231 = vector.load %arg23[%c0_218, %c4_219] : memref<64x1152xf32, #tpu.memory_space<vmem>>, vector<24x256xf32>
    %232 = arith.truncf %231 : vector<24x256xf32> to vector<24x256xbf16>
    %c1_220 = arith.constant 1 : index
    %c0_221 = arith.constant 0 : index
    %c0_222 = arith.constant 0 : index
    %233 = vector.load %arg14[%c1_220, %c0_221, %c0_222] : memref<9x48x24xbf16, #tpu.memory_space<vmem>>, vector<1x48x24xbf16>
    %234 = vector.shape_cast %233 : vector<1x48x24xbf16> to vector<48x24xbf16>
    %cst_223 = arith.constant dense<0.000000e+00> : vector<48x256xf32>
    %235 = tpu.matmul %234, %232, %cst_223 {dimension_numbers = #tpu.dot_dimension_numbers<[1], [0], [0], [1], [0, 0, 1, 1], [], []>} : vector<48x24xbf16>, vector<24x256xbf16>, vector<48x256xf32> -> vector<48x256xf32>
    %236 = arith.addf %230, %235 : vector<48x256xf32>
    %c0_224 = arith.constant 0 : index
    %c8_225 = arith.constant 8 : index
    %237 = vector.load %arg23[%c0_224, %c8_225] : memref<64x1152xf32, #tpu.memory_space<vmem>>, vector<24x256xf32>
    %238 = arith.truncf %237 : vector<24x256xf32> to vector<24x256xbf16>
    %c2_226 = arith.constant 2 : index
    %c0_227 = arith.constant 0 : index
    %c0_228 = arith.constant 0 : index
    %239 = vector.load %arg14[%c2_226, %c0_227, %c0_228] : memref<9x48x24xbf16, #tpu.memory_space<vmem>>, vector<1x48x24xbf16>
    %240 = vector.shape_cast %239 : vector<1x48x24xbf16> to vector<48x24xbf16>
    %cst_229 = arith.constant dense<0.000000e+00> : vector<48x256xf32>
    %241 = tpu.matmul %240, %238, %cst_229 {dimension_numbers = #tpu.dot_dimension_numbers<[1], [0], [0], [1], [0, 0, 1, 1], [], []>} : vector<48x24xbf16>, vector<24x256xbf16>, vector<48x256xf32> -> vector<48x256xf32>
    %242 = arith.addf %236, %241 : vector<48x256xf32>
    %c0_230 = arith.constant 0 : index
    %c120_231 = arith.constant 120 : index
    %243 = vector.load %arg23[%c0_230, %c120_231] : memref<64x1152xf32, #tpu.memory_space<vmem>>, vector<24x256xf32>
    %244 = arith.truncf %243 : vector<24x256xf32> to vector<24x256xbf16>
    %c3_232 = arith.constant 3 : index
    %c0_233 = arith.constant 0 : index
    %c0_234 = arith.constant 0 : index
    %245 = vector.load %arg14[%c3_232, %c0_233, %c0_234] : memref<9x48x24xbf16, #tpu.memory_space<vmem>>, vector<1x48x24xbf16>
    %246 = vector.shape_cast %245 : vector<1x48x24xbf16> to vector<48x24xbf16>
    %cst_235 = arith.constant dense<0.000000e+00> : vector<48x256xf32>
    %247 = tpu.matmul %246, %244, %cst_235 {dimension_numbers = #tpu.dot_dimension_numbers<[1], [0], [0], [1], [0, 0, 1, 1], [], []>} : vector<48x24xbf16>, vector<24x256xbf16>, vector<48x256xf32> -> vector<48x256xf32>
    %248 = arith.addf %242, %247 : vector<48x256xf32>
    %c0_236 = arith.constant 0 : index
    %c124_237 = arith.constant 124 : index
    %249 = vector.load %arg23[%c0_236, %c124_237] : memref<64x1152xf32, #tpu.memory_space<vmem>>, vector<24x256xf32>
    %250 = arith.truncf %249 : vector<24x256xf32> to vector<24x256xbf16>
    %c4_238 = arith.constant 4 : index
    %c0_239 = arith.constant 0 : index
    %c0_240 = arith.constant 0 : index
    %251 = vector.load %arg14[%c4_238, %c0_239, %c0_240] : memref<9x48x24xbf16, #tpu.memory_space<vmem>>, vector<1x48x24xbf16>
    %252 = vector.shape_cast %251 : vector<1x48x24xbf16> to vector<48x24xbf16>
    %cst_241 = arith.constant dense<0.000000e+00> : vector<48x256xf32>
    %253 = tpu.matmul %252, %250, %cst_241 {dimension_numbers = #tpu.dot_dimension_numbers<[1], [0], [0], [1], [0, 0, 1, 1], [], []>} : vector<48x24xbf16>, vector<24x256xbf16>, vector<48x256xf32> -> vector<48x256xf32>
    %254 = arith.addf %248, %253 : vector<48x256xf32>
    %c0_242 = arith.constant 0 : index
    %c128 = arith.constant 128 : index
    %255 = vector.load %arg23[%c0_242, %c128] : memref<64x1152xf32, #tpu.memory_space<vmem>>, vector<24x256xf32>
    %256 = arith.truncf %255 : vector<24x256xf32> to vector<24x256xbf16>
    %c5_243 = arith.constant 5 : index
    %c0_244 = arith.constant 0 : index
    %c0_245 = arith.constant 0 : index
    %257 = vector.load %arg14[%c5_243, %c0_244, %c0_245] : memref<9x48x24xbf16, #tpu.memory_space<vmem>>, vector<1x48x24xbf16>
    %258 = vector.shape_cast %257 : vector<1x48x24xbf16> to vector<48x24xbf16>
    %cst_246 = arith.constant dense<0.000000e+00> : vector<48x256xf32>
    %259 = tpu.matmul %258, %256, %cst_246 {dimension_numbers = #tpu.dot_dimension_numbers<[1], [0], [0], [1], [0, 0, 1, 1], [], []>} : vector<48x24xbf16>, vector<24x256xbf16>, vector<48x256xf32> -> vector<48x256xf32>
    %260 = arith.addf %254, %259 : vector<48x256xf32>
    %c0_247 = arith.constant 0 : index
    %c240 = arith.constant 240 : index
    %261 = vector.load %arg23[%c0_247, %c240] : memref<64x1152xf32, #tpu.memory_space<vmem>>, vector<24x256xf32>
    %262 = arith.truncf %261 : vector<24x256xf32> to vector<24x256xbf16>
    %c6_248 = arith.constant 6 : index
    %c0_249 = arith.constant 0 : index
    %c0_250 = arith.constant 0 : index
    %263 = vector.load %arg14[%c6_248, %c0_249, %c0_250] : memref<9x48x24xbf16, #tpu.memory_space<vmem>>, vector<1x48x24xbf16>
    %264 = vector.shape_cast %263 : vector<1x48x24xbf16> to vector<48x24xbf16>
    %cst_251 = arith.constant dense<0.000000e+00> : vector<48x256xf32>
    %265 = tpu.matmul %264, %262, %cst_251 {dimension_numbers = #tpu.dot_dimension_numbers<[1], [0], [0], [1], [0, 0, 1, 1], [], []>} : vector<48x24xbf16>, vector<24x256xbf16>, vector<48x256xf32> -> vector<48x256xf32>
    %266 = arith.addf %260, %265 : vector<48x256xf32>
    %c0_252 = arith.constant 0 : index
    %c244 = arith.constant 244 : index
    %267 = vector.load %arg23[%c0_252, %c244] : memref<64x1152xf32, #tpu.memory_space<vmem>>, vector<24x256xf32>
    %268 = arith.truncf %267 : vector<24x256xf32> to vector<24x256xbf16>
    %c7_253 = arith.constant 7 : index
    %c0_254 = arith.constant 0 : index
    %c0_255 = arith.constant 0 : index
    %269 = vector.load %arg14[%c7_253, %c0_254, %c0_255] : memref<9x48x24xbf16, #tpu.memory_space<vmem>>, vector<1x48x24xbf16>
    %270 = vector.shape_cast %269 : vector<1x48x24xbf16> to vector<48x24xbf16>
    %cst_256 = arith.constant dense<0.000000e+00> : vector<48x256xf32>
    %271 = tpu.matmul %270, %268, %cst_256 {dimension_numbers = #tpu.dot_dimension_numbers<[1], [0], [0], [1], [0, 0, 1, 1], [], []>} : vector<48x24xbf16>, vector<24x256xbf16>, vector<48x256xf32> -> vector<48x256xf32>
    %272 = arith.addf %266, %271 : vector<48x256xf32>
    %c0_257 = arith.constant 0 : index
    %c248 = arith.constant 248 : index
    %273 = vector.load %arg23[%c0_257, %c248] : memref<64x1152xf32, #tpu.memory_space<vmem>>, vector<24x256xf32>
    %274 = arith.truncf %273 : vector<24x256xf32> to vector<24x256xbf16>
    %c8_258 = arith.constant 8 : index
    %c0_259 = arith.constant 0 : index
    %c0_260 = arith.constant 0 : index
    %275 = vector.load %arg14[%c8_258, %c0_259, %c0_260] : memref<9x48x24xbf16, #tpu.memory_space<vmem>>, vector<1x48x24xbf16>
    %276 = vector.shape_cast %275 : vector<1x48x24xbf16> to vector<48x24xbf16>
    %cst_261 = arith.constant dense<0.000000e+00> : vector<48x256xf32>
    %277 = tpu.matmul %276, %274, %cst_261 {dimension_numbers = #tpu.dot_dimension_numbers<[1], [0], [0], [1], [0, 0, 1, 1], [], []>} : vector<48x24xbf16>, vector<24x256xbf16>, vector<48x256xf32> -> vector<48x256xf32>
    %278 = arith.addf %272, %277 : vector<48x256xf32>
    %c0_262 = arith.constant 0 : index
    %c0_263 = arith.constant 0 : index
    %279 = vector.load %arg15[%c0_262, %c0_263] : memref<48x1xf32, #tpu.memory_space<vmem>>, vector<48x1xf32>
    %280 = vector.broadcast %279 : vector<48x1xf32> to vector<48x256xf32>
    %281 = arith.addf %278, %280 : vector<48x256xf32>
    %c0_264 = arith.constant 0 : index
    %c0_265 = arith.constant 0 : index
    %282 = vector.load %arg24[%c0_264, %c0_265] : memref<64x1152xf32, #tpu.memory_space<vmem>>, vector<48x256xf32>
    tpu.vector_store %arg24[%c0_264, %c0_265], %281 {strides = array<i32>} : memref<64x1152xf32, #tpu.memory_space<vmem>>, vector<48x256xf32>,
    %c0_266 = arith.constant 0 : index
    %c0_267 = arith.constant 0 : index
    %283 = vector.load %arg16[%c0_266, %c0_267] : memref<32x48xbf16, #tpu.memory_space<vmem>>, vector<32x48xbf16>
    %c0_268 = arith.constant 0 : index
    %c0_269 = arith.constant 0 : index
    %284 = vector.load %arg24[%c0_268, %c0_269] : memref<64x1152xf32, #tpu.memory_space<vmem>>, vector<48x256xf32>
    %285 = arith.truncf %284 : vector<48x256xf32> to vector<48x256xbf16>
    %cst_270 = arith.constant dense<0.000000e+00> : vector<32x256xf32>
    %286 = tpu.matmul %283, %285, %cst_270 {dimension_numbers = #tpu.dot_dimension_numbers<[1], [0], [0], [1], [0, 0, 1, 1], [], []>} : vector<32x48xbf16>, vector<48x256xbf16>, vector<32x256xf32> -> vector<32x256xf32>
    %c0_271 = arith.constant 0 : index
    %c0_272 = arith.constant 0 : index
    %287 = vector.load %arg17[%c0_271, %c0_272] : memref<32x1xf32, #tpu.memory_space<vmem>>, vector<32x1xf32>
    %288 = vector.broadcast %287 : vector<32x1xf32> to vector<32x256xf32>
    %289 = arith.addf %286, %288 : vector<32x256xf32>
    %c0_273 = arith.constant 0 : index
    %c0_274 = arith.constant 0 : index
    %290 = vector.load %arg23[%c0_273, %c0_274] : memref<64x1152xf32, #tpu.memory_space<vmem>>, vector<32x256xf32>
    tpu.vector_store %arg23[%c0_273, %c0_274], %289 {strides = array<i32>} : memref<64x1152xf32, #tpu.memory_space<vmem>>, vector<32x256xf32>,
    %c0_275 = arith.constant 0 : index
    %c0_276 = arith.constant 0 : index
    %291 = vector.load %arg23[%c0_275, %c0_276] : memref<64x1152xf32, #tpu.memory_space<vmem>>, vector<32x256xf32>
    %292 = tpu.transpose %291, [1, 0] : vector<32x256xf32> -> vector<256x32xf32>
    %cst_277 = arith.constant 0.000000e+00 : f32
    %293 = vector.broadcast %cst_277 : f32 to vector<8x64xf32>
    %294 = vector.extract_strided_slice %292 {offsets = [0, 0], sizes = [8, 32], strides = [1, 1]} : vector<256x32xf32> to vector<8x32xf32>
    %295 = arith.truncf %294 : vector<8x32xf32> to vector<8x32xbf16>
    %c0_278 = arith.constant 0 : index
    %c0_279 = arith.constant 0 : index
    %c0_280 = arith.constant 0 : index
    %296 = vector.load %arg18[%c0_278, %c0_279, %c0_280] : memref<9x32x64xbf16, #tpu.memory_space<vmem>>, vector<1x32x64xbf16>
    %297 = vector.shape_cast %296 : vector<1x32x64xbf16> to vector<32x64xbf16>
    %cst_281 = arith.constant dense<0.000000e+00> : vector<8x64xf32>
    %298 = tpu.matmul %295, %297, %cst_281 {dimension_numbers = #tpu.dot_dimension_numbers<[1], [0], [0], [1], [0, 0, 1, 1], [], []>} : vector<8x32xbf16>, vector<32x64xbf16>, vector<8x64xf32> -> vector<8x64xf32>
    %299 = arith.addf %293, %298 : vector<8x64xf32>
    %300 = vector.extract_strided_slice %292 {offsets = [4, 0], sizes = [8, 32], strides = [1, 1]} : vector<256x32xf32> to vector<8x32xf32>
    %301 = arith.truncf %300 : vector<8x32xf32> to vector<8x32xbf16>
    %c1_282 = arith.constant 1 : index
    %c0_283 = arith.constant 0 : index
    %c0_284 = arith.constant 0 : index
    %302 = vector.load %arg18[%c1_282, %c0_283, %c0_284] : memref<9x32x64xbf16, #tpu.memory_space<vmem>>, vector<1x32x64xbf16>
    %303 = vector.shape_cast %302 : vector<1x32x64xbf16> to vector<32x64xbf16>
    %cst_285 = arith.constant dense<0.000000e+00> : vector<8x64xf32>
    %304 = tpu.matmul %301, %303, %cst_285 {dimension_numbers = #tpu.dot_dimension_numbers<[1], [0], [0], [1], [0, 0, 1, 1], [], []>} : vector<8x32xbf16>, vector<32x64xbf16>, vector<8x64xf32> -> vector<8x64xf32>
    %305 = arith.addf %299, %304 : vector<8x64xf32>
    %306 = vector.extract_strided_slice %292 {offsets = [8, 0], sizes = [8, 32], strides = [1, 1]} : vector<256x32xf32> to vector<8x32xf32>
    %307 = arith.truncf %306 : vector<8x32xf32> to vector<8x32xbf16>
    %c2_286 = arith.constant 2 : index
    %c0_287 = arith.constant 0 : index
    %c0_288 = arith.constant 0 : index
    %308 = vector.load %arg18[%c2_286, %c0_287, %c0_288] : memref<9x32x64xbf16, #tpu.memory_space<vmem>>, vector<1x32x64xbf16>
    %309 = vector.shape_cast %308 : vector<1x32x64xbf16> to vector<32x64xbf16>
    %cst_289 = arith.constant dense<0.000000e+00> : vector<8x64xf32>
    %310 = tpu.matmul %307, %309, %cst_289 {dimension_numbers = #tpu.dot_dimension_numbers<[1], [0], [0], [1], [0, 0, 1, 1], [], []>} : vector<8x32xbf16>, vector<32x64xbf16>, vector<8x64xf32> -> vector<8x64xf32>
    %311 = arith.addf %305, %310 : vector<8x64xf32>
    %312 = vector.extract_strided_slice %292 {offsets = [120, 0], sizes = [8, 32], strides = [1, 1]} : vector<256x32xf32> to vector<8x32xf32>
    %313 = arith.truncf %312 : vector<8x32xf32> to vector<8x32xbf16>
    %c3_290 = arith.constant 3 : index
    %c0_291 = arith.constant 0 : index
    %c0_292 = arith.constant 0 : index
    %314 = vector.load %arg18[%c3_290, %c0_291, %c0_292] : memref<9x32x64xbf16, #tpu.memory_space<vmem>>, vector<1x32x64xbf16>
    %315 = vector.shape_cast %314 : vector<1x32x64xbf16> to vector<32x64xbf16>
    %cst_293 = arith.constant dense<0.000000e+00> : vector<8x64xf32>
    %316 = tpu.matmul %313, %315, %cst_293 {dimension_numbers = #tpu.dot_dimension_numbers<[1], [0], [0], [1], [0, 0, 1, 1], [], []>} : vector<8x32xbf16>, vector<32x64xbf16>, vector<8x64xf32> -> vector<8x64xf32>
    %317 = arith.addf %311, %316 : vector<8x64xf32>
    %318 = vector.extract_strided_slice %292 {offsets = [124, 0], sizes = [8, 32], strides = [1, 1]} : vector<256x32xf32> to vector<8x32xf32>
    %319 = arith.truncf %318 : vector<8x32xf32> to vector<8x32xbf16>
    %c4_294 = arith.constant 4 : index
    %c0_295 = arith.constant 0 : index
    %c0_296 = arith.constant 0 : index
    %320 = vector.load %arg18[%c4_294, %c0_295, %c0_296] : memref<9x32x64xbf16, #tpu.memory_space<vmem>>, vector<1x32x64xbf16>
    %321 = vector.shape_cast %320 : vector<1x32x64xbf16> to vector<32x64xbf16>
    %cst_297 = arith.constant dense<0.000000e+00> : vector<8x64xf32>
    %322 = tpu.matmul %319, %321, %cst_297 {dimension_numbers = #tpu.dot_dimension_numbers<[1], [0], [0], [1], [0, 0, 1, 1], [], []>} : vector<8x32xbf16>, vector<32x64xbf16>, vector<8x64xf32> -> vector<8x64xf32>
    %323 = arith.addf %317, %322 : vector<8x64xf32>
    %324 = vector.extract_strided_slice %292 {offsets = [128, 0], sizes = [8, 32], strides = [1, 1]} : vector<256x32xf32> to vector<8x32xf32>
    %325 = arith.truncf %324 : vector<8x32xf32> to vector<8x32xbf16>
    %c5_298 = arith.constant 5 : index
    %c0_299 = arith.constant 0 : index
    %c0_300 = arith.constant 0 : index
    %326 = vector.load %arg18[%c5_298, %c0_299, %c0_300] : memref<9x32x64xbf16, #tpu.memory_space<vmem>>, vector<1x32x64xbf16>
    %327 = vector.shape_cast %326 : vector<1x32x64xbf16> to vector<32x64xbf16>
    %cst_301 = arith.constant dense<0.000000e+00> : vector<8x64xf32>
    %328 = tpu.matmul %325, %327, %cst_301 {dimension_numbers = #tpu.dot_dimension_numbers<[1], [0], [0], [1], [0, 0, 1, 1], [], []>} : vector<8x32xbf16>, vector<32x64xbf16>, vector<8x64xf32> -> vector<8x64xf32>
    %329 = arith.addf %323, %328 : vector<8x64xf32>
    %330 = vector.extract_strided_slice %292 {offsets = [240, 0], sizes = [8, 32], strides = [1, 1]} : vector<256x32xf32> to vector<8x32xf32>
    %331 = arith.truncf %330 : vector<8x32xf32> to vector<8x32xbf16>
    %c6_302 = arith.constant 6 : index
    %c0_303 = arith.constant 0 : index
    %c0_304 = arith.constant 0 : index
    %332 = vector.load %arg18[%c6_302, %c0_303, %c0_304] : memref<9x32x64xbf16, #tpu.memory_space<vmem>>, vector<1x32x64xbf16>
    %333 = vector.shape_cast %332 : vector<1x32x64xbf16> to vector<32x64xbf16>
    %cst_305 = arith.constant dense<0.000000e+00> : vector<8x64xf32>
    %334 = tpu.matmul %331, %333, %cst_305 {dimension_numbers = #tpu.dot_dimension_numbers<[1], [0], [0], [1], [0, 0, 1, 1], [], []>} : vector<8x32xbf16>, vector<32x64xbf16>, vector<8x64xf32> -> vector<8x64xf32>
    %335 = arith.addf %329, %334 : vector<8x64xf32>
    %336 = vector.extract_strided_slice %292 {offsets = [244, 0], sizes = [8, 32], strides = [1, 1]} : vector<256x32xf32> to vector<8x32xf32>
    %337 = arith.truncf %336 : vector<8x32xf32> to vector<8x32xbf16>
    %c7_306 = arith.constant 7 : index
    %c0_307 = arith.constant 0 : index
    %c0_308 = arith.constant 0 : index
    %338 = vector.load %arg18[%c7_306, %c0_307, %c0_308] : memref<9x32x64xbf16, #tpu.memory_space<vmem>>, vector<1x32x64xbf16>
    %339 = vector.shape_cast %338 : vector<1x32x64xbf16> to vector<32x64xbf16>
    %cst_309 = arith.constant dense<0.000000e+00> : vector<8x64xf32>
    %340 = tpu.matmul %337, %339, %cst_309 {dimension_numbers = #tpu.dot_dimension_numbers<[1], [0], [0], [1], [0, 0, 1, 1], [], []>} : vector<8x32xbf16>, vector<32x64xbf16>, vector<8x64xf32> -> vector<8x64xf32>
    %341 = arith.addf %335, %340 : vector<8x64xf32>
    %342 = vector.extract_strided_slice %292 {offsets = [248, 0], sizes = [8, 32], strides = [1, 1]} : vector<256x32xf32> to vector<8x32xf32>
    %343 = arith.truncf %342 : vector<8x32xf32> to vector<8x32xbf16>
    %c8_310 = arith.constant 8 : index
    %c0_311 = arith.constant 0 : index
    %c0_312 = arith.constant 0 : index
    %344 = vector.load %arg18[%c8_310, %c0_311, %c0_312] : memref<9x32x64xbf16, #tpu.memory_space<vmem>>, vector<1x32x64xbf16>
    %345 = vector.shape_cast %344 : vector<1x32x64xbf16> to vector<32x64xbf16>
    %cst_313 = arith.constant dense<0.000000e+00> : vector<8x64xf32>
    %346 = tpu.matmul %343, %345, %cst_313 {dimension_numbers = #tpu.dot_dimension_numbers<[1], [0], [0], [1], [0, 0, 1, 1], [], []>} : vector<8x32xbf16>, vector<32x64xbf16>, vector<8x64xf32> -> vector<8x64xf32>
    %347 = arith.addf %341, %346 : vector<8x64xf32>
    %c0_314 = arith.constant 0 : index
    %c0_315 = arith.constant 0 : index
    %348 = vector.load %arg19[%c0_314, %c0_315] : memref<1x64xf32, #tpu.memory_space<vmem>>, vector<1x64xf32>
    %349 = vector.broadcast %348 : vector<1x64xf32> to vector<8x64xf32>
    %350 = arith.addf %347, %349 : vector<8x64xf32>
    %cst_316 = arith.constant 0.000000e+00 : f32
    %351 = vector.broadcast %cst_316 : f32 to vector<8x64xf32>
    %352 = arith.maximumf %350, %351 : vector<8x64xf32>
    %353 = vector.extract_strided_slice %352 {offsets = [0, 0], sizes = [1, 64], strides = [1, 1]} : vector<8x64xf32> to vector<1x64xf32>
    %354 = arith.truncf %353 : vector<1x64xf32> to vector<1x64xbf16>
    %c0_317 = arith.constant 0 : index
    %c0_318 = arith.constant 0 : index
    %355 = vector.load %arg20[%c0_317, %c0_318] : memref<64x43xbf16, #tpu.memory_space<vmem>>, vector<64x43xbf16>
    %cst_319 = arith.constant dense<0.000000e+00> : vector<1x43xf32>
    %356 = tpu.matmul %354, %355, %cst_319 {dimension_numbers = #tpu.dot_dimension_numbers<[1], [0], [0], [1], [0, 0, 1, 1], [], []>} : vector<1x64xbf16>, vector<64x43xbf16>, vector<1x43xf32> -> vector<1x43xf32>
    %c0_320 = arith.constant 0 : index
    %c0_321 = arith.constant 0 : index
    %357 = vector.load %arg21[%c0_320, %c0_321] : memref<1x43xf32, #tpu.memory_space<vmem>>, vector<1x43xf32>
    %358 = arith.addf %356, %357 : vector<1x43xf32>
    %cst_322 = arith.constant dense<0xFF800000> : vector<1xf32>
    %359 = vector.multi_reduction <maximumf>, %358, %cst_322 [1] : vector<1x43xf32> to vector<1xf32>
    %360 = vector.shape_cast %359 : vector<1xf32> to vector<1x1xf32>
    %361 = vector.broadcast %360 : vector<1x1xf32> to vector<1x43xf32>
    %362 = arith.subf %358, %361 : vector<1x43xf32>
    %363 = math.exp %362 : vector<1x43xf32>
    %cst_323 = arith.constant dense<0.000000e+00> : vector<1xf32>
    %364 = vector.multi_reduction <add>, %363, %cst_323 [1] : vector<1x43xf32> to vector<1xf32>
    %365 = vector.shape_cast %364 : vector<1xf32> to vector<1x1xf32>
    %366 = math.log %365 : vector<1x1xf32>
    %367 = vector.broadcast %366 : vector<1x1xf32> to vector<1x43xf32>
    %368 = arith.subf %362, %367 : vector<1x43xf32>
    %c0_324 = arith.constant 0 : index
    %c0_325 = arith.constant 0 : index
    %c0_326 = arith.constant 0 : index
    %369 = vector.load %arg22[%c0_324, %c0_325, %c0_326] : memref<1x1x43xf32, #tpu.memory_space<vmem>>, vector<1x1x43xf32>
    %370 = vector.shape_cast %369 : vector<1x1x43xf32> to vector<1x43xf32>
    %371 = vector.shape_cast %368 : vector<1x43xf32> to vector<1x1x43xf32>
    tpu.vector_store %arg22[%c0_324, %c0_325, %c0_326], %371 {strides = array<i32>} : memref<1x1x43xf32, #tpu.memory_space<vmem>>, vector<1x1x43xf32>,
    return
  }
  func.func @transform_0(%arg0: i32) -> (i32, i32, i32) {
    %c0_i32 = arith.constant 0 : i32
    %c0_i32_0 = arith.constant 0 : i32
    %c0_i32_1 = arith.constant 0 : i32
    return %arg0, %c0_i32, %c0_i32_0 : i32, i32, i32
  }
  func.func @transform_1(%arg0: i32) -> (i32, i32, i32) {
    %c0_i32 = arith.constant 0 : i32
    %c0_i32_0 = arith.constant 0 : i32
    %c0_i32_1 = arith.constant 0 : i32
    %c0_i32_2 = arith.constant 0 : i32
    return %c0_i32, %c0_i32_0, %c0_i32_1 : i32, i32, i32
  }
  func.func @transform_2(%arg0: i32) -> (i32, i32) {
    %c0_i32 = arith.constant 0 : i32
    %c0_i32_0 = arith.constant 0 : i32
    %c0_i32_1 = arith.constant 0 : i32
    return %c0_i32, %c0_i32_0 : i32, i32
  }
  func.func @transform_3(%arg0: i32) -> (i32, i32) {
    %c0_i32 = arith.constant 0 : i32
    %c0_i32_0 = arith.constant 0 : i32
    %c0_i32_1 = arith.constant 0 : i32
    return %c0_i32, %c0_i32_0 : i32, i32
  }
  func.func @transform_4(%arg0: i32) -> (i32, i32) {
    %c0_i32 = arith.constant 0 : i32
    %c0_i32_0 = arith.constant 0 : i32
    %c0_i32_1 = arith.constant 0 : i32
    return %c0_i32, %c0_i32_0 : i32, i32
  }
  func.func @transform_5(%arg0: i32) -> (i32, i32, i32) {
    %c0_i32 = arith.constant 0 : i32
    %c0_i32_0 = arith.constant 0 : i32
    %c0_i32_1 = arith.constant 0 : i32
    %c0_i32_2 = arith.constant 0 : i32
    return %c0_i32, %c0_i32_0, %c0_i32_1 : i32, i32, i32
  }
  func.func @transform_6(%arg0: i32) -> (i32, i32) {
    %c0_i32 = arith.constant 0 : i32
    %c0_i32_0 = arith.constant 0 : i32
    %c0_i32_1 = arith.constant 0 : i32
    return %c0_i32, %c0_i32_0 : i32, i32
  }
  func.func @transform_7(%arg0: i32) -> (i32, i32) {
    %c0_i32 = arith.constant 0 : i32
    %c0_i32_0 = arith.constant 0 : i32
    %c0_i32_1 = arith.constant 0 : i32
    return %c0_i32, %c0_i32_0 : i32, i32
  }
  func.func @transform_8(%arg0: i32) -> (i32, i32) {
    %c0_i32 = arith.constant 0 : i32
    %c0_i32_0 = arith.constant 0 : i32
    %c0_i32_1 = arith.constant 0 : i32
    return %c0_i32, %c0_i32_0 : i32, i32
  }
  func.func @transform_9(%arg0: i32) -> (i32, i32, i32) {
    %c0_i32 = arith.constant 0 : i32
    %c0_i32_0 = arith.constant 0 : i32
    %c0_i32_1 = arith.constant 0 : i32
    %c0_i32_2 = arith.constant 0 : i32
    return %c0_i32, %c0_i32_0, %c0_i32_1 : i32, i32, i32
  }
  func.func @transform_10(%arg0: i32) -> (i32, i32) {
    %c0_i32 = arith.constant 0 : i32
    %c0_i32_0 = arith.constant 0 : i32
    %c0_i32_1 = arith.constant 0 : i32
    return %c0_i32, %c0_i32_0 : i32, i32
  }
  func.func @transform_11(%arg0: i32) -> (i32, i32) {
    %c0_i32 = arith.constant 0 : i32
    %c0_i32_0 = arith.constant 0 : i32
    %c0_i32_1 = arith.constant 0 : i32
    return %c0_i32, %c0_i32_0 : i32, i32
  }
  func.func @transform_12(%arg0: i32) -> (i32, i32) {
    %c0_i32 = arith.constant 0 : i32
    %c0_i32_0 = arith.constant 0 : i32
    %c0_i32_1 = arith.constant 0 : i32
    return %c0_i32, %c0_i32_0 : i32, i32
  }
  func.func @transform_13(%arg0: i32) -> (i32, i32, i32) {
    %c0_i32 = arith.constant 0 : i32
    %c0_i32_0 = arith.constant 0 : i32
    %c0_i32_1 = arith.constant 0 : i32
    %c0_i32_2 = arith.constant 0 : i32
    return %c0_i32, %c0_i32_0, %c0_i32_1 : i32, i32, i32
  }
  func.func @transform_14(%arg0: i32) -> (i32, i32) {
    %c0_i32 = arith.constant 0 : i32
    %c0_i32_0 = arith.constant 0 : i32
    %c0_i32_1 = arith.constant 0 : i32
    return %c0_i32, %c0_i32_0 : i32, i32
  }
  func.func @transform_15(%arg0: i32) -> (i32, i32) {
    %c0_i32 = arith.constant 0 : i32
    %c0_i32_0 = arith.constant 0 : i32
    %c0_i32_1 = arith.constant 0 : i32
    return %c0_i32, %c0_i32_0 : i32, i32
  }
  func.func @transform_16(%arg0: i32) -> (i32, i32) {
    %c0_i32 = arith.constant 0 : i32
    %c0_i32_0 = arith.constant 0 : i32
    %c0_i32_1 = arith.constant 0 : i32
    return %c0_i32, %c0_i32_0 : i32, i32
  }
  func.func @transform_17(%arg0: i32) -> (i32, i32, i32) {
    %c0_i32 = arith.constant 0 : i32
    %c0_i32_0 = arith.constant 0 : i32
    %c0_i32_1 = arith.constant 0 : i32
    %c0_i32_2 = arith.constant 0 : i32
    return %c0_i32, %c0_i32_0, %c0_i32_1 : i32, i32, i32
  }
  func.func @transform_18(%arg0: i32) -> (i32, i32) {
    %c0_i32 = arith.constant 0 : i32
    %c0_i32_0 = arith.constant 0 : i32
    %c0_i32_1 = arith.constant 0 : i32
    return %c0_i32, %c0_i32_0 : i32, i32
  }
  func.func @transform_19(%arg0: i32) -> (i32, i32) {
    %c0_i32 = arith.constant 0 : i32
    %c0_i32_0 = arith.constant 0 : i32
    %c0_i32_1 = arith.constant 0 : i32
    return %c0_i32, %c0_i32_0 : i32, i32
  }
  func.func @transform_20(%arg0: i32) -> (i32, i32) {
    %c0_i32 = arith.constant 0 : i32
    %c0_i32_0 = arith.constant 0 : i32
    %c0_i32_1 = arith.constant 0 : i32
    return %c0_i32, %c0_i32_0 : i32, i32
  }
  func.func @transform_21(%arg0: i32) -> (i32, i32, i32) {
    %c0_i32 = arith.constant 0 : i32
    %c0_i32_0 = arith.constant 0 : i32
    %c0_i32_1 = arith.constant 0 : i32
    return %arg0, %c0_i32, %c0_i32_0 : i32, i32, i32
  }
}

</mosaic_0001>

<bundles_post_ra>
// kernel: forward.1
= control target key start
LH: loop header
LB: loop body
LE: loop exit
PB: predicated region body
PF: predicated region fallthrough
CT: control target
= control target key end

     0   :  { %s20671_s0 = inlined_call_operand.vmem [shape: f32[2,3,1152], index: 0, kind: input, shape index: {}]   ;;  %s20672_s1 = inlined_call_operand.vmem [shape: bf16[9,40,3], index: 1, kind: input, shape index: {}]   ;;  %s20673_s2 = inlined_call_operand.vmem [shape: f32[40,1], index: 2, kind: input, shape index: {}]   ;;  %s20674_s3 = inlined_call_operand.vmem [shape: bf16[20,40], index: 3, kind: input, shape index: {}]   ;;  %s20675_s4 = inlined_call_operand.vmem [shape: f32[20,1], index: 4, kind: input, shape index: {}]   ;;  %s20676_s5 = inlined_call_operand.vmem [shape: bf16[9,48,20], index: 5, kind: input, shape index: {}]   ;;  %s20677_s6 = inlined_call_operand.vmem [shape: f32[48,1], index: 6, kind: input, shape index: {}]   ;;  %s20678_s7 = inlined_call_operand.vmem [shape: bf16[24,48], index: 7, kind: input, shape index: {}]   ;;  %s20679_s8 = inlined_call_operand.vmem [shape: f32[24,1], index: 8, kind: input, shape index: {}]   ;;  %s20680_s9 = inlined_call_operand.vmem [shape: bf16[9,48,24], index: 9, kind: input, shape index: {}]   ;;  %s20681_s10 = inlined_call_operand.vmem [shape: f32[48,1], index: 10, kind: input, shape index: {}]   ;;  %s20682_s11 = inlined_call_operand.vmem [shape: bf16[24,48], index: 11, kind: input, shape index: {}]   ;;  %s20683_s12 = inlined_call_operand.vmem [shape: f32[24,1], index: 12, kind: input, shape index: {}]   ;;  %s20684_s13 = inlined_call_operand.vmem [shape: bf16[9,48,24], index: 13, kind: input, shape index: {}]   ;;  %s20685_s14 = inlined_call_operand.vmem [shape: f32[48,1], index: 14, kind: input, shape index: {}]   ;;  %s20686_s15 = inlined_call_operand.vmem [shape: bf16[32,48], index: 15, kind: input, shape index: {}]   ;;  %s20687_s16 = inlined_call_operand.vmem [shape: f32[32,1], index: 16, kind: input, shape index: {}]   ;;  %s20688_s17 = inlined_call_operand.vmem [shape: bf16[9,32,64], index: 17, kind: input, shape index: {}]   ;;  %s20689_s18 = inlined_call_operand.vmem [shape: f32[1,64], index: 18, kind: input, shape index: {}]   ;;  %s20690_s19 = inlined_call_operand.vmem [shape: bf16[64,43], index: 19, kind: input, shape index: {}]   ;;  %s20691_s20 = inlined_call_operand.vmem [shape: f32[1,43], index: 20, kind: input, shape index: {}]   ;;  %s20692_s21 = inlined_call_operand.hbm [shape: f32[2,1,43], index: 21, kind: output, shape index: {}]  }
   0x1   :  { %20784 = sst [smem:[#allocation15_spill]] %s20671_s0 }
   0x2   :  { %20785 = sst [smem:[#allocation16_spill]] %s20672_s1 }
   0x3   :  { %20786 = sst [smem:[#allocation17_spill]] %s20673_s2 }
   0x4   :  { %20787 = sst [smem:[#allocation18_spill]] %s20674_s3 }
   0x5   :  { %20788 = sst [smem:[#allocation19_spill]] %s20675_s4 }
   0x6   :  { %20789 = sst [smem:[#allocation20_spill]] %s20676_s5 }
   0x7   :  { %26 = vsyncpa [#allocation5], 0 }
   0x8   :  { %28 = vsyncpa [#allocation5 + $0x1], 0  ;;  %s15884_s2 = smov 0   ;;  %s15886_s25 = smov 0  }
   0x9   :  { %s15888_s26 = smov 0   ;;  %s15890_s27 = smov 0  }
   0xa LB: > { %20790 = sst [smem:[#allocation7_spill]] %s15739_s2  ;;  %s15905_s3 = sadd.s32 4294967295, %s15751_s27   ;;  %s15751_s27 = sphi %s15890_s27, %s20872_s27   ;;  %s15747_s26 = sphi %s15888_s26, %s20874_s26   ;;  %s15743_s25 = sphi %s15886_s25, %s20876_s25   ;;  %s15739_s2 = sphi %s15884_s2, %s20875_s2  }
   0xb   : > { %20791 = sst [smem:[#allocation8_spill]] %s15747_s26  ;;  %s13545_s28 = sadd.s32 4294967294, %s15751_s27  }
   0xc   : > { %s15909_s29 = sadd.s32 1, %s15751_s27   ;;  %s487_s0 = sadd.s32 1, %s15747_s26 }
   0xd   : > { %20792 = sst [smem:[#allocation9_spill]] %s15909_s29  ;;  %s484_s4 = ssub.s32 %s15751_s27, %s15909_s29 }
   0xe   : > { %p497_p0 = scmp.ne.s32.totalorder %s15747_s26, %s15743_s25  ;;  %p485_p1 = scmp.eq.s32.totalorder %s484_s4, 0 }
   0xf   : > { %p498_p2 = scmp.eq.s32.totalorder %s15905_s3, 1  ;;  %p503_p3 = scmp.ne.s32.totalorder %s15743_s25, %s15739_s2 }
  0x10   : > { %p504_p4 = scmp.eq.s32.totalorder %s13545_s28, 1  ;;  %p13548_p7 = scmp.ge.s32.totalorder %s15751_s27, 1 }
  0x11   : > { %s15920_s30 = scalar_select %p485_p1, %s15747_s26, %s487_s0  }
  0x12   : > { %p15922_p5 = por %p498_p2, %p497_p0  ;;  %p15926_p6 = por %p504_p4, %p503_p3 }
  0x13   : > { %20793 = sst [smem:[#allocation10_spill]] %s15920_s30  ;;  %p590_p8 = scmp.lt.s32.totalorder %s15751_s27, 3 }
  0x14   : > { %s20795_s22 = scalar_select %p15926_p6, 1, 0 }
  0x15   : > { %p591_p9 = pnand %p13548_p7, %p590_p8 }
  0x16   : > { %20796 = sst [smem:[#allocation11_spill]] %s20795_s22 }
  0x17   : > { %594 = sbr.rel (%p591_p9) target bundleno = 5421 (0x152d), region = 104 }
  0x1e   : > { %p649_p10 = scmp.lt.s32.totalorder %s15905_s3, 1  ;;  %s20797_s0 = sld [smem:[#allocation15_spill]]  ;;  %v20712_v14 = vmov 0   ;;  %vm769_vm0 = vcmask 1040384   ;;  %vm750_vm1 = vcmask 1039360   ;;  %vm770_vm2 = vcmask 1041408  }
  0x1f   : > { %829 = vmatprep.mubr.bf16.mxu0 %v20712_v14  ;;  %890 = vmatprep.mubr.bf16.mxu1 %v20712_v14  ;;  %s20702_s24 = smov 98   ;;  %s15757_s28 = smov 97   ;;  %v15759_v30 = vmov 65535   ;;  %vm759_vm3 = vcmask 23552   ;;  %vm1368_vm4 = vcmask 1031168   ;;  %vm1731_vm5 = vcmask 801792  }
  0x20   : > { %s650_s23 = scalar_select %p649_p10, %s15905_s3, 1  ;;  %15505 = vset.pattern.permute.xlu0 %v20712_v14  ;;  %15506 = vset.pattern.permute.xlu1 %v20712_v14  ;;  %v771_v31 = vsel %vm769_vm0, 4294967295, %v15759_v30  ;;  %vm2094_vm6 = vcmask 793600   ;;  %vm2457_vm7 = vcmask 785408   ;;  %vm2820_vm8 = vcmask 556032  }
  0x21   : > { %v16031_v34 = vsel %vm770_vm2, %v771_v31, 0  ;;  %vm3183_vm9 = vcmask 547840   ;;  %vm3546_vm10 = vcmask 539648   ;;  %s20800_s26 = smov 127   ;;  %s20801_s30 = smov 98   ;;  %vm4651_vm11 = vcmask 1043456  }
  0x22   : > { %s15445_s1 = smul.u32 36, %s650_s23  ;;  %s20706_s23 = smov 127   ;;  %vm4644_vm12 = vcmask 326656   ;;  %vm5018_vm13 = vcmask 162816   ;;  %vm5516_vm14 = vcmask 1014784   ;;  %vm6477_vm15 = vcmask 523264  }
  0x23   : > { %s20827_s22 = sld [smem:[#allocation18_spill]]  ;;  %s20831_s29 = smov 66   ;;  %vm6798_vm0 = vcmask 64512  }
  0x24   : > { %s653_s4 = scalar_lea.vmem %s20797_s0, %s15445_s1  ;;  %s20698_s1 = smov 126  }
  0x25   : > { %v655_v0 = vld [vmem:[%s653_s4] sm:$0x77]  ;;  %v656_v1 = vld [vmem:[%s653_s4 + $0x8] sm:$0x77]  ;;  %v657_v2 = vld [vmem:[%s653_s4 + $0x10] sm:$0x77] }
  0x26   : > { %672 = vst [vmem:[#allocation2] sm:$0x7] %v655_v0  ;;  %v664_v3 = vcombine.high %v655_v0, %v655_v0  ;;  %v665_v4 = vcombine.high %v656_v1, %v656_v1  ;;  %674 = vst [vmem:[#allocation2 + $0x10] sm:$0x7] %v656_v1  ;;  %v666_v5 = vcombine.high %v657_v2, %v657_v2  ;;  %v658_v6 = vld [vmem:[%s653_s4 + $0x18] sm:$0x77] }
  0x27   : > { %676 = vst [vmem:[#allocation2 + $0x20] sm:$0x7] %v657_v2  ;;  %v659_v7 = vld [vmem:[%s653_s4 + $0x20] sm:$0x7]  ;;  %678 = vst [vmem:[#allocation2 + $0x30] sm:$0x7] %v658_v6  ;;  %v667_v8 = vcombine.high %v658_v6, %v658_v6 }
  0x28   : > { %680 = vst [vmem:[#allocation2 + $0x40] sm:$0x7] %v659_v7  ;;  %673 = vst [vmem:[#allocation2 + $0x8] sm:$0x7] %v664_v3  ;;  %s15758_s0 = smov 96   ;;  %s20700_s4 = smov 68  }
  0x29   : > { %675 = vst [vmem:[#allocation2 + $0x18] sm:$0x7] %v665_v4  ;;  %677 = vst [vmem:[#allocation2 + $0x28] sm:$0x7] %v666_v5  ;;  %s20836_s2 = smov 6  }
  0x2a   : > { %679 = vst [vmem:[#allocation2 + $0x38] sm:$0x7] %v667_v8 }
  0x2d   : > { %v681_v9 = vld [vmem:[#allocation2] sm:$0x7]  ;;  %v683_v13 = vld [vmem:[#allocation2 + $0x10] sm:$0x7] }
  0x2e   : > { %v15937_v10 = vpack.c.bf16 %v681_v9, %v681_v9  ;;  %v685_v18 = vld [vmem:[#allocation2 + $0x20] sm:$0x7]  ;;  %v15951_v19 = vpack.c.bf16 %v683_v13, %v683_v13  ;;  %v687_v21 = vld [vmem:[#allocation2 + $0x30] sm:$0x7] }
  0x2f   : > { %v682_v11 = vld [vmem:[#allocation2 + $0x8] sm:$0x7]  ;;  %v15959_v23 = vpack.c.bf16 %v685_v18, %v685_v18  ;;  %v702_v25 = vld [vmem:[#allocation2 + $0x40] sm:$0x7]  ;;  %v15967_v26 = vpack.c.bf16 %v687_v21, %v687_v21 }
  0x30   : > { %v684_v12 = vld [vmem:[#allocation2 + $0x18] sm:$0x7]  ;;  %732 = vrot.lane.b32.xlu1 %v15937_v10, %s20706_s23  ;;  %v15943_v15 = vpack.c.bf16 %v682_v11, %v682_v11  ;;  %v686_v17 = vld [vmem:[#allocation2 + $0x28] sm:$0x7]  ;;  %v15973_v27 = vpack.c.bf16 %v702_v25, %v702_v25  ;;  %v1064_v61 = vand.u32 %v16031_v34, %v15937_v10  ;;  %v1070_v63 = vand.u32 %v16031_v34, %v15951_v19 }
  0x31   : > { %v15945_v16 = vpack.c.bf16 %v684_v12, %v684_v12  ;;  %v15955_v20 = vpack.c.bf16 %v686_v17, %v686_v17  ;;  %v688_v22 = vld [vmem:[#allocation2 + $0x38] sm:$0x7]  ;;  %v1076_v8 = vand.u32 %v16031_v34, %v15959_v23  ;;  %v1082_v12 = vand.u32 %v16031_v34, %v15967_v26 }
  0x32   : > { %734 = vrot.lane.b32.xlu0 %v15943_v15, %s20706_s23  ;;  %v15963_v24 = vpack.c.bf16 %v688_v22, %v688_v22  ;;  %v1067_v52 = vand.u32 %v16031_v34, %v15943_v15 }
  0x33   : > { %v1073_v59 = vand.u32 %v16031_v34, %v15945_v16  ;;  %v1079_v62 = vand.u32 %v16031_v34, %v15955_v20 }
  0x34   : > { %738 = vrot.lane.b32.xlu1 %v15945_v16, %s20706_s23  ;;  %v1085_v0 = vand.u32 %v16031_v34, %v15963_v24 }
  0x36   : > { %736 = vrot.lane.b32.xlu0 %v15951_v19, %s20706_s23 }
  0x38   : > { %742 = vrot.lane.b32.xlu1 %v15955_v20, %s20706_s23 }
  0x3a   : > { %740 = vrot.lane.b32.xlu0 %v15959_v23, %s20706_s23 }
  0x3c   : > { %746 = vrot.lane.b32.xlu1 %v15963_v24, %s20706_s23 }
  0x3e   : > { %744 = vrot.lane.b32.xlu0 %v15967_v26, %s20706_s23 }
  0x40   : > { %1352 = vrot.lane.b32.xlu1 %v15943_v15, %s20698_s1 }
  0x42   : > { %748 = vrot.lane.b32.xlu0 %v15973_v27, %s20706_s23  ;;  %s20835_s23 = smov 8  }
  0x44   : > { %1350 = vrot.lane.b32.xlu1 %v15937_v10, %s20698_s1 }
  0x46   : > { %1354 = vrot.lane.b32.xlu0 %v15951_v19, %s20698_s1 }
  0x48   : > { %1358 = vrot.lane.b32.xlu1 %v15959_v23, %s20698_s1 }
  0x4a   : > { %1356 = vrot.lane.b32.xlu0 %v15945_v16, %s20698_s1 }
  0x4c   : > { %1362 = vrot.lane.b32.xlu1 %v15967_v26, %s20698_s1 }
  0x4e   : > { %1360 = vrot.lane.b32.xlu0 %v15955_v20, %s20698_s1 }
  0x50   : > { %1366 = vrot.lane.b32.xlu1 %v15973_v27, %s20698_s1 }
  0x52   : > { %1364 = vrot.lane.b32.xlu0 %v15963_v24, %s20698_s1  ;;  %s20798_s1 = sld [smem:[#allocation16_spill]] }
  0x54   : > { %1717 = vrot.lane.b32.xlu1 %v15951_v19, %s20702_s24 }
  0x56   : > { %1715 = vrot.lane.b32.xlu0 %v15943_v15, %s20702_s24 }
  0x58   : > { %1719 = vrot.lane.b32.xlu1 %v15945_v16, %s20702_s24  ;;  %v15547_v41 = vld [vmem:[%s20798_s1 + $0x14] sm:$0xff]   ;;  %v15548_v54 = vld [vmem:[%s20798_s1 + $0x1c] sm:$0xff]   ;;  %v15549_v60 = vld [vmem:[%s20798_s1 + $0x24] ss:$0 sps:$4 sm:$0xff]  }
  0x59   : > { %v15550_v5 = vld [vmem:[%s20798_s1] sm:$0xff]   ;;  %v15551_v17 = vld [vmem:[%s20798_s1 + $0x8] sm:$0xff]   ;;  %v15552_v18 = vld [vmem:[%s20798_s1 + $0x10] ss:$0 sps:$4 sm:$0xff]  }
  0x5a   : > { %1713 = vrot.lane.b32.xlu0 %v15937_v10, %s20702_s24 }
  0x5c   : > { %1723 = vrot.lane.b32.xlu1 %v15955_v20, %s20702_s24 }
  0x5e   : > { %1721 = vrot.lane.b32.xlu0 %v15959_v23, %s20702_s24 }
  0x60   : > { %1727 = vrot.lane.b32.xlu1 %v15963_v24, %s20702_s24 }
  0x62   : > { %1725 = vrot.lane.b32.xlu0 %v15967_v26, %s20702_s24 }
  0x64   : > { %2078 = vrot.lane.b32.xlu1 %v15943_v15, %s15757_s28 }
  0x66   : > { %1729 = vrot.lane.b32.xlu0 %v15973_v27, %s20702_s24  ;;  %s15761_s24 = smov 67  }
  0x68   : > { %2076 = vrot.lane.b32.xlu1 %v15937_v10, %s15757_s28 }
  0x6a   : > { %2080 = vrot.lane.b32.xlu0 %v15951_v19, %s15757_s28 }
  0x6c   : > { %2084 = vrot.lane.b32.xlu1 %v15959_v23, %s15757_s28 }
  0x6e   : > { %2082 = vrot.lane.b32.xlu0 %v15945_v16, %s15757_s28 }
  0x70   : > { %2088 = vrot.lane.b32.xlu1 %v15967_v26, %s15757_s28 }
  0x72   : > { %2086 = vrot.lane.b32.xlu0 %v15955_v20, %s15757_s28 }
  0x74   : > { %2092 = vrot.lane.b32.xlu1 %v15973_v27, %s15757_s28 }
  0x76   : > { %2090 = vrot.lane.b32.xlu0 %v15963_v24, %s15757_s28  ;;  %s20825_s28 = sld [smem:[#allocation19_spill]] }
  0x78   : > { %2443 = vrot.lane.b32.xlu1 %v15951_v19, %s15758_s0 }
  0x7a   : > { %2441 = vrot.lane.b32.xlu0 %v15943_v15, %s15758_s0 }
  0x7c   : > { %2445 = vrot.lane.b32.xlu1 %v15945_v16, %s15758_s0 }
  0x7e   : > { %2439 = vrot.lane.b32.xlu0 %v15937_v10, %s15758_s0 }
  0x80   : > { %2449 = vrot.lane.b32.xlu1 %v15955_v20, %s15758_s0 }
  0x82   : > { %2447 = vrot.lane.b32.xlu0 %v15959_v23, %s15758_s0 }
  0x84   : > { %2453 = vrot.lane.b32.xlu1 %v15963_v24, %s15758_s0 }
  0x86   : > { %2451 = vrot.lane.b32.xlu0 %v15967_v26, %s15758_s0 }
  0x88   : > { %2804 = vrot.lane.b32.xlu1 %v15943_v15, %s20700_s4 }
  0x8a   : > { %2455 = vrot.lane.b32.xlu0 %v15973_v27, %s15758_s0  ;;  %s20704_s0 = smov 66  }
  0x8c   : > { %2802 = vrot.lane.b32.xlu1 %v15937_v10, %s20700_s4 }
  0x8e   : > { %2806 = vrot.lane.b32.xlu0 %v15951_v19, %s20700_s4 }
  0x90   : > { %2810 = vrot.lane.b32.xlu1 %v15959_v23, %s20700_s4 }
  0x92   : > { %2808 = vrot.lane.b32.xlu0 %v15945_v16, %s20700_s4 }
  0x94   : > { %2814 = vrot.lane.b32.xlu1 %v15967_v26, %s20700_s4 }
  0x96   : > { %2812 = vrot.lane.b32.xlu0 %v15955_v20, %s20700_s4 }
  0x98   : > { %2818 = vrot.lane.b32.xlu1 %v15973_v27, %s20700_s4 }
  0x9a   : > { %2816 = vrot.lane.b32.xlu0 %v15963_v24, %s20700_s4  ;;  %s20829_s4 = smov 126  }
  0x9c   : > { %3169 = vrot.lane.b32.xlu1 %v15951_v19, %s15761_s24 }
  0x9e   : > { %3167 = vrot.lane.b32.xlu0 %v15943_v15, %s15761_s24 }
  0xa0   : > { %3171 = vrot.lane.b32.xlu1 %v15945_v16, %s15761_s24 }
  0xa2   : > { %v733_v28 = vpop.permute.xlu1 %732  ;;  %3165 = vrot.lane.b32.xlu0 %v15937_v10, %s15761_s24 }
  0xa4   : > { %v735_v29 = vpop.permute.xlu0 %734  ;;  %3175 = vrot.lane.b32.xlu1 %v15955_v20, %s15761_s24 }
  0xa5   : > { %v751_v35 = vsel %vm750_vm1, %v733_v28, %v735_v29 }
  0xa6   : > { %v739_v32 = vpop.permute.xlu1 %738  ;;  %v774_v39 = vand.u32 %v16031_v34, %v751_v35  ;;  %3173 = vrot.lane.b32.xlu0 %v15959_v23, %s15761_s24 }
  0xa8   : > { %v737_v33 = vpop.permute.xlu0 %736  ;;  %3179 = vrot.lane.b32.xlu1 %v15963_v24, %s15761_s24 }
  0xa9   : > { %v752_v36 = vsel %vm750_vm1, %v735_v29, %v737_v33  ;;  %v753_v42 = vsel %vm750_vm1, %v737_v33, %v739_v32 }
  0xaa   : > { %v777_v37 = vand.u32 %v16031_v34, %v752_v36  ;;  %v743_v38 = vpop.permute.xlu1 %742  ;;  %v780_v45 = vand.u32 %v16031_v34, %v753_v42  ;;  %3177 = vrot.lane.b32.xlu0 %v15967_v26, %s15761_s24 }
  0xac   : > { %797 = vmatprep.subr.bf16.mxu0 %v777_v37  ;;  %v741_v40 = vpop.permute.xlu0 %740  ;;  %3530 = vrot.lane.b32.xlu1 %v15943_v15, %s20704_s0 }
  0xad   : > { %798 = vmatpush1.bf16.msra.mxu0 %v774_v39  ;;  %v754_v43 = vsel %vm750_vm1, %v739_v32, %v741_v40  ;;  %v755_v47 = vsel %vm750_vm1, %v741_v40, %v743_v38 }
  0xae   : > { %v783_v44 = vand.u32 %v16031_v34, %v754_v43  ;;  %v747_v46 = vpop.permute.xlu1 %746  ;;  %v786_v53 = vand.u32 %v16031_v34, %v755_v47  ;;  %3181 = vrot.lane.b32.xlu0 %v15973_v27, %s15761_s24  ;;  %v15553_v43 = vld [vmem:[%s20798_s1 + $0x28] sm:$0xff]   ;;  %s20748_s24 = smov 64  }
  0xb0   : > { %13558 = vmatmul.mubr.msk.bf16.vlgmr.msra.gmra.mrb[0].mxu0 %vm759_vm3, %v15547_v41  ;;  %858 = vmatprep.subr.bf16.mxu1 %v783_v44  ;;  %v745_v48 = vpop.permute.xlu0 %744 }
  0xb1   : > { %v756_v49 = vsel %vm750_vm1, %v743_v38, %v745_v48  ;;  %859 = vmatpush1.bf16.msra.mxu1 %v780_v45  ;;  %839 = vmatprep.mubr.bf16.mxu0 %v20712_v14  ;;  %v757_v51 = vsel %vm750_vm1, %v745_v48, %v747_v46 }
  0xb2   : > { %v789_v50 = vand.u32 %v16031_v34, %v756_v49  ;;  %v792_v56 = vand.u32 %v16031_v34, %v757_v51  ;;  %v1353_v1 = vpop.permute.xlu1 %1352  ;;  %3532 = vrot.lane.b32.xlu0 %v15951_v19, %s20704_s0  ;;  %3528 = vrot.lane.b32.xlu1 %v15937_v10, %s20704_s0 }
  0xb4   : > { %13561 = vmatmul.mubr.msk.bf16.vlgmr.msra.gmra.mrb[0].mxu1 %vm759_vm3, %v15547_v41  ;;  %919 = vmatprep.subr.bf16.mxu0 %v789_v50  ;;  %v749_v55 = vpop.permute.xlu0 %748 }
  0xb5   : > { %920 = vmatpush1.bf16.msra.mxu0 %v786_v53  ;;  %900 = vmatprep.mubr.bf16.mxu1 %v20712_v14  ;;  %v758_v57 = vsel %vm750_vm1, %v747_v46, %v749_v55  ;;  %v15555_v53 = vld [vmem:[%s20798_s1 + $0x38] ss:$0 sps:$4 sm:$0xff]  }
  0xb6   : > { %v795_v58 = vand.u32 %v16031_v34, %v758_v57  ;;  %1087 = vmatprep.subr.bf16.mxu0 %v1067_v52  ;;  %v1351_v2 = vpop.permute.xlu1 %1350  ;;  %v15554_v52 = vld [vmem:[%s20798_s1 + $0x30] sm:$0xff]   ;;  %3534 = vrot.lane.b32.xlu0 %v15945_v16, %s20704_s0 }
  0xb7   : > { %v1369_v25 = vsel %vm1368_vm4, %v1351_v2, %v1353_v1  ;;  %3536 = vrot.lane.b32.xlu1 %v15959_v23, %s20704_s0 }
  0xb8   : > { %13559 = vmatmul.mubr.msk.bf16.gmra.mrb[4].mxu0 %vm759_vm3, %v15548_v54  ;;  %980 = vmatprep.subr.bf16.mxu1 %v795_v58  ;;  %v1355_v3 = vpop.permute.xlu0 %1354  ;;  %v1387_v31 = vand.u32 %v1369_v25, %v16031_v34 }
  0xb9   : > { %849 = vmatprep.mubr.bf16.mxu0 %v20712_v14  ;;  %981 = vmatpush1.bf16.msra.mxu1 %v792_v56  ;;  %v1370_v4 = vsel %vm1368_vm4, %v1353_v1, %v1355_v3 }
  0xba   : > { %1148 = vmatprep.subr.bf16.mxu1 %v1073_v59  ;;  %v16116_v6 = vpop.permute.xlu1 %1358  ;;  %v1390_v9 = vand.u32 %v1370_v4, %v16031_v34  ;;  %3538 = vrot.lane.b32.xlu0 %v15955_v20, %s20704_s0  ;;  %v15556_v20 = vld [vmem:[%s20798_s1 + $0x3c] sm:$0xff]  }
  0xbb   : > { %3540 = vrot.lane.b32.xlu1 %v15967_v26, %s20704_s0 }
  0xbc   : > { %13562 = vmatmul.mubr.msk.bf16.gmra.mrb[4].mxu1 %vm759_vm3, %v15548_v54  ;;  %v1357_v7 = vpop.permute.xlu0 %1356 }
  0xbd   : > { %910 = vmatprep.mubr.bf16.mxu1 %v20712_v14  ;;  %v1372_v11 = vsel %vm1368_vm4, %v1357_v7, %v16116_v6  ;;  %v1371_v32 = vsel %vm1368_vm4, %v1355_v3, %v1357_v7  ;;  %v15557_v7 = vld [vmem:[%s20798_s1 + $0x44] sm:$0xff]  }
  0xbe   : > { %v1396_v13 = vand.u32 %v1372_v11, %v16031_v34  ;;  %v1363_v22 = vpop.permute.xlu1 %1362  ;;  %v1393_v36 = vand.u32 %v1371_v32, %v16031_v34  ;;  %3542 = vrot.lane.b32.xlu0 %v15963_v24, %s20704_s0 }
  0xbf   : > { %3544 = vrot.lane.b32.xlu1 %v15973_v27, %s20704_s0  ;;  %s20799_s0 = sld [smem:[#allocation17_spill]] }
  0xc0   : > { %13560 = vmatmul.mubr.msk.bf16.gmra.mrb[8].mxu0 %vm759_vm3, %v15549_v60  ;;  %v1361_v21 = vpop.permute.xlu0 %1360 }
  0xc1   : > { %951 = vmatprep.mubr.bf16.mxu0 %v20712_v14  ;;  %v1374_v28 = vsel %vm1368_vm4, %v1361_v21, %v1363_v22 }
  0xc2   : > { %v1367_v29 = vpop.permute.xlu1 %1366  ;;  %v1402_v33 = vand.u32 %v1374_v28, %v16031_v34 }
  0xc4   : > { %13563 = vmatmul.mubr.msk.bf16.gmra.mrb[8].mxu1 %vm759_vm3, %v15549_v60  ;;  %v1365_v30 = vpop.permute.xlu0 %1364 }
  0xc5   : > { %1012 = vmatprep.mubr.bf16.mxu1 %v20712_v14  ;;  %v1376_v35 = vsel %vm1368_vm4, %v1365_v30, %v1367_v29  ;;  %v1375_v47 = vsel %vm1368_vm4, %v1363_v22, %v1365_v30 }
  0xc6   : > { %v1408_v37 = vand.u32 %v1376_v35, %v16031_v34  ;;  %v1718_v39 = vpop.permute.xlu1 %1717  ;;  %v1405_v50 = vand.u32 %v1375_v47, %v16031_v34  ;;  %v15561_v47 = vld [vmem:[%s20798_s1 + $0x60] ss:$0 sps:$4 sm:$0xff]  }
  0xc8   : > { %13564 = vmatmul.mubr.msk.bf16.vlgmr.msra.gmra.mrb[12].mxu0 %vm759_vm3, %v15547_v41  ;;  %v1716_v38 = vpop.permute.xlu0 %1715 }
  0xc9   : > { %961 = vmatprep.mubr.bf16.mxu0 %v20712_v14  ;;  %1088 = vmatpush1.bf16.msra.mxu0 %v1064_v61  ;;  %v1733_v42 = vsel %vm1731_vm5, %v1716_v38, %v1718_v39 }
  0xca   : > { %1209 = vmatprep.subr.bf16.mxu0 %v1079_v62  ;;  %v1720_v44 = vpop.permute.xlu1 %1719  ;;  %v1753_v48 = vand.u32 %v1733_v42, %v16031_v34 }
  0xcb   : > { %v1734_v61 = vsel %vm1731_vm5, %v1718_v39, %v1720_v44 }
  0xcc   : > { %13567 = vmatmul.mubr.msk.bf16.vlgmr.msra.gmra.mrb[12].mxu1 %vm759_vm3, %v15547_v41  ;;  %v1714_v40 = vpop.permute.xlu0 %1713  ;;  %v1373_v41 = vsel %vm1368_vm4, %v16116_v6, %v1361_v21 }
  0xcd   : > { %1022 = vmatprep.mubr.bf16.mxu1 %v20712_v14  ;;  %1149 = vmatpush1.bf16.msra.mxu1 %v1070_v63  ;;  %v1399_v46 = vand.u32 %v1373_v41, %v16031_v34  ;;  %v1732_v56 = vsel %vm1731_vm5, %v1714_v40, %v1716_v38 }
  0xce   : > { %1270 = vmatprep.subr.bf16.mxu1 %v1085_v0  ;;  %v1756_v0 = vand.u32 %v1734_v61, %v16031_v34 }
  0xd0   : > { %13565 = vmatmul.mubr.msk.bf16.gmra.mrb[16].mxu0 %vm759_vm3, %v15548_v54  ;;  %v16179_v45 = vpop.permute.xlu0 %1721 }
  0xd1   : > { %971 = vmatprep.mubr.bf16.mxu0 %v20712_v14  ;;  %v1735_v49 = vsel %vm1731_vm5, %v1720_v44, %v16179_v45 }
  0xd2   : > { %v1759_v51 = vand.u32 %v1735_v49, %v16031_v34 }
  0xd4   : > { %13568 = vmatmul.mubr.msk.bf16.gmra.mrb[16].mxu1 %vm759_vm3, %v15548_v54  ;;  %v1724_v54 = vpop.permute.xlu1 %1723  ;;  %v1726_v55 = vpop.permute.xlu0 %1725 }
  0xd5   : > { %1032 = vmatprep.mubr.bf16.mxu1 %v20712_v14  ;;  %v1737_v57 = vsel %vm1731_vm5, %v1724_v54, %v1726_v55  ;;  %v1736_v16 = vsel %vm1731_vm5, %v16179_v45, %v1724_v54 }
  0xd6   : > { %v1765_v62 = vand.u32 %v1737_v57, %v16031_v34  ;;  %v1762_v26 = vand.u32 %v1736_v16, %v16031_v34 }
  0xd8   : > { %13566 = vmatmul.mubr.msk.bf16.gmra.mrb[20].mxu0 %vm759_vm3, %v15549_v60  ;;  %v1728_v58 = vpop.permute.xlu1 %1727  ;;  %v1730_v59 = vpop.permute.xlu0 %1729 }
  0xd9   : > { %1119 = vmatprep.mubr.bf16.mxu0 %v20712_v14  ;;  %v1739_v63 = vsel %vm1731_vm5, %v1728_v58, %v1730_v59  ;;  %v1738_v3 = vsel %vm1731_vm5, %v1726_v55, %v1728_v58 }
  0xda   : > { %v1771_v1 = vand.u32 %v1739_v63, %v16031_v34 }
  0xdc   : > { %13569 = vmatmul.mubr.msk.bf16.gmra.mrb[20].mxu1 %vm759_vm3, %v15549_v60  ;;  %v1750_v60 = vand.u32 %v1732_v56, %v16031_v34  ;;  %v2079_v2 = vpop.permute.xlu1 %2078  ;;  %v2081_v10 = vpop.permute.xlu0 %2080 }
  0xdd   : > { %1180 = vmatprep.mubr.bf16.mxu1 %v20712_v14  ;;  %v2096_v19 = vsel %vm2094_vm6, %v2079_v2, %v2081_v10 }
  0xde   : > { %v2116_v4 = vand.u32 %v2096_v19, %v16031_v34 }
  0xe0   : > { %13573 = vmatmul.mubr.msk.bf16.vlgmr.msra.gmra.mrb[0].mxu0 %vm759_vm3, %v15550_v5  ;;  %v2077_v15 = vpop.permute.xlu1 %2076  ;;  %v2083_v24 = vpop.permute.xlu0 %2082 }
  0xe1   : > { %1129 = vmatprep.mubr.bf16.mxu0 %v20712_v14  ;;  %1210 = vmatpush1.bf16.msra.mxu0 %v1076_v8  ;;  %v15558_v8 = vld [vmem:[%s20798_s1 + $0x4c] ss:$0 sps:$4 sm:$0xff]   ;;  %v2097_v22 = vsel %vm2094_vm6, %v2081_v10, %v2083_v24 }
  0xe2   : > { %1410 = vmatprep.subr.bf16.mxu0 %v1390_v9  ;;  %v2119_v29 = vand.u32 %v2097_v22, %v16031_v34 }
  0xe4   : > { %13576 = vmatmul.mubr.msk.bf16.vlgmr.msra.gmra.mrb[0].mxu1 %vm759_vm3, %v15550_v5  ;;  %v2085_v23 = vpop.permute.xlu1 %2084  ;;  %v2087_v9 = vpop.permute.xlu0 %2086 }
  0xe5   : > { %1190 = vmatprep.mubr.bf16.mxu1 %v20712_v14  ;;  %1271 = vmatpush1.bf16.msra.mxu1 %v1082_v12  ;;  %v2098_v27 = vsel %vm2094_vm6, %v2083_v24, %v2085_v23  ;;  %v2095_v12 = vsel %vm2094_vm6, %v2077_v15, %v2079_v2  ;;  %v2099_v35 = vsel %vm2094_vm6, %v2085_v23, %v2087_v9  ;;  %v15562_v24 = vld [vmem:[%s20798_s1 + $0x64] sm:$0xff]  }
  0xe6   : > { %1471 = vmatprep.subr.bf16.mxu1 %v1396_v13  ;;  %v2122_v6 = vand.u32 %v2098_v27, %v16031_v34  ;;  %v2113_v21 = vand.u32 %v2095_v12, %v16031_v34  ;;  %v2125_v40 = vand.u32 %v2099_v35, %v16031_v34 }
  0xe8   : > { %13574 = vmatmul.mubr.msk.bf16.gmra.mrb[4].mxu0 %vm759_vm3, %v15551_v17  ;;  %v2089_v11 = vpop.permute.xlu1 %2088 }
  0xe9   : > { %1139 = vmatprep.mubr.bf16.mxu0 %v20712_v14  ;;  %v2100_v13 = vsel %vm2094_vm6, %v2087_v9, %v2089_v11  ;;  %v15563_v9 = vld [vmem:[%s20798_s1 + $0x6c] sm:$0xff]  }
  0xea   : > { %v2128_v25 = vand.u32 %v2100_v13, %v16031_v34  ;;  %v15564_v13 = vld [vmem:[%s20798_s1 + $0x74] ss:$0 sps:$4 sm:$0xff]  }
  0xec   : > { %13577 = vmatmul.mubr.msk.bf16.gmra.mrb[4].mxu1 %vm759_vm3, %v15551_v17 }
  0xed   : > { %1200 = vmatprep.mubr.bf16.mxu1 %v20712_v14 }
  0xf0   : > { %13575 = vmatmul.mubr.msk.bf16.gmra.mrb[24].mxu0 %vm759_vm3, %v15552_v18 }
  0xf1   : > { %1241 = vmatprep.mubr.bf16.mxu0 %v20712_v14 }
  0xf4   : > { %13578 = vmatmul.mubr.msk.bf16.gmra.mrb[24].mxu1 %vm759_vm3, %v15552_v18 }
  0xf5   : > { %1302 = vmatprep.mubr.bf16.mxu1 %v20712_v14 }
  0xf8   : > { %13579 = vmatmul.mubr.msk.bf16.vlgmr.msra.gmra.mrb[12].mxu0 %vm759_vm3, %v15550_v5 }
  0xf9   : > { %1251 = vmatprep.mubr.bf16.mxu0 %v20712_v14  ;;  %1411 = vmatpush1.bf16.msra.mxu0 %v1387_v31 }
  0xfa   : > { %1532 = vmatprep.subr.bf16.mxu0 %v1402_v33 }
  0xfc   : > { %13582 = vmatmul.mubr.msk.bf16.vlgmr.msra.gmra.mrb[12].mxu1 %vm759_vm3, %v15550_v5  ;;  %v1768_v5 = vand.u32 %v1738_v3, %v16031_v34 }
  0xfd   : > { %1312 = vmatprep.mubr.bf16.mxu1 %v20712_v14  ;;  %1472 = vmatpush1.bf16.msra.mxu1 %v1393_v36 }
  0xfe   : > { %1593 = vmatprep.subr.bf16.mxu1 %v1408_v37  ;;  %v15559_v37 = vld [vmem:[%s20798_s1 + $0x50] sm:$0xff]  }
 0x100   : > { %13580 = vmatmul.mubr.msk.bf16.gmra.mrb[16].mxu0 %vm759_vm3, %v15551_v17 }
 0x101   : > { %1261 = vmatprep.mubr.bf16.mxu0 %v20712_v14 }
 0x104   : > { %13583 = vmatmul.mubr.msk.bf16.gmra.mrb[16].mxu1 %vm759_vm3, %v15551_v17  ;;  %v2093_v17 = vpop.permute.xlu1 %2092 }
 0x105   : > { %1322 = vmatprep.mubr.bf16.mxu1 %v20712_v14 }
 0x108   : > { %13581 = vmatmul.mubr.msk.bf16.gmra.mrb[28].mxu0 %vm759_vm3, %v15552_v18  ;;  %v2444_v32 = vpop.permute.xlu1 %2443 }
 0x109   : > { %1442 = vmatprep.mubr.bf16.mxu0 %v20712_v14 }
 0x10c   : > { %13584 = vmatmul.mubr.msk.bf16.gmra.mrb[28].mxu1 %vm759_vm3, %v15552_v18  ;;  %v2091_v18 = vpop.permute.xlu0 %2090  ;;  %v2446_v38 = vpop.permute.xlu1 %2445 }
 0x10d   : > { %1503 = vmatprep.mubr.bf16.mxu1 %v20712_v14  ;;  %v2102_v28 = vsel %vm2094_vm6, %v2091_v18, %v2093_v17  ;;  %v2101_v41 = vsel %vm2094_vm6, %v2089_v11, %v2091_v18  ;;  %v2460_v55 = vsel %vm2457_vm7, %v2444_v32, %v2446_v38  ;;  %vm8189_vm6 = vcmask 195584  }
 0x10e   : > { %v2134_v30 = vand.u32 %v2102_v28, %v16031_v34  ;;  %v2131_v44 = vand.u32 %v2101_v41, %v16031_v34  ;;  %v2482_v58 = vand.u32 %v2460_v55, %v16031_v34 }
 0x110   : > { %13593 = vmatmul.mubr.msk.bf16.vlgmr.msra.gmra.mrb[0].mxu0 %vm759_vm3, %v15553_v43  ;;  %v2442_v31 = vpop.permute.xlu0 %2441 }
 0x111   : > { %1533 = vmatpush1.bf16.msra.mxu0 %v1399_v46  ;;  %1452 = vmatprep.mubr.bf16.mxu0 %v20712_v14  ;;  %v2459_v36 = vsel %vm2457_vm7, %v2442_v31, %v2444_v32  ;;  %v15560_v46 = vld [vmem:[%s20798_s1 + $0x58] sm:$0xff]  }
 0x112   : > { %1773 = vmatprep.subr.bf16.mxu0 %v1753_v48  ;;  %v2479_v42 = vand.u32 %v2459_v36, %v16031_v34  ;;  %v2450_v48 = vpop.permute.xlu1 %2449 }
 0x114   : > { %13596 = vmatmul.mubr.msk.bf16.vlgmr.msra.gmra.mrb[0].mxu1 %vm759_vm3, %v15553_v43  ;;  %v2440_v33 = vpop.permute.xlu0 %2439 }
 0x115   : > { %1513 = vmatprep.mubr.bf16.mxu1 %v20712_v14  ;;  %1594 = vmatpush1.bf16.msra.mxu1 %v1405_v50  ;;  %v2458_v50 = vsel %vm2457_vm7, %v2440_v33, %v2442_v31 }
 0x116   : > { %1834 = vmatprep.subr.bf16.mxu1 %v1759_v51  ;;  %v2476_v54 = vand.u32 %v2458_v50, %v16031_v34 }
 0x118   : > { %13594 = vmatmul.mubr.msk.bf16.gmra.mrb[4].mxu0 %vm759_vm3, %v15554_v52  ;;  %v16299_v39 = vpop.permute.xlu0 %2447 }
 0x119   : > { %1462 = vmatprep.mubr.bf16.mxu0 %v20712_v14  ;;  %v2462_v19 = vsel %vm2457_vm7, %v16299_v39, %v2450_v48 }
 0x11c   : > { %13597 = vmatmul.mubr.msk.bf16.gmra.mrb[4].mxu1 %vm759_vm3, %v15554_v52  ;;  %v2452_v49 = vpop.permute.xlu0 %2451 }
 0x11d   : > { %1523 = vmatprep.mubr.bf16.mxu1 %v20712_v14  ;;  %v2463_v51 = vsel %vm2457_vm7, %v2450_v48, %v2452_v49 }
 0x11e   : > { %v2491_v56 = vand.u32 %v2463_v51, %v16031_v34 }
 0x120   : > { %13595 = vmatmul.mubr.msk.bf16.gmra.mrb[32].mxu0 %vm759_vm3, %v15555_v53 }
 0x121   : > { %1564 = vmatprep.mubr.bf16.mxu0 %v20712_v14 }
 0x124   : > { %13598 = vmatmul.mubr.msk.bf16.gmra.mrb[32].mxu1 %vm759_vm3, %v15555_v53 }
 0x125   : > { %1625 = vmatprep.mubr.bf16.mxu1 %v20712_v14 }
 0x128   : > { %13599 = vmatmul.mubr.msk.bf16.vlgmr.msra.gmra.mrb[12].mxu0 %vm759_vm3, %v15553_v43 }
 0x129   : > { %1574 = vmatprep.mubr.bf16.mxu0 %v20712_v14  ;;  %1774 = vmatpush1.bf16.msra.mxu0 %v1750_v60 }
 0x12a   : > { %1895 = vmatprep.subr.bf16.mxu0 %v1765_v62 }
 0x12c   : > { %13602 = vmatmul.mubr.msk.bf16.vlgmr.msra.gmra.mrb[12].mxu1 %vm759_vm3, %v15553_v43  ;;  %v2461_v43 = vsel %vm2457_vm7, %v2446_v38, %v16299_v39 }
 0x12d   : > { %1635 = vmatprep.mubr.bf16.mxu1 %v20712_v14  ;;  %1835 = vmatpush1.bf16.msra.mxu1 %v1756_v0  ;;  %v2485_v45 = vand.u32 %v2461_v43, %v16031_v34 }
 0x12e   : > { %1956 = vmatprep.subr.bf16.mxu1 %v1771_v1 }
 0x130   : > { %13600 = vmatmul.mubr.msk.bf16.gmra.mrb[16].mxu0 %vm759_vm3, %v15554_v52 }
 0x131   : > { %1584 = vmatprep.mubr.bf16.mxu0 %v20712_v14 }
 0x134   : > { %13603 = vmatmul.mubr.msk.bf16.gmra.mrb[16].mxu1 %vm759_vm3, %v15554_v52  ;;  %v2454_v52 = vpop.permute.xlu1 %2453 }
 0x135   : > { %1645 = vmatprep.mubr.bf16.mxu1 %v20712_v14  ;;  %v2464_v27 = vsel %vm2457_vm7, %v2452_v49, %v2454_v52 }
 0x138   : > { %13601 = vmatmul.mubr.msk.bf16.gmra.mrb[36].mxu0 %vm759_vm3, %v15555_v53  ;;  %v2805_v60 = vpop.permute.xlu1 %2804 }
 0x139   : > { %1805 = vmatprep.mubr.bf16.mxu0 %v20712_v14 }
 0x13c   : > { %13604 = vmatmul.mubr.msk.bf16.gmra.mrb[36].mxu1 %vm759_vm3, %v15555_v53  ;;  %v2456_v53 = vpop.permute.xlu0 %2455  ;;  %v2803_v2 = vpop.permute.xlu1 %2802 }
 0x13d   : > { %1866 = vmatprep.mubr.bf16.mxu1 %v20712_v14  ;;  %v2465_v57 = vsel %vm2457_vm7, %v2454_v52, %v2456_v53  ;;  %v2821_v31 = vsel %vm2820_vm8, %v2803_v2, %v2805_v60  ;;  %vm12201_vm7 = vcmask 130048  }
 0x13e   : > { %v2497_v59 = vand.u32 %v2465_v57, %v16031_v34  ;;  %v2839_v36 = vand.u32 %v2821_v31, %v16031_v34 }
 0x140   : > { %13613 = vmatmul.mubr.msk.bf16.vlgmr.msra.gmra.mrb[0].mxu0 %vm759_vm3, %v15556_v20  ;;  %v2807_v0 = vpop.permute.xlu0 %2806 }
 0x141   : > { %1896 = vmatpush1.bf16.msra.mxu0 %v1762_v26  ;;  %1815 = vmatprep.mubr.bf16.mxu0 %v20712_v14  ;;  %v2822_v23 = vsel %vm2820_vm8, %v2805_v60, %v2807_v0  ;;  %v16360_v26 = vpop.permute.xlu1 %2810 }
 0x142   : > { %2136 = vmatprep.subr.bf16.mxu0 %v2116_v4  ;;  %v2488_v4 = vand.u32 %v2462_v19, %v16031_v34 }
 0x144   : > { %13616 = vmatmul.mubr.msk.bf16.vlgmr.msra.gmra.mrb[0].mxu1 %vm759_vm3, %v15556_v20  ;;  %v2809_v3 = vpop.permute.xlu0 %2808 }
 0x145   : > { %1876 = vmatprep.mubr.bf16.mxu1 %v20712_v14  ;;  %1957 = vmatpush1.bf16.msra.mxu1 %v1768_v5  ;;  %v2842_v5 = vand.u32 %v2822_v23, %v16031_v34  ;;  %v2815_v28 = vpop.permute.xlu1 %2814  ;;  %v15567_v23 = vld [vmem:[%s20798_s1 + $0x88] ss:$0 sps:$4 sm:$0xff]  }
 0x146   : > { %2197 = vmatprep.subr.bf16.mxu1 %v2122_v6  ;;  %v2824_v6 = vsel %vm2820_vm8, %v2809_v3, %v16360_v26 }
 0x148   : > { %13614 = vmatmul.mubr.msk.bf16.gmra.mrb[4].mxu0 %vm759_vm3, %v15557_v7  ;;  %v2813_v22 = vpop.permute.xlu0 %2812 }
 0x149   : > { %1825 = vmatprep.mubr.bf16.mxu0 %v20712_v14  ;;  %v2826_v32 = vsel %vm2820_vm8, %v2813_v22, %v2815_v28  ;;  %v2819_v33 = vpop.permute.xlu1 %2818 }
 0x14a   : > { %v2854_v38 = vand.u32 %v2826_v32, %v16031_v34  ;;  %v3872_v32 = vld [vmem:[%s20799_s0] sm:$0xff] }
 0x14b   : > { %3879 = vperm.xlu0 %15505, %v3872_v32  }
 0x14c   : > { %13617 = vmatmul.mubr.msk.bf16.gmra.mrb[4].mxu1 %vm759_vm3, %v15557_v7  ;;  %v2817_v35 = vpop.permute.xlu0 %2816 }
 0x14d   : > { %1886 = vmatprep.mubr.bf16.mxu1 %v20712_v14  ;;  %v2828_v39 = vsel %vm2820_vm8, %v2817_v35, %v2819_v33  ;;  %v16420_v48 = vpop.permute.xlu1 %3169 }
 0x14e   : > { %v2860_v41 = vand.u32 %v2828_v39, %v16031_v34 }
 0x150   : > { %13615 = vmatmul.mubr.msk.bf16.gmra.mrb[40].mxu0 %vm759_vm3, %v15558_v8 }
 0x151   : > { %1927 = vmatprep.mubr.bf16.mxu0 %v20712_v14  ;;  %v3172_v60 = vpop.permute.xlu1 %3171 }
 0x154   : > { %13618 = vmatmul.mubr.msk.bf16.gmra.mrb[40].mxu1 %vm759_vm3, %v15558_v8 }
 0x155   : > { %1988 = vmatprep.mubr.bf16.mxu1 %v20712_v14 }
 0x158   : > { %13619 = vmatmul.mubr.msk.bf16.vlgmr.msra.gmra.mrb[12].mxu0 %vm759_vm3, %v15556_v20 }
 0x159   : > { %1937 = vmatprep.mubr.bf16.mxu0 %v20712_v14  ;;  %2137 = vmatpush1.bf16.msra.mxu0 %v2113_v21 }
 0x15a   : > { %2258 = vmatprep.subr.bf16.mxu0 %v2128_v25 }
 0x15c   : > { %13622 = vmatmul.mubr.msk.bf16.vlgmr.msra.gmra.mrb[12].mxu1 %vm759_vm3, %v15556_v20 }
 0x15d   : > { %1998 = vmatprep.mubr.bf16.mxu1 %v20712_v14  ;;  %2198 = vmatpush1.bf16.msra.mxu1 %v2119_v29 }
 0x15e   : > { %2319 = vmatprep.subr.bf16.mxu1 %v2134_v30 }
 0x160   : > { %13620 = vmatmul.mubr.msk.bf16.gmra.mrb[16].mxu0 %vm759_vm3, %v15557_v7 }
 0x161   : > { %1947 = vmatprep.mubr.bf16.mxu0 %v20712_v14 }
 0x164   : > { %13623 = vmatmul.mubr.msk.bf16.gmra.mrb[16].mxu1 %vm759_vm3, %v15557_v7  ;;  %v2494_v7 = vand.u32 %v2464_v27, %v16031_v34  ;;  %v3176_v27 = vpop.permute.xlu1 %3175 }
 0x165   : > { %2008 = vmatprep.mubr.bf16.mxu1 %v20712_v14 }
 0x168   : > { %13621 = vmatmul.mubr.msk.bf16.gmra.mrb[44].mxu0 %vm759_vm3, %v15558_v8 }
 0x169   : > { %2168 = vmatprep.mubr.bf16.mxu0 %v20712_v14 }
 0x16c   : > { %13624 = vmatmul.mubr.msk.bf16.gmra.mrb[44].mxu1 %vm759_vm3, %v15558_v8  ;;  %v2848_v8 = vand.u32 %v2824_v6, %v16031_v34 }
 0x16d   : > { %2229 = vmatprep.mubr.bf16.mxu1 %v20712_v14 }
 0x170   : > { %13633 = vmatmul.mubr.msk.bf16.vlgmr.msra.gmra.mrb[0].mxu0 %vm759_vm3, %v15559_v37 }
 0x171   : > { %2259 = vmatpush1.bf16.msra.mxu0 %v2125_v40  ;;  %2178 = vmatprep.mubr.bf16.mxu0 %v20712_v14 }
 0x172   : > { %2499 = vmatprep.subr.bf16.mxu0 %v2479_v42  ;;  %v16409_v42 = vpop.permute.xlu0 %3167 }
 0x174   : > { %13636 = vmatmul.mubr.msk.bf16.vlgmr.msra.gmra.mrb[0].mxu1 %vm759_vm3, %v15559_v37 }
 0x175   : > { %2239 = vmatprep.mubr.bf16.mxu1 %v20712_v14  ;;  %2320 = vmatpush1.bf16.msra.mxu1 %v2131_v44 }
 0x176   : > { %2560 = vmatprep.subr.bf16.mxu1 %v2485_v45  ;;  %v3166_v50 = vpop.permute.xlu0 %3165 }
 0x178   : > { %13634 = vmatmul.mubr.msk.bf16.gmra.mrb[4].mxu0 %vm759_vm3, %v15560_v46 }
 0x179   : > { %2188 = vmatprep.mubr.bf16.mxu0 %v20712_v14 }
 0x17c   : > { %13637 = vmatmul.mubr.msk.bf16.gmra.mrb[4].mxu1 %vm759_vm3, %v15560_v46 }
 0x17d   : > { %2249 = vmatprep.mubr.bf16.mxu1 %v20712_v14 }
 0x180   : > { %13635 = vmatmul.mubr.msk.bf16.gmra.mrb[48].mxu0 %vm759_vm3, %v15561_v47 }
 0x181   : > { %2290 = vmatprep.mubr.bf16.mxu0 %v20712_v14 }
 0x184   : > { %13638 = vmatmul.mubr.msk.bf16.gmra.mrb[48].mxu1 %vm759_vm3, %v15561_v47 }
 0x185   : > { %2351 = vmatprep.mubr.bf16.mxu1 %v20712_v14 }
 0x188   : > { %13639 = vmatmul.mubr.msk.bf16.vlgmr.msra.gmra.mrb[12].mxu0 %vm759_vm3, %v15559_v37 }
 0x189   : > { %2300 = vmatprep.mubr.bf16.mxu0 %v20712_v14  ;;  %2500 = vmatpush1.bf16.msra.mxu0 %v2476_v54 }
 0x18a   : > { %2621 = vmatprep.subr.bf16.mxu0 %v2491_v56  ;;  %v2825_v56 = vsel %vm2820_vm8, %v16360_v26, %v2813_v22  ;;  %v3186_v22 = vsel %vm3183_vm9, %v16420_v48, %v3172_v60 }
 0x18c   : > { %13642 = vmatmul.mubr.msk.bf16.vlgmr.msra.gmra.mrb[12].mxu1 %vm759_vm3, %v15559_v37  ;;  %v2823_v37 = vsel %vm2820_vm8, %v2807_v0, %v2809_v3 }
 0x18d   : > { %2361 = vmatprep.mubr.bf16.mxu1 %v20712_v14  ;;  %2561 = vmatpush1.bf16.msra.mxu1 %v2482_v58  ;;  %v2845_v40 = vand.u32 %v2823_v37, %v16031_v34  ;;  %v3185_v58 = vsel %vm3183_vm9, %v16409_v42, %v16420_v48 }
 0x18e   : > { %2682 = vmatprep.subr.bf16.mxu1 %v2497_v59  ;;  %v15565_v59 = vld [vmem:[%s20798_s1 + $0x78] sm:$0xff]   ;;  %v3205_v0 = vand.u32 %v3185_v58, %v16031_v34 }
 0x190   : > { %13640 = vmatmul.mubr.msk.bf16.gmra.mrb[16].mxu0 %vm759_vm3, %v15560_v46 }
 0x191   : > { %2310 = vmatprep.mubr.bf16.mxu0 %v20712_v14 }
 0x193   : > { %v16341_v61 = vpop.f32.mrb[8].mxu0 }
 0x194   : > { %v16343_v62 = vpop.f32.mrb[9].mxu0  ;;  %13643 = vmatmul.mubr.msk.bf16.gmra.mrb[16].mxu1 %vm759_vm3, %v15560_v46 }
 0x195   : > { %v855_v63 = vpop.f32.mrb[10].mxu0  ;;  %2371 = vmatprep.mubr.bf16.mxu1 %v20712_v14 }
 0x196   : > { %v856_v1 = vpop.f32.mrb[11].mxu0  ;;  %v2827_v63 = vsel %vm2820_vm8, %v2815_v28, %v2817_v35 }
 0x197   : > { %v16347_v15 = vpop.f32.mrb[8].mxu1  ;;  %v2857_v2 = vand.u32 %v2827_v63, %v16031_v34 }
 0x198   : > { %v16349_v10 = vpop.f32.mrb[9].mxu1  ;;  %13641 = vmatmul.mubr.msk.bf16.gmra.mrb[52].mxu0 %vm759_vm3, %v15561_v47 }
 0x199   : > { %v916_v16 = vpop.f32.mrb[10].mxu1  ;;  %2531 = vmatprep.mubr.bf16.mxu0 %v20712_v14 }
 0x19a   : > { %v917_v20 = vpop.f32.mrb[11].mxu1 }
 0x19c   : > { %13644 = vmatmul.mubr.msk.bf16.gmra.mrb[52].mxu1 %vm759_vm3, %v15561_v47 }
 0x19d   : > { %2592 = vmatprep.mubr.bf16.mxu1 %v20712_v14 }
 0x1a0   : > { %13653 = vmatmul.mubr.msk.bf16.vlgmr.msra.gmra.mrb[0].mxu0 %vm759_vm3, %v15562_v24 }
 0x1a1   : > { %2622 = vmatpush1.bf16.msra.mxu0 %v2488_v4  ;;  %2541 = vmatprep.mubr.bf16.mxu0 %v20712_v14 }
 0x1a2   : > { %2862 = vmatprep.subr.bf16.mxu0 %v2842_v5 }
 0x1a4   : > { %13656 = vmatmul.mubr.msk.bf16.vlgmr.msra.gmra.mrb[0].mxu1 %vm759_vm3, %v15562_v24 }
 0x1a5   : > { %2602 = vmatprep.mubr.bf16.mxu1 %v20712_v14  ;;  %2683 = vmatpush1.bf16.msra.mxu1 %v2494_v7 }
 0x1a6   : > { %2923 = vmatprep.subr.bf16.mxu1 %v2848_v8 }
 0x1a8   : > { %13654 = vmatmul.mubr.msk.bf16.gmra.mrb[4].mxu0 %vm759_vm3, %v15563_v9 }
 0x1a9   : > { %2551 = vmatprep.mubr.bf16.mxu0 %v20712_v14 }
 0x1ab   : > { %v16379_v11 = vpop.f32.mrb[20].mxu0 }
 0x1ac   : > { %v16381_v12 = vpop.f32.mrb[21].mxu0  ;;  %13657 = vmatmul.mubr.msk.bf16.gmra.mrb[4].mxu1 %vm759_vm3, %v15563_v9 }
 0x1ad   : > { %v977_v17 = vpop.f32.mrb[22].mxu0  ;;  %2612 = vmatprep.mubr.bf16.mxu1 %v20712_v14 }
 0x1ae   : > { %v978_v18 = vpop.f32.mrb[23].mxu0  ;;  %v3180_v17 = vpop.permute.xlu1 %3179 }
 0x1af   : > { %v16388_v21 = vpop.f32.mrb[20].mxu1 }
 0x1b0   : > { %v16390_v25 = vpop.f32.mrb[21].mxu1  ;;  %13655 = vmatmul.mubr.msk.bf16.gmra.mrb[56].mxu0 %vm759_vm3, %v15564_v13 }
 0x1b1   : > { %v1038_v29 = vpop.f32.mrb[22].mxu1  ;;  %2653 = vmatprep.mubr.bf16.mxu0 %v20712_v14 }
 0x1b2   : > { %v1039_v30 = vpop.f32.mrb[23].mxu1  ;;  %v3208_v29 = vand.u32 %v3186_v22, %v16031_v34  ;;  %v16494_v31 = vpop.permute.xlu1 %3530 }
 0x1b4   : > { %13658 = vmatmul.mubr.msk.bf16.gmra.mrb[56].mxu1 %vm759_vm3, %v15564_v13 }
 0x1b5   : > { %2714 = vmatprep.mubr.bf16.mxu1 %v20712_v14 }
 0x1b8   : > { %13659 = vmatmul.mubr.msk.bf16.vlgmr.msra.gmra.mrb[12].mxu0 %vm759_vm3, %v15562_v24 }
 0x1b9   : > { %2663 = vmatprep.mubr.bf16.mxu0 %v20712_v14  ;;  %2863 = vmatpush1.bf16.msra.mxu0 %v2839_v36 }
 0x1ba   : > { %2984 = vmatprep.subr.bf16.mxu0 %v2854_v38 }
 0x1bc   : > { %13662 = vmatmul.mubr.msk.bf16.vlgmr.msra.gmra.mrb[12].mxu1 %vm759_vm3, %v15562_v24 }
 0x1bd   : > { %2724 = vmatprep.mubr.bf16.mxu1 %v20712_v14  ;;  %2924 = vmatpush1.bf16.msra.mxu1 %v2845_v40 }
 0x1be   : > { %3045 = vmatprep.subr.bf16.mxu1 %v2860_v41  ;;  %v3529_v41 = vpop.permute.xlu1 %3528 }
 0x1c0   : > { %13660 = vmatmul.mubr.msk.bf16.gmra.mrb[16].mxu0 %vm759_vm3, %v15563_v9 }
 0x1c1   : > { %2673 = vmatprep.mubr.bf16.mxu0 %v20712_v14 }
 0x1c3   : > { %v1141_v43 = vpop.f32.mrb[24].mxu0 }
 0x1c4   : > { %v16413_v44 = vadd.f32 %v1141_v43, %v16341_v61  ;;  %v1143_v45 = vpop.f32.mrb[25].mxu0  ;;  %13663 = vmatmul.mubr.msk.bf16.gmra.mrb[16].mxu1 %vm759_vm3, %v15563_v9  ;;  %v16439_v61 = vpop.permute.xlu0 %3173 }
 0x1c5   : > { %v16417_v46 = vadd.f32 %v1143_v45, %v16343_v62  ;;  %v1145_v47 = vpop.f32.mrb[26].mxu0  ;;  %2734 = vmatprep.mubr.bf16.mxu1 %v20712_v14  ;;  %v2851_v62 = vand.u32 %v2825_v56, %v16031_v34  ;;  %v3187_v1 = vsel %vm3183_vm9, %v3172_v60, %v16439_v61  ;;  %v3873_v60 = vld [vmem:[%s20799_s0 + $0x8] sm:$0xff] }
 0x1c6   : > { %v1146_v49 = vpop.f32.mrb[27].mxu0  ;;  %v3188_v47 = vsel %vm3183_vm9, %v16439_v61, %v3176_v27  ;;  %v3875_v61 = vld [vmem:[%s20799_s0 + $0x18] sm:$0xff]  ;;  %3884 = vperm.xlu1 %15506, %v3873_v60  }
 0x1c7   : > { %v1202_v51 = vpop.f32.mrb[24].mxu1  ;;  %3894 = vperm.xlu0 %15505, %v3875_v61  }
 0x1c8   : > { %v16423_v52 = vadd.f32 %v1202_v51, %v16347_v15  ;;  %v1204_v53 = vpop.f32.mrb[25].mxu1  ;;  %13661 = vmatmul.mubr.msk.bf16.gmra.mrb[60].mxu0 %vm759_vm3, %v15564_v13  ;;  %v3211_v15 = vand.u32 %v3187_v1, %v16031_v34  ;;  %v3178_v7 = vpop.permute.xlu0 %3177 }
 0x1c9   : > { %v16427_v54 = vadd.f32 %v1204_v53, %v16349_v10  ;;  %v1206_v55 = vpop.f32.mrb[26].mxu1  ;;  %2894 = vmatprep.mubr.bf16.mxu0 %v20712_v14  ;;  %v15566_v10 = vld [vmem:[%s20798_s1 + $0x80] sm:$0xff]   ;;  %v16529_v51 = vpop.permute.xlu1 %3536  ;;  %v3214_v53 = vand.u32 %v3188_v47, %v16031_v34 }
 0x1ca   : > { %v1207_v57 = vpop.f32.mrb[27].mxu1 }
 0x1cc   : > { %13664 = vmatmul.mubr.msk.bf16.gmra.mrb[60].mxu1 %vm759_vm3, %v15564_v13  ;;  %v3189_v13 = vsel %vm3183_vm9, %v3176_v27, %v3178_v7  ;;  %v3182_v18 = vpop.permute.xlu0 %3181 }
 0x1cd   : > { %2955 = vmatprep.mubr.bf16.mxu1 %v20712_v14  ;;  %v3191_v28 = vsel %vm3183_vm9, %v3180_v17, %v3182_v18 }
 0x1ce   : > { %v3223_v30 = vand.u32 %v3191_v28, %v16031_v34 }
 0x1d0   : > { %13673 = vmatmul.mubr.msk.bf16.vlgmr.msra.gmra.mrb[0].mxu0 %vm759_vm3, %v15565_v59  ;;  %v16508_v39 = vpop.permute.xlu0 %3532 }
 0x1d1   : > { %2985 = vmatpush1.bf16.msra.mxu0 %v2851_v62  ;;  %2904 = vmatprep.mubr.bf16.mxu0 %v20712_v14  ;;  %v3548_v49 = vsel %vm3546_vm10, %v16494_v31, %v16508_v39  ;;  %v3874_v62 = vld [vmem:[%s20799_s0 + $0x10] sm:$0xff] }
 0x1d2   : > { %3225 = vmatprep.subr.bf16.mxu0 %v3205_v0  ;;  %v3568_v55 = vand.u32 %v3548_v49, %v16031_v34  ;;  %3889 = vperm.xlu1 %15506, %v3874_v62   ;;  %v3876_v0 = vld [vmem:[%s20799_s0 + $0x20] sm:$0xff]  ;;  %s20832_s0 = sld [smem:[#allocation20_spill]] }
 0x1d4   : > { %13676 = vmatmul.mubr.msk.bf16.vlgmr.msra.gmra.mrb[0].mxu1 %vm759_vm3, %v15565_v59 }
 0x1d5   : > { %2965 = vmatprep.mubr.bf16.mxu1 %v20712_v14  ;;  %3046 = vmatpush1.bf16.msra.mxu1 %v2857_v2 }
 0x1d6   : > { %3286 = vmatprep.subr.bf16.mxu1 %v3211_v15  ;;  %v15570_v15 = vld [vmem:[%s20798_s1 + $0x9c] ss:$0 sps:$4 sm:$0xff]   ;;  %3899 = vperm.xlu1 %15506, %v3876_v0  }
 0x1d8   : > { %13674 = vmatmul.mubr.msk.bf16.gmra.mrb[4].mxu0 %vm759_vm3, %v15566_v10 }
 0x1d9   : > { %2914 = vmatprep.mubr.bf16.mxu0 %v20712_v14 }
 0x1db   : > { %v1263_v16 = vpop.f32.mrb[28].mxu0 }
 0x1dc   : > { %v16459_v19 = vadd.f32 %v1263_v16, %v16379_v11  ;;  %v1265_v20 = vpop.f32.mrb[29].mxu0  ;;  %13677 = vmatmul.mubr.msk.bf16.gmra.mrb[4].mxu1 %vm759_vm3, %v15566_v10 }
 0x1dd   : > { %v16466_v24 = vadd.f32 %v1265_v20, %v16381_v12  ;;  %v1267_v26 = vpop.f32.mrb[30].mxu0  ;;  %2975 = vmatprep.mubr.bf16.mxu1 %v20712_v14  ;;  %v3184_v12 = vsel %vm3183_vm9, %v3166_v50, %v16409_v42  ;;  %v16527_v50 = vld [vmem:[%s20798_s1 + $0x8c] sm:$0xff]  }
 0x1de   : > { %v1268_v3 = vpop.f32.mrb[31].mxu0 }
 0x1df   : > { %v1324_v4 = vpop.f32.mrb[28].mxu1 }
 0x1e0   : > { %v16470_v5 = vadd.f32 %v1324_v4, %v16388_v21  ;;  %v1326_v6 = vpop.f32.mrb[29].mxu1  ;;  %13675 = vmatmul.mubr.msk.bf16.gmra.mrb[64].mxu0 %vm759_vm3, %v15567_v23  ;;  %v3202_v21 = vand.u32 %v3184_v12, %v16031_v34  ;;  %v3541_v4 = vpop.permute.xlu1 %3540 }
 0x1e1   : > { %v16474_v8 = vadd.f32 %v1326_v6, %v16390_v25  ;;  %v1328_v9 = vpop.f32.mrb[30].mxu1  ;;  %3016 = vmatprep.mubr.bf16.mxu0 %v20712_v14  ;;  %v3217_v25 = vand.u32 %v3189_v13, %v16031_v34 }
 0x1e2   : > { %v1329_v11 = vpop.f32.mrb[31].mxu1 }
 0x1e4   : > { %13678 = vmatmul.mubr.msk.bf16.gmra.mrb[64].mxu1 %vm759_vm3, %v15567_v23 }
 0x1e5   : > { %3077 = vmatprep.mubr.bf16.mxu1 %v20712_v14 }
 0x1e8   : > { %13679 = vmatmul.mubr.msk.bf16.vlgmr.msra.gmra.mrb[12].mxu0 %vm759_vm3, %v15565_v59 }
 0x1e9   : > { %3026 = vmatprep.mubr.bf16.mxu0 %v20712_v14  ;;  %3226 = vmatpush1.bf16.msra.mxu0 %v3202_v21 }
 0x1ea   : > { %3347 = vmatprep.subr.bf16.mxu0 %v3217_v25 }
 0x1ec   : > { %13682 = vmatmul.mubr.msk.bf16.vlgmr.msra.gmra.mrb[12].mxu1 %vm759_vm3, %v15565_v59  ;;  %v15569_v59 = vld [vmem:[%s20798_s1 + $0x94] sm:$0xff]  }
 0x1ed   : > { %3087 = vmatprep.mubr.bf16.mxu1 %v20712_v14  ;;  %3287 = vmatpush1.bf16.msra.mxu1 %v3208_v29 }
 0x1ee   : > { %3408 = vmatprep.subr.bf16.mxu1 %v3223_v30 }
 0x1f0   : > { %13680 = vmatmul.mubr.msk.bf16.gmra.mrb[16].mxu0 %vm759_vm3, %v15566_v10 }
 0x1f1   : > { %3036 = vmatprep.mubr.bf16.mxu0 %v20712_v14 }
 0x1f3   : > { %v1464_v33 = vpop.f32.mrb[32].mxu0 }
 0x1f4   : > { %v16501_v35 = vadd.f32 %v1464_v33, %v16413_v44  ;;  %v1466_v36 = vpop.f32.mrb[33].mxu0  ;;  %13683 = vmatmul.mubr.msk.bf16.gmra.mrb[16].mxu1 %vm759_vm3, %v15566_v10 }
 0x1f5   : > { %v16505_v37 = vadd.f32 %v1466_v36, %v16417_v46  ;;  %v1468_v38 = vpop.f32.mrb[34].mxu0  ;;  %3097 = vmatprep.mubr.bf16.mxu1 %v20712_v14 }
 0x1f6   : > { %v1469_v40 = vpop.f32.mrb[35].mxu0 }
 0x1f7   : > { %v1525_v42 = vpop.f32.mrb[32].mxu1 }
 0x1f8   : > { %v16511_v43 = vadd.f32 %v1525_v42, %v16423_v52  ;;  %v1527_v45 = vpop.f32.mrb[33].mxu1  ;;  %13681 = vmatmul.mubr.msk.bf16.gmra.mrb[68].mxu0 %vm759_vm3, %v15567_v23  ;;  %v3535_v52 = vpop.permute.xlu0 %3534 }
 0x1f9   : > { %v16515_v44 = vadd.f32 %v1527_v45, %v16427_v54  ;;  %v1529_v46 = vpop.f32.mrb[34].mxu1  ;;  %3257 = vmatprep.mubr.bf16.mxu0 %v20712_v14  ;;  %v3190_v54 = vsel %vm3183_vm9, %v3178_v7, %v3180_v17  ;;  %v3550_v56 = vsel %vm3546_vm10, %v3535_v52, %v16529_v51  ;;  %v3547_v7 = vsel %vm3546_vm10, %v3529_v41, %v16494_v31  ;;  %v15572_v45 = vld [vmem:[%s20798_s1 + $0xa8] sm:$0xff]  }
 0x1fa   : > { %v1530_v48 = vpop.f32.mrb[35].mxu1  ;;  %v3220_v57 = vand.u32 %v3190_v54, %v16031_v34  ;;  %v3574_v58 = vand.u32 %v3550_v56, %v16031_v34  ;;  %v3565_v12 = vand.u32 %v3547_v7, %v16031_v34  ;;  %vm12839_vm9 = vcmask 261120  }
 0x1fc   : > { %13684 = vmatmul.mubr.msk.bf16.gmra.mrb[68].mxu1 %vm759_vm3, %v15567_v23  ;;  %v3539_v26 = vpop.permute.xlu0 %3538 }
 0x1fd   : > { %3318 = vmatprep.mubr.bf16.mxu1 %v20712_v14  ;;  %v3552_v9 = vsel %vm3546_vm10, %v3539_v26, %v3541_v4 }
 0x1fe   : > { %v3580_v13 = vand.u32 %v3552_v9, %v16031_v34 }
 0x200   : > { %13693 = vmatmul.mubr.msk.bf16.vlgmr.msra.gmra.mrb[0].mxu0 %vm759_vm3, %v16527_v50  ;;  %v3543_v11 = vpop.permute.xlu0 %3542 }
 0x201   : > { %3348 = vmatpush1.bf16.msra.mxu0 %v3214_v53  ;;  %3267 = vmatprep.mubr.bf16.mxu0 %v20712_v14  ;;  %v3553_v42 = vsel %vm3546_vm10, %v3541_v4, %v3543_v11 }
 0x202   : > { %3588 = vmatprep.subr.bf16.mxu0 %v3568_v55 }
 0x204   : > { %13696 = vmatmul.mubr.msk.bf16.vlgmr.msra.gmra.mrb[0].mxu1 %vm759_vm3, %v16527_v50 }
 0x205   : > { %3328 = vmatprep.mubr.bf16.mxu1 %v20712_v14  ;;  %3409 = vmatpush1.bf16.msra.mxu1 %v3220_v57 }
 0x206   : > { %3649 = vmatprep.subr.bf16.mxu1 %v3574_v58 }
 0x208   : > { %13694 = vmatmul.mubr.msk.bf16.gmra.mrb[4].mxu0 %vm759_vm3, %v15569_v59 }
 0x209   : > { %3277 = vmatprep.mubr.bf16.mxu0 %v20712_v14 }
 0x20b   : > { %v1586_v63 = vpop.f32.mrb[36].mxu0 }
 0x20c   : > { %v16563_v1 = vadd.f32 %v1586_v63, %v16459_v19  ;;  %v1588_v2 = vpop.f32.mrb[37].mxu0  ;;  %13697 = vmatmul.mubr.msk.bf16.gmra.mrb[4].mxu1 %vm759_vm3, %v15569_v59 }
 0x20d   : > { %v16570_v10 = vadd.f32 %v1588_v2, %v16466_v24  ;;  %v1590_v16 = vpop.f32.mrb[38].mxu0  ;;  %3338 = vmatprep.mubr.bf16.mxu1 %v20712_v14 }
 0x20e   : > { %v1591_v20 = vpop.f32.mrb[39].mxu0 }
 0x20f   : > { %v1647_v23 = vpop.f32.mrb[36].mxu1 }
 0x210   : > { %v16574_v19 = vadd.f32 %v1647_v23, %v16470_v5  ;;  %v1649_v3 = vpop.f32.mrb[37].mxu1  ;;  %13695 = vmatmul.mubr.msk.bf16.gmra.mrb[72].mxu0 %vm759_vm3, %v15570_v15  ;;  %v3545_v5 = vpop.permute.xlu1 %3544 }
 0x211   : > { %v16578_v27 = vadd.f32 %v1649_v3, %v16474_v8  ;;  %v1651_v6 = vpop.f32.mrb[38].mxu1  ;;  %3379 = vmatprep.mubr.bf16.mxu0 %v20712_v14  ;;  %v3549_v8 = vsel %vm3546_vm10, %v16508_v39, %v3535_v52  ;;  %v3554_v17 = vsel %vm3546_vm10, %v3543_v11, %v3545_v5 }
 0x212   : > { %v1652_v24 = vpop.f32.mrb[39].mxu1  ;;  %v3571_v18 = vand.u32 %v3549_v8, %v16031_v34  ;;  %v3586_v21 = vand.u32 %v3554_v17, %v16031_v34 }
 0x214   : > { %13698 = vmatmul.mubr.msk.bf16.gmra.mrb[72].mxu1 %vm759_vm3, %v15570_v15 }
 0x215   : > { %3440 = vmatprep.mubr.bf16.mxu1 %v20712_v14 }
 0x218   : > { %13699 = vmatmul.mubr.msk.bf16.vlgmr.msra.gmra.mrb[12].mxu0 %vm759_vm3, %v16527_v50 }
 0x219   : > { %3389 = vmatprep.mubr.bf16.mxu0 %v20712_v14  ;;  %3589 = vmatpush1.bf16.msra.mxu0 %v3565_v12 }
 0x21a   : > { %3710 = vmatprep.subr.bf16.mxu0 %v3580_v13 }
 0x21c   : > { %13702 = vmatmul.mubr.msk.bf16.vlgmr.msra.gmra.mrb[12].mxu1 %vm759_vm3, %v16527_v50 }
 0x21d   : > { %3450 = vmatprep.mubr.bf16.mxu1 %v20712_v14  ;;  %3650 = vmatpush1.bf16.msra.mxu1 %v3571_v18 }
 0x21e   : > { %3771 = vmatprep.subr.bf16.mxu1 %v3586_v21 }
 0x220   : > { %13700 = vmatmul.mubr.msk.bf16.gmra.mrb[16].mxu0 %vm759_vm3, %v15569_v59 }
 0x221   : > { %3399 = vmatprep.mubr.bf16.mxu0 %v20712_v14 }
 0x223   : > { %v1827_v22 = vpop.f32.mrb[40].mxu0 }
 0x224   : > { %v2049_v25 = vadd.f32 %v1827_v22, %v16501_v35  ;;  %v1829_v28 = vpop.f32.mrb[41].mxu0  ;;  %13703 = vmatmul.mubr.msk.bf16.gmra.mrb[16].mxu1 %vm759_vm3, %v15569_v59  ;;  %v3551_v35 = vsel %vm3546_vm10, %v16529_v51, %v3539_v26 }
 0x225   : > { %v2050_v29 = vadd.f32 %v1829_v28, %v16505_v37  ;;  %v1831_v30 = vpop.f32.mrb[42].mxu0  ;;  %3460 = vmatprep.mubr.bf16.mxu1 %v20712_v14  ;;  %v15571_v37 = vld [vmem:[%s20798_s1 + $0xa0] sm:$0xff]   ;;  %v3577_v41 = vand.u32 %v3551_v35, %v16031_v34 }
 0x226   : > { %v1832_v31 = vpop.f32.mrb[43].mxu0 }
 0x227   : > { %v1888_v32 = vpop.f32.mrb[40].mxu1 }
 0x228   : > { %v2051_v33 = vadd.f32 %v1888_v32, %v16511_v43  ;;  %v1890_v36 = vpop.f32.mrb[41].mxu1  ;;  %13701 = vmatmul.mubr.msk.bf16.gmra.mrb[76].mxu0 %vm759_vm3, %v15570_v15  ;;  %v3583_v43 = vand.u32 %v3553_v42, %v16031_v34  ;;  %v15573_v34 = vld [vmem:[%s20798_s1 + $0xb0] ss:$0 sps:$4 sm:$0xff]   ;;  %s20833_s1 = smov 124  }
 0x229   : > { %v2052_v38 = vadd.f32 %v1890_v36, %v16515_v44  ;;  %v1892_v39 = vpop.f32.mrb[42].mxu1  ;;  %3620 = vmatprep.mubr.bf16.mxu0 %v20712_v14 }
 0x22a   : > { %v1893_v40 = vpop.f32.mrb[43].mxu1 }
 0x22c   : > { %13704 = vmatmul.mubr.msk.bf16.gmra.mrb[76].mxu1 %vm759_vm3, %v15570_v15 }
 0x22d   : > { %3681 = vmatprep.mubr.bf16.mxu1 %v20712_v14 }
 0x230   : > { %13713 = vmatmul.mubr.msk.bf16.vlgmr.msra.gmra.mrb[0].mxu0 %vm759_vm3, %v15571_v37 }
 0x231   : > { %3711 = vmatpush1.bf16.msra.mxu0 %v3577_v41  ;;  %3630 = vmatprep.mubr.bf16.mxu0 %v20712_v14 }
 0x234   : > { %13716 = vmatmul.mubr.msk.bf16.vlgmr.msra.gmra.mrb[0].mxu1 %vm759_vm3, %v15571_v37 }
 0x235   : > { %3691 = vmatprep.mubr.bf16.mxu1 %v20712_v14  ;;  %3772 = vmatpush1.bf16.msra.mxu1 %v3583_v43 }
 0x238   : > { %13714 = vmatmul.mubr.msk.bf16.gmra.mrb[4].mxu0 %vm759_vm3, %v15572_v45 }
 0x239   : > { %3640 = vmatprep.mubr.bf16.mxu0 %v20712_v14 }
 0x23b   : > { %v1949_v44 = vpop.f32.mrb[44].mxu0 }
 0x23c   : > { %v2053_v46 = vadd.f32 %v1949_v44, %v16563_v1  ;;  %v1951_v47 = vpop.f32.mrb[45].mxu0  ;;  %13717 = vmatmul.mubr.msk.bf16.gmra.mrb[4].mxu1 %vm759_vm3, %v15572_v45 }
 0x23d   : > { %v2054_v48 = vadd.f32 %v1951_v47, %v16570_v10  ;;  %v1953_v49 = vpop.f32.mrb[46].mxu0  ;;  %3701 = vmatprep.mubr.bf16.mxu1 %v20712_v14 }
 0x23e   : > { %v1954_v50 = vpop.f32.mrb[47].mxu0 }
 0x23f   : > { %v2010_v51 = vpop.f32.mrb[44].mxu1 }
 0x240   : > { %v2055_v52 = vadd.f32 %v2010_v51, %v16574_v19  ;;  %v2012_v53 = vpop.f32.mrb[45].mxu1  ;;  %13715 = vmatmul.mubr.msk.bf16.gmra.mrb[80].mxu0 %vm759_vm3, %v15573_v34 }
 0x241   : > { %v2056_v54 = vadd.f32 %v2012_v53, %v16578_v27  ;;  %v2014_v55 = vpop.f32.mrb[46].mxu1  ;;  %3742 = vmatprep.mubr.bf16.mxu0 %v20712_v14 }
 0x242   : > { %v2015_v56 = vpop.f32.mrb[47].mxu1 }
 0x244   : > { %13718 = vmatmul.mubr.msk.bf16.gmra.mrb[80].mxu1 %vm759_vm3, %v15573_v34 }
 0x245   : > { %3803 = vmatprep.mubr.bf16.mxu1 %v20712_v14 }
 0x248   : > { %13719 = vmatmul.mubr.msk.bf16.vlgmr.msra.gmra.mrb[12].mxu0 %vm759_vm3, %v15571_v37 }
 0x249   : > { %3752 = vmatprep.mubr.bf16.mxu0 %v20712_v14 }
 0x24c   : > { %13722 = vmatmul.mubr.msk.bf16.vlgmr.msra.gmra.mrb[12].mxu1 %vm759_vm3, %v15571_v37 }
 0x24d   : > { %3813 = vmatprep.mubr.bf16.mxu1 %v20712_v14 }
 0x250   : > { %13720 = vmatmul.mubr.msk.bf16.gmra.mrb[16].mxu0 %vm759_vm3, %v15572_v45 }
 0x251   : > { %3762 = vmatprep.mubr.bf16.mxu0 %v20712_v14 }
 0x253   : > { %v2190_v57 = vpop.f32.mrb[48].mxu0 }
 0x254   : > { %v2412_v58 = vadd.f32 %v2190_v57, %v2049_v25  ;;  %v2192_v59 = vpop.f32.mrb[49].mxu0  ;;  %13723 = vmatmul.mubr.msk.bf16.gmra.mrb[16].mxu1 %vm759_vm3, %v15572_v45 }
 0x255   : > { %v2413_v60 = vadd.f32 %v2192_v59, %v2050_v29  ;;  %v2194_v61 = vpop.f32.mrb[50].mxu0  ;;  %3823 = vmatprep.mubr.bf16.mxu1 %v20712_v14 }
 0x256   : > { %v2195_v62 = vpop.f32.mrb[51].mxu0 }
 0x257   : > { %v2251_v63 = vpop.f32.mrb[48].mxu1 }
 0x258   : > { %v2414_v0 = vadd.f32 %v2251_v63, %v2051_v33  ;;  %v2253_v1 = vpop.f32.mrb[49].mxu1  ;;  %13721 = vmatmul.mubr.msk.bf16.gmra.mrb[84].mxu0 %vm759_vm3, %v15573_v34 }
 0x259   : > { %v2415_v2 = vadd.f32 %v2253_v1, %v2052_v38  ;;  %v2255_v15 = vpop.f32.mrb[50].mxu1  ;;  %4705 = vmatprep.mubr.bf16.mxu0 %v20712_v14 }
 0x25a   : > { %v2256_v10 = vpop.f32.mrb[51].mxu1 }
 0x25c   : > { %13724 = vmatmul.mubr.msk.bf16.gmra.mrb[84].mxu1 %vm759_vm3, %v15573_v34  ;;  %vm7440_vm3 = vcmask 31744  }
 0x25d   : > { %4756 = vmatprep.mubr.bf16.mxu1 %v20712_v14 }
 0x26b   : > { %v2312_v16 = vpop.f32.mrb[52].mxu0 }
 0x26c   : > { %v2416_v20 = vadd.f32 %v2312_v16, %v2053_v46  ;;  %v2314_v23 = vpop.f32.mrb[53].mxu0 }
 0x26d   : > { %v2417_v26 = vadd.f32 %v2314_v23, %v2054_v48  ;;  %v2316_v19 = vpop.f32.mrb[54].mxu0 }
 0x26e   : > { %v2317_v3 = vpop.f32.mrb[55].mxu0 }
 0x26f   : > { %v2373_v4 = vpop.f32.mrb[52].mxu1 }
 0x270   : > { %v2418_v27 = vadd.f32 %v2373_v4, %v2055_v52  ;;  %v2375_v6 = vpop.f32.mrb[53].mxu1 }
 0x271   : > { %v2419_v24 = vadd.f32 %v2375_v6, %v2056_v54  ;;  %v2377_v7 = vpop.f32.mrb[54].mxu1 }
 0x272   : > { %v2378_v9 = vpop.f32.mrb[55].mxu1 }
 0x283   : > { %v2553_v5 = vpop.f32.mrb[56].mxu0 }
 0x284   : > { %v2775_v11 = vadd.f32 %v2553_v5, %v2412_v58  ;;  %v2555_v12 = vpop.f32.mrb[57].mxu0 }
 0x285   : > { %v2776_v8 = vadd.f32 %v2555_v12, %v2413_v60  ;;  %v2557_v13 = vpop.f32.mrb[58].mxu0 }
 0x286   : > { %v2558_v17 = vpop.f32.mrb[59].mxu0 }
 0x287   : > { %v2614_v18 = vpop.f32.mrb[56].mxu1 }
 0x288   : > { %v2777_v21 = vadd.f32 %v2614_v18, %v2414_v0  ;;  %v2616_v22 = vpop.f32.mrb[57].mxu1 }
 0x289   : > { %v2778_v25 = vadd.f32 %v2616_v22, %v2415_v2  ;;  %v2618_v28 = vpop.f32.mrb[58].mxu1 }
 0x28a   : > { %v2619_v29 = vpop.f32.mrb[59].mxu1 }
 0x29b   : > { %v2675_v30 = vpop.f32.mrb[60].mxu0 }
 0x29c   : > { %v2779_v31 = vadd.f32 %v2675_v30, %v2416_v20  ;;  %v2677_v32 = vpop.f32.mrb[61].mxu0 }
 0x29d   : > { %v2780_v33 = vadd.f32 %v2677_v32, %v2417_v26  ;;  %v2679_v36 = vpop.f32.mrb[62].mxu0 }
 0x29e   : > { %v2680_v38 = vpop.f32.mrb[63].mxu0 }
 0x29f   : > { %v2736_v39 = vpop.f32.mrb[60].mxu1 }
 0x2a0   : > { %v2781_v35 = vadd.f32 %v2736_v39, %v2418_v27  ;;  %v2738_v40 = vpop.f32.mrb[61].mxu1 }
 0x2a1   : > { %v2782_v37 = vadd.f32 %v2738_v40, %v2419_v24  ;;  %v2740_v41 = vpop.f32.mrb[62].mxu1 }
 0x2a2   : > { %v2741_v42 = vpop.f32.mrb[63].mxu1 }
 0x2b3   : > { %v2916_v43 = vpop.f32.mrb[64].mxu0 }
 0x2b4   : > { %v3138_v45 = vadd.f32 %v2916_v43, %v2775_v11  ;;  %v2918_v44 = vpop.f32.mrb[65].mxu0 }
 0x2b5   : > { %v3139_v46 = vadd.f32 %v2918_v44, %v2776_v8  ;;  %v2920_v47 = vpop.f32.mrb[66].mxu0 }
 0x2b6   : > { %v2921_v34 = vpop.f32.mrb[67].mxu0 }
 0x2b7   : > { %v2977_v48 = vpop.f32.mrb[64].mxu1 }
 0x2b8   : > { %v3140_v49 = vadd.f32 %v2977_v48, %v2777_v21  ;;  %v2979_v50 = vpop.f32.mrb[65].mxu1 }
 0x2b9   : > { %v3141_v51 = vadd.f32 %v2979_v50, %v2778_v25  ;;  %v2981_v52 = vpop.f32.mrb[66].mxu1  ;;  %v16669_v25 = vpop.permute.xlu0 %3879 }
 0x2ba   : > { %v2982_v53 = vpop.f32.mrb[67].mxu1 }
 0x2cb   : > { %v3038_v54 = vpop.f32.mrb[68].mxu0 }
 0x2cc   : > { %v3142_v55 = vadd.f32 %v3038_v54, %v2779_v31  ;;  %v3040_v56 = vpop.f32.mrb[69].mxu0  ;;  %v16674_v31 = vpop.permute.xlu1 %3884 }
 0x2cd   : > { %v3143_v57 = vadd.f32 %v3040_v56, %v2780_v33  ;;  %v3042_v58 = vpop.f32.mrb[70].mxu0 }
 0x2ce   : > { %v3043_v59 = vpop.f32.mrb[71].mxu0 }
 0x2cf   : > { %v3099_v60 = vpop.f32.mrb[68].mxu1 }
 0x2d0   : > { %v3144_v61 = vadd.f32 %v3099_v60, %v2781_v35  ;;  %v3101_v62 = vpop.f32.mrb[69].mxu1 }
 0x2d1   : > { %v3145_v63 = vadd.f32 %v3101_v62, %v2782_v37  ;;  %v3103_v0 = vpop.f32.mrb[70].mxu1 }
 0x2d2   : > { %v3104_v1 = vpop.f32.mrb[71].mxu1 }
 0x2e3   : > { %v3279_v2 = vpop.f32.mrb[72].mxu0 }
 0x2e4   : > { %v16653_v15 = vadd.f32 %v3279_v2, %v3138_v45  ;;  %v3281_v10 = vpop.f32.mrb[73].mxu0 }
 0x2e5   : > { %v16655_v16 = vadd.f32 %v3281_v10, %v3139_v46  ;;  %v3283_v20 = vpop.f32.mrb[74].mxu0  ;;  %v16694_v46 = vpop.permute.xlu1 %3889 }
 0x2e6   : > { %v3284_v23 = vpop.f32.mrb[75].mxu0 }
 0x2e7   : > { %v3340_v26 = vpop.f32.mrb[72].mxu1 }
 0x2e8   : > { %v16657_v19 = vadd.f32 %v3340_v26, %v3140_v49  ;;  %v3342_v3 = vpop.f32.mrb[73].mxu1 }
 0x2e9   : > { %v16659_v4 = vadd.f32 %v3342_v3, %v3141_v51  ;;  %v3344_v27 = vpop.f32.mrb[74].mxu1 }
 0x2ea   : > { %v3345_v6 = vpop.f32.mrb[75].mxu1 }
 0x2fb   : > { %v3401_v24 = vpop.f32.mrb[76].mxu0 }
 0x2fc   : > { %v16661_v7 = vadd.f32 %v3401_v24, %v3142_v55  ;;  %v3403_v9 = vpop.f32.mrb[77].mxu0 }
 0x2fd   : > { %v16663_v5 = vadd.f32 %v3403_v9, %v3143_v57  ;;  %v3405_v11 = vpop.f32.mrb[78].mxu0 }
 0x2fe   : > { %v3406_v12 = vpop.f32.mrb[79].mxu0 }
 0x2ff   : > { %v3462_v8 = vpop.f32.mrb[76].mxu1 }
 0x300   : > { %v16665_v13 = vadd.f32 %v3462_v8, %v3144_v61  ;;  %v3464_v17 = vpop.f32.mrb[77].mxu1  ;;  %v16752_v8 = vpop.permute.xlu0 %3894 }
 0x301   : > { %v16667_v18 = vadd.f32 %v3464_v17, %v3145_v63  ;;  %v3466_v21 = vpop.f32.mrb[78].mxu1 }
 0x302   : > { %v3467_v22 = vpop.f32.mrb[79].mxu1 }
 0x303   : > { %v3622_v28 = vpop.f32.mrb[0].mxu0 }
 0x304   : > { %v16672_v29 = vadd.f32 %v16669_v25, %v3622_v28  ;;  %v3624_v30 = vpop.f32.mrb[1].mxu0 }
 0x305   : > { %v3626_v32 = vpop.f32.mrb[2].mxu0  ;;  %v16678_v36 = vadd.f32 %v16669_v25, %v3624_v30 }
 0x306   : > { %v3942_v33 = vmax.f32 %v16672_v29, 0.0  ;;  %v3628_v38 = vpop.f32.mrb[3].mxu0  ;;  %v16688_v42 = vadd.f32 %v16674_v31, %v3626_v32 }
 0x307   : > { %v3683_v39 = vpop.f32.mrb[0].mxu1  ;;  %v3943_v41 = vmax.f32 %v16678_v36, 0.0  ;;  %v16704_v49 = vadd.f32 %v16674_v31, %v3628_v38 }
 0x308   : > { %v16681_v35 = vadd.f32 %v16669_v25, %v3683_v39  ;;  %v3685_v40 = vpop.f32.mrb[1].mxu1  ;;  %4102 = vrot.lane.b32.xlu0 %v3942_v33, %s20800_s26  ;;  %v20722_v52 = vmax.f32 %v16688_v42, 0.0 }
 0x309   : > { %v3687_v37 = vpop.f32.mrb[2].mxu1  ;;  %v16692_v45 = vadd.f32 %v16669_v25, %v3685_v40  ;;  %v20725_v63 = vmax.f32 %v16704_v49, 0.0 }
 0x30a   : > { %v3944_v43 = vmax.f32 %v16681_v35, 0.0  ;;  %v3689_v44 = vpop.f32.mrb[3].mxu1  ;;  %v16710_v54 = vadd.f32 %v16674_v31, %v3687_v37 }
 0x30b   : > { %v3632_v47 = vpop.f32.mrb[4].mxu0  ;;  %v20716_v53 = vmax.f32 %v16692_v45, 0.0  ;;  %v16729_v1 = vadd.f32 %v16674_v31, %v3689_v44  ;;  %v16782_v44 = vpop.permute.xlu1 %3899 }
 0x30c   : > { %v3918_v34 = vadd.f32 %v16694_v46, %v3632_v47  ;;  %v3634_v48 = vpop.f32.mrb[5].mxu0  ;;  %4106 = vrot.lane.b32.xlu1 %v3944_v43, %s20800_s26  ;;  %4104 = vrot.lane.b32.xlu0 %v3943_v41, %s20800_s26  ;;  %v20724_v0 = vmax.f32 %v16710_v54, 0.0 }
 0x30d   : > { %v3919_v50 = vadd.f32 %v16694_v46, %v3634_v48  ;;  %v3636_v51 = vpop.f32.mrb[6].mxu0  ;;  %v20714_v24 = vmax.f32 %v16729_v1, 0.0 }
 0x30e   : > { %v16712_v55 = vmax.f32 %v3918_v34, 0.0  ;;  %v3638_v56 = vpop.f32.mrb[7].mxu0  ;;  %v16756_v21 = vadd.f32 %v16752_v8, %v3636_v51 }
 0x30f   : > { %v16714_v57 = vmax.f32 %v3919_v50, 0.0  ;;  %v3693_v58 = vpop.f32.mrb[4].mxu1 }
 0x310   : > { %3998 = vst [vmem:[#allocation3 + $0x90] sm:$0xff] %v16712_v55  ;;  %v3920_v59 = vadd.f32 %v16694_v46, %v3693_v58  ;;  %v3695_v60 = vpop.f32.mrb[5].mxu1  ;;  %4108 = vrot.lane.b32.xlu0 %v20716_v53, %s20800_s26  ;;  %4118 = vrot.lane.b32.xlu1 %v20722_v52, %s20800_s26  ;;  %v20718_v32 = vmax.f32 %v16756_v21, 0.0 }
 0x311   : > { %3999 = vst [vmem:[#allocation3 + $0x98] sm:$0xff] %v16714_v57  ;;  %v3921_v61 = vadd.f32 %v16694_v46, %v3695_v60  ;;  %v3697_v62 = vpop.f32.mrb[6].mxu1 }
 0x312   : > { %v16731_v2 = vmax.f32 %v3920_v59, 0.0  ;;  %v3699_v10 = vpop.f32.mrb[7].mxu1  ;;  %v16773_v38 = vadd.f32 %v16752_v8, %v3697_v62 }
 0x313   : > { %v16733_v20 = vmax.f32 %v3921_v61, 0.0  ;;  %v3642_v23 = vpop.f32.mrb[80].mxu0  ;;  %v16785_v47 = vadd.f32 %v16752_v8, %v3699_v10 }
 0x314   : > { %4000 = vst [vmem:[#allocation3 + $0xa0] sm:$0xff] %v16731_v2  ;;  %v3864_v26 = vadd.f32 %v3642_v23, %v16653_v15  ;;  %v3644_v3 = vpop.f32.mrb[81].mxu0  ;;  %4122 = vrot.lane.b32.xlu0 %v20724_v0, %s20800_s26  ;;  %4120 = vrot.lane.b32.xlu1 %v20725_v63, %s20800_s26  ;;  %v20719_v51 = vmax.f32 %v16773_v38, 0.0 }
 0x315   : > { %4001 = vst [vmem:[#allocation3 + $0xa8] sm:$0xff] %v16733_v20  ;;  %v3865_v27 = vadd.f32 %v3644_v3, %v16655_v16  ;;  %v3646_v6 = vpop.f32.mrb[82].mxu0  ;;  %v20715_v23 = vmax.f32 %v16785_v47, 0.0 }
 0x316   : > { %v3647_v9 = vpop.f32.mrb[83].mxu0 }
 0x317   : > { %v3703_v11 = vpop.f32.mrb[80].mxu1 }
 0x318   : > { %v3866_v15 = vadd.f32 %v3703_v11, %v16657_v19  ;;  %v3705_v12 = vpop.f32.mrb[81].mxu1  ;;  %4124 = vrot.lane.b32.xlu1 %v20714_v24, %s20800_s26  ;;  %4134 = vrot.lane.b32.xlu0 %v16712_v55, %s20800_s26 }
 0x319   : > { %v3867_v17 = vadd.f32 %v3705_v12, %v16659_v4  ;;  %v3707_v16 = vpop.f32.mrb[82].mxu1  ;;  %v16770_v4 = vadd.f32 %v16752_v8, %v3638_v56  ;;  %v16795_v56 = vadd.f32 %v16782_v44, %v3864_v26  ;;  %v16810_v26 = vadd.f32 %v16782_v44, %v3865_v27 }
 0x31a   : > { %v3708_v22 = vpop.f32.mrb[83].mxu1  ;;  %v16816_v12 = vadd.f32 %v16782_v44, %v3866_v15 }
 0x31b   : > { %v16758_v28 = vpop.f32.mrb[12].mxu0  ;;  %v20720_v50 = vmax.f32 %v16770_v4, 0.0  ;;  %v20717_v11 = vmax.f32 %v16795_v56, 0.0 }
 0x31c   : > { %v16760_v19 = vpop.f32.mrb[13].mxu0  ;;  %4138 = vrot.lane.b32.xlu1 %v16731_v2, %s20800_s26  ;;  %4136 = vrot.lane.b32.xlu0 %v16714_v57, %s20800_s26  ;;  %v20723_v24 = vmax.f32 %v16816_v12, 0.0 }
 0x31d   : > { %v16766_v30 = vpop.f32.mrb[14].mxu0 }
 0x31e   : > { %v16775_v39 = vpop.f32.mrb[15].mxu0 }
 0x31f   : > { %v3805_v40 = vpop.f32.mrb[12].mxu1 }
 0x320   : > { %v3807_v37 = vpop.f32.mrb[13].mxu1  ;;  %4140 = vrot.lane.b32.xlu0 %v16733_v20, %s20800_s26  ;;  %4150 = vrot.lane.b32.xlu1 %v20718_v32, %s20800_s26 }
 0x321   : > { %v16788_v34 = vadd.f32 %v16669_v25, %v3807_v37  ;;  %v16790_v48 = vpop.f32.mrb[14].mxu1 }
 0x322   : > { %v3811_v58 = vpop.f32.mrb[15].mxu1 }
 0x323   : > { %v20736_v59 = vmax.f32 %v16788_v34, 0.0  ;;  %v16799_v60 = vadd.f32 %v16674_v31, %v3811_v58  ;;  %v3754_v61 = vpop.f32.mrb[16].mxu0 }
 0x324   : > { %v3922_v62 = vadd.f32 %v16694_v46, %v3754_v61  ;;  %v3756_v10 = vpop.f32.mrb[17].mxu0  ;;  %4154 = vrot.lane.b32.xlu0 %v20719_v51, %s20800_s26  ;;  %4152 = vrot.lane.b32.xlu1 %v20720_v50, %s20800_s26 }
 0x325   : > { %v20735_v3 = vmax.f32 %v16799_v60, 0.0  ;;  %v3923_v6 = vadd.f32 %v16694_v46, %v3756_v10  ;;  %v3758_v9 = vpop.f32.mrb[18].mxu0 }
 0x326   : > { %v16818_v16 = vmax.f32 %v3922_v62, 0.0  ;;  %v16821_v22 = vadd.f32 %v16752_v8, %v3758_v9  ;;  %v3760_v37 = vpop.f32.mrb[19].mxu0  ;;  %v20721_v62 = vmax.f32 %v16810_v26, 0.0 }
 0x327   : > { %v16823_v58 = vmax.f32 %v3923_v6, 0.0  ;;  %v16826_v27 = vadd.f32 %v16752_v8, %v3760_v37  ;;  %v3815_v61 = vpop.f32.mrb[16].mxu1  ;;  %v16839_v6 = vadd.f32 %v16782_v44, %v3867_v17 }
 0x328   : > { %4002 = vst [vmem:[#allocation3 + $0xb0] sm:$0xff] %v16818_v16  ;;  %v3970_v10 = vmax.f32 %v16821_v22, 0.0  ;;  %v3924_v14 = vadd.f32 %v16694_v46, %v3815_v61  ;;  %v3817_v15 = vpop.f32.mrb[17].mxu1  ;;  %4156 = vrot.lane.b32.xlu1 %v20715_v23, %s20800_s26  ;;  %4166 = vrot.lane.b32.xlu0 %v20717_v11, %s20800_s26  ;;  %v16848_v23 = vadd.f32 %v16669_v25, %v3805_v40 }
 0x329   : > { %4003 = vst [vmem:[#allocation3 + $0xb8] sm:$0xff] %v16823_v58  ;;  %v20734_v9 = vmax.f32 %v16826_v27, 0.0  ;;  %v16844_v37 = vadd.f32 %v16694_v46, %v3817_v15  ;;  %v3819_v61 = vpop.f32.mrb[18].mxu1 }
 0x32a   : > { %v16850_v53 = vmax.f32 %v3924_v14, 0.0  ;;  %v16853_v11 = vadd.f32 %v16752_v8, %v3819_v61  ;;  %v3821_v17 = vpop.f32.mrb[19].mxu1  ;;  %v16870_v14 = vadd.f32 %v16669_v25, %v16758_v28 }
 0x32b   : > { %v20730_v32 = vmax.f32 %v16844_v37, 0.0  ;;  %v16857_v51 = vadd.f32 %v16752_v8, %v3821_v17  ;;  %v3764_v50 = vpop.f32.mrb[84].mxu0 }
 0x32c   : > { %4004 = vst [vmem:[#allocation3 + $0xc0] sm:$0xff] %v16850_v53  ;;  %v20733_v46 = vmax.f32 %v16853_v11, 0.0  ;;  %v3868_v15 = vadd.f32 %v3764_v50, %v16661_v7  ;;  %v3766_v40 = vpop.f32.mrb[85].mxu0  ;;  %4168 = vrot.lane.b32.xlu1 %v20721_v62, %s20800_s26  ;;  %4170 = vrot.lane.b32.xlu0 %v20723_v24, %s20800_s26  ;;  %v20726_v7 = vmax.f32 %v16839_v6, 0.0  ;;  %v16877_v50 = vadd.f32 %v16669_v25, %v16760_v19 }
 0x32d   : > { %v20729_v8 = vmax.f32 %v16857_v51, 0.0  ;;  %v3869_v61 = vadd.f32 %v3766_v40, %v16663_v5  ;;  %v3768_v17 = vpop.f32.mrb[86].mxu0  ;;  %v20727_v62 = vmax.f32 %v16848_v23, 0.0 }
 0x32e   : > { %v16881_v52 = vadd.f32 %v16782_v44, %v3868_v15  ;;  %v3769_v24 = vpop.f32.mrb[87].mxu0  ;;  %v3946_v15 = vmax.f32 %v16870_v14, 0.0  ;;  %v20812_v14 = vmax.f32 %v16848_v23, 0.0 }
 0x32f   : > { %v16884_v28 = vadd.f32 %v16782_v44, %v3869_v61  ;;  %v3825_v0 = vpop.f32.mrb[84].mxu1  ;;  %v3947_v61 = vmax.f32 %v16877_v50, 0.0  ;;  %v20813_v50 = vmax.f32 %v16729_v1, 0.0 }
 0x330   : > { %v3978_v63 = vmax.f32 %v16881_v52, 0.0  ;;  %v3870_v5 = vadd.f32 %v3825_v0, %v16665_v13  ;;  %v3827_v40 = vpop.f32.mrb[85].mxu1  ;;  %4172 = vrot.lane.b32.xlu1 %v20726_v7, %s20800_s26  ;;  %4114 = vrot.lane.b32.xlu0 %v20727_v62, %s20800_s26  ;;  %v16900_v13 = vadd.f32 %v16674_v31, %v16766_v30  ;;  %v20817_v52 = vmax.f32 %v16788_v34, 0.0 }
 0x331   : > { %v20728_v25 = vmax.f32 %v16884_v28, 0.0  ;;  %v3871_v24 = vadd.f32 %v3827_v40, %v16667_v18  ;;  %v3829_v19 = vpop.f32.mrb[86].mxu1 }
 0x332   : > { %v16903_v0 = vadd.f32 %v16782_v44, %v3870_v5  ;;  %v3830_v17 = vpop.f32.mrb[87].mxu1  ;;  %v3954_v30 = vmax.f32 %v16900_v13, 0.0  ;;  %v16919_v5 = vadd.f32 %v16674_v31, %v16775_v39 }
 0x333   : > { %v16906_v7 = vadd.f32 %v16782_v44, %v3871_v24  ;;  %v16923_v44 = vadd.f32 %v16674_v31, %v16790_v48 }
 0x334   : > { %v20732_v62 = vmax.f32 %v16903_v0, 0.0  ;;  %4110 = vrot.lane.b32.xlu1 %v3946_v15, %s20800_s26  ;;  %4112 = vrot.lane.b32.xlu0 %v3947_v61, %s20800_s26  ;;  %v3955_v40 = vmax.f32 %v16919_v5, 0.0 }
 0x335   : > { %v20731_v18 = vmax.f32 %v16906_v7, 0.0  ;;  %v20737_v24 = vmax.f32 %v16923_v44, 0.0 }
 0x338   : > { %4116 = vrot.lane.b32.xlu1 %v20736_v59, %s20800_s26  ;;  %4126 = vrot.lane.b32.xlu0 %v3954_v30, %s20800_s26 }
 0x33c   : > { %4128 = vrot.lane.b32.xlu1 %v3955_v40, %s20800_s26  ;;  %4130 = vrot.lane.b32.xlu0 %v20737_v24, %s20800_s26  ;;  %v20808_v24 = vmax.f32 %v16795_v56, 0.0  ;;  %v20810_v56 = vmax.f32 %v16816_v12, 0.0 }
 0x340   : > { %4132 = vrot.lane.b32.xlu1 %v20735_v3, %s20800_s26  ;;  %4146 = vrot.lane.b32.xlu0 %v16850_v53, %s20800_s26 }
 0x344   : > { %4142 = vrot.lane.b32.xlu1 %v16818_v16, %s20800_s26  ;;  %4144 = vrot.lane.b32.xlu0 %v16823_v58, %s20800_s26 }
 0x348   : > { %4148 = vrot.lane.b32.xlu1 %v20730_v32, %s20800_s26  ;;  %4158 = vrot.lane.b32.xlu0 %v3970_v10, %s20800_s26 }
 0x34c   : > { %4160 = vrot.lane.b32.xlu1 %v20734_v9, %s20800_s26  ;;  %4162 = vrot.lane.b32.xlu0 %v20733_v46, %s20800_s26 }
 0x350   : > { %4176 = vrot.lane.b32.xlu1 %v20728_v25, %s20800_s26  ;;  %4174 = vrot.lane.b32.xlu0 %v3978_v63, %s20800_s26 }
 0x354   : > { %4164 = vrot.lane.b32.xlu1 %v20729_v8, %s20800_s26  ;;  %4178 = vrot.lane.b32.xlu0 %v20732_v62, %s20800_s26 }
 0x358   : > { %4180 = vrot.lane.b32.xlu1 %v20731_v18, %s20800_s26  ;;  %s20738_s26 = smov 124  }
 0x37a   : > { %v4103_v31 = vpop.permute.xlu0 %4102 }
 0x37e   : > { %v4107_v39 = vpop.permute.xlu1 %4106  ;;  %v4105_v48 = vpop.permute.xlu0 %4104 }
 0x37f   : > { %v4184_v19 = vsel %vm750_vm1, %v4105_v48, %v4107_v39  ;;  %v4183_v25 = vsel %vm750_vm1, %v4103_v31, %v4105_v48 }
 0x380   : > { %v16978_v17 = vmax.f32 %v3943_v41, %v4184_v19  ;;  %v16989_v62 = vmax.f32 %v3942_v33, %v4183_v25 }
 0x382   : > { %v16981_v8 = vpop.permute.xlu0 %4108  ;;  %v4119_v32 = vpop.permute.xlu1 %4118  ;;  %4340 = vrot.lane.b32.xlu0 %v16978_v17, %s20801_s30 }
 0x383   : > { %v4185_v18 = vsel %vm750_vm1, %v4107_v39, %v16981_v8  ;;  %v20802_v39 = vmax.f32 %v16704_v49, 0.0 }
 0x384   : > { %v16993_v36 = vmax.f32 %v3944_v43, %v4185_v18  ;;  %v20803_v43 = vmax.f32 %v16710_v54, 0.0 }
 0x386   : > { %v4123_v41 = vpop.permute.xlu0 %4122  ;;  %v4121_v19 = vpop.permute.xlu1 %4120  ;;  %4342 = vrot.lane.b32.xlu1 %v16993_v36, %s20801_s30  ;;  %4338 = vrot.lane.b32.xlu0 %v16989_v62, %s20801_s30 }
 0x387   : > { %v4191_v31 = vsel %vm750_vm1, %v4121_v19, %v4123_v41  ;;  %v4190_v18 = vsel %vm750_vm1, %v4119_v32, %v4121_v19 }
 0x388   : > { %v17002_v48 = vmax.f32 %v20802_v39, %v4191_v31  ;;  %v20804_v31 = vmax.f32 %v16688_v42, 0.0 }
 0x38a   : > { %v17004_v29 = vpop.permute.xlu1 %4124  ;;  %v4135_v33 = vpop.permute.xlu0 %4134  ;;  %4356 = vrot.lane.b32.xlu0 %v17002_v48, %s20801_s30  ;;  %v17020_v39 = vmax.f32 %v20804_v31, %v4190_v18 }
 0x38b   : > { %v4192_v35 = vsel %vm750_vm1, %v4123_v41, %v17004_v29 }
 0x38c   : > { %v17012_v25 = vmax.f32 %v20803_v43, %v4192_v35  ;;  %v20805_v43 = vmax.f32 %v16770_v4, 0.0 }
 0x38e   : > { %v4139_v46 = vpop.permute.xlu1 %4138  ;;  %v4137_v9 = vpop.permute.xlu0 %4136  ;;  %4358 = vrot.lane.b32.xlu1 %v17012_v25, %s20801_s30 }
 0x38f   : > { %v4198_v49 = vsel %vm750_vm1, %v4137_v9, %v4139_v46  ;;  %v4197_v54 = vsel %vm750_vm1, %v4135_v33, %v4137_v9 }
 0x390   : > { %v17023_v3 = vmax.f32 %v16714_v57, %v4198_v49  ;;  %v17035_v42 = vmax.f32 %v16712_v55, %v4197_v54  ;;  %v20806_v49 = vmax.f32 %v16773_v38, 0.0 }
 0x392   : > { %v17026_v41 = vpop.permute.xlu0 %4140  ;;  %v4151_v35 = vpop.permute.xlu1 %4150  ;;  %4354 = vrot.lane.b32.xlu1 %v17020_v39, %s20801_s30  ;;  %4372 = vrot.lane.b32.xlu0 %v17023_v3, %s20801_s30 }
 0x393   : > { %v4199_v32 = vsel %vm750_vm1, %v4139_v46, %v17026_v41 }
 0x394   : > { %v17038_v57 = vmax.f32 %v16731_v2, %v4199_v32 }
 0x396   : > { %v4155_v19 = vpop.permute.xlu0 %4154  ;;  %v4153_v9 = vpop.permute.xlu1 %4152  ;;  %4374 = vrot.lane.b32.xlu1 %v17038_v57, %s20801_s30  ;;  %4370 = vrot.lane.b32.xlu0 %v17035_v42, %s20801_s30 }
 0x397   : > { %v4205_v33 = vsel %vm750_vm1, %v4153_v9, %v4155_v19  ;;  %v4204_v54 = vsel %vm750_vm1, %v4151_v35, %v4153_v9 }
 0x398   : > { %v17047_v18 = vmax.f32 %v20805_v43, %v4205_v33  ;;  %v20807_v43 = vmax.f32 %v16756_v21, 0.0  ;;  %v20809_v21 = vmax.f32 %v16810_v26, 0.0  ;;  %v20811_v26 = vmax.f32 %v16692_v45, 0.0 }
 0x39a   : > { %v4157_v46 = vpop.permute.xlu1 %4156  ;;  %4388 = vrot.lane.b32.xlu0 %v17047_v18, %s20801_s30  ;;  %v4167_v55 = vpop.permute.xlu0 %4166  ;;  %v17062_v59 = vmax.f32 %v20807_v43, %v4204_v54 }
 0x39b   : > { %v4206_v2 = vsel %vm750_vm1, %v4155_v19, %v4157_v46 }
 0x39c   : > { %v17054_v31 = vmax.f32 %v20806_v49, %v4206_v2 }
 0x39e   : > { %4390 = vrot.lane.b32.xlu1 %v17054_v31, %s20801_s30  ;;  %v4169_v32 = vpop.permute.xlu1 %4168  ;;  %v4171_v4 = vpop.permute.xlu0 %4170 }
 0x39f   : > { %v4211_v33 = vsel %vm750_vm1, %v4167_v55, %v4169_v32  ;;  %v4212_v38 = vsel %vm750_vm1, %v4169_v32, %v4171_v4 }
 0x3a0   : > { %v17066_v19 = vmax.f32 %v20808_v24, %v4211_v33  ;;  %v17076_v2 = vmax.f32 %v20809_v21, %v4212_v38 }
 0x3a2   : > { %4386 = vrot.lane.b32.xlu1 %v17062_v59, %s20801_s30  ;;  %v4173_v35 = vpop.permute.xlu1 %4172  ;;  %4402 = vrot.lane.b32.xlu0 %v17066_v19, %s20801_s30  ;;  %v4115_v9 = vpop.permute.xlu0 %4114 }
 0x3a3   : > { %v4213_v55 = vsel %vm750_vm1, %v4171_v4, %v4173_v35 }
 0x3a4   : > { %v17080_v24 = vmax.f32 %v20810_v56, %v4213_v55 }
 0x3a6   : > { %v4111_v49 = vpop.permute.xlu1 %4110  ;;  %4406 = vrot.lane.b32.xlu0 %v17080_v24, %s20801_s30  ;;  %4404 = vrot.lane.b32.xlu1 %v17076_v2, %s20801_s30  ;;  %v4113_v54 = vpop.permute.xlu0 %4112 }
 0x3a7   : > { %v4186_v32 = vsel %vm750_vm1, %v16981_v8, %v4111_v49  ;;  %v4187_v4 = vsel %vm750_vm1, %v4111_v49, %v4113_v54  ;;  %v4188_v43 = vsel %vm750_vm1, %v4113_v54, %v4115_v9 }
 0x3a8   : > { %v17091_v33 = vmax.f32 %v20811_v26, %v4186_v32  ;;  %v17095_v12 = vmax.f32 %v3946_v15, %v4187_v4  ;;  %v17105_v45 = vmax.f32 %v3947_v61, %v4188_v43 }
 0x3aa   : > { %v4117_v38 = vpop.permute.xlu1 %4116  ;;  %4344 = vrot.lane.b32.xlu1 %v17091_v33, %s20801_s30  ;;  %4346 = vrot.lane.b32.xlu0 %v17095_v12, %s20801_s30  ;;  %v4127_v8 = vpop.permute.xlu0 %4126 }
 0x3ab   : > { %v4189_v55 = vsel %vm750_vm1, %v4115_v9, %v4117_v38  ;;  %v4193_v21 = vsel %vm750_vm1, %v17004_v29, %v4127_v8 }
 0x3ac   : > { %v17109_v15 = vmax.f32 %v20812_v14, %v4189_v55  ;;  %v17120_v61 = vmax.f32 %v20813_v50, %v4193_v21 }
 0x3ae   : > { %v4129_v56 = vpop.permute.xlu1 %4128  ;;  %4348 = vrot.lane.b32.xlu1 %v17105_v45, %s20801_s30  ;;  %4350 = vrot.lane.b32.xlu0 %v17109_v15, %s20801_s30  ;;  %v4131_v49 = vpop.permute.xlu0 %4130 }
 0x3af   : > { %v4194_v9 = vsel %vm750_vm1, %v4127_v8, %v4129_v56  ;;  %v4195_v22 = vsel %vm750_vm1, %v4129_v56, %v4131_v49  ;;  %v20818_v56 = vmax.f32 %v16799_v60, 0.0 }
 0x3b0   : > { %v17124_v23 = vmax.f32 %v3954_v30, %v4194_v9 }
 0x3b2   : > { %v4133_v54 = vpop.permute.xlu1 %4132  ;;  %4362 = vrot.lane.b32.xlu1 %v17124_v23, %s20801_s30  ;;  %4360 = vrot.lane.b32.xlu0 %v17120_v61, %s20801_s30  ;;  %v4147_v29 = vpop.permute.xlu0 %4146 }
 0x3b6   : > { %v4143_v32 = vpop.permute.xlu1 %4142  ;;  %v4145_v4 = vpop.permute.xlu0 %4144 }
 0x3b7   : > { %v4200_v26 = vsel %vm750_vm1, %v17026_v41, %v4143_v32  ;;  %v4201_v1 = vsel %vm750_vm1, %v4143_v32, %v4145_v4  ;;  %v20814_v41 = vmax.f32 %v16785_v47, 0.0  ;;  %v4202_v5 = vsel %vm750_vm1, %v4145_v4, %v4147_v29 }
 0x3b8   : > { %v17134_v43 = vmax.f32 %v16733_v20, %v4200_v26  ;;  %v17137_v13 = vmax.f32 %v16818_v16, %v4201_v1  ;;  %v20815_v26 = vmax.f32 %v16839_v6, 0.0  ;;  %v20816_v6 = vmax.f32 %v16923_v44, 0.0 }
 0x3b9   : > { %v17194_v44 = vmax.f32 %v16823_v58, %v4202_v5  ;;  %v20820_v58 = vmax.f32 %v16853_v11, 0.0 }
 0x3ba   : > { %v4149_v30 = vpop.permute.xlu1 %4148  ;;  %4376 = vrot.lane.b32.xlu1 %v17134_v43, %s20801_s30  ;;  %4378 = vrot.lane.b32.xlu0 %v17137_v13, %s20801_s30  ;;  %v4159_v8 = vpop.permute.xlu0 %4158 }
 0x3bb   : > { %v4207_v55 = vsel %vm750_vm1, %v4157_v46, %v4159_v8 }
 0x3bc   : > { %v17146_v14 = vmax.f32 %v20814_v41, %v4207_v55 }
 0x3be   : > { %v4161_v21 = vpop.permute.xlu1 %4160  ;;  %4392 = vrot.lane.b32.xlu0 %v17146_v14, %s20801_s30  ;;  %v4163_v20 = vpop.permute.xlu0 %4162 }
 0x3bf   : > { %v4208_v16 = vsel %vm750_vm1, %v4159_v8, %v4161_v21  ;;  %v4209_v34 = vsel %vm750_vm1, %v4161_v21, %v4163_v20  ;;  %v20821_v21 = vmax.f32 %v16844_v37, 0.0  ;;  %v20826_v37 = vmax.f32 %v16906_v7, 0.0 }
 0x3c0   : > { %v17153_v9 = vmax.f32 %v3970_v10, %v4208_v16  ;;  %v4196_v10 = vsel %vm750_vm1, %v4131_v49, %v4133_v54  ;;  %v4294_v49 = vmax.f32 %v20818_v56, %v4133_v54 }
 0x3c1   : > { %v17179_v55 = vmax.f32 %v20816_v6, %v4196_v10 }
 0x3c2   : > { %v4177_v50 = vpop.permute.xlu1 %4176  ;;  %4394 = vrot.lane.b32.xlu1 %v17153_v9, %s20801_s30  ;;  %v4175_v46 = vpop.permute.xlu0 %4174 }
 0x3c3   : > { %v4214_v47 = vsel %vm750_vm1, %v4173_v35, %v4175_v46  ;;  %v4215_v32 = vsel %vm750_vm1, %v4175_v46, %v4177_v50  ;;  %v17175_v35 = vmax.f32 %v3955_v40, %v4195_v22  ;;  %v4203_v40 = vsel %vm750_vm1, %v4147_v29, %v4149_v30 }
 0x3c4   : > { %v17161_v1 = vmax.f32 %v20815_v26, %v4214_v47  ;;  %v17165_v8 = vmax.f32 %v3978_v63, %v4215_v32  ;;  %v4293_v63 = vmax.f32 %v20817_v52, %v4117_v38  ;;  %v17197_v16 = vmax.f32 %v16850_v53, %v4203_v40 }
 0x3c5   : > { %v20819_v38 = vmax.f32 %v16826_v27, 0.0  ;;  %v20822_v46 = vmax.f32 %v16857_v51, 0.0  ;;  %v20823_v32 = vmax.f32 %v16884_v28, 0.0  ;;  %v20824_v22 = vmax.f32 %v16903_v0, 0.0  ;;  %v4618_v51 = vld [vmem:[%s20825_s28] sm:$0xff]  ;;  %v4619_v0 = vld [vmem:[%s20825_s28 + $0x8] sm:$0xff] }
 0x3c6   : > { %4410 = vrot.lane.b32.xlu0 %v17165_v8, %s20801_s30  ;;  %4408 = vrot.lane.b32.xlu1 %v17161_v1, %s20801_s30  ;;  %v4165_v41 = vpop.permute.xlu1 %4164  ;;  %v4179_v53 = vpop.permute.xlu0 %4178  ;;  %v4620_v28 = vld [vmem:[%s20825_s28 + $0x10] sm:$0xf]  ;;  %s20750_s28 = smov 4  }
 0x3c7   : > { %v4210_v60 = vsel %vm750_vm1, %v4163_v20, %v4165_v41  ;;  %v17207_v54 = vmax.f32 %v20819_v38, %v4209_v34  ;;  %v4295_v20 = vmax.f32 %v20821_v21, %v4149_v30  ;;  %v4296_v27 = vmax.f32 %v20822_v46, %v4165_v41 }
 0x3c8   : > { %v17211_v29 = vmax.f32 %v20820_v58, %v4210_v60  ;;  %v4216_v47 = vsel %vm750_vm1, %v4177_v50, %v4179_v53 }
 0x3c9   : > { %v17227_v26 = vmax.f32 %v20823_v32, %v4216_v47 }
 0x3ca   : > { %4366 = vrot.lane.b32.xlu0 %v17179_v55, %s20801_s30  ;;  %4364 = vrot.lane.b32.xlu1 %v17175_v35, %s20801_s30  ;;  %v4181_v4 = vpop.permute.xlu1 %4180 }
 0x3cb   : > { %v4217_v11 = vsel %vm750_vm1, %v4179_v53, %v4181_v4  ;;  %v4297_v30 = vmax.f32 %v20826_v37, %v4181_v4  ;;  %vm7119_vm1 = vcmask 48128  }
 0x3cc   : > { %v17231_v10 = vmax.f32 %v20824_v22, %v4217_v11 }
 0x3ce   : > { %4368 = vrot.lane.b32.xlu0 %v4294_v49, %s20801_s30  ;;  %4352 = vrot.lane.b32.xlu1 %v4293_v63, %s20801_s30 }
 0x3d2   : > { %4382 = vrot.lane.b32.xlu0 %v17197_v16, %s20801_s30  ;;  %4380 = vrot.lane.b32.xlu1 %v17194_v44, %s20801_s30 }
 0x3d6   : > { %4398 = vrot.lane.b32.xlu0 %v17211_v29, %s20801_s30  ;;  %4396 = vrot.lane.b32.xlu1 %v17207_v54, %s20801_s30 }
 0x3da   : > { %4400 = vrot.lane.b32.xlu0 %v4296_v27, %s20801_s30  ;;  %4384 = vrot.lane.b32.xlu1 %v4295_v20, %s20801_s30 }
 0x3de   : > { %4414 = vrot.lane.b32.xlu0 %v17231_v10, %s20801_s30  ;;  %4412 = vrot.lane.b32.xlu1 %v17227_v26, %s20801_s30 }
 0x3e2   : > { %4623 = vperm.xlu0 %15505, %v4618_v51   ;;  %4416 = vrot.lane.b32.xlu1 %v4297_v30, %s20801_s30  ;;  %s20830_s30 = smov 68  }
 0x3e6   : > { %4633 = vperm.xlu0 %15505, %v4620_v28   ;;  %4628 = vperm.xlu1 %15506, %v4619_v0  }
 0x3f4   : > { %v4341_v50 = vpop.permute.xlu0 %4340 }
 0x3f8   : > { %v4339_v6 = vpop.permute.xlu0 %4338  ;;  %v4343_v52 = vpop.permute.xlu1 %4342 }
 0x3f9   : > { %v4420_v63 = vsel %vm1731_vm5, %v4341_v50, %v4343_v52  ;;  %v4419_v41 = vsel %vm1731_vm5, %v4339_v6, %v4341_v50 }
 0x3fa   : > { %v4490_v5 = vmax.f32 %v16978_v17, %v4420_v63  ;;  %v4489_v53 = vmax.f32 %v16989_v62, %v4419_v41  ;;  %v17274_v41 = vld [vmem:[%s20827_s22] sm:$0xff]  }
 0x3fc   : > { %v4357_v7 = vpop.permute.xlu0 %4356 }
 0x400   : > { %v4359_v56 = vpop.permute.xlu1 %4358 }
 0x401   : > { %v4427_v49 = vsel %vm1731_vm5, %v4357_v7, %v4359_v56 }
 0x402   : > { %v4497_v40 = vmax.f32 %v17002_v48, %v4427_v49 }
 0x404   : > { %v4355_v34 = vpop.permute.xlu1 %4354  ;;  %v4373_v60 = vpop.permute.xlu0 %4372  ;;  %v4598_v38 = vpack.c.bf16 %v4497_v40, %v4490_v5 }
 0x405   : > { %v4426_v58 = vsel %vm1731_vm5, %v4355_v34, %v4357_v7 }
 0x406   : > { %v4496_v4 = vmax.f32 %v17020_v39, %v4426_v58  ;;  %4673 = vmatprep.subr.bf16.mxu0 %v4598_v38  ;;  %v20828_v38 = vmov 0  }
 0x408   : > { %v4597_v21 = vpack.c.bf16 %v4496_v4, %v4489_v53  ;;  %v4371_v20 = vpop.permute.xlu0 %4370  ;;  %v4375_v46 = vpop.permute.xlu1 %4374 }
 0x409   : > { %v4434_v17 = vsel %vm1731_vm5, %v4373_v60, %v4375_v46  ;;  %v4433_v22 = vsel %vm1731_vm5, %v4371_v20, %v4373_v60 }
 0x40a   : > { %4674 = vmatpush1.bf16.msra.mxu0 %v4597_v21  ;;  %v4504_v11 = vmax.f32 %v17023_v3, %v4434_v17  ;;  %v4503_v30 = vmax.f32 %v17035_v42, %v4433_v22 }
 0x40c   : > { %v4389_v27 = vpop.permute.xlu0 %4388 }
 0x410   : > { %v4391_v48 = vpop.permute.xlu1 %4390 }
 0x411   : > { %v4441_v47 = vsel %vm1731_vm5, %v4389_v27, %v4391_v48 }
 0x412   : > { %v4511_v32 = vmax.f32 %v17047_v18, %v4441_v47 }
 0x414   : > { %v4387_v62 = vpop.permute.xlu1 %4386  ;;  %v4403_v51 = vpop.permute.xlu0 %4402  ;;  %v4605_v39 = vpack.c.bf16 %v4511_v32, %v4504_v11 }
 0x415   : > { %v4440_v37 = vsel %vm1731_vm5, %v4387_v62, %v4389_v27 }
 0x416   : > { %v4510_v28 = vmax.f32 %v17062_v59, %v4440_v37  ;;  %4675 = vmatprep.subr.bf16.mxu0 %v4605_v39 }
 0x418   : > { %v4405_v0 = vpop.permute.xlu1 %4404  ;;  %v4407_v50 = vpop.permute.xlu0 %4406  ;;  %v4604_v6 = vpack.c.bf16 %v4510_v28, %v4503_v30 }
 0x419   : > { %v4447_v63 = vsel %vm1731_vm5, %v4403_v51, %v4405_v0  ;;  %v4448_v3 = vsel %vm1731_vm5, %v4405_v0, %v4407_v50 }
 0x41a   : > { %v4517_v18 = vmax.f32 %v17066_v19, %v4447_v63  ;;  %v4518_v7 = vmax.f32 %v17076_v2, %v4448_v3  ;;  %4676 = vmatpush1.bf16.msra.mxu0 %v4604_v6 }
 0x41c   : > { %v4345_v49 = vpop.permute.xlu1 %4344  ;;  %v4347_v5 = vpop.permute.xlu0 %4346  ;;  %v4612_v40 = vpack.c.bf16 %v4518_v7, %v4518_v7  ;;  %v4611_v42 = vpack.c.bf16 %v4517_v18, %v4517_v18 }
 0x41d   : > { %v4421_v2 = vsel %vm1731_vm5, %v4343_v52, %v4345_v49  ;;  %v4422_v60 = vsel %vm1731_vm5, %v4345_v49, %v4347_v5  ;;  %v17290_v52 = vld [vmem:[%s20827_s22 + $0x8] ss:$0 sps:$4 sm:$0x33]   ;;  %s20746_s22 = smov 8  }
 0x41e   : > { %13727 = vmatprep.subr.msk.bf16.mxu0 %vm4651_vm11, %v4612_v40  ;;  %v4653_v59 = vsel %vm4651_vm11, %v4611_v42, 0  ;;  %v4491_v20 = vmax.f32 %v16993_v36, %v4421_v2  ;;  %v4492_v17 = vmax.f32 %v17091_v33, %v4422_v60 }
 0x41f   : > { %4678 = vmatpush1.bf16.msra.mxu0 %v4653_v59 }
 0x420   : > { %v4349_v19 = vpop.permute.xlu1 %4348  ;;  %v4351_v34 = vpop.permute.xlu0 %4350 }
 0x422   : > { %13728 = vmatmul.mubr.msk.bf16.vlgmr.msra.gmra.mrb[88].mxu0 %vm4644_vm12, %v17274_v41 }
 0x423   : > { %4715 = vmatprep.mubr.bf16.mxu0 %v20828_v38 }
 0x424   : > { %v4363_v58 = vpop.permute.xlu1 %4362  ;;  %v4361_v53 = vpop.permute.xlu0 %4360 }
 0x425   : > { %v4428_v4 = vsel %vm1731_vm5, %v4359_v56, %v4361_v53  ;;  %v4429_v21 = vsel %vm1731_vm5, %v4361_v53, %v4363_v58 }
 0x426   : > { %v4498_v27 = vmax.f32 %v17012_v25, %v4428_v4  ;;  %v4499_v47 = vmax.f32 %v17120_v61, %v4429_v21 }
 0x428   : > { %v4600_v11 = vpack.c.bf16 %v4499_v47, %v4492_v17  ;;  %v4599_v32 = vpack.c.bf16 %v4498_v27, %v4491_v20 }
 0x42a   : > { %13729 = vmatmul.mubr.msk.bf16.gmra.mrb[92].mxu0 %vm4644_vm12, %v17290_v52  ;;  %4724 = vmatprep.subr.bf16.mxu1 %v4600_v11 }
 0x42b   : > { %4725 = vmatpush1.bf16.msra.mxu1 %v4599_v32  ;;  %4807 = vmatprep.mubr.bf16.mxu0 %v20828_v38 }
 0x42c   : > { %v4379_v36 = vpop.permute.xlu0 %4378  ;;  %v4377_v33 = vpop.permute.xlu1 %4376 }
 0x42d   : > { %v4436_v61 = vsel %vm1731_vm5, %v4377_v33, %v4379_v36  ;;  %v4435_v22 = vsel %vm1731_vm5, %v4375_v46, %v4377_v33 }
 0x42e   : > { %v4506_v37 = vmax.f32 %v17134_v43, %v4436_v61  ;;  %v4505_v28 = vmax.f32 %v17038_v57, %v4435_v22 }
 0x430   : > { %v4393_v56 = vpop.permute.xlu0 %4392 }
 0x431   : > { %v4442_v25 = vsel %vm1731_vm5, %v4391_v48, %v4393_v56 }
 0x432   : > { %v4512_v51 = vmax.f32 %v17054_v31, %v4442_v25  ;;  %v4423_v31 = vsel %vm1731_vm5, %v4347_v5, %v4349_v19 }
 0x434   : > { %v4395_v62 = vpop.permute.xlu1 %4394  ;;  %v4606_v3 = vpack.c.bf16 %v4512_v51, %v4505_v28 }
 0x435   : > { %v4443_v39 = vsel %vm1731_vm5, %v4393_v56, %v4395_v62 }
 0x436   : > { %v4513_v30 = vmax.f32 %v17146_v14, %v4443_v39  ;;  %v4424_v14 = vsel %vm1731_vm5, %v4349_v19, %v4351_v34 }
 0x437   : > { %v4494_v5 = vmax.f32 %v17105_v45, %v4424_v14 }
 0x438   : > { %v4409_v0 = vpop.permute.xlu1 %4408  ;;  %v17303_v6 = vpop.permute.xlu0 %4410  ;;  %v4607_v63 = vpack.c.bf16 %v4513_v30, %v4506_v37 }
 0x439   : > { %v4449_v48 = vsel %vm1731_vm5, %v4407_v50, %v4409_v0  ;;  %v4450_v46 = vsel %vm1731_vm5, %v4409_v0, %v17303_v6  ;;  %v4493_v50 = vmax.f32 %v17095_v12, %v4423_v31 }
 0x43a   : > { %v4519_v18 = vmax.f32 %v17080_v24, %v4449_v48  ;;  %v4520_v43 = vmax.f32 %v17161_v1, %v4450_v46  ;;  %4726 = vmatprep.subr.bf16.mxu1 %v4607_v63 }
 0x43b   : > { %4727 = vmatpush1.bf16.msra.mxu1 %v4606_v3 }
 0x43c   : > { %v4365_v57 = vpop.permute.xlu1 %4364  ;;  %v4367_v7 = vpop.permute.xlu0 %4366  ;;  %v4614_v49 = vpack.c.bf16 %v4520_v43, %v4520_v43  ;;  %v4613_v40 = vpack.c.bf16 %v4519_v18, %v4519_v18 }
 0x43d   : > { %v4430_v42 = vsel %vm1731_vm5, %v4363_v58, %v4365_v57  ;;  %v4431_v59 = vsel %vm1731_vm5, %v4365_v57, %v4367_v7 }
 0x43e   : > { %v4500_v24 = vmax.f32 %v17124_v23, %v4430_v42  ;;  %v4501_v1 = vmax.f32 %v17175_v35, %v4431_v59  ;;  %13730 = vmatprep.subr.msk.bf16.mxu1 %vm4651_vm11, %v4614_v49  ;;  %v4659_v19 = vsel %vm4651_vm11, %v4613_v40, 0 }
 0x43f   : > { %4729 = vmatpush1.bf16.msra.mxu1 %v4659_v19 }
 0x440   : > { %v4353_v2 = vpop.permute.xlu1 %4352  ;;  %v4369_v60 = vpop.permute.xlu0 %4368  ;;  %v4602_v53 = vpack.c.bf16 %v4501_v1, %v4494_v5  ;;  %v4601_v4 = vpack.c.bf16 %v4500_v24, %v4493_v50 }
 0x441   : > { %v4425_v12 = vsel %vm1731_vm5, %v4351_v34, %v4353_v2  ;;  %v4432_v58 = vsel %vm1731_vm5, %v4367_v7, %v4369_v60 }
 0x442   : > { %v4495_v21 = vmax.f32 %v17109_v15, %v4425_v12  ;;  %v4502_v45 = vmax.f32 %v17179_v55, %v4432_v58  ;;  %13731 = vmatmul.mubr.msk.bf16.vlgmr.msra.gmra.mrb[88].mxu1 %vm4644_vm12, %v17274_v41  ;;  %4775 = vmatprep.subr.bf16.mxu0 %v4602_v53 }
 0x443   : > { %4776 = vmatpush1.bf16.msra.mxu0 %v4601_v4  ;;  %4766 = vmatprep.mubr.bf16.mxu1 %v20828_v38 }
 0x444   : > { %4530 = vst [vmem:[#allocation2 + $0x30] sm:$0xff] %v4495_v21  ;;  %v4381_v23 = vpop.permute.xlu1 %4380  ;;  %v4383_v35 = vpop.permute.xlu0 %4382  ;;  %v4603_v20 = vpack.c.bf16 %v4502_v45, %v4495_v21 }
 0x445   : > { %v4437_v34 = vsel %vm1731_vm5, %v4379_v36, %v4381_v23  ;;  %v4438_v17 = vsel %vm1731_vm5, %v4381_v23, %v4383_v35 }
 0x446   : > { %14374 = vmatprep.subr.bf16.mxu1 %v4603_v20  ;;  %v4507_v11 = vmax.f32 %v17137_v13, %v4437_v34  ;;  %v4508_v32 = vmax.f32 %v17194_v44, %v4438_v17 }
 0x447   : > { %14375 = vmatpush3.bf16.msra.mxu1 %v4603_v20 }
 0x448   : > { %v4397_v15 = vpop.permute.xlu1 %4396  ;;  %v4399_v27 = vpop.permute.xlu0 %4398 }
 0x449   : > { %v4444_v55 = vsel %vm1731_vm5, %v4395_v62, %v4397_v15  ;;  %v4445_v47 = vsel %vm1731_vm5, %v4397_v15, %v4399_v27 }
 0x44a   : > { %v4514_v33 = vmax.f32 %v17153_v9, %v4444_v55  ;;  %v4515_v56 = vmax.f32 %v17207_v54, %v4445_v47  ;;  %13732 = vmatmul.mubr.msk.bf16.gmra.mrb[92].mxu1 %vm4644_vm12, %v17290_v52 }
 0x44b   : > { %14380 = vmatprep.mubr.msk.bf16.mxu1 %vm4644_vm12, %v17274_v41 }
 0x44c   : > { %v4385_v36 = vpop.permute.xlu1 %4384  ;;  %v4401_v25 = vpop.permute.xlu0 %4400  ;;  %v4609_v61 = vpack.c.bf16 %v4515_v56, %v4508_v32  ;;  %v4608_v22 = vpack.c.bf16 %v4514_v33, %v4507_v11 }
 0x44d   : > { %v4439_v62 = vsel %vm1731_vm5, %v4383_v35, %v4385_v36  ;;  %v4446_v13 = vsel %vm1731_vm5, %v4399_v27, %v4401_v25 }
 0x44e   : > { %v4509_v44 = vmax.f32 %v17197_v16, %v4439_v62  ;;  %v4516_v9 = vmax.f32 %v17211_v29, %v4446_v13  ;;  %4777 = vmatprep.subr.bf16.mxu0 %v4609_v61 }
 0x44f   : > { %4778 = vmatpush1.bf16.msra.mxu0 %v4608_v22 }
 0x450   : > { %v4413_v54 = vpop.permute.xlu1 %4412  ;;  %v4415_v51 = vpop.permute.xlu0 %4414  ;;  %v4610_v39 = vpack.c.bf16 %v4516_v9, %v4509_v44 }
 0x451   : > { %v4451_v37 = vsel %vm1731_vm5, %v17303_v6, %v4413_v54  ;;  %v4452_v30 = vsel %vm1731_vm5, %v4413_v54, %v4415_v51 }
 0x452   : > { %v4521_v28 = vmax.f32 %v17165_v8, %v4451_v37  ;;  %v4522_v0 = vmax.f32 %v17227_v26, %v4452_v30  ;;  %14376 = vmatprep.subr.bf16.mxu1 %v4610_v39 }
 0x453   : > { %14377 = vmatpush3.bf16.msra.mxu1 %v4610_v39 }
 0x454   : > { %v4417_v63 = vpop.permute.xlu1 %4416  ;;  %v4616_v16 = vpack.c.bf16 %v4522_v0, %v4522_v0  ;;  %v4615_v48 = vpack.c.bf16 %v4521_v28, %v4521_v28 }
 0x455   : > { %v4453_v29 = vsel %vm1731_vm5, %v4415_v51, %v4417_v63  ;;  %vm15769_vm5 = vmmov 0  }
 0x456   : > { %v4523_v46 = vmax.f32 %v17231_v10, %v4453_v29  ;;  %13733 = vmatprep.subr.msk.bf16.mxu0 %vm4651_vm11, %v4616_v16  ;;  %v4665_v3 = vsel %vm4651_vm11, %v4615_v48, 0 }
 0x457   : > { %4780 = vmatpush1.bf16.msra.mxu0 %v4665_v3 }
 0x458   : > { %v4617_v6 = vpack.c.bf16 %v4523_v46, %v4523_v46 }
 0x45a   : > { %13734 = vmatmul.mubr.msk.bf16.vlgmr.msra.gmra.mrb[96].mxu0 %vm4644_vm12, %v17274_v41  ;;  %15444 = vmatprep.subr.msk.bf16.mxu1 %vm4651_vm11, %v4617_v6  ;;  %v4671_v8 = vsel %vm4651_vm11, %v4617_v6, 0 }
 0x45b   : > { %14379 = vmatpush3.bf16.msra.mxu1 %v4671_v8  ;;  %4817 = vmatprep.mubr.bf16.mxu0 %v20828_v38 }
 0x45e   : > { %14381 = vmatmul.mubr.msk.bf16.vlgmr.msra.gmra.mrb[96].mxu1 %vm4644_vm12, %v17290_v52 }
 0x45f   : > { %5078 = vmatprep.mubr.bf16.mxu1 %v20828_v38 }
 0x461   : > { %v17363_v10 = vpop.permute.xlu0 %4623 }
 0x462   : > { %13735 = vmatmul.mubr.msk.bf16.gmra.mrb[100].mxu0 %vm4644_vm12, %v17290_v52 }
 0x463   : > { %5141 = vmatprep.mubr.bf16.mxu0 %v20828_v38 }
 0x465   : > { %v17365_v31 = vpop.permute.xlu1 %4628  ;;  %v4634_v50 = vpop.permute.xlu0 %4633 }
 0x4f5   : > { %v4707_v26 = vpop.f32.mrb[88].mxu0 }
 0x4f6   : > { %v4709_v41 = vpop.f32.mrb[89].mxu0  ;;  %v4708_v43 = vadd.f32 %v4707_v26, %v17363_v10 }
 0x4f7   : > { %v4711_v18 = vpop.f32.mrb[90].mxu0  ;;  %v4710_v7 = vadd.f32 %v4709_v41, %v17363_v10 }
 0x4f8   : > { %v4712_v14 = vadd.f32 %v4711_v18, %v17365_v31  ;;  %v4713_v57 = vpop.f32.mrb[91].mxu0 }
 0x4f9   : > { %v4714_v49 = vadd.f32 %v4713_v57, %v17365_v31 }
 0x4fa   : > { %v17371_v40 = vpack.c.bf16 %v4712_v14, %v4708_v43 }
 0x4fb   : > { %v17373_v52 = vpack.c.bf16 %v4714_v49, %v4710_v7 }
 0x4fc   : > { %4972 = vrot.lane.b32.xlu1 %v17371_v40, %s20829_s4 }
 0x4fd   : > { %v4717_v42 = vpop.f32.mrb[92].mxu0 }
 0x4fe   : > { %v4718_v59 = vadd.f32 %v4717_v42, %v4634_v50  ;;  %v4719_v5 = vpop.f32.mrb[93].mxu0 }
 0x4ff   : > { %v4720_v24 = vadd.f32 %v4719_v5, %v4634_v50  ;;  %v4721_v1 = vpop.f32.mrb[94].mxu0 }
 0x500   : > { %4888 = vst [vmem:[#allocation3 + $0x90] sm:$0xf] %v4718_v59  ;;  %4974 = vrot.lane.b32.xlu1 %v17373_v52, %s20829_s4  ;;  %v4722_v19 = vpop.f32.mrb[95].mxu0 }
 0x501   : > { %4889 = vst [vmem:[#allocation3 + $0x98] sm:$0xf] %v4720_v24 }
 0x507   : > { %v4907_v2 = vld [vmem:[#allocation3 + $0x90] sm:$0xf] }
 0x508   : > { %v17379_v60 = vpack.c.bf16 %v4907_v2, %v4907_v2  ;;  %v4908_v53 = vld [vmem:[#allocation3 + $0x98] sm:$0xf] }
 0x509   : > { %v17381_v4 = vpack.c.bf16 %v4908_v53, %v4908_v53 }
 0x50a   : > { %4986 = vrot.lane.b32.xlu0 %v17379_v60, %s20829_s4 }
 0x50b   : > { %4988 = vrot.lane.b32.xlu1 %v17381_v4, %s20829_s4 }
 0x515   : > { %v4758_v12 = vpop.f32.mrb[88].mxu1 }
 0x516   : > { %v4760_v58 = vpop.f32.mrb[89].mxu1  ;;  %v4759_v45 = vadd.f32 %v4758_v12, %v17363_v10 }
 0x517   : > { %v4762_v21 = vpop.f32.mrb[90].mxu1  ;;  %v4761_v20 = vadd.f32 %v4760_v58, %v17363_v10 }
 0x518   : > { %v4763_v23 = vadd.f32 %v4762_v21, %v17365_v31  ;;  %v4764_v35 = vpop.f32.mrb[91].mxu1  ;;  %v17534_v21 = vld [vmem:[%s20832_s0 + $0x18] sm:$0xff]  }
 0x519   : > { %v4765_v34 = vadd.f32 %v4764_v35, %v17365_v31  ;;  %v17566_v35 = vld [vmem:[%s20832_s0 + $0x28] sm:$0xff]  }
 0x51a   : > { %v17391_v17 = vpack.c.bf16 %v4763_v23, %v4759_v45  ;;  %v17550_v45 = vld [vmem:[%s20832_s0 + $0x20] sm:$0xff]  }
 0x51b   : > { %v17393_v15 = vpack.c.bf16 %v4765_v34, %v4761_v20 }
 0x51c   : > { %4976 = vrot.lane.b32.xlu0 %v17391_v17, %s20829_s4 }
 0x51d   : > { %v4768_v27 = vpop.f32.mrb[92].mxu1 }
 0x51e   : > { %v4769_v55 = vadd.f32 %v4768_v27, %v4634_v50  ;;  %v4770_v47 = vpop.f32.mrb[93].mxu1 }
 0x51f   : > { %v4771_v11 = vadd.f32 %v4770_v47, %v4634_v50  ;;  %v4772_v32 = vpop.f32.mrb[94].mxu1 }
 0x520   : > { %4890 = vst [vmem:[#allocation3 + $0xa0] sm:$0xf] %v4769_v55  ;;  %v4773_v33 = vpop.f32.mrb[95].mxu1 }
 0x521   : > { %4891 = vst [vmem:[#allocation3 + $0xa8] sm:$0xf] %v4771_v11 }
 0x527   : > { %v4909_v56 = vld [vmem:[#allocation3 + $0xa0] sm:$0xf] }
 0x528   : > { %v17397_v36 = vpack.c.bf16 %v4909_v56, %v4909_v56  ;;  %v4910_v7 = vld [vmem:[#allocation3 + $0xa8] sm:$0xf] }
 0x52a   : > { %4990 = vrot.lane.b32.xlu0 %v17397_v36, %s20829_s4 }
 0x52d   : > { %v4809_v25 = vpop.f32.mrb[96].mxu0 }
 0x52e   : > { %v4811_v61 = vpop.f32.mrb[97].mxu0  ;;  %v4810_v62 = vadd.f32 %v4809_v25, %v17363_v10 }
 0x52f   : > { %v4813_v22 = vpop.f32.mrb[98].mxu0  ;;  %v4812_v9 = vadd.f32 %v4811_v61, %v17363_v10 }
 0x530   : > { %v4814_v13 = vadd.f32 %v4813_v22, %v17365_v31  ;;  %v4815_v44 = vpop.f32.mrb[99].mxu0 }
 0x531   : > { %v4816_v54 = vadd.f32 %v4815_v44, %v17365_v31  ;;  %v14382_v51 = vpop.f32.mrb[96].mxu1 }
 0x532   : > { %v17405_v39 = vpack.c.bf16 %v4814_v13, %v4810_v62  ;;  %v4869_v37 = vadd.f32 %v14382_v51, %v4634_v50  ;;  %v4860_v30 = vpop.f32.mrb[97].mxu1 }
 0x533   : > { %v17407_v28 = vpack.c.bf16 %v4816_v54, %v4812_v9  ;;  %v4861_v0 = vadd.f32 %v4860_v30, %v17363_v10  ;;  %v14383_v63 = vpop.f32.mrb[98].mxu1  ;;  %v5260_v54 = vsel %vm770_vm2, %v17379_v60, 0 }
 0x534   : > { %4894 = vst [vmem:[#allocation3 + $0xc0] sm:$0xf] %v4869_v37  ;;  %v4863_v16 = vpop.f32.mrb[99].mxu1 }
 0x535   : > { %v4864_v48 = vadd.f32 %v4863_v16, %v17365_v31  ;;  %v4819_v29 = vpop.f32.mrb[100].mxu0  ;;  %4982 = vrot.lane.b32.xlu1 %v17407_v28, %s20829_s4 }
 0x536   : > { %v4820_v46 = vadd.f32 %v4819_v29, %v4634_v50  ;;  %v4821_v3 = vpop.f32.mrb[101].mxu0 }
 0x537   : > { %v4822_v6 = vadd.f32 %v4821_v3, %v4634_v50  ;;  %v4823_v8 = vpop.f32.mrb[102].mxu0  ;;  %v17413_v26 = vpack.c.bf16 %v4864_v48, %v4861_v0  ;;  %v17495_v50 = vpack.c.bf16 %v4910_v7, %v4910_v7 }
 0x538   : > { %4892 = vst [vmem:[#allocation3 + $0xb0] sm:$0xf] %v4820_v46  ;;  %v4824_v41 = vpop.f32.mrb[103].mxu0  ;;  %v17670_v46 = vld [vmem:[%s20832_s0] sm:$0xff]  }
 0x539   : > { %4893 = vst [vmem:[#allocation3 + $0xb8] sm:$0xf] %v4822_v6  ;;  %4980 = vrot.lane.b32.xlu1 %v17405_v39, %s20829_s4 }
 0x53b   : > { %v4933_v14 = vld [vmem:[#allocation3 + $0xc0] sm:$0xf] }
 0x53c   : > { %v17429_v57 = vpack.c.bf16 %v4933_v14, %v4933_v14 }
 0x53f   : > { %v4911_v10 = vld [vmem:[#allocation3 + $0xb0] sm:$0xf] }
 0x540   : > { %v17417_v18 = vpack.c.bf16 %v4911_v10, %v4911_v10  ;;  %v4912_v31 = vld [vmem:[#allocation3 + $0xb8] sm:$0xf] }
 0x541   : > { %v17419_v43 = vpack.c.bf16 %v4912_v31, %v4912_v31  ;;  %v17699_v31 = vld [vmem:[%s20832_s0 + $0x8] sm:$0xff]  }
 0x542   : > { %4994 = vrot.lane.b32.xlu0 %v17417_v18, %s20829_s4  ;;  %v5272_v10 = vsel %vm770_vm2, %v17417_v18, 0 }
 0x543   : > { %4996 = vrot.lane.b32.xlu1 %v17419_v43, %s20829_s4 }
 0x546   : > { %4984 = vrot.lane.b32.xlu0 %v17413_v26, %s20829_s4 }
 0x547   : > { %5490 = vrot.lane.b32.xlu1 %v17373_v52, %s20738_s26 }
 0x54a   : > { %4998 = vrot.lane.b32.xlu0 %v17429_v57, %s20829_s4 }
 0x54b   : > { %5488 = vrot.lane.b32.xlu1 %v17371_v40, %s20738_s26 }
 0x54e   : > { %5492 = vrot.lane.b32.xlu0 %v17391_v17, %s20738_s26 }
 0x54f   : > { %5504 = vrot.lane.b32.xlu1 %v17381_v4, %s20738_s26 }
 0x552   : > { %5502 = vrot.lane.b32.xlu0 %v17379_v60, %s20738_s26 }
 0x553   : > { %5498 = vrot.lane.b32.xlu1 %v17407_v28, %s20738_s26 }
 0x556   : > { %5506 = vrot.lane.b32.xlu0 %v17397_v36, %s20738_s26 }
 0x557   : > { %5496 = vrot.lane.b32.xlu1 %v17405_v39, %s20738_s26 }
 0x55a   : > { %5510 = vrot.lane.b32.xlu0 %v17417_v18, %s20738_s26 }
 0x55b   : > { %5512 = vrot.lane.b32.xlu1 %v17419_v43, %s20738_s26 }
 0x55e   : > { %5500 = vrot.lane.b32.xlu0 %v17413_v26, %s20738_s26 }
 0x55f   : > { %5811 = vrot.lane.b32.xlu1 %v17373_v52, %s20830_s30 }
 0x562   : > { %5514 = vrot.lane.b32.xlu0 %v17429_v57, %s20738_s26  ;;  %s20744_s26 = smov 6  }
 0x563   : > { %5809 = vrot.lane.b32.xlu1 %v17371_v40, %s20830_s30 }
 0x566   : > { %5813 = vrot.lane.b32.xlu0 %v17391_v17, %s20830_s30 }
 0x567   : > { %5825 = vrot.lane.b32.xlu1 %v17381_v4, %s20830_s30 }
 0x56a   : > { %5823 = vrot.lane.b32.xlu0 %v17379_v60, %s20830_s30 }
 0x56b   : > { %5819 = vrot.lane.b32.xlu1 %v17407_v28, %s20830_s30 }
 0x56e   : > { %5827 = vrot.lane.b32.xlu0 %v17397_v36, %s20830_s30  ;;  %v4973_v49 = vpop.permute.xlu1 %4972 }
 0x56f   : > { %5817 = vrot.lane.b32.xlu1 %v17405_v39, %s20830_s30 }
 0x572   : > { %5831 = vrot.lane.b32.xlu0 %v17417_v18, %s20830_s30  ;;  %v4975_v59 = vpop.permute.xlu1 %4974 }
 0x573   : > { %5833 = vrot.lane.b32.xlu1 %v17419_v43, %s20830_s30  ;;  %v5000_v1 = vsel %vm1368_vm4, %v4973_v49, %v4975_v59 }
 0x576   : > { %5821 = vrot.lane.b32.xlu0 %v17413_v26, %s20830_s30 }
 0x577   : > { %6131 = vrot.lane.b32.xlu1 %v17373_v52, %s20831_s29 }
 0x57a   : > { %5835 = vrot.lane.b32.xlu0 %v17429_v57, %s20830_s30 }
 0x57b   : > { %6129 = vrot.lane.b32.xlu1 %v17371_v40, %s20831_s29 }
 0x57c   : > { %v4987_v42 = vpop.permute.xlu0 %4986 }
 0x57d   : > { %v4989_v19 = vpop.permute.xlu1 %4988 }
 0x57e   : > { %6133 = vrot.lane.b32.xlu0 %v17391_v17, %s20831_s29  ;;  %v5006_v2 = vsel %vm1368_vm4, %v4987_v42, %v4989_v19 }
 0x57f   : > { %6145 = vrot.lane.b32.xlu1 %v17381_v4, %s20831_s29  ;;  %v5029_v58 = vsel %vm770_vm2, %v5006_v2, 0 }
 0x582   : > { %6143 = vrot.lane.b32.xlu0 %v17379_v60, %s20831_s29 }
 0x583   : > { %4978 = vrot.lane.b32.xlu1 %v17393_v15, %s20829_s4 }
 0x586   : > { %6147 = vrot.lane.b32.xlu0 %v17397_v36, %s20831_s29 }
 0x587   : > { %6139 = vrot.lane.b32.xlu1 %v17407_v28, %s20831_s29 }
 0x58a   : > { %4992 = vrot.lane.b32.xlu0 %v17495_v50, %s20829_s4 }
 0x58b   : > { %6137 = vrot.lane.b32.xlu1 %v17405_v39, %s20831_s29 }
 0x58e   : > { %6151 = vrot.lane.b32.xlu0 %v17417_v18, %s20831_s29  ;;  %v17503_v5 = vpop.permute.xlu0 %4976 }
 0x58f   : > { %6153 = vrot.lane.b32.xlu1 %v17419_v43, %s20831_s29  ;;  %v5001_v24 = vsel %vm1368_vm4, %v4975_v59, %v17503_v5 }
 0x590   : > { %5046 = vmatprep.subr.bf16.mxu1 %v5001_v24  ;;  %v17726_v24 = vld [vmem:[%s20832_s0 + $0x10] sm:$0xff]  }
 0x591   : > { %5047 = vmatpush1.bf16.msra.mxu1 %v5000_v1 }
 0x592   : > { %6141 = vrot.lane.b32.xlu0 %v17413_v26, %s20831_s29 }
 0x593   : > { %6451 = vrot.lane.b32.xlu1 %v17373_v52, %s20748_s24 }
 0x596   : > { %6155 = vrot.lane.b32.xlu0 %v17429_v57, %s20831_s29 }
 0x597   : > { %6449 = vrot.lane.b32.xlu1 %v17371_v40, %s20748_s24 }
 0x59a   : > { %6453 = vrot.lane.b32.xlu0 %v17391_v17, %s20748_s24 }
 0x59b   : > { %6465 = vrot.lane.b32.xlu1 %v17381_v4, %s20748_s24 }
 0x59c   : > { %v17523_v53 = vpop.permute.xlu0 %4990 }
 0x59d   : > { %v5007_v12 = vsel %vm1368_vm4, %v4989_v19, %v17523_v53 }
 0x59e   : > { %6463 = vrot.lane.b32.xlu0 %v17379_v60, %s20748_s24  ;;  %13747 = vmatprep.subr.msk.bf16.mxu1 %vm770_vm2, %v5007_v12 }
 0x59f   : > { %5049 = vmatpush1.bf16.msra.mxu1 %v5029_v58  ;;  %5494 = vrot.lane.b32.xlu1 %v17393_v15, %s20833_s1 }
 0x5a2   : > { %6467 = vrot.lane.b32.xlu0 %v17397_v36, %s20748_s24  ;;  %13748 = vmatmul.mubr.msk.bf16.vlgmr.msra.gmra.mrb[100].mxu1 %vm5018_vm13, %v17534_v21 }
 0x5a3   : > { %6459 = vrot.lane.b32.xlu1 %v17407_v28, %s20748_s24  ;;  %5088 = vmatprep.mubr.bf16.mxu1 %v20828_v38 }
 0x5a6   : > { %5508 = vrot.lane.b32.xlu0 %v17495_v50, %s20833_s1 }
 0x5a7   : > { %6457 = vrot.lane.b32.xlu1 %v17405_v39, %s20748_s24  ;;  %v4983_v23 = vpop.permute.xlu1 %4982 }
 0x5aa   : > { %6471 = vrot.lane.b32.xlu0 %v17417_v18, %s20748_s24  ;;  %13749 = vmatmul.mubr.msk.bf16.gmra.mrb[104].mxu1 %vm5018_vm13, %v17550_v45 }
 0x5ab   : > { %6473 = vrot.lane.b32.xlu1 %v17419_v43, %s20748_s24  ;;  %5098 = vmatprep.mubr.bf16.mxu1 %v20828_v38  ;;  %v17570_v20 = vpop.permute.xlu1 %4980 }
 0x5ac   : > { %v5004_v32 = vsel %vm1368_vm4, %v17570_v20, %v4983_v23 }
 0x5ae   : > { %6461 = vrot.lane.b32.xlu0 %v17413_v26, %s20748_s24 }
 0x5af   : > { %5815 = vrot.lane.b32.xlu1 %v17393_v15, %s20830_s30 }
 0x5b2   : > { %6475 = vrot.lane.b32.xlu0 %v17429_v57, %s20748_s24  ;;  %13750 = vmatmul.mubr.msk.bf16.gmra.mrb[108].mxu1 %vm5018_vm13, %v17566_v35 }
 0x5b3   : > { %6772 = vrot.lane.b32.xlu1 %v17373_v52, %s20746_s22  ;;  %5204 = vmatprep.mubr.bf16.mxu1 %v20828_v38 }
 0x5b4   : > { %v17579_v34 = vpop.permute.xlu0 %4994 }
 0x5b5   : > { %v4997_v27 = vpop.permute.xlu1 %4996 }
 0x5b6   : > { %5829 = vrot.lane.b32.xlu0 %v17495_v50, %s20830_s30  ;;  %v5010_v33 = vsel %vm1368_vm4, %v17579_v34, %v4997_v27 }
 0x5b7   : > { %6770 = vrot.lane.b32.xlu1 %v17371_v40, %s20746_s22  ;;  %v5041_v22 = vsel %vm770_vm2, %v5010_v33, 0 }
 0x5b8   : > { %v4985_v55 = vpop.permute.xlu0 %4984 }
 0x5b9   : > { %v5005_v47 = vsel %vm1368_vm4, %v4983_v23, %v4985_v55  ;;  %v17586_v11 = vpop.permute.xlu1 %5490 }
 0x5ba   : > { %6774 = vrot.lane.b32.xlu0 %v17391_v17, %s20746_s22  ;;  %5172 = vmatprep.subr.bf16.mxu1 %v5005_v47 }
 0x5bb   : > { %5173 = vmatpush1.bf16.msra.mxu1 %v5004_v32  ;;  %6786 = vrot.lane.b32.xlu1 %v17381_v4, %s20746_s22 }
 0x5bc   : > { %v4999_v56 = vpop.permute.xlu0 %4998 }
 0x5bd   : > { %v5011_v25 = vsel %vm1368_vm4, %v4997_v27, %v4999_v56  ;;  %v17597_v61 = vpop.permute.xlu1 %5488 }
 0x5be   : > { %6784 = vrot.lane.b32.xlu0 %v17379_v60, %s20746_s22  ;;  %13755 = vmatprep.subr.msk.bf16.mxu1 %vm770_vm2, %v5011_v25  ;;  %v5517_v27 = vsel %vm5516_vm14, %v17597_v61, %v17586_v11 }
 0x5bf   : > { %5175 = vmatpush1.bf16.msra.mxu1 %v5041_v22  ;;  %6135 = vrot.lane.b32.xlu1 %v17393_v15, %s20831_s29 }
 0x5c0   : > { %5277 = vmatprep.subr.bf16.mxu1 %v17373_v52  ;;  %v17606_v62 = vpop.permute.xlu0 %5492 }
 0x5c1   : > { %v17608_v13 = vpop.permute.xlu1 %5504  ;;  %v5518_v14 = vsel %vm5516_vm14, %v17586_v11, %v17606_v62 }
 0x5c2   : > { %6788 = vrot.lane.b32.xlu0 %v17397_v36, %s20746_s22  ;;  %13756 = vmatmul.mubr.msk.bf16.vlgmr.msra.gmra.mrb[112].mxu1 %vm5018_vm13, %v17534_v21 }
 0x5c3   : > { %5278 = vmatpush1.bf16.msra.mxu1 %v17371_v40  ;;  %6780 = vrot.lane.b32.xlu1 %v17407_v28, %s20746_s22 }
 0x5c4   : > { %13762 = vmatprep.subr.msk.bf16.mxu1 %vm770_vm2, %v17381_v4  ;;  %v17619_v44 = vpop.permute.xlu0 %5502  ;;  %5214 = vmatprep.mubr.bf16.mxu1 %v20828_v38 }
 0x5c5   : > { %v17622_v9 = vpop.permute.xlu1 %5498  ;;  %v5523_v55 = vsel %vm5516_vm14, %v17619_v44, %v17608_v13 }
 0x5c6   : > { %6149 = vrot.lane.b32.xlu0 %v17495_v50, %s20831_s29  ;;  %v5545_v33 = vsel %vm770_vm2, %v5523_v55, 0  ;;  %v17913_v55 = vld [vmem:[%s20832_s0 + $0x40] sm:$0xff]  }
 0x5c7   : > { %5280 = vmatpush1.bf16.msra.mxu1 %v5260_v54  ;;  %6778 = vrot.lane.b32.xlu1 %v17405_v39, %s20746_s22 }
 0x5c8   : > { %v17630_v51 = vpop.permute.xlu0 %5506  ;;  %5403 = vmatprep.subr.bf16.mxu1 %v17407_v28 }
 0x5c9   : > { %v17633_v37 = vpop.permute.xlu1 %5496  ;;  %v5524_v47 = vsel %vm5516_vm14, %v17608_v13, %v17630_v51 }
 0x5ca   : > { %6792 = vrot.lane.b32.xlu0 %v17417_v18, %s20746_s22  ;;  %13757 = vmatmul.mubr.msk.bf16.gmra.mrb[116].mxu1 %vm5018_vm13, %v17550_v45 }
 0x5cb   : > { %6794 = vrot.lane.b32.xlu1 %v17419_v43, %s20746_s22  ;;  %5224 = vmatprep.mubr.bf16.mxu1 %v20828_v38 }
 0x5cc   : > { %v17642_v30 = vpop.permute.xlu0 %5510 }
 0x5cd   : > { %v17644_v0 = vpop.permute.xlu1 %5512 }
 0x5ce   : > { %6782 = vrot.lane.b32.xlu0 %v17413_v26, %s20746_s22 }
 0x5cf   : > { %6455 = vrot.lane.b32.xlu1 %v17393_v15, %s20748_s24 }
 0x5d0   : > { %v17650_v63 = vpop.permute.xlu0 %5500 }
 0x5d1   : > { %v17652_v16 = vpop.permute.xlu1 %5811 }
 0x5d2   : > { %6796 = vrot.lane.b32.xlu0 %v17429_v57, %s20746_s22  ;;  %13758 = vmatmul.mubr.msk.bf16.gmra.mrb[120].mxu1 %vm5018_vm13, %v17566_v35 }
 0x5d3   : > { %7093 = vrot.lane.b32.xlu1 %v17373_v52, %s20744_s26  ;;  %5309 = vmatprep.mubr.bf16.mxu1 %v20828_v38 }
 0x5d4   : > { %v17661_v48 = vpop.permute.xlu0 %5514 }
 0x5d5   : > { %v17663_v29 = vpop.permute.xlu1 %5809 }
 0x5d6   : > { %6469 = vrot.lane.b32.xlu0 %v17495_v50, %s20748_s24  ;;  %s15770_s24 = smov 120  }
 0x5d7   : > { %7091 = vrot.lane.b32.xlu1 %v17371_v40, %s20744_s26 }
 0x5d8   : > { %v17674_v3 = vpop.permute.xlu0 %5813 }
 0x5d9   : > { %v17676_v6 = vpop.permute.xlu1 %5825 }
 0x5da   : > { %7095 = vrot.lane.b32.xlu0 %v17391_v17, %s20744_s26  ;;  %13763 = vmatmul.mubr.msk.bf16.vlgmr.msra.gmra.mrb[100].mxu1 %vm5018_vm13, %v17670_v46 }
 0x5db   : > { %5404 = vmatpush1.bf16.msra.mxu1 %v17405_v39  ;;  %7107 = vrot.lane.b32.xlu1 %v17381_v4, %s20744_s26 }
 0x5dc   : > { %13770 = vmatprep.subr.msk.bf16.mxu1 %vm770_vm2, %v17419_v43  ;;  %v17687_v8 = vpop.permute.xlu0 %5823  ;;  %5319 = vmatprep.mubr.bf16.mxu1 %v20828_v38 }
 0x5dd   : > { %v17690_v41 = vpop.permute.xlu1 %5819 }
 0x5de   : > { %7105 = vrot.lane.b32.xlu0 %v17379_v60, %s20744_s26 }
 0x5df   : > { %5406 = vmatpush1.bf16.msra.mxu1 %v5272_v10  ;;  %6776 = vrot.lane.b32.xlu1 %v17393_v15, %s20746_s22 }
 0x5e0   : > { %5562 = vmatprep.subr.bf16.mxu1 %v5518_v14  ;;  %v17706_v7 = vpop.permute.xlu0 %5827  ;;  %v7712_v14 = vld [vmem:[%s20677_s6 + $0x8] sm:$0xff] }
 0x5e1   : > { %v17708_v49 = vpop.permute.xlu1 %5817 }
 0x5e2   : > { %7109 = vrot.lane.b32.xlu0 %v17397_v36, %s20744_s26  ;;  %13764 = vmatmul.mubr.msk.bf16.gmra.mrb[104].mxu1 %vm5018_vm13, %v17699_v31 }
 0x5e3   : > { %7101 = vrot.lane.b32.xlu1 %v17407_v28, %s20744_s26  ;;  %5329 = vmatprep.mubr.bf16.mxu1 %v20828_v38 }
 0x5e4   : > { %v17717_v42 = vpop.permute.xlu0 %5831 }
 0x5e5   : > { %v17719_v59 = vpop.permute.xlu1 %5833 }
 0x5e6   : > { %6790 = vrot.lane.b32.xlu0 %v17495_v50, %s20746_s22 }
 0x5e7   : > { %7099 = vrot.lane.b32.xlu1 %v17405_v39, %s20744_s26 }
 0x5e8   : > { %v17730_v1 = vpop.permute.xlu0 %5821 }
 0x5e9   : > { %v17732_v19 = vpop.permute.xlu1 %6131 }
 0x5ea   : > { %7113 = vrot.lane.b32.xlu0 %v17417_v18, %s20744_s26  ;;  %13765 = vmatmul.mubr.msk.bf16.gmra.mrb[108].mxu1 %vm5018_vm13, %v17726_v24 }
 0x5eb   : > { %7115 = vrot.lane.b32.xlu1 %v17419_v43, %s20744_s26  ;;  %5435 = vmatprep.mubr.bf16.mxu1 %v20828_v38 }
 0x5ec   : > { %v17741_v2 = vpop.permute.xlu0 %5835 }
 0x5ed   : > { %v17743_v12 = vpop.permute.xlu1 %6129 }
 0x5ee   : > { %7103 = vrot.lane.b32.xlu0 %v17413_v26, %s20744_s26 }
 0x5ef   : > { %7097 = vrot.lane.b32.xlu1 %v17393_v15, %s20744_s26 }
 0x5f0   : > { %v17749_v58 = vpop.permute.xlu0 %6133 }
 0x5f1   : > { %v17751_v23 = vpop.permute.xlu1 %6145 }
 0x5f2   : > { %7117 = vrot.lane.b32.xlu0 %v17429_v57, %s20744_s26  ;;  %13771 = vmatmul.mubr.msk.bf16.vlgmr.msra.gmra.mrb[112].mxu1 %vm5018_vm13, %v17670_v46 }
 0x5f3   : > { %5563 = vmatpush1.bf16.msra.mxu1 %v5517_v27  ;;  %7414 = vrot.lane.b32.xlu1 %v17373_v52, %s20750_s28  ;;  %v5522_v52 = vsel %vm5516_vm14, %v17622_v9, %v17650_v63 }
 0x5f4   : > { %13783 = vmatprep.subr.msk.bf16.mxu1 %vm770_vm2, %v5524_v47  ;;  %v17769_v11 = vpop.permute.xlu0 %6143  ;;  %5445 = vmatprep.mubr.bf16.mxu1 %v20828_v38 }
 0x5f5   : > { %v4979_v32 = vpop.permute.xlu1 %4978 }
 0x5f6   : > { %7111 = vrot.lane.b32.xlu0 %v17495_v50, %s20744_s26  ;;  %v5003_v56 = vsel %vm1368_vm4, %v4979_v32, %v17570_v20  ;;  %v5002_v25 = vsel %vm1368_vm4, %v17503_v5, %v4979_v32  ;;  %s20834_s26 = smov 64  }
 0x5f7   : > { %5565 = vmatpush1.bf16.msra.mxu1 %v5545_v33  ;;  %7412 = vrot.lane.b32.xlu1 %v17371_v40, %s20750_s28 }
 0x5f8   : > { %5688 = vmatprep.subr.bf16.mxu1 %v5522_v52  ;;  %v17784_v61 = vpop.permute.xlu0 %6147  ;;  %5109 = vmatprep.subr.bf16.mxu0 %v5003_v56  ;;  %v7876_v56 = vld [vmem:[%s20679_s8] sm:$0xff] }
 0x5f9   : > { %5110 = vmatpush1.bf16.msra.mxu0 %v5002_v25  ;;  %v17786_v22 = vpop.permute.xlu1 %6139 }
 0x5fa   : > { %7416 = vrot.lane.b32.xlu0 %v17391_v17, %s20750_s28  ;;  %13772 = vmatmul.mubr.msk.bf16.gmra.mrb[116].mxu1 %vm5018_vm13, %v17699_v31 }
 0x5fb   : > { %7428 = vrot.lane.b32.xlu1 %v17381_v4, %s20750_s28  ;;  %5455 = vmatprep.mubr.bf16.mxu1 %v20828_v38 }
 0x5fc   : > { %v4993_v5 = vpop.permute.xlu0 %4992 }
 0x5fd   : > { %v5008_v40 = vsel %vm1368_vm4, %v17523_v53, %v4993_v5  ;;  %v5009_v20 = vsel %vm1368_vm4, %v4993_v5, %v17579_v34  ;;  %v17799_v13 = vpop.permute.xlu1 %6137 }
 0x5fe   : > { %7426 = vrot.lane.b32.xlu0 %v17379_v60, %s20750_s28  ;;  %13751 = vmatprep.subr.msk.bf16.mxu0 %vm770_vm2, %v5009_v20  ;;  %v5035_v44 = vsel %vm770_vm2, %v5008_v40, 0  ;;  %v7877_v40 = vld [vmem:[%s20679_s8 + $0x8] sm:$0xff] }
 0x5ff   : > { %5112 = vmatpush1.bf16.msra.mxu0 %v5035_v44  ;;  %7418 = vrot.lane.b32.xlu1 %v17393_v15, %s20750_s28 }
 0x600   : > { %5340 = vmatprep.subr.bf16.mxu0 %v17393_v15  ;;  %v17808_v4 = vpop.permute.xlu0 %6151 }
 0x601   : > { %v17810_v53 = vpop.permute.xlu1 %6153 }
 0x602   : > { %7430 = vrot.lane.b32.xlu0 %v17397_v36, %s20750_s28  ;;  %13752 = vmatmul.mubr.msk.bf16.vlgmr.msra.gmra.mrb[104].mxu0 %vm5018_vm13, %v17534_v21  ;;  %v17836_v21 = vld [vmem:[%s20832_s0 + $0x30] sm:$0xff]  }
 0x603   : > { %13773 = vmatmul.mubr.msk.bf16.gmra.mrb[120].mxu1 %vm5018_vm13, %v17726_v24  ;;  %5341 = vmatpush1.bf16.msra.mxu0 %v17391_v17  ;;  %v5266_v17 = vsel %vm770_vm2, %v17397_v36, 0  ;;  %v5521_v36 = vsel %vm5516_vm14, %v17633_v37, %v17622_v9  ;;  %v7711_v9 = vld [vmem:[%s20677_s6] sm:$0xff] }
 0x604   : > { %13766 = vmatprep.subr.msk.bf16.mxu0 %vm770_vm2, %v17495_v50  ;;  %v17821_v60 = vpop.permute.xlu0 %6141  ;;  %7432 = vrot.lane.b32.xlu1 %v17495_v50, %s20750_s28 }
 0x605   : > { %v17825_v15 = vpop.permute.xlu1 %6451  ;;  %5151 = vmatprep.mubr.bf16.mxu0 %v20828_v38  ;;  %5594 = vmatprep.mubr.bf16.mxu1 %v20828_v38 }
 0x606   : > { %7420 = vrot.lane.b32.xlu0 %v17405_v39, %s20750_s28  ;;  %v5527_v39 = vsel %vm5516_vm14, %v17642_v30, %v17644_v0 }
 0x607   : > { %5343 = vmatpush1.bf16.msra.mxu0 %v5266_v17  ;;  %v5557_v54 = vsel %vm770_vm2, %v5527_v39, 0  ;;  %v5843_v39 = vsel %vm2820_vm8, %v17687_v8, %v17676_v6  ;;  %v5842_v8 = vsel %vm2820_vm8, %v17690_v41, %v17730_v1 }
 0x608   : > { %v17838_v34 = vpop.permute.xlu0 %6155  ;;  %7422 = vrot.lane.b32.xlu1 %v17407_v28, %s20750_s28  ;;  %v5528_v28 = vsel %vm5516_vm14, %v17644_v0, %v17661_v48  ;;  %v17877_v0 = vld [vmem:[%s20832_s0 + $0x38] sm:$0xff]  }
 0x609   : > { %v17842_v50 = vpop.permute.xlu1 %6449 }
 0x60a   : > { %7434 = vrot.lane.b32.xlu0 %v17417_v18, %s20750_s28  ;;  %13753 = vmatmul.mubr.msk.bf16.gmra.mrb[108].mxu0 %vm5018_vm13, %v17550_v45 }
 0x60b   : > { %13784 = vmatmul.mubr.msk.bf16.vlgmr.msra.gmra.mrb[100].mxu1 %vm5018_vm13, %v17836_v21  ;;  %5161 = vmatprep.mubr.bf16.mxu0 %v20828_v38 }
 0x60c   : > { %5689 = vmatpush1.bf16.msra.mxu1 %v5521_v36  ;;  %v17860_v18 = vpop.permute.xlu0 %6453  ;;  %7436 = vrot.lane.b32.xlu1 %v17419_v43, %s20750_s28  ;;  %v5838_v43 = vsel %vm2820_vm8, %v17652_v16, %v17674_v3  ;;  %v5837_v36 = vsel %vm2820_vm8, %v17663_v29, %v17652_v16  ;;  %v5865_v29 = vsel %vm770_vm2, %v5843_v39, 0 }
 0x60d   : > { %13791 = vmatprep.subr.msk.bf16.mxu1 %vm770_vm2, %v5528_v28  ;;  %v17865_v45 = vpop.permute.xlu1 %6465  ;;  %5604 = vmatprep.mubr.bf16.mxu1 %v20828_v38 }
 0x60e   : > { %7424 = vrot.lane.b32.xlu0 %v17413_v26, %s20750_s28  ;;  %v7713_v26 = vld [vmem:[%s20677_s6 + $0x10] sm:$0xff] }
 0x610   : > { %5691 = vmatpush1.bf16.msra.mxu1 %v5557_v54  ;;  %v17882_v63 = vpop.permute.xlu0 %6463  ;;  %7719 = vperm.xlu1 %15506, %v7711_v9  }
 0x611   : > { %5882 = vmatprep.subr.bf16.mxu1 %v5838_v43  ;;  %v5495_v48 = vpop.permute.xlu1 %5494 }
 0x612   : > { %7438 = vrot.lane.b32.xlu0 %v17429_v57, %s20750_s28  ;;  %13754 = vmatmul.mubr.msk.bf16.gmra.mrb[112].mxu0 %vm5018_vm13, %v17566_v35  ;;  %v5520_v10 = vsel %vm5516_vm14, %v5495_v48, %v17633_v37  ;;  %v7715_v35 = vld [vmem:[%s20677_s6 + $0x20] sm:$0xff]  ;;  %v7714_v37 = vld [vmem:[%s20677_s6 + $0x18] sm:$0xff]  ;;  %v5519_v25 = vsel %vm5516_vm14, %v17606_v62, %v5495_v48  ;;  %v7878_v62 = vld [vmem:[%s20679_s8 + $0x10] sm:$0xff] }
 0x613   : > { %13785 = vmatmul.mubr.msk.bf16.gmra.mrb[104].mxu1 %vm5018_vm13, %v17877_v0  ;;  %5625 = vmatprep.subr.bf16.mxu0 %v5520_v10 }
 0x614   : > { %v17898_v27 = vpop.permute.xlu0 %6467  ;;  %7729 = vperm.xlu1 %15506, %v7713_v26   ;;  %5372 = vmatprep.mubr.bf16.mxu0 %v20828_v38 }
 0x615   : > { %v17901_v57 = vpop.permute.xlu1 %6459  ;;  %5614 = vmatprep.mubr.bf16.mxu1 %v20828_v38 }
 0x616   : > { %7724 = vperm.xlu0 %15505, %v7712_v14  }
 0x618   : > { %v5509_v47 = vpop.permute.xlu0 %5508  ;;  %7739 = vperm.xlu1 %15506, %v7715_v35  }
 0x619   : > { %v17915_v32 = vpop.permute.xlu1 %6457  ;;  %v5526_v33 = vsel %vm5516_vm14, %v5509_v47, %v17642_v30  ;;  %v5525_v52 = vsel %vm5516_vm14, %v17630_v51, %v5509_v47  ;;  %v7716_v30 = vld [vmem:[%s20677_s6 + $0x28] sm:$0xff]  ;;  %v5841_v47 = vsel %vm2820_vm8, %v17708_v49, %v17690_v41  ;;  %v15586_v41 = vld [vmem:[%s20832_s0 + $0x50] sm:$0xff]  }
 0x61a   : > { %7734 = vperm.xlu0 %15505, %v7714_v37   ;;  %13767 = vmatmul.mubr.msk.bf16.vlgmr.msra.gmra.mrb[104].mxu0 %vm5018_vm13, %v17670_v46  ;;  %v5551_v51 = vsel %vm770_vm2, %v5525_v52, 0 }
 0x61b   : > { %13786 = vmatmul.mubr.msk.bf16.gmra.mrb[108].mxu1 %vm5018_vm13, %v17913_v55  ;;  %5626 = vmatpush1.bf16.msra.mxu0 %v5519_v25 }
 0x61c   : > { %13787 = vmatprep.subr.msk.bf16.mxu0 %vm770_vm2, %v5526_v33  ;;  %v17934_v5 = vpop.permute.xlu0 %6471  ;;  %7881 = vperm.xlu1 %15506, %v7876_v56   ;;  %v5847_v33 = vsel %vm2820_vm8, %v17717_v42, %v17719_v59  ;;  %v5848_v56 = vsel %vm2820_vm8, %v17719_v59, %v17741_v2 }
 0x61d   : > { %v17936_v46 = vpop.permute.xlu1 %6473  ;;  %5382 = vmatprep.mubr.bf16.mxu0 %v20828_v38  ;;  %5720 = vmatprep.mubr.bf16.mxu1 %v20828_v38 }
 0x61e   : > { %7744 = vperm.xlu0 %15505, %v7716_v30   ;;  %v15587_v30 = vld [vmem:[%s20832_s0 + $0x58] sm:$0xff]  }
 0x61f   : > { %5628 = vmatpush1.bf16.msra.mxu0 %v5551_v51 }
 0x620   : > { %v17947_v20 = vpop.permute.xlu0 %6461  ;;  %7891 = vperm.xlu1 %15506, %v7878_v62  }
 0x621   : > { %v5816_v44 = vpop.permute.xlu1 %5815 }
 0x622   : > { %7886 = vperm.xlu0 %15505, %v7877_v40   ;;  %13768 = vmatmul.mubr.msk.bf16.gmra.mrb[108].mxu0 %vm5018_vm13, %v17699_v31  ;;  %v5840_v17 = vsel %vm2820_vm8, %v5816_v44, %v17708_v49  ;;  %v5844_v31 = vsel %vm2820_vm8, %v17676_v6, %v17706_v7  ;;  %v5839_v1 = vsel %vm2820_vm8, %v17674_v3, %v5816_v44 }
 0x623   : > { %13792 = vmatmul.mubr.msk.bf16.vlgmr.msra.gmra.mrb[112].mxu1 %vm5018_vm13, %v17836_v21  ;;  %5945 = vmatprep.subr.bf16.mxu0 %v5840_v17 }
 0x624   : > { %5883 = vmatpush1.bf16.msra.mxu1 %v5837_v36  ;;  %v17964_v28 = vpop.permute.xlu0 %6475  ;;  %5392 = vmatprep.mubr.bf16.mxu0 %v20828_v38 }
 0x625   : > { %13804 = vmatprep.subr.msk.bf16.mxu1 %vm770_vm2, %v5844_v31  ;;  %v17968_v16 = vpop.permute.xlu1 %6772  ;;  %5730 = vmatprep.mubr.bf16.mxu1 %v20828_v38  ;;  %v6157_v31 = vsel %vm3546_vm10, %v17743_v12, %v17732_v19 }
 0x628   : > { %5885 = vmatpush1.bf16.msra.mxu1 %v5865_v29  ;;  %v5830_v9 = vpop.permute.xlu0 %5829  ;;  %v6163_v29 = vsel %vm3546_vm10, %v17769_v11, %v17751_v23  ;;  %v6162_v11 = vsel %vm3546_vm10, %v17786_v22, %v17821_v60 }
 0x629   : > { %6008 = vmatprep.subr.bf16.mxu1 %v5842_v8  ;;  %v17975_v6 = vpop.permute.xlu1 %6770  ;;  %v5846_v26 = vsel %vm2820_vm8, %v5830_v9, %v17717_v42  ;;  %v6158_v42 = vsel %vm3546_vm10, %v17732_v19, %v17749_v58  ;;  %v6164_v8 = vsel %vm3546_vm10, %v17751_v23, %v17784_v61 }
 0x62a   : > { %13769 = vmatmul.mubr.msk.bf16.gmra.mrb[112].mxu0 %vm5018_vm13, %v17726_v24  ;;  %v5845_v24 = vsel %vm2820_vm8, %v17706_v7, %v5830_v9  ;;  %v6185_v9 = vsel %vm770_vm2, %v6163_v29, 0 }
 0x62b   : > { %13793 = vmatmul.mubr.msk.bf16.gmra.mrb[116].mxu1 %vm5018_vm13, %v17877_v0  ;;  %5657 = vmatprep.mubr.bf16.mxu0 %v20828_v38  ;;  %v5871_v3 = vsel %vm770_vm2, %v5845_v24, 0 }
 0x62c   : > { %v17982_v54 = vpop.permute.xlu0 %6774  ;;  %5740 = vmatprep.mubr.bf16.mxu1 %v20828_v38 }
 0x62d   : > { %v17985_v43 = vpop.permute.xlu1 %6786 }
 0x630   : > { %v17987_v48 = vpop.permute.xlu0 %6784 }
 0x631   : > { %v6136_v10 = vpop.permute.xlu1 %6135 }
 0x632   : > { %13788 = vmatmul.mubr.msk.bf16.vlgmr.msra.gmra.mrb[104].mxu0 %vm5018_vm13, %v17836_v21  ;;  %v6160_v7 = vsel %vm3546_vm10, %v6136_v10, %v17799_v13  ;;  %v15585_v21 = vld [vmem:[%s20832_s0 + $0x48] sm:$0xff]   ;;  %v6159_v62 = vsel %vm3546_vm10, %v17749_v58, %v6136_v10 }
 0x633   : > { %13794 = vmatmul.mubr.msk.bf16.gmra.mrb[120].mxu1 %vm5018_vm13, %v17913_v55  ;;  %5946 = vmatpush1.bf16.msra.mxu0 %v5839_v1  ;;  %v18103_v1 = vld [vmem:[%s20832_s0 + $0x60] sm:$0xff]  }
 0x634   : > { %13808 = vmatprep.subr.msk.bf16.mxu0 %vm770_vm2, %v5846_v26  ;;  %v18000_v14 = vpop.permute.xlu0 %6788  ;;  %5667 = vmatprep.mubr.bf16.mxu0 %v20828_v38 }
 0x635   : > { %5914 = vmatprep.mubr.bf16.mxu1 %v20828_v38  ;;  %v18010_v37 = vpop.permute.xlu1 %6780 }
 0x637   : > { %5948 = vmatpush1.bf16.msra.mxu0 %v5871_v3 }
 0x638   : > { %6265 = vmatprep.subr.bf16.mxu0 %v6160_v7  ;;  %v6150_v35 = vpop.permute.xlu0 %6149 }
 0x639   : > { %v18033_v49 = vpop.permute.xlu1 %6778  ;;  %v6166_v51 = vsel %vm3546_vm10, %v6150_v35, %v17808_v4 }
 0x63a   : > { %13789 = vmatmul.mubr.msk.bf16.gmra.mrb[108].mxu0 %vm5018_vm13, %v17877_v0  ;;  %v5877_v0 = vsel %vm770_vm2, %v5847_v33, 0 }
 0x63b   : > { %13805 = vmatmul.mubr.msk.bf16.vlgmr.msra.gmra.mrb[100].mxu1 %vm5018_vm13, %v15585_v21  ;;  %5677 = vmatprep.mubr.bf16.mxu0 %v20828_v38 }
 0x63c   : > { %6009 = vmatpush1.bf16.msra.mxu1 %v5841_v47  ;;  %v18025_v25 = vpop.permute.xlu0 %6792  ;;  %5924 = vmatprep.mubr.bf16.mxu1 %v20828_v38 }
 0x63d   : > { %13812 = vmatprep.subr.msk.bf16.mxu1 %vm770_vm2, %v5848_v56  ;;  %v18045_v2 = vpop.permute.xlu1 %6794  ;;  %v6161_v56 = vsel %vm3546_vm10, %v17799_v13, %v17786_v22 }
 0x640   : > { %6011 = vmatpush1.bf16.msra.mxu1 %v5877_v0  ;;  %v18038_v59 = vpop.permute.xlu0 %6782  ;;  %v6167_v0 = vsel %vm3546_vm10, %v17808_v4, %v17810_v53  ;;  %v6479_v4 = vsel %vm6477_vm15, %v17825_v15, %v17860_v18 }
 0x641   : > { %6202 = vmatprep.subr.bf16.mxu1 %v6158_v42  ;;  %v6456_v40 = vpop.permute.xlu1 %6455  ;;  %v15590_v42 = vld [vmem:[%s20832_s0 + $0x70] sm:$0xff]   ;;  %v6197_v22 = vsel %vm770_vm2, %v6167_v0, 0 }
 0x642   : > { %13790 = vmatmul.mubr.msk.bf16.gmra.mrb[112].mxu0 %vm5018_vm13, %v17913_v55  ;;  %v6165_v55 = vsel %vm3546_vm10, %v17784_v61, %v6150_v35  ;;  %v6481_v17 = vsel %vm6477_vm15, %v6456_v40, %v17915_v32  ;;  %v6480_v60 = vsel %vm6477_vm15, %v17860_v18, %v6456_v40 }
 0x643   : > { %13806 = vmatmul.mubr.msk.bf16.gmra.mrb[104].mxu1 %vm5018_vm13, %v15586_v41  ;;  %5977 = vmatprep.mubr.bf16.mxu0 %v20828_v38  ;;  %v6191_v58 = vsel %vm770_vm2, %v6165_v55, 0 }
 0x644   : > { %5934 = vmatprep.mubr.bf16.mxu1 %v20828_v38  ;;  %v18047_v52 = vpop.permute.xlu0 %6796 }
 0x645   : > { %v18066_v36 = vpop.permute.xlu1 %7093 }
 0x648   : > { %v6470_v44 = vpop.permute.xlu0 %6469 }
 0x649   : > { %v18085_v19 = vpop.permute.xlu1 %7091  ;;  %v6486_v24 = vsel %vm6477_vm15, %v17898_v27, %v6470_v44  ;;  %v6487_v26 = vsel %vm6477_vm15, %v6470_v44, %v17934_v5 }
 0x64a   : > { %13809 = vmatmul.mubr.msk.bf16.vlgmr.msra.gmra.mrb[104].mxu0 %vm5018_vm13, %v15585_v21  ;;  %v6512_v7 = vsel %vm770_vm2, %v6486_v24, 0  ;;  %v18234_v24 = vld [vmem:[%s20832_s0 + $0x90] sm:$0xff]  }
 0x64b   : > { %13807 = vmatmul.mubr.msk.bf16.gmra.mrb[108].mxu1 %vm5018_vm13, %v15587_v30  ;;  %6266 = vmatpush1.bf16.msra.mxu0 %v6159_v62  ;;  %v18168_v62 = vld [vmem:[%s20832_s0 + $0x78] sm:$0xff]  }
 0x64c   : > { %13829 = vmatprep.subr.msk.bf16.mxu0 %vm770_vm2, %v6166_v51  ;;  %5987 = vmatprep.mubr.bf16.mxu0 %v20828_v38  ;;  %v18068_v39 = vpop.permute.xlu0 %7095 }
 0x64d   : > { %6040 = vmatprep.mubr.bf16.mxu1 %v20828_v38  ;;  %v18096_v23 = vpop.permute.xlu1 %7107 }
 0x64f   : > { %6268 = vmatpush1.bf16.msra.mxu0 %v6191_v58 }
 0x650   : > { %6586 = vmatprep.subr.bf16.mxu0 %v6481_v17  ;;  %v18087_v12 = vpop.permute.xlu0 %7105  ;;  %v18186_v17 = vld [vmem:[%s20832_s0 + $0x80] sm:$0xff]  }
 0x651   : > { %v6777_v10 = vpop.permute.xlu1 %6776 }
 0x652   : > { %13810 = vmatmul.mubr.msk.bf16.gmra.mrb[108].mxu0 %vm5018_vm13, %v15586_v41  ;;  %v6802_v35 = vsel %vm6798_vm0, %v6777_v10, %v18033_v49  ;;  %v6801_v18 = vsel %vm6798_vm0, %v17982_v54, %v6777_v10 }
 0x653   : > { %13813 = vmatmul.mubr.msk.bf16.vlgmr.msra.gmra.mrb[112].mxu1 %vm5018_vm13, %v15585_v21  ;;  %5997 = vmatprep.mubr.bf16.mxu0 %v20828_v38  ;;  %v18121_v21 = vld [vmem:[%s20832_s0 + $0x68] sm:$0xff]  }
 0x654   : > { %6203 = vmatpush1.bf16.msra.mxu1 %v6157_v31  ;;  %6050 = vmatprep.mubr.bf16.mxu1 %v20828_v38  ;;  %v18098_v61 = vpop.permute.xlu0 %7109 }
 0x655   : > { %13825 = vmatprep.subr.msk.bf16.mxu1 %vm770_vm2, %v6164_v8  ;;  %v18125_v47 = vpop.permute.xlu1 %7101  ;;  %v6478_v8 = vsel %vm6477_vm15, %v17842_v50, %v17825_v15  ;;  %v18213_v15 = vld [vmem:[%s20832_s0 + $0x88] sm:$0xff]  }
 0x658   : > { %6205 = vmatpush1.bf16.msra.mxu1 %v6185_v9  ;;  %v6791_v3 = vpop.permute.xlu0 %6790  ;;  %v6484_v9 = vsel %vm6477_vm15, %v17882_v63, %v17865_v45  ;;  %v6483_v63 = vsel %vm6477_vm15, %v17901_v57, %v17947_v20 }
 0x659   : > { %6328 = vmatprep.subr.bf16.mxu1 %v6162_v11  ;;  %v18149_v13 = vpop.permute.xlu1 %7099  ;;  %v6807_v55 = vsel %vm6798_vm0, %v18000_v14, %v6791_v3  ;;  %v6808_v51 = vsel %vm6798_vm0, %v6791_v3, %v18025_v25  ;;  %v6506_v50 = vsel %vm770_vm2, %v6484_v9, 0 }
 0x65a   : > { %13811 = vmatmul.mubr.msk.bf16.gmra.mrb[112].mxu0 %vm5018_vm13, %v15587_v30  ;;  %v6833_v58 = vsel %vm770_vm2, %v6807_v55, 0 }
 0x65b   : > { %13814 = vmatmul.mubr.msk.bf16.gmra.mrb[116].mxu1 %vm5018_vm13, %v15586_v41  ;;  %6297 = vmatprep.mubr.bf16.mxu0 %v20828_v38  ;;  %v6168_v41 = vsel %vm3546_vm10, %v17810_v53, %v17838_v34 }
 0x65c   : > { %6060 = vmatprep.mubr.bf16.mxu1 %v20828_v38  ;;  %v18127_v33 = vpop.permute.xlu0 %7113 }
 0x65d   : > { %v18161_v53 = vpop.permute.xlu1 %7115 }
 0x661   : > { %v7098_v40 = vpop.permute.xlu1 %7097 }
 0x662   : > { %13830 = vmatmul.mubr.msk.bf16.vlgmr.msra.gmra.mrb[104].mxu0 %vm5018_vm13, %v18103_v1  ;;  %v7123_v31 = vsel %vm7119_vm1, %v7098_v40, %v18149_v13 }
 0x663   : > { %13815 = vmatmul.mubr.msk.bf16.gmra.mrb[120].mxu1 %vm5018_vm13, %v15587_v30  ;;  %6587 = vmatpush1.bf16.msra.mxu0 %v6480_v60  ;;  %v18151_v30 = vpop.permute.xlu0 %7103  ;;  %v6485_v60 = vsel %vm6477_vm15, %v17865_v45, %v17898_v27 }
 0x664   : > { %13850 = vmatprep.subr.msk.bf16.mxu0 %vm770_vm2, %v6487_v26  ;;  %6234 = vmatprep.mubr.bf16.mxu1 %v20828_v38  ;;  %v7122_v26 = vsel %vm7119_vm1, %v18068_v39, %v7098_v40  ;;  %v18315_v40 = vld [vmem:[%s20832_s0 + $0xb0] sm:$0xff]  }
 0x665   : > { %6307 = vmatprep.mubr.bf16.mxu0 %v20828_v38  ;;  %v18203_v11 = vpop.permute.xlu1 %7414 }
 0x667   : > { %6589 = vmatpush1.bf16.msra.mxu0 %v6512_v7  ;;  %v18163_v34 = vpop.permute.xlu0 %7117 }
 0x668   : > { %6907 = vmatprep.subr.bf16.mxu0 %v6802_v35 }
 0x669   : > { %v18221_v45 = vpop.permute.xlu1 %7412 }
 0x66a   : > { %13831 = vmatmul.mubr.msk.bf16.gmra.mrb[108].mxu0 %vm5018_vm13, %v18121_v21 }
 0x66b   : > { %13826 = vmatmul.mubr.msk.bf16.vlgmr.msra.gmra.mrb[100].mxu1 %vm5018_vm13, %v18103_v1  ;;  %6317 = vmatprep.mubr.bf16.mxu0 %v20828_v38  ;;  %v7112_v44 = vpop.permute.xlu0 %7111 }
 0x66c   : > { %6329 = vmatpush1.bf16.msra.mxu1 %v6161_v56  ;;  %6244 = vmatprep.mubr.bf16.mxu1 %v20828_v38  ;;  %v7128_v10 = vsel %vm7119_vm1, %v18098_v61, %v7112_v44  ;;  %v7129_v3 = vsel %vm7119_vm1, %v7112_v44, %v18127_v33  ;;  %v18256_v56 = vld [vmem:[%s20832_s0 + $0x98] sm:$0xff]   ;;  %v6799_v44 = vsel %vm6798_vm0, %v17975_v6, %v17968_v16 }
 0x66d   : > { %13833 = vmatprep.subr.msk.bf16.mxu1 %vm770_vm2, %v6168_v41  ;;  %v18236_v20 = vpop.permute.xlu1 %7428  ;;  %v7154_v35 = vsel %vm770_vm2, %v7128_v10, 0  ;;  %v6482_v41 = vsel %vm6477_vm15, %v17915_v32, %v17901_v57  ;;  %v6800_v32 = vsel %vm6798_vm0, %v17968_v16, %v17982_v54  ;;  %v18336_v16 = vld [vmem:[%s20832_s0 + $0xb8] sm:$0xff]  }
 0x66f   : > { %v18190_v29 = vpop.permute.xlu0 %7416 }
 0x670   : > { %6331 = vmatpush1.bf16.msra.mxu1 %v6197_v22  ;;  %v6489_v22 = vsel %vm6477_vm15, %v17936_v46, %v17964_v28 }
 0x671   : > { %6523 = vmatprep.subr.bf16.mxu1 %v6479_v4  ;;  %v18279_v4 = vld [vmem:[%s20832_s0 + $0xa0] sm:$0xff]  }
 0x672   : > { %13832 = vmatmul.mubr.msk.bf16.gmra.mrb[112].mxu0 %vm5018_vm13, %v15590_v42 }
 0x673   : > { %13827 = vmatmul.mubr.msk.bf16.gmra.mrb[104].mxu1 %vm5018_vm13, %v18121_v21  ;;  %6618 = vmatprep.mubr.bf16.mxu0 %v20828_v38 }
 0x674   : > { %6254 = vmatprep.mubr.bf16.mxu1 %v20828_v38 }
 0x67a   : > { %13851 = vmatmul.mubr.msk.bf16.vlgmr.msra.gmra.mrb[104].mxu0 %vm5018_vm13, %v18168_v62 }
 0x67b   : > { %13828 = vmatmul.mubr.msk.bf16.gmra.mrb[108].mxu1 %vm5018_vm13, %v15590_v42  ;;  %6908 = vmatpush1.bf16.msra.mxu0 %v6801_v18 }
 0x67c   : > { %13871 = vmatprep.subr.msk.bf16.mxu0 %vm770_vm2, %v6808_v51  ;;  %6360 = vmatprep.mubr.bf16.mxu1 %v20828_v38 }
 0x67d   : > { %6628 = vmatprep.mubr.bf16.mxu0 %v20828_v38 }
 0x67f   : > { %6910 = vmatpush1.bf16.msra.mxu0 %v6833_v58  ;;  %v6805_v58 = vsel %vm6798_vm0, %v17987_v48, %v17985_v43  ;;  %v6804_v48 = vsel %vm6798_vm0, %v18010_v37, %v18038_v59  ;;  %v6803_v59 = vsel %vm6798_vm0, %v18033_v49, %v18010_v37  ;;  %v7120_v49 = vsel %vm7119_vm1, %v18085_v19, %v18066_v36 }
 0x680   : > { %7228 = vmatprep.subr.bf16.mxu0 %v7123_v31  ;;  %v6806_v31 = vsel %vm6798_vm0, %v17985_v43, %v18000_v14  ;;  %v6827_v6 = vsel %vm770_vm2, %v6805_v58, 0  ;;  %v18351_v43 = vld [vmem:[%s20832_s0 + $0xc0] sm:$0xff]   ;;  %v18362_v14 = vld [vmem:[%s20832_s0 + $0xc8] sm:$0xff]   ;;  %v7124_v19 = vsel %vm7119_vm1, %v18149_v13, %v18125_v47 }
 0x682   : > { %13852 = vmatmul.mubr.msk.bf16.gmra.mrb[108].mxu0 %vm5018_vm13, %v18186_v17 }
 0x683   : > { %13834 = vmatmul.mubr.msk.bf16.vlgmr.msra.gmra.mrb[112].mxu1 %vm5018_vm13, %v18103_v1  ;;  %6638 = vmatprep.mubr.bf16.mxu0 %v20828_v38  ;;  %v18216_v1 = vpop.permute.xlu0 %7426 }
 0x684   : > { %6524 = vmatpush1.bf16.msra.mxu1 %v6478_v8  ;;  %6370 = vmatprep.mubr.bf16.mxu1 %v20828_v38  ;;  %v18383_v8 = vld [vmem:[%s20832_s0 + $0xd0] sm:$0xff]   ;;  %v7447_v13 = vsel %vm7440_vm3, %v18216_v1, %v18236_v20 }
 0x685   : > { %13846 = vmatprep.subr.msk.bf16.mxu1 %vm770_vm2, %v6485_v60 }
 0x687   : > { %v18229_v27 = vpop.permute.xlu0 %7430 }
 0x688   : > { %6526 = vmatpush1.bf16.msra.mxu1 %v6506_v50 }
 0x689   : > { %6649 = vmatprep.subr.bf16.mxu1 %v6483_v63 }
 0x68a   : > { %13853 = vmatmul.mubr.msk.bf16.gmra.mrb[112].mxu0 %vm5018_vm13, %v18213_v15 }
 0x68b   : > { %13835 = vmatmul.mubr.msk.bf16.gmra.mrb[116].mxu1 %vm5018_vm13, %v18121_v21  ;;  %6939 = vmatprep.mubr.bf16.mxu0 %v20828_v38  ;;  %v18247_v7 = vpop.permute.xlu0 %7420  ;;  %v7419_v21 = vpop.permute.xlu1 %7418 }
 0x68c   : > { %6380 = vmatprep.mubr.bf16.mxu1 %v20828_v38  ;;  %v7444_v0 = vsel %vm7440_vm3, %v7419_v21, %v18247_v7  ;;  %v7443_v54 = vsel %vm7440_vm3, %v18190_v29, %v7419_v21 }
 0x68f   : > { %v18296_v28 = vpop.permute.xlu0 %7434 }
 0x692   : > { %13872 = vmatmul.mubr.msk.bf16.vlgmr.msra.gmra.mrb[104].mxu0 %vm5018_vm13, %v18234_v24 }
 0x693   : > { %13836 = vmatmul.mubr.msk.bf16.gmra.mrb[120].mxu1 %vm5018_vm13, %v15590_v42  ;;  %7229 = vmatpush1.bf16.msra.mxu0 %v7122_v26  ;;  %v6488_v42 = vsel %vm6477_vm15, %v17934_v5, %v17936_v46  ;;  %v18294_v5 = vld [vmem:[%s20832_s0 + $0xa8] sm:$0xff]   ;;  %v7433_v46 = vpop.permute.xlu1 %7432 }
 0x694   : > { %13892 = vmatprep.subr.msk.bf16.mxu0 %vm770_vm2, %v7129_v3  ;;  %6949 = vmatprep.mubr.bf16.mxu0 %v20828_v38  ;;  %v6518_v57 = vsel %vm770_vm2, %v6488_v42, 0  ;;  %v7449_v18 = vsel %vm7440_vm3, %v18229_v27, %v7433_v46  ;;  %v7450_v55 = vsel %vm7440_vm3, %v7433_v46, %v18296_v28 }
 0x695   : > { %6555 = vmatprep.mubr.bf16.mxu1 %v20828_v38  ;;  %v7475_v51 = vsel %vm770_vm2, %v7449_v18, 0 }
 0x697   : > { %7231 = vmatpush1.bf16.msra.mxu0 %v7154_v35 }
 0x698   : > { %7549 = vmatprep.subr.bf16.mxu0 %v7444_v0 }
 0x69a   : > { %13873 = vmatmul.mubr.msk.bf16.gmra.mrb[108].mxu0 %vm5018_vm13, %v18256_v56 }
 0x69b   : > { %13847 = vmatmul.mubr.msk.bf16.vlgmr.msra.gmra.mrb[100].mxu1 %vm5018_vm13, %v18168_v62  ;;  %6959 = vmatprep.mubr.bf16.mxu0 %v20828_v38 }
 0x69c   : > { %6650 = vmatpush1.bf16.msra.mxu1 %v6482_v41  ;;  %6565 = vmatprep.mubr.bf16.mxu1 %v20828_v38 }
 0x69d   : > { %13854 = vmatprep.subr.msk.bf16.mxu1 %vm770_vm2, %v6489_v22 }
 0x6a0   : > { %6652 = vmatpush1.bf16.msra.mxu1 %v6518_v57 }
 0x6a1   : > { %6844 = vmatprep.subr.bf16.mxu1 %v6800_v32 }
 0x6a2   : > { %13874 = vmatmul.mubr.msk.bf16.gmra.mrb[112].mxu0 %vm5018_vm13, %v18279_v4 }
 0x6a3   : > { %13848 = vmatmul.mubr.msk.bf16.gmra.mrb[104].mxu1 %vm5018_vm13, %v18186_v17  ;;  %7260 = vmatprep.mubr.bf16.mxu0 %v20828_v38 }
 0x6a4   : > { %6575 = vmatprep.mubr.bf16.mxu1 %v20828_v38 }
 0x6aa   : > { %13893 = vmatmul.mubr.msk.bf16.vlgmr.msra.gmra.mrb[104].mxu0 %vm5018_vm13, %v18294_v5 }
 0x6ab   : > { %13849 = vmatmul.mubr.msk.bf16.gmra.mrb[108].mxu1 %vm5018_vm13, %v18213_v15  ;;  %7550 = vmatpush1.bf16.msra.mxu0 %v7443_v54 }
 0x6ac   : > { %13913 = vmatprep.subr.msk.bf16.mxu0 %vm770_vm2, %v7450_v55  ;;  %6681 = vmatprep.mubr.bf16.mxu1 %v20828_v38 }
 0x6ad   : > { %7270 = vmatprep.mubr.bf16.mxu0 %v20828_v38 }
 0x6af   : > { %7552 = vmatpush1.bf16.msra.mxu0 %v7475_v51 }
 0x6b2   : > { %13894 = vmatmul.mubr.msk.bf16.gmra.mrb[108].mxu0 %vm5018_vm13, %v18315_v40 }
 0x6b3   : > { %13855 = vmatmul.mubr.msk.bf16.vlgmr.msra.gmra.mrb[112].mxu1 %vm5018_vm13, %v18168_v62  ;;  %7280 = vmatprep.mubr.bf16.mxu0 %v20828_v38  ;;  %v6809_v62 = vsel %vm6798_vm0, %v18025_v25, %v18045_v2  ;;  %v7121_v25 = vsel %vm7119_vm1, %v18066_v36, %v18068_v39  ;;  %v7125_v36 = vsel %vm7119_vm1, %v18125_v47, %v18151_v30 }
 0x6b4   : > { %6845 = vmatpush1.bf16.msra.mxu1 %v6799_v44  ;;  %6691 = vmatprep.mubr.bf16.mxu1 %v20828_v38  ;;  %v6839_v37 = vsel %vm770_vm2, %v6809_v62, 0  ;;  %v7442_v47 = vsel %vm7440_vm3, %v18203_v11, %v18190_v29  ;;  %v7448_v30 = vsel %vm7440_vm3, %v18236_v20, %v18229_v27  ;;  %v7423_v29 = vpop.permute.xlu1 %7422 }
 0x6b5   : > { %13867 = vmatprep.subr.msk.bf16.mxu1 %vm770_vm2, %v6806_v31 }
 0x6b8   : > { %6847 = vmatpush1.bf16.msra.mxu1 %v6827_v6 }
 0x6b9   : > { %6970 = vmatprep.subr.bf16.mxu1 %v6804_v48 }
 0x6ba   : > { %13895 = vmatmul.mubr.msk.bf16.gmra.mrb[112].mxu0 %vm5018_vm13, %v18336_v16 }
 0x6bb   : > { %13856 = vmatmul.mubr.msk.bf16.gmra.mrb[116].mxu1 %vm5018_vm13, %v18186_v17  ;;  %7581 = vmatprep.mubr.bf16.mxu0 %v20828_v38  ;;  %v6810_v17 = vsel %vm6798_vm0, %v18045_v2, %v18047_v52  ;;  %v7126_v2 = vsel %vm7119_vm1, %v18087_v12, %v18096_v23  ;;  %v7127_v52 = vsel %vm7119_vm1, %v18096_v23, %v18098_v61 }
 0x6bc   : > { %6701 = vmatprep.mubr.bf16.mxu1 %v20828_v38  ;;  %v7148_v39 = vsel %vm770_vm2, %v7126_v2, 0  ;;  %v7130_v12 = vsel %vm7119_vm1, %v18127_v33, %v18161_v53  ;;  %v7131_v23 = vsel %vm7119_vm1, %v18161_v53, %v18163_v34  ;;  %v7441_v33 = vsel %vm7440_vm3, %v18221_v45, %v18203_v11  ;;  %v7425_v53 = vpop.permute.xlu0 %7424  ;;  %v7437_v11 = vpop.permute.xlu1 %7436 }
 0x6bd   : > { %v7160_v61 = vsel %vm770_vm2, %v7130_v12, 0  ;;  %v7469_v34 = vsel %vm770_vm2, %v7447_v13, 0  ;;  %v7446_v9 = vsel %vm7440_vm3, %v7423_v29, %v7425_v53  ;;  %v7451_v50 = vsel %vm7440_vm3, %v18296_v28, %v7437_v11 }
 0x6be   : > { %v7481_v63 = vsel %vm770_vm2, %v7451_v50, 0 }
 0x6c0   : > { %v7439_v60 = vpop.permute.xlu0 %7438  ;;  %v18489_v27 = vpop.permute.xlu1 %7719 }
 0x6c1   : > { %v7452_v1 = vsel %vm7440_vm3, %v7437_v11, %v7439_v60 }
 0x6c2   : > { %13914 = vmatmul.mubr.msk.bf16.vlgmr.msra.gmra.mrb[104].mxu0 %vm5018_vm13, %v18351_v43 }
 0x6c3   : > { %13857 = vmatmul.mubr.msk.bf16.gmra.mrb[120].mxu1 %vm5018_vm13, %v18213_v15  ;;  %7591 = vmatprep.mubr.bf16.mxu0 %v20828_v38  ;;  %v7445_v15 = vsel %vm7440_vm3, %v18247_v7, %v7423_v29 }
 0x6c4   : > { %6876 = vmatprep.mubr.bf16.mxu1 %v20828_v38  ;;  %v18491_v20 = vpop.permute.xlu0 %7724  ;;  %v18509_v42 = vpop.permute.xlu1 %7729 }
 0x6ca   : > { %13915 = vmatmul.mubr.msk.bf16.gmra.mrb[108].mxu0 %vm5018_vm13, %v18362_v14 }
 0x6cb   : > { %13868 = vmatmul.mubr.msk.bf16.vlgmr.msra.gmra.mrb[100].mxu1 %vm5018_vm13, %v18234_v24  ;;  %7601 = vmatprep.mubr.bf16.mxu0 %v20828_v38 }
 0x6cc   : > { %6971 = vmatpush1.bf16.msra.mxu1 %v6803_v59  ;;  %6886 = vmatprep.mubr.bf16.mxu1 %v20828_v38 }
 0x6cd   : > { %13875 = vmatprep.subr.msk.bf16.mxu1 %vm770_vm2, %v6810_v17 }
 0x6d0   : > { %6973 = vmatpush1.bf16.msra.mxu1 %v6839_v37 }
 0x6d1   : > { %7165 = vmatprep.subr.bf16.mxu1 %v7121_v25 }
 0x6d2   : > { %13916 = vmatmul.mubr.msk.bf16.gmra.mrb[112].mxu0 %vm5018_vm13, %v18383_v8 }
 0x6d3   : > { %13869 = vmatmul.mubr.msk.bf16.gmra.mrb[104].mxu1 %vm5018_vm13, %v18256_v56  ;;  %7941 = vmatprep.mubr.bf16.mxu0 %v20828_v38 }
 0x6d4   : > { %6896 = vmatprep.mubr.bf16.mxu1 %v20828_v38 }
 0x6db   : > { %13870 = vmatmul.mubr.msk.bf16.gmra.mrb[108].mxu1 %vm5018_vm13, %v18279_v4 }
 0x6dc   : > { %7002 = vmatprep.mubr.bf16.mxu1 %v20828_v38 }
 0x6e3   : > { %13876 = vmatmul.mubr.msk.bf16.vlgmr.msra.gmra.mrb[112].mxu1 %vm5018_vm13, %v18234_v24 }
 0x6e4   : > { %7166 = vmatpush1.bf16.msra.mxu1 %v7120_v49  ;;  %7012 = vmatprep.mubr.bf16.mxu1 %v20828_v38 }
 0x6e5   : > { %13888 = vmatprep.subr.msk.bf16.mxu1 %vm770_vm2, %v7127_v52 }
 0x6e8   : > { %7168 = vmatpush1.bf16.msra.mxu1 %v7148_v39 }
 0x6e9   : > { %7291 = vmatprep.subr.bf16.mxu1 %v7125_v36 }
 0x6eb   : > { %13877 = vmatmul.mubr.msk.bf16.gmra.mrb[116].mxu1 %vm5018_vm13, %v18256_v56 }
 0x6ec   : > { %7022 = vmatprep.mubr.bf16.mxu1 %v20828_v38 }
 0x6f3   : > { %13878 = vmatmul.mubr.msk.bf16.gmra.mrb[120].mxu1 %vm5018_vm13, %v18279_v4  ;;  %v18511_v4 = vpop.permute.xlu0 %7734 }
 0x6f4   : > { %7197 = vmatprep.mubr.bf16.mxu1 %v20828_v38 }
 0x6f7   : > { %v18531_v58 = vpop.permute.xlu0 %7744 }
 0x6fb   : > { %13889 = vmatmul.mubr.msk.bf16.vlgmr.msra.gmra.mrb[100].mxu1 %vm5018_vm13, %v18294_v5 }
 0x6fc   : > { %7292 = vmatpush1.bf16.msra.mxu1 %v7124_v19  ;;  %7207 = vmatprep.mubr.bf16.mxu1 %v20828_v38 }
 0x6fd   : > { %13896 = vmatprep.subr.msk.bf16.mxu1 %vm770_vm2, %v7131_v23 }
 0x700   : > { %7294 = vmatpush1.bf16.msra.mxu1 %v7160_v61 }
 0x701   : > { %7486 = vmatprep.subr.bf16.mxu1 %v7442_v47 }
 0x703   : > { %13890 = vmatmul.mubr.msk.bf16.gmra.mrb[104].mxu1 %vm5018_vm13, %v18315_v40 }
 0x704   : > { %7217 = vmatprep.mubr.bf16.mxu1 %v20828_v38 }
 0x70b   : > { %13891 = vmatmul.mubr.msk.bf16.gmra.mrb[108].mxu1 %vm5018_vm13, %v18336_v16 }
 0x70c   : > { %7323 = vmatprep.mubr.bf16.mxu1 %v20828_v38 }
 0x713   : > { %13897 = vmatmul.mubr.msk.bf16.vlgmr.msra.gmra.mrb[112].mxu1 %vm5018_vm13, %v18294_v5 }
 0x714   : > { %7487 = vmatpush1.bf16.msra.mxu1 %v7441_v33  ;;  %7333 = vmatprep.mubr.bf16.mxu1 %v20828_v38 }
 0x715   : > { %13909 = vmatprep.subr.msk.bf16.mxu1 %vm770_vm2, %v7448_v30 }
 0x718   : > { %7489 = vmatpush1.bf16.msra.mxu1 %v7469_v34 }
 0x719   : > { %7612 = vmatprep.subr.bf16.mxu1 %v7446_v9 }
 0x71b   : > { %13898 = vmatmul.mubr.msk.bf16.gmra.mrb[116].mxu1 %vm5018_vm13, %v18315_v40  ;;  %v18529_v40 = vpop.permute.xlu1 %7739 }
 0x71c   : > { %7343 = vmatprep.mubr.bf16.mxu1 %v20828_v38 }
 0x723   : > { %13899 = vmatmul.mubr.msk.bf16.gmra.mrb[120].mxu1 %vm5018_vm13, %v18336_v16 }
 0x724   : > { %7518 = vmatprep.mubr.bf16.mxu1 %v20828_v38 }
 0x72b   : > { %13910 = vmatmul.mubr.msk.bf16.vlgmr.msra.gmra.mrb[100].mxu1 %vm5018_vm13, %v18351_v43 }
 0x72c   : > { %7613 = vmatpush1.bf16.msra.mxu1 %v7445_v15  ;;  %7528 = vmatprep.mubr.bf16.mxu1 %v20828_v38 }
 0x72d   : > { %13917 = vmatprep.subr.msk.bf16.mxu1 %vm770_vm2, %v7452_v1  ;;  %vm7902_vm2 = vcmask 392192  }
 0x730   : > { %7615 = vmatpush1.bf16.msra.mxu1 %v7481_v63 }
 0x733   : > { %13911 = vmatmul.mubr.msk.bf16.gmra.mrb[104].mxu1 %vm5018_vm13, %v18362_v14 }
 0x734   : > { %7538 = vmatprep.mubr.bf16.mxu1 %v20828_v38 }
 0x73b   : > { %13912 = vmatmul.mubr.msk.bf16.gmra.mrb[108].mxu1 %vm5018_vm13, %v18383_v8 }
 0x73c   : > { %7644 = vmatprep.mubr.bf16.mxu1 %v20828_v38 }
 0x743   : > { %13918 = vmatmul.mubr.msk.bf16.vlgmr.msra.gmra.mrb[112].mxu1 %vm5018_vm13, %v18351_v43 }
 0x744   : > { %7654 = vmatprep.mubr.bf16.mxu1 %v20828_v38 }
 0x74b   : > { %13919 = vmatmul.mubr.msk.bf16.gmra.mrb[116].mxu1 %vm5018_vm13, %v18362_v14 }
 0x74c   : > { %7664 = vmatprep.mubr.bf16.mxu1 %v20828_v38 }
 0x753   : > { %13920 = vmatmul.mubr.msk.bf16.gmra.mrb[120].mxu1 %vm5018_vm13, %v18383_v8 }
 0x795   : > { %v7583_v45 = vpop.f32.mrb[104].mxu0 }
 0x796   : > { %v7585_v24 = vpop.f32.mrb[105].mxu0  ;;  %v18494_v10 = vadd.f32 %v18489_v27, %v7583_v45 }
 0x797   : > { %v7587_v26 = vpop.f32.mrb[106].mxu0  ;;  %v18500_v21 = vadd.f32 %v18489_v27, %v7585_v24 }
 0x798   : > { %v18497_v3 = vadd.f32 %v18491_v20, %v7587_v26  ;;  %v7589_v7 = vpop.f32.mrb[107].mxu0 }
 0x799   : > { %v18503_v35 = vadd.f32 %v18491_v20, %v7589_v7 }
 0x79a   : > { %v7860_v56 = vpack.c.bf16 %v18497_v3, %v18494_v10 }
 0x79b   : > { %v7861_v0 = vpack.c.bf16 %v18503_v35, %v18500_v21  ;;  %v15604_v35 = vld [vmem:[%s20678_s7 + $0x8] ss:$0 sps:$4 sm:$0xff]  }
 0x79d   : > { %v7593_v41 = vpop.f32.mrb[108].mxu0 }
 0x79e   : > { %v7595_v22 = vpop.f32.mrb[109].mxu0  ;;  %v18514_v32 = vadd.f32 %v18509_v42, %v7593_v41  ;;  %v15603_v41 = vld [vmem:[%s20678_s7] sm:$0xff]  }
 0x79f   : > { %v7597_v57 = vpop.f32.mrb[110].mxu0  ;;  %v18520_v28 = vadd.f32 %v18509_v42, %v7595_v22 }
 0x7a0   : > { %v18517_v5 = vadd.f32 %v18511_v4, %v7597_v57  ;;  %v7599_v46 = vpop.f32.mrb[111].mxu0 }
 0x7a1   : > { %v18523_v54 = vadd.f32 %v18511_v4, %v7599_v46 }
 0x7a2   : > { %v7866_v18 = vpack.c.bf16 %v18517_v5, %v18514_v32 }
 0x7a3   : > { %v7867_v55 = vpack.c.bf16 %v18523_v54, %v18520_v28 }
 0x7a5   : > { %v7603_v51 = vpop.f32.mrb[112].mxu0 }
 0x7a6   : > { %v7605_v44 = vpop.f32.mrb[113].mxu0  ;;  %v18534_v16 = vadd.f32 %v18529_v40, %v7603_v51 }
 0x7a7   : > { %v7607_v31 = vpop.f32.mrb[114].mxu0  ;;  %v18540_v43 = vadd.f32 %v18529_v40, %v7605_v44 }
 0x7a8   : > { %v18537_v6 = vadd.f32 %v18531_v58, %v7607_v31  ;;  %v7609_v48 = vpop.f32.mrb[115].mxu0 }
 0x7a9   : > { %v18543_v14 = vadd.f32 %v18531_v58, %v7609_v48 }
 0x7aa   : > { %v7872_v59 = vpack.c.bf16 %v18537_v6, %v18534_v16 }
 0x7ab   : > { %v7873_v62 = vpack.c.bf16 %v18543_v14, %v18540_v43 }
 0x7fe   : > { %v7520_v17 = vpop.f32.mrb[100].mxu1 }
 0x7ff   : > { %v7522_v8 = vpop.f32.mrb[101].mxu1  ;;  %v7747_v25 = vadd.f32 %v18489_v27, %v7520_v17 }
 0x800   : > { %v7524_v37 = vpop.f32.mrb[102].mxu1  ;;  %v7748_v52 = vadd.f32 %v18489_v27, %v7522_v8 }
 0x801   : > { %v7753_v49 = vadd.f32 %v18491_v20, %v7524_v37  ;;  %v7526_v2 = vpop.f32.mrb[103].mxu1  ;;  %v7887_v37 = vpop.permute.xlu0 %7886 }
 0x802   : > { %v7754_v39 = vadd.f32 %v18491_v20, %v7526_v2 }
 0x803   : > { %v7858_v36 = vpack.c.bf16 %v7753_v49, %v7747_v25 }
 0x804   : > { %v7859_v19 = vpack.c.bf16 %v7754_v39, %v7748_v52 }
 0x806   : > { %v7530_v12 = vpop.f32.mrb[104].mxu1  ;;  %7909 = vmatprep.subr.bf16.mxu0 %v7859_v19 }
 0x807   : > { %v7532_v23 = vpop.f32.mrb[105].mxu1  ;;  %7910 = vmatpush1.bf16.msra.mxu0 %v7858_v36  ;;  %v7759_v47 = vadd.f32 %v18509_v42, %v7530_v12 }
 0x808   : > { %v7534_v61 = vpop.f32.mrb[106].mxu1  ;;  %v7760_v30 = vadd.f32 %v18509_v42, %v7532_v23 }
 0x809   : > { %v7765_v33 = vadd.f32 %v18511_v4, %v7534_v61  ;;  %v7536_v13 = vpop.f32.mrb[107].mxu1 }
 0x80a   : > { %v7766_v53 = vadd.f32 %v18511_v4, %v7536_v13 }
 0x80b   : > { %v7864_v34 = vpack.c.bf16 %v7765_v33, %v7759_v47 }
 0x80c   : > { %v7865_v29 = vpack.c.bf16 %v7766_v53, %v7760_v30 }
 0x80e   : > { %v7540_v9 = vpop.f32.mrb[108].mxu1  ;;  %7911 = vmatprep.subr.bf16.mxu0 %v7865_v29 }
 0x80f   : > { %v7542_v11 = vpop.f32.mrb[109].mxu1  ;;  %7912 = vmatpush1.bf16.msra.mxu0 %v7864_v34  ;;  %v7771_v15 = vadd.f32 %v18529_v40, %v7540_v9 }
 0x810   : > { %v7544_v60 = vpop.f32.mrb[110].mxu1  ;;  %v7772_v63 = vadd.f32 %v18529_v40, %v7542_v11 }
 0x811   : > { %v7777_v50 = vadd.f32 %v18531_v58, %v7544_v60  ;;  %v7546_v1 = vpop.f32.mrb[111].mxu1 }
 0x812   : > { %v7778_v45 = vadd.f32 %v18531_v58, %v7546_v1 }
 0x813   : > { %v7870_v24 = vpack.c.bf16 %v7777_v50, %v7771_v15 }
 0x814   : > { %v7871_v26 = vpack.c.bf16 %v7778_v45, %v7772_v63 }
 0x816   : > { %v7646_v7 = vpop.f32.mrb[112].mxu1  ;;  %7913 = vmatprep.subr.bf16.mxu0 %v7871_v26 }
 0x817   : > { %v7648_v22 = vpop.f32.mrb[113].mxu1  ;;  %7914 = vmatpush1.bf16.msra.mxu0 %v7870_v24  ;;  %v7751_v51 = vadd.f32 %v18489_v27, %v7646_v7 }
 0x818   : > { %v7752_v57 = vadd.f32 %v18489_v27, %v7648_v22  ;;  %v7650_v46 = vpop.f32.mrb[114].mxu1  ;;  %7960 = vmatprep.subr.bf16.mxu0 %v7861_v0 }
 0x819   : > { %v7757_v44 = vadd.f32 %v18491_v20, %v7650_v46  ;;  %v7652_v31 = vpop.f32.mrb[115].mxu1 }
 0x81a   : > { %7788 = vst [vmem:[#allocation2 + $0x28] sm:$0xff] %v7752_v57  ;;  %v7758_v48 = vadd.f32 %v18491_v20, %v7652_v31  ;;  %13923 = vmatmul.mubr.msk.bf16.vlgmr.msra.gmra.mrb[116].mxu0 %vm7902_vm2, %v15603_v41 }
 0x81b   : > { %7961 = vmatpush1.bf16.msra.mxu0 %v7860_v56  ;;  %7951 = vmatprep.mubr.bf16.mxu0 %v20828_v38  ;;  %v7862_v43 = vpack.c.bf16 %v7757_v44, %v7751_v51 }
 0x81c   : > { %7962 = vmatprep.subr.bf16.mxu0 %v7867_v55  ;;  %v7863_v27 = vpack.c.bf16 %v7758_v48, %v7752_v57 }
 0x81e   : > { %v7656_v21 = vpop.f32.mrb[116].mxu1 }
 0x81f   : > { %v7658_v20 = vpop.f32.mrb[117].mxu1  ;;  %7963 = vmatpush1.bf16.msra.mxu0 %v7866_v18  ;;  %v7763_v56 = vadd.f32 %v18509_v42, %v7656_v21 }
 0x820   : > { %v7764_v10 = vadd.f32 %v18509_v42, %v7658_v20  ;;  %v7660_v3 = vpop.f32.mrb[118].mxu1  ;;  %7964 = vmatprep.subr.bf16.mxu0 %v7873_v62 }
 0x821   : > { %v7769_v0 = vadd.f32 %v18511_v4, %v7660_v3  ;;  %v7662_v28 = vpop.f32.mrb[119].mxu1 }
 0x822   : > { %v7770_v54 = vadd.f32 %v18511_v4, %v7662_v28  ;;  %13924 = vmatmul.mubr.msk.bf16.gmra.mrb[120].mxu0 %vm7902_vm2, %v15604_v35 }
 0x823   : > { %7965 = vmatpush1.bf16.msra.mxu0 %v7872_v59  ;;  %7992 = vmatprep.mubr.bf16.mxu0 %v20828_v38  ;;  %v7868_v32 = vpack.c.bf16 %v7769_v0, %v7763_v56 }
 0x824   : > { %8011 = vmatprep.subr.bf16.mxu0 %v7863_v27  ;;  %v7869_v5 = vpack.c.bf16 %v7770_v54, %v7764_v10 }
 0x826   : > { %v7666_v18 = vpop.f32.mrb[120].mxu1 }
 0x827   : > { %v7668_v55 = vpop.f32.mrb[121].mxu1  ;;  %v7775_v62 = vadd.f32 %v18529_v40, %v7666_v18 }
 0x828   : > { %v7776_v42 = vadd.f32 %v18529_v40, %v7668_v55  ;;  %v7670_v14 = vpop.f32.mrb[122].mxu1 }
 0x829   : > { %v7781_v4 = vadd.f32 %v18531_v58, %v7670_v14  ;;  %v7672_v17 = vpop.f32.mrb[123].mxu1  ;;  %v20754_v14 = vmov 0.0  }
 0x82a   : > { %v7782_v8 = vadd.f32 %v18531_v58, %v7672_v17  ;;  %13925 = vmatmul.mubr.msk.bf16.vlgmr.msra.gmra.mrb[124].mxu0 %vm7902_vm2, %v15603_v41  ;;  %v7882_v58 = vpop.permute.xlu1 %7881  ;;  %14416 = vmatprep.subr.bf16.mxu1 %v20754_v14 }
 0x82b   : > { %8012 = vmatpush1.bf16.msra.mxu0 %v7862_v43  ;;  %8002 = vmatprep.mubr.bf16.mxu0 %v20828_v38  ;;  %v7874_v16 = vpack.c.bf16 %v7781_v4, %v7775_v62 }
 0x82c   : > { %8013 = vmatprep.subr.bf16.mxu0 %v7869_v5  ;;  %v7875_v6 = vpack.c.bf16 %v7782_v8, %v7776_v42  ;;  %14420 = vmatprep.mubr.msk.bf16.mxu1 %vm15769_vm5, %v20754_v14 }
 0x82e   : > { %v7892_v23 = vpop.permute.xlu1 %7891 }
 0x82f   : > { %8014 = vmatpush1.bf16.msra.mxu0 %v7868_v32 }
 0x830   : > { %8015 = vmatprep.subr.bf16.mxu0 %v7875_v6 }
 0x832   : > { %13926 = vmatmul.mubr.msk.bf16.gmra.mrb[128].mxu0 %vm7902_vm2, %v15604_v35 }
 0x833   : > { %8016 = vmatpush1.bf16.msra.mxu0 %v7874_v16  ;;  %8043 = vmatprep.mubr.bf16.mxu0 %v20828_v38 }
 0x83a   : > { %13927 = vmatmul.mubr.msk.bf16.vlgmr.msra.gmra.mrb[132].mxu0 %vm7902_vm2, %v15603_v41 }
 0x83b   : > { %8053 = vmatprep.mubr.bf16.mxu0 %v20828_v38 }
 0x842   : > { %13928 = vmatmul.mubr.msk.bf16.gmra.mrb[136].mxu0 %vm7902_vm2, %v15604_v35 }
 0x843   : > { %8246 = vmatprep.mubr.bf16.mxu0 %v20828_v38 }
 0x8ed   : > { %v7943_v40 = vpop.f32.mrb[116].mxu0 }
 0x8ee   : > { %v7945_v59 = vpop.f32.mrb[117].mxu0  ;;  %v7944_v49 = vadd.f32 %v7943_v40, %v7882_v58 }
 0x8ef   : > { %v7947_v25 = vpop.f32.mrb[118].mxu0  ;;  %v7946_v39 = vadd.f32 %v7945_v59, %v7882_v58 }
 0x8f0   : > { %v7948_v2 = vadd.f32 %v7947_v25, %v7887_v37  ;;  %v7949_v52 = vpop.f32.mrb[119].mxu0 }
 0x8f1   : > { %v7950_v36 = vadd.f32 %v7949_v52, %v7887_v37 }
 0x8f2   : > { %v18606_v19 = vpack.c.bf16 %v7948_v2, %v7944_v49  ;;  %v18766_v2 = vld [vmem:[%s20680_s9 + $0x18] sm:$0xff]  }
 0x8f3   : > { %v18608_v12 = vpack.c.bf16 %v7950_v36, %v7946_v39 }
 0x8f4   : > { %8150 = vrot.lane.b32.xlu0 %v18606_v19, %s20829_s4 }
 0x8f5   : > { %v7953_v61 = vpop.f32.mrb[120].mxu0 }
 0x8f6   : > { %v7954_v47 = vadd.f32 %v7953_v61, %v7892_v23  ;;  %v7955_v33 = vpop.f32.mrb[121].mxu0 }
 0x8f7   : > { %v7956_v13 = vadd.f32 %v7955_v33, %v7892_v23  ;;  %v7957_v30 = vpop.f32.mrb[122].mxu0 }
 0x8f8   : > { %v7958_v53 = vpop.f32.mrb[123].mxu0  ;;  %8152 = vrot.lane.b32.xlu0 %v18608_v12, %s20829_s4  ;;  %v18614_v34 = vpack.c.bf16 %v7954_v47, %v7954_v47 }
 0x8f9   : > { %v18616_v29 = vpack.c.bf16 %v7956_v13, %v7956_v13 }
 0x8fa   : > { %8162 = vrot.lane.b32.xlu1 %v18614_v34, %s20829_s4 }
 0x8fc   : > { %8164 = vrot.lane.b32.xlu0 %v18616_v29, %s20829_s4 }
 0x8fd   : > { %v7994_v9 = vpop.f32.mrb[124].mxu0 }
 0x8fe   : > { %v7996_v11 = vpop.f32.mrb[125].mxu0  ;;  %v7995_v15 = vadd.f32 %v7994_v9, %v7882_v58 }
 0x8ff   : > { %v7998_v60 = vpop.f32.mrb[126].mxu0  ;;  %v7997_v63 = vadd.f32 %v7996_v11, %v7882_v58 }
 0x900   : > { %v7999_v50 = vadd.f32 %v7998_v60, %v7887_v37  ;;  %v8000_v1 = vpop.f32.mrb[127].mxu0  ;;  %v18806_v60 = vld [vmem:[%s20680_s9 + $0x28] sm:$0xff]  }
 0x901   : > { %v8001_v45 = vadd.f32 %v8000_v1, %v7887_v37 }
 0x902   : > { %v18622_v24 = vpack.c.bf16 %v7999_v50, %v7995_v15 }
 0x903   : > { %v18624_v26 = vpack.c.bf16 %v8001_v45, %v7997_v63 }
 0x904   : > { %8154 = vrot.lane.b32.xlu1 %v18622_v24, %s20829_s4 }
 0x905   : > { %v8004_v7 = vpop.f32.mrb[128].mxu0  ;;  %8156 = vrot.lane.b32.xlu0 %v18624_v26, %s20829_s4 }
 0x906   : > { %v8005_v41 = vadd.f32 %v8004_v7, %v7892_v23  ;;  %v8006_v22 = vpop.f32.mrb[129].mxu0 }
 0x907   : > { %v8007_v57 = vadd.f32 %v8006_v22, %v7892_v23  ;;  %v8008_v46 = vpop.f32.mrb[130].mxu0 }
 0x908   : > { %v8009_v51 = vpop.f32.mrb[131].mxu0  ;;  %v18630_v44 = vpack.c.bf16 %v8005_v41, %v8005_v41 }
 0x909   : > { %v18632_v31 = vpack.c.bf16 %v8007_v57, %v8007_v57 }
 0x90a   : > { %8166 = vrot.lane.b32.xlu1 %v18630_v44, %s20829_s4 }
 0x90b   : > { %8168 = vrot.lane.b32.xlu0 %v18632_v31, %s20829_s4 }
 0x90d   : > { %v8045_v48 = vpop.f32.mrb[132].mxu0 }
 0x90e   : > { %v8046_v43 = vadd.f32 %v8045_v48, %v7882_v58  ;;  %v8047_v27 = vpop.f32.mrb[133].mxu0 }
 0x90f   : > { %v8048_v21 = vadd.f32 %v8047_v27, %v7882_v58  ;;  %v8049_v35 = vpop.f32.mrb[134].mxu0 }
 0x910   : > { %v8050_v20 = vadd.f32 %v8049_v35, %v7887_v37  ;;  %v8051_v10 = vpop.f32.mrb[135].mxu0 }
 0x911   : > { %v8052_v3 = vadd.f32 %v8051_v10, %v7887_v37 }
 0x912   : > { %v18638_v56 = vpack.c.bf16 %v8050_v20, %v8046_v43 }
 0x913   : > { %v18640_v0 = vpack.c.bf16 %v8052_v3, %v8048_v21 }
 0x914   : > { %8158 = vrot.lane.b32.xlu1 %v18638_v56, %s20829_s4 }
 0x915   : > { %v8055_v28 = vpop.f32.mrb[136].mxu0  ;;  %8160 = vrot.lane.b32.xlu0 %v18640_v0, %s20829_s4 }
 0x916   : > { %v8056_v54 = vadd.f32 %v8055_v28, %v7892_v23  ;;  %v8057_v32 = vpop.f32.mrb[137].mxu0 }
 0x917   : > { %v8058_v5 = vadd.f32 %v8057_v32, %v7892_v23  ;;  %v8059_v18 = vpop.f32.mrb[138].mxu0  ;;  %v18782_v23 = vld [vmem:[%s20680_s9 + $0x20] sm:$0xff]  }
 0x918   : > { %8078 = vst [vmem:[#allocation3 + $0xb0] sm:$0xff] %v8056_v54  ;;  %v18646_v55 = vpack.c.bf16 %v8056_v54, %v8056_v54  ;;  %v8060_v42 = vpop.f32.mrb[139].mxu0 }
 0x919   : > { %8079 = vst [vmem:[#allocation3 + $0xb8] sm:$0xff] %v8058_v5  ;;  %8643 = vrot.lane.b32.xlu0 %v18608_v12, %s20833_s1  ;;  %v18653_v62 = vpack.c.bf16 %v8058_v5, %v8058_v5  ;;  %v8422_v5 = vsel %vm4651_vm11, %v18614_v34, 0 }
 0x91a   : > { %8170 = vrot.lane.b32.xlu1 %v18646_v55, %s20829_s4 }
 0x91d   : > { %8641 = vrot.lane.b32.xlu0 %v18606_v19, %s20833_s1 }
 0x91e   : > { %8172 = vrot.lane.b32.xlu1 %v18653_v62, %s20829_s4 }
 0x921   : > { %8655 = vrot.lane.b32.xlu0 %v18616_v29, %s20833_s1 }
 0x922   : > { %8645 = vrot.lane.b32.xlu1 %v18622_v24, %s20833_s1 }
 0x925   : > { %8647 = vrot.lane.b32.xlu0 %v18624_v26, %s20833_s1 }
 0x926   : > { %8653 = vrot.lane.b32.xlu1 %v18614_v34, %s20833_s1 }
 0x929   : > { %8659 = vrot.lane.b32.xlu0 %v18632_v31, %s20833_s1 }
 0x92a   : > { %8657 = vrot.lane.b32.xlu1 %v18630_v44, %s20833_s1 }
 0x92d   : > { %8941 = vrot.lane.b32.xlu0 %v18608_v12, %s20830_s30 }
 0x92e   : > { %8649 = vrot.lane.b32.xlu1 %v18638_v56, %s20833_s1 }
 0x931   : > { %8939 = vrot.lane.b32.xlu0 %v18606_v19, %s20830_s30 }
 0x932   : > { %8661 = vrot.lane.b32.xlu1 %v18646_v55, %s20833_s1 }
 0x935   : > { %8953 = vrot.lane.b32.xlu0 %v18616_v29, %s20830_s30 }
 0x936   : > { %8943 = vrot.lane.b32.xlu1 %v18622_v24, %s20830_s30 }
 0x939   : > { %8945 = vrot.lane.b32.xlu0 %v18624_v26, %s20830_s30 }
 0x93a   : > { %8951 = vrot.lane.b32.xlu1 %v18614_v34, %s20830_s30 }
 0x93d   : > { %8957 = vrot.lane.b32.xlu0 %v18632_v31, %s20830_s30 }
 0x93e   : > { %8955 = vrot.lane.b32.xlu1 %v18630_v44, %s20830_s30 }
 0x941   : > { %9239 = vrot.lane.b32.xlu0 %v18608_v12, %s20831_s29 }
 0x942   : > { %8947 = vrot.lane.b32.xlu1 %v18638_v56, %s20830_s30 }
 0x945   : > { %9237 = vrot.lane.b32.xlu0 %v18606_v19, %s20831_s29 }
 0x946   : > { %8959 = vrot.lane.b32.xlu1 %v18646_v55, %s20830_s30 }
 0x949   : > { %9251 = vrot.lane.b32.xlu0 %v18616_v29, %s20831_s29 }
 0x94a   : > { %9241 = vrot.lane.b32.xlu1 %v18622_v24, %s20831_s29 }
 0x94d   : > { %9243 = vrot.lane.b32.xlu0 %v18624_v26, %s20831_s29 }
 0x94e   : > { %9249 = vrot.lane.b32.xlu1 %v18614_v34, %s20831_s29 }
 0x951   : > { %9255 = vrot.lane.b32.xlu0 %v18632_v31, %s20831_s29 }
 0x952   : > { %9253 = vrot.lane.b32.xlu1 %v18630_v44, %s20831_s29 }
 0x955   : > { %9537 = vrot.lane.b32.xlu0 %v18608_v12, %s20834_s26 }
 0x956   : > { %9245 = vrot.lane.b32.xlu1 %v18638_v56, %s20831_s29 }
 0x959   : > { %9535 = vrot.lane.b32.xlu0 %v18606_v19, %s20834_s26 }
 0x95a   : > { %9257 = vrot.lane.b32.xlu1 %v18646_v55, %s20831_s29 }
 0x95d   : > { %9549 = vrot.lane.b32.xlu0 %v18616_v29, %s20834_s26 }
 0x95e   : > { %9539 = vrot.lane.b32.xlu1 %v18622_v24, %s20834_s26 }
 0x961   : > { %9541 = vrot.lane.b32.xlu0 %v18624_v26, %s20834_s26 }
 0x962   : > { %9547 = vrot.lane.b32.xlu1 %v18614_v34, %s20834_s26 }
 0x965   : > { %9553 = vrot.lane.b32.xlu0 %v18632_v31, %s20834_s26 }
 0x966   : > { %9551 = vrot.lane.b32.xlu1 %v18630_v44, %s20834_s26  ;;  %v8151_v4 = vpop.permute.xlu0 %8150 }
 0x969   : > { %8651 = vrot.lane.b32.xlu0 %v18640_v0, %s20833_s1 }
 0x96a   : > { %9543 = vrot.lane.b32.xlu1 %v18638_v56, %s20834_s26  ;;  %v8153_v17 = vpop.permute.xlu0 %8152 }
 0x96b   : > { %v8174_v58 = vsel %vm1368_vm4, %v8151_v4, %v8153_v17 }
 0x96c   : > { %v8163_v8 = vpop.permute.xlu1 %8162 }
 0x96d   : > { %9835 = vrot.lane.b32.xlu0 %v18608_v12, %s20835_s23 }
 0x96e   : > { %9555 = vrot.lane.b32.xlu1 %v18646_v55, %s20834_s26  ;;  %v8165_v40 = vpop.permute.xlu0 %8164 }
 0x96f   : > { %v8179_v59 = vsel %vm1368_vm4, %v8163_v8, %v8165_v40 }
 0x970   : > { %v8200_v49 = vsel %vm4651_vm11, %v8179_v59, 0 }
 0x971   : > { %9833 = vrot.lane.b32.xlu0 %v18606_v19, %s20835_s23 }
 0x972   : > { %8663 = vrot.lane.b32.xlu1 %v18653_v62, %s20833_s1 }
 0x975   : > { %9847 = vrot.lane.b32.xlu0 %v18616_v29, %s20835_s23 }
 0x976   : > { %v8155_v16 = vpop.permute.xlu1 %8154  ;;  %9837 = vrot.lane.b32.xlu1 %v18622_v24, %s20835_s23 }
 0x977   : > { %v8175_v6 = vsel %vm1368_vm4, %v8153_v17, %v8155_v16  ;;  %v8157_v52 = vpop.permute.xlu0 %8156 }
 0x978   : > { %8214 = vmatprep.subr.bf16.mxu0 %v8175_v6  ;;  %v8176_v33 = vsel %vm1368_vm4, %v8155_v16, %v8157_v52  ;;  %v10709_v16 = vld [vmem:[%s20681_s10 + $0x20] sm:$0xff] }
 0x979   : > { %8215 = vmatpush1.bf16.msra.mxu0 %v8174_v58  ;;  %8949 = vrot.lane.b32.xlu0 %v18640_v0, %s20830_s30  ;;  %v18962_v6 = vld [vmem:[%s20680_s9] sm:$0xff]   ;;  %v10706_v58 = vld [vmem:[%s20681_s10 + $0x8] sm:$0xff] }
 0x97a   : > { %9845 = vrot.lane.b32.xlu1 %v18614_v34, %s20835_s23 }
 0x97c   : > { %v8167_v37 = vpop.permute.xlu1 %8166 }
 0x97d   : > { %9839 = vrot.lane.b32.xlu0 %v18624_v26, %s20835_s23  ;;  %v8180_v25 = vsel %vm1368_vm4, %v8165_v40, %v8167_v37  ;;  %v8169_v39 = vpop.permute.xlu0 %8168 }
 0x97e   : > { %13938 = vmatprep.subr.msk.bf16.mxu0 %vm4651_vm11, %v8180_v25  ;;  %9849 = vrot.lane.b32.xlu1 %v18630_v44, %s20835_s23  ;;  %v8181_v13 = vsel %vm1368_vm4, %v8167_v37, %v8169_v39  ;;  %v10708_v37 = vld [vmem:[%s20681_s10 + $0x18] sm:$0xff] }
 0x97f   : > { %8217 = vmatpush1.bf16.msra.mxu0 %v8200_v49  ;;  %v8206_v11 = vsel %vm4651_vm11, %v8181_v13, 0  ;;  %v8428_v49 = vsel %vm4651_vm11, %v18630_v44, 0 }
 0x981   : > { %9851 = vrot.lane.b32.xlu0 %v18632_v31, %s20835_s23 }
 0x982   : > { %13939 = vmatmul.mubr.msk.bf16.vlgmr.msra.gmra.mrb[140].mxu0 %vm8189_vm6, %v18766_v2  ;;  %8961 = vrot.lane.b32.xlu1 %v18653_v62, %s20830_s30 }
 0x983   : > { %8256 = vmatprep.mubr.bf16.mxu0 %v20828_v38 }
 0x985   : > { %9247 = vrot.lane.b32.xlu0 %v18640_v0, %s20831_s29 }
 0x986   : > { %9841 = vrot.lane.b32.xlu1 %v18638_v56, %s20835_s23  ;;  %v8159_v36 = vpop.permute.xlu1 %8158 }
 0x987   : > { %v8161_v61 = vpop.permute.xlu0 %8160  ;;  %v8177_v47 = vsel %vm1368_vm4, %v8157_v52, %v8159_v36  ;;  %v10710_v52 = vld [vmem:[%s20681_s10 + $0x28] sm:$0xff] }
 0x988   : > { %8277 = vmatprep.subr.bf16.mxu0 %v8177_v47  ;;  %v8178_v41 = vsel %vm1368_vm4, %v8159_v36, %v8161_v61  ;;  %v19009_v36 = vld [vmem:[%s20680_s9 + $0x10] sm:$0xff]  }
 0x989   : > { %10133 = vrot.lane.b32.xlu0 %v18608_v12, %s20836_s2  ;;  %8278 = vmatpush1.bf16.msra.mxu0 %v8176_v33 }
 0x98a   : > { %13940 = vmatmul.mubr.msk.bf16.gmra.mrb[144].mxu0 %vm8189_vm6, %v18782_v23  ;;  %9853 = vrot.lane.b32.xlu1 %v18646_v55, %s20835_s23 }
 0x98b   : > { %v18793_v30 = vpop.permute.xlu0 %8643  ;;  %8266 = vmatprep.mubr.bf16.mxu0 %v20828_v38 }
 0x98c   : > { %v8171_v53 = vpop.permute.xlu1 %8170 }
 0x98d   : > { %10131 = vrot.lane.b32.xlu0 %v18606_v19, %s20836_s2  ;;  %v8182_v9 = vsel %vm1368_vm4, %v8169_v39, %v8171_v53 }
 0x98e   : > { %9259 = vrot.lane.b32.xlu1 %v18653_v62, %s20831_s29  ;;  %13942 = vmatprep.subr.msk.bf16.mxu0 %vm4651_vm11, %v8182_v9  ;;  %s20837_s29 = smov 4  }
 0x98f   : > { %v18808_v15 = vpop.permute.xlu0 %8641  ;;  %8280 = vmatpush1.bf16.msra.mxu0 %v8206_v11 }
 0x990   : > { %v8173_v50 = vpop.permute.xlu1 %8172  ;;  %14384 = vmatprep.subr.bf16.mxu0 %v20754_v14 }
 0x991   : > { %10145 = vrot.lane.b32.xlu0 %v18616_v29, %s20836_s2  ;;  %v8183_v22 = vsel %vm1368_vm4, %v8171_v53, %v8173_v50 }
 0x992   : > { %13941 = vmatmul.mubr.msk.bf16.gmra.mrb[148].mxu0 %vm8189_vm6, %v18806_v60  ;;  %10135 = vrot.lane.b32.xlu1 %v18622_v24, %s20836_s2  ;;  %v8212_v51 = vsel %vm4651_vm11, %v8183_v22, 0  ;;  %v8434_v22 = vsel %vm4651_vm11, %v18646_v55, 0 }
 0x993   : > { %v18817_v1 = vpop.permute.xlu0 %8655  ;;  %8309 = vmatprep.mubr.bf16.mxu0 %v20828_v38 }
 0x994   : > { %v18820_v63 = vpop.permute.xlu1 %8645 }
 0x995   : > { %9545 = vrot.lane.b32.xlu0 %v18640_v0, %s20834_s26 }
 0x996   : > { %10143 = vrot.lane.b32.xlu1 %v18614_v34, %s20836_s2 }
 0x997   : > { %v18826_v45 = vpop.permute.xlu0 %8647 }
 0x998   : > { %v18828_v7 = vpop.permute.xlu1 %8653 }
 0x999   : > { %10137 = vrot.lane.b32.xlu0 %v18624_v26, %s20836_s2 }
 0x99a   : > { %10147 = vrot.lane.b32.xlu1 %v18630_v44, %s20836_s2  ;;  %13943 = vmatmul.mubr.msk.bf16.vlgmr.msra.gmra.mrb[152].mxu0 %vm8189_vm6, %v18766_v2 }
 0x99b   : > { %14385 = vmatpush3.bf16.msra.mxu0 %v8178_v41  ;;  %v18838_v57 = vpop.permute.xlu0 %8659  ;;  %8319 = vmatprep.mubr.bf16.mxu0 %v20828_v38 }
 0x99c   : > { %v18841_v46 = vpop.permute.xlu1 %8657  ;;  %14386 = vmatprep.subr.bf16.mxu0 %v20754_v14 }
 0x99d   : > { %10149 = vrot.lane.b32.xlu0 %v18632_v31, %s20836_s2 }
 0x99e   : > { %9557 = vrot.lane.b32.xlu1 %v18653_v62, %s20834_s26  ;;  %s14289_s26 = sshll.u32 %s15905_s3, 4  ;;  %s15773_s3 = smov [#allocation4]  }
 0x99f   : > { %14387 = vmatpush3.bf16.msra.mxu0 %v8212_v51  ;;  %v18849_v48 = vpop.permute.xlu0 %8941  ;;  %v19042_v51 = vld [vmem:[%s20680_s9 + $0x30] sm:$0xff]   ;;  %s20628_s28 = scalar_lea.hbm %s20692_s21, %s14289_s26  ;;  %s15693_s22 = sshll.u32 %s15773_s3, 4  ;;  %s15694_s22 = int_to_ptr.vmem [resolvable:$false] %s15693_s22 }
 0x9a0   : > { %8436 = vmatprep.subr.bf16.mxu0 %v18608_v12  ;;  %v18852_v43 = vpop.permute.xlu1 %8649 }
 0x9a1   : > { %9843 = vrot.lane.b32.xlu0 %v18640_v0, %s20835_s23 }
 0x9a2   : > { %10139 = vrot.lane.b32.xlu1 %v18638_v56, %s20836_s2  ;;  %13944 = vmatmul.mubr.msk.bf16.gmra.mrb[156].mxu0 %vm8189_vm6, %v18782_v23 }
 0x9a3   : > { %v18860_v27 = vpop.permute.xlu0 %8939  ;;  %8329 = vmatprep.mubr.bf16.mxu0 %v20828_v38 }
 0x9a4   : > { %v18863_v21 = vpop.permute.xlu1 %8661 }
 0x9a5   : > { %10431 = vrot.lane.b32.xlu0 %v18608_v12, %s20837_s29 }
 0x9a6   : > { %10151 = vrot.lane.b32.xlu1 %v18646_v55, %s20836_s2 }
 0x9a7   : > { %v18869_v35 = vpop.permute.xlu0 %8953 }
 0x9a8   : > { %v18871_v20 = vpop.permute.xlu1 %8943 }
 0x9a9   : > { %10429 = vrot.lane.b32.xlu0 %v18606_v19, %s20837_s29 }
 0x9aa   : > { %9855 = vrot.lane.b32.xlu1 %v18653_v62, %s20835_s23  ;;  %13945 = vmatmul.mubr.msk.bf16.gmra.mrb[160].mxu0 %vm8189_vm6, %v18806_v60 }
 0x9ab   : > { %v18879_v10 = vpop.permute.xlu0 %8945  ;;  %14388 = vmatprep.mubr.msk.bf16.mxu0 %vm15769_vm5, %v20754_v14 }
 0x9ac   : > { %v18883_v12 = vpop.permute.xlu1 %8951 }
 0x9ad   : > { %10443 = vrot.lane.b32.xlu0 %v18616_v29, %s20837_s29 }
 0x9ae   : > { %10433 = vrot.lane.b32.xlu1 %v18622_v24, %s20837_s29 }
 0x9af   : > { %v18889_v3 = vpop.permute.xlu0 %8957 }
 0x9b0   : > { %v18891_v28 = vpop.permute.xlu1 %8955 }
 0x9b1   : > { %10141 = vrot.lane.b32.xlu0 %v18640_v0, %s20836_s2 }
 0x9b2   : > { %10441 = vrot.lane.b32.xlu1 %v18614_v34, %s20837_s29  ;;  %14389 = vmatmul.mubr.msk.bf16.vlgmr.msra.gmra.mrb[164].mxu0 %vm8189_vm6, %v18766_v2 }
 0x9b3   : > { %8437 = vmatpush1.bf16.msra.mxu0 %v18606_v19  ;;  %v18900_v54 = vpop.permute.xlu0 %9239  ;;  %14392 = vmatprep.mubr.msk.bf16.mxu0 %vm15769_vm5, %v20754_v14 }
 0x9b4   : > { %13952 = vmatprep.subr.msk.bf16.mxu0 %vm4651_vm11, %v18616_v29  ;;  %v18906_v32 = vpop.permute.xlu1 %8947 }
 0x9b5   : > { %10435 = vrot.lane.b32.xlu0 %v18624_v26, %s20837_s29 }
 0x9b6   : > { %10445 = vrot.lane.b32.xlu1 %v18630_v44, %s20837_s29 }
 0x9b7   : > { %8439 = vmatpush1.bf16.msra.mxu0 %v8422_v5  ;;  %v18914_v19 = vpop.permute.xlu0 %9237  ;;  %v8666_v5 = vsel %vm5516_vm14, %v18793_v30, %v18820_v63 }
 0x9b8   : > { %8499 = vmatprep.subr.bf16.mxu0 %v18624_v26  ;;  %v18917_v18 = vpop.permute.xlu1 %8959  ;;  %v10705_v26 = vld [vmem:[%s20681_s10] sm:$0xff] }
 0x9b9   : > { %10447 = vrot.lane.b32.xlu0 %v18632_v31, %s20837_s29 }
 0x9ba   : > { %10153 = vrot.lane.b32.xlu1 %v18653_v62, %s20836_s2  ;;  %14393 = vmatmul.mubr.msk.bf16.gmra.mrb[168].mxu0 %vm8189_vm6, %v18782_v23  ;;  %s15772_s2 = smov 12  }
 0x9bb   : > { %v18925_v29 = vpop.permute.xlu0 %9251  ;;  %14396 = vmatprep.mubr.msk.bf16.mxu0 %vm15769_vm5, %v20754_v14 }
 0x9bc   : > { %v18929_v34 = vpop.permute.xlu1 %9241 }
 0x9bd   : > { %10439 = vrot.lane.b32.xlu0 %v18640_v0, %s20837_s29  ;;  %v10707_v0 = vld [vmem:[%s20681_s10 + $0x10] sm:$0xff] }
 0x9be   : > { %10437 = vrot.lane.b32.xlu1 %v18638_v56, %s20837_s29 }
 0x9bf   : > { %v18938_v42 = vpop.permute.xlu0 %9243 }
 0x9c0   : > { %v18940_v4 = vpop.permute.xlu1 %9249 }
 0x9c1   : > { %10713 = vperm.xlu0 %15505, %v10705_v26  }
 0x9c2   : > { %10449 = vrot.lane.b32.xlu1 %v18646_v55, %s20837_s29  ;;  %14397 = vmatmul.mubr.msk.bf16.gmra.mrb[172].mxu0 %vm8189_vm6, %v18806_v60 }
 0x9c3   : > { %v18949_v17 = vpop.permute.xlu0 %9255  ;;  %8468 = vmatprep.mubr.bf16.mxu0 %v20828_v38 }
 0x9c4   : > { %v18952_v8 = vpop.permute.xlu1 %9253 }
 0x9c5   : > { %10723 = vperm.xlu0 %15505, %v10707_v0  }
 0x9c6   : > { %10451 = vrot.lane.b32.xlu1 %v18653_v62, %s20837_s29 }
 0x9c7   : > { %v18964_v40 = vpop.permute.xlu0 %9537 }
 0x9c8   : > { %v18969_v59 = vpop.permute.xlu1 %9245 }
 0x9c9   : > { %10733 = vperm.xlu0 %15505, %v10709_v16  }
 0x9ca   : > { %10718 = vperm.xlu1 %15506, %v10706_v58   ;;  %13953 = vmatmul.mubr.msk.bf16.vlgmr.msra.gmra.mrb[140].mxu0 %vm8189_vm6, %v18962_v6  ;;  %v19066_v58 = vld [vmem:[%s20680_s9 + $0x38] sm:$0xff]  }
 0x9cb   : > { %8500 = vmatpush1.bf16.msra.mxu0 %v18622_v24  ;;  %v18974_v62 = vpop.permute.xlu0 %9535  ;;  %8478 = vmatprep.mubr.bf16.mxu0 %v20828_v38  ;;  %v18989_v24 = vld [vmem:[%s20680_s9 + $0x8] sm:$0xff]  }
 0x9cc   : > { %13956 = vmatprep.subr.msk.bf16.mxu0 %vm4651_vm11, %v18632_v31  ;;  %v18982_v25 = vpop.permute.xlu1 %9257 }
 0x9ce   : > { %10728 = vperm.xlu1 %15506, %v10708_v37  }
 0x9cf   : > { %8502 = vmatpush1.bf16.msra.mxu0 %v8428_v49  ;;  %v18991_v2 = vpop.permute.xlu0 %9549 }
 0x9d0   : > { %v18996_v39 = vpop.permute.xlu1 %9539  ;;  %14400 = vmatprep.subr.bf16.mxu0 %v20754_v14 }
 0x9d2   : > { %10738 = vperm.xlu1 %15506, %v10710_v52   ;;  %13954 = vmatmul.mubr.msk.bf16.gmra.mrb[144].mxu0 %vm8189_vm6, %v18989_v24 }
 0x9d3   : > { %v19001_v44 = vpop.permute.xlu0 %9541  ;;  %8488 = vmatprep.mubr.bf16.mxu0 %v20828_v38 }
 0x9d4   : > { %v19004_v31 = vpop.permute.xlu1 %9547 }
 0x9d7   : > { %v19011_v23 = vpop.permute.xlu0 %9553 }
 0x9d8   : > { %v19013_v61 = vpop.permute.xlu1 %9551 }
 0x9da   : > { %13955 = vmatmul.mubr.msk.bf16.gmra.mrb[148].mxu0 %vm8189_vm6, %v19009_v36 }
 0x9db   : > { %v8652_v47 = vpop.permute.xlu0 %8651  ;;  %8531 = vmatprep.mubr.bf16.mxu0 %v20828_v38 }
 0x9dc   : > { %v8669_v33 = vsel %vm5516_vm14, %v18852_v43, %v8652_v47  ;;  %v19020_v13 = vpop.permute.xlu1 %9543 }
 0x9dd   : > { %14417 = vmatpush3.bf16.msra.mxu1 %v8669_v33 }
 0x9de   : > { %14418 = vmatprep.subr.bf16.mxu1 %v20754_v14 }
 0x9df   : > { %v19023_v53 = vpop.permute.xlu0 %9835 }
 0x9e0   : > { %v19025_v9 = vpop.permute.xlu1 %9555 }
 0x9e2   : > { %13957 = vmatmul.mubr.msk.bf16.vlgmr.msra.gmra.mrb[152].mxu0 %vm8189_vm6, %v18962_v6 }
 0x9e3   : > { %14401 = vmatpush3.bf16.msra.mxu0 %v18638_v56  ;;  %v19030_v11 = vpop.permute.xlu0 %9833  ;;  %8541 = vmatprep.mubr.bf16.mxu0 %v20828_v38 }
 0x9e4   : > { %v8664_v60 = vpop.permute.xlu1 %8663  ;;  %14402 = vmatprep.subr.bf16.mxu0 %v20754_v14 }
 0x9e5   : > { %v8674_v50 = vsel %vm5516_vm14, %v18863_v21, %v8664_v60  ;;  %v19087_v60 = vld [vmem:[%s20680_s9 + $0x40] sm:$0xff]  }
 0x9e6   : > { %v8702_v41 = vsel %vm4651_vm11, %v8674_v50, 0 }
 0x9e7   : > { %14403 = vmatpush3.bf16.msra.mxu0 %v8434_v22  ;;  %v19044_v56 = vpop.permute.xlu0 %9847  ;;  %14419 = vmatpush3.bf16.msra.mxu1 %v8702_v41  ;;  %v8665_v22 = vsel %vm5516_vm14, %v18808_v15, %v18793_v30 }
 0x9e8   : > { %8704 = vmatprep.subr.bf16.mxu0 %v8666_v5  ;;  %v19049_v26 = vpop.permute.xlu1 %9837  ;;  %14432 = vmatprep.subr.bf16.mxu1 %v20754_v14  ;;  %v8670_v5 = vsel %vm5516_vm14, %v18828_v7, %v18817_v1  ;;  %v19118_v7 = vld [vmem:[%s20680_s9 + $0x48] sm:$0xff]  }
 0x9e9   : > { %v8690_v15 = vsel %vm4651_vm11, %v8670_v5, 0 }
 0x9ea   : > { %13958 = vmatmul.mubr.msk.bf16.gmra.mrb[156].mxu0 %vm8189_vm6, %v18989_v24  ;;  %14421 = vmatmul.mubr.msk.bf16.vlgmr.msra.gmra.mrb[124].mxu1 %vm8189_vm6, %v19042_v51 }
 0x9eb   : > { %v8950_v55 = vpop.permute.xlu0 %8949  ;;  %8551 = vmatprep.mubr.bf16.mxu0 %v20828_v38  ;;  %14424 = vmatprep.mubr.msk.bf16.mxu1 %vm15769_vm5, %v20754_v14 }
 0x9ec   : > { %v8967_v0 = vsel %vm2820_vm8, %v18906_v32, %v8950_v55  ;;  %v19061_v16 = vpop.permute.xlu1 %9845  ;;  %v8671_v55 = vsel %vm5516_vm14, %v18817_v1, %v18841_v46  ;;  %v8668_v1 = vsel %vm5516_vm14, %v18826_v45, %v18852_v43 }
 0x9ed   : > { %14433 = vmatpush3.bf16.msra.mxu1 %v8967_v0 }
 0x9ee   : > { %14434 = vmatprep.subr.bf16.mxu1 %v20754_v14 }
 0x9ef   : > { %v19075_v49 = vpop.permute.xlu0 %9839 }
 0x9f0   : > { %v19069_v37 = vpop.permute.xlu1 %9849 }
 0x9f2   : > { %13959 = vmatmul.mubr.msk.bf16.gmra.mrb[160].mxu0 %vm8189_vm6, %v19009_v36  ;;  %14425 = vmatmul.mubr.msk.bf16.gmra.mrb[128].mxu1 %vm8189_vm6, %v19066_v58 }
 0x9f3   : > { %14404 = vmatprep.mubr.msk.bf16.mxu0 %vm15769_vm5, %v20754_v14  ;;  %14428 = vmatprep.mubr.msk.bf16.mxu1 %vm15769_vm5, %v20754_v14  ;;  %v19092_v41 = vpop.permute.xlu0 %9851 }
 0x9f4   : > { %v8962_v52 = vpop.permute.xlu1 %8961 }
 0x9f5   : > { %v8972_v47 = vsel %vm2820_vm8, %v18917_v18, %v8962_v52 }
 0x9f6   : > { %v9000_v33 = vsel %vm4651_vm11, %v8972_v47, 0 }
 0x9f7   : > { %14435 = vmatpush3.bf16.msra.mxu1 %v9000_v33 }
 0x9f8   : > { %v19089_v50 = vpop.permute.xlu1 %9841  ;;  %14448 = vmatprep.subr.bf16.mxu1 %v20754_v14 }
 0x9fa   : > { %14405 = vmatmul.mubr.msk.bf16.vlgmr.msra.gmra.mrb[176].mxu0 %vm8189_vm6, %v18962_v6  ;;  %14429 = vmatmul.mubr.msk.bf16.gmra.mrb[132].mxu1 %vm8189_vm6, %v19087_v60  ;;  %v9248_v6 = vpop.permute.xlu0 %9247 }
 0x9fb   : > { %8705 = vmatpush1.bf16.msra.mxu0 %v8665_v22  ;;  %14408 = vmatprep.mubr.msk.bf16.mxu0 %vm15769_vm5, %v20754_v14  ;;  %v9265_v52 = vsel %vm3546_vm10, %v18969_v59, %v9248_v6  ;;  %v19144_v22 = vld [vmem:[%s20680_s9 + $0x50] sm:$0xff]  }
 0x9fc   : > { %13972 = vmatprep.subr.msk.bf16.mxu0 %vm4651_vm11, %v8671_v55  ;;  %v19110_v30 = vpop.permute.xlu1 %9853  ;;  %14436 = vmatprep.mubr.msk.bf16.mxu1 %vm15769_vm5, %v20754_v14 }
 0x9fe   : > { %v19136_v43 = vpop.permute.xlu0 %10133 }
 0x9ff   : > { %8707 = vmatpush1.bf16.msra.mxu0 %v8690_v15  ;;  %v19161_v15 = vld [vmem:[%s20680_s9 + $0x58] sm:$0xff]  }
 0xa00   : > { %8767 = vmatprep.subr.bf16.mxu0 %v8668_v1  ;;  %v9260_v0 = vpop.permute.xlu1 %9259  ;;  %v8667_v1 = vsel %vm5516_vm14, %v18820_v63, %v18826_v45  ;;  %v19188_v45 = vld [vmem:[%s20680_s9 + $0x60] sm:$0xff]  }
 0xa01   : > { %v9270_v47 = vsel %vm3546_vm10, %v18982_v25, %v9260_v0  ;;  %v8672_v0 = vsel %vm5516_vm14, %v18841_v46, %v18838_v57 }
 0xa02   : > { %14409 = vmatmul.mubr.msk.bf16.gmra.mrb[180].mxu0 %vm8189_vm6, %v18989_v24  ;;  %14437 = vmatmul.mubr.msk.bf16.vlgmr.msra.gmra.mrb[136].mxu1 %vm8189_vm6, %v19118_v7  ;;  %v9298_v33 = vsel %vm4651_vm11, %v9270_v47, 0  ;;  %v19151_v5 = vpop.permute.xlu0 %10131  ;;  %v8696_v63 = vsel %vm4651_vm11, %v8672_v0, 0  ;;  %v19209_v0 = vld [vmem:[%s20680_s9 + $0x68] sm:$0xff]  }
 0xa03   : > { %14449 = vmatpush3.bf16.msra.mxu1 %v9265_v52  ;;  %14412 = vmatprep.mubr.msk.bf16.mxu0 %vm15769_vm5, %v20754_v14  ;;  %v8673_v52 = vsel %vm5516_vm14, %v18838_v57, %v18863_v21  ;;  %v8964_v57 = vsel %vm2820_vm8, %v18849_v48, %v18871_v20 }
 0xa04   : > { %14450 = vmatprep.subr.bf16.mxu1 %v20754_v14  ;;  %14440 = vmatprep.mubr.msk.bf16.mxu1 %vm15769_vm5, %v20754_v14  ;;  %v19139_v24 = vpop.permute.xlu1 %10135 }
 0xa06   : > { %v19163_v6 = vpop.permute.xlu0 %10145 }
 0xa07   : > { %14451 = vmatpush3.bf16.msra.mxu1 %v9298_v33 }
 0xa08   : > { %14464 = vmatprep.subr.bf16.mxu1 %v20754_v14  ;;  %v19156_v55 = vpop.permute.xlu1 %10143 }
 0xa0a   : > { %14413 = vmatmul.mubr.msk.bf16.gmra.mrb[184].mxu0 %vm8189_vm6, %v19009_v36  ;;  %14441 = vmatmul.mubr.msk.bf16.gmra.mrb[140].mxu1 %vm8189_vm6, %v19144_v22  ;;  %v9546_v46 = vpop.permute.xlu0 %9545 }
 0xa0b   : > { %8736 = vmatprep.mubr.bf16.mxu0 %v20828_v38  ;;  %14444 = vmatprep.mubr.msk.bf16.mxu1 %vm15769_vm5, %v20754_v14  ;;  %v9563_v47 = vsel %vm6477_vm15, %v19020_v13, %v9546_v46  ;;  %v19226_v46 = vld [vmem:[%s20680_s9 + $0x70] sm:$0xff]  }
 0xa0c   : > { %v19165_v36 = vpop.permute.xlu1 %10147 }
 0xa10   : > { %v9558_v21 = vpop.permute.xlu1 %9557 }
 0xa11   : > { %v9568_v33 = vsel %vm6477_vm15, %v19025_v9, %v9558_v21  ;;  %v8963_v21 = vsel %vm2820_vm8, %v18860_v27, %v18849_v48  ;;  %v19253_v27 = vld [vmem:[%s20680_s9 + $0x78] sm:$0xff]  }
 0xa12   : > { %13973 = vmatmul.mubr.msk.bf16.vlgmr.msra.gmra.mrb[140].mxu0 %vm8189_vm6, %v19042_v51  ;;  %14445 = vmatmul.mubr.msk.bf16.gmra.mrb[144].mxu1 %vm8189_vm6, %v19161_v15 }
 0xa13   : > { %8768 = vmatpush1.bf16.msra.mxu0 %v8667_v1  ;;  %8746 = vmatprep.mubr.bf16.mxu0 %v20828_v38  ;;  %v9596_v1 = vsel %vm4651_vm11, %v9568_v33, 0  ;;  %v8968_v33 = vsel %vm2820_vm8, %v18883_v12, %v18869_v35 }
 0xa14   : > { %13976 = vmatprep.subr.msk.bf16.mxu0 %vm4651_vm11, %v8673_v52  ;;  %14452 = vmatprep.mubr.msk.bf16.mxu1 %vm15769_vm5, %v20754_v14  ;;  %v19216_v52 = vpop.permute.xlu0 %10137  ;;  %v8988_v48 = vsel %vm4651_vm11, %v8968_v33, 0 }
 0xa17   : > { %8770 = vmatpush1.bf16.msra.mxu0 %v8696_v63  ;;  %v19221_v63 = vpop.permute.xlu1 %10139 }
 0xa18   : > { %9002 = vmatprep.subr.bf16.mxu0 %v8964_v57  ;;  %v19228_v57 = vpop.permute.xlu0 %10149 }
 0xa1a   : > { %13974 = vmatmul.mubr.msk.bf16.gmra.mrb[144].mxu0 %vm8189_vm6, %v19066_v58  ;;  %14453 = vmatmul.mubr.msk.bf16.vlgmr.msra.gmra.mrb[148].mxu1 %vm8189_vm6, %v19188_v45 }
 0xa1b   : > { %14465 = vmatpush3.bf16.msra.mxu1 %v9563_v47  ;;  %8756 = vmatprep.mubr.bf16.mxu0 %v20828_v38  ;;  %v19233_v47 = vpop.permute.xlu1 %10151 }
 0xa1c   : > { %14466 = vmatprep.subr.bf16.mxu1 %v20754_v14  ;;  %14456 = vmatprep.mubr.msk.bf16.mxu1 %vm15769_vm5, %v20754_v14  ;;  %v9844_v12 = vpop.permute.xlu0 %9843 }
 0xa1f   : > { %14467 = vmatpush3.bf16.msra.mxu1 %v9596_v1  ;;  %v8969_v1 = vsel %vm2820_vm8, %v18869_v35, %v18891_v28  ;;  %v8966_v35 = vsel %vm2820_vm8, %v18879_v10, %v18906_v32 }
 0xa20   : > { %14480 = vmatprep.subr.bf16.mxu1 %v20754_v14  ;;  %v19270_v32 = vpop.permute.xlu0 %10431 }
 0xa22   : > { %13975 = vmatmul.mubr.msk.bf16.gmra.mrb[148].mxu0 %vm8189_vm6, %v19087_v60  ;;  %14457 = vmatmul.mubr.msk.bf16.gmra.mrb[152].mxu1 %vm8189_vm6, %v19209_v0 }
 0xa23   : > { %8799 = vmatprep.mubr.bf16.mxu0 %v20828_v38  ;;  %14460 = vmatprep.mubr.msk.bf16.mxu1 %vm15769_vm5, %v20754_v14 }
 0xa2a   : > { %13977 = vmatmul.mubr.msk.bf16.vlgmr.msra.gmra.mrb[152].mxu0 %vm8189_vm6, %v19042_v51  ;;  %14461 = vmatmul.mubr.msk.bf16.gmra.mrb[156].mxu1 %vm8189_vm6, %v19226_v46  ;;  %v9856_v51 = vpop.permute.xlu1 %9855 }
 0xa2b   : > { %9003 = vmatpush1.bf16.msra.mxu0 %v8963_v21  ;;  %8809 = vmatprep.mubr.bf16.mxu0 %v20828_v38  ;;  %v9861_v21 = vsel %vm6798_vm0, %v19089_v50, %v9844_v12  ;;  %v9866_v33 = vsel %vm6798_vm0, %v19110_v30, %v9856_v51  ;;  %v19285_v12 = vpop.permute.xlu0 %10429  ;;  %v19295_v51 = vld [vmem:[%s20680_s9 + $0x88] sm:$0xff]  }
 0xa2c   : > { %13992 = vmatprep.subr.msk.bf16.mxu0 %vm4651_vm11, %v8969_v1  ;;  %14468 = vmatprep.mubr.msk.bf16.mxu1 %vm15769_vm5, %v20754_v14  ;;  %v9894_v1 = vsel %vm4651_vm11, %v9866_v33, 0  ;;  %v8965_v33 = vsel %vm2820_vm8, %v18871_v20, %v18879_v10  ;;  %v19322_v10 = vld [vmem:[%s20680_s9 + $0x90] sm:$0xff]  }
 0xa2f   : > { %9005 = vmatpush1.bf16.msra.mxu0 %v8988_v48  ;;  %v19273_v48 = vpop.permute.xlu1 %10433 }
 0xa30   : > { %9065 = vmatprep.subr.bf16.mxu0 %v8966_v35 }
 0xa32   : > { %13978 = vmatmul.mubr.msk.bf16.gmra.mrb[156].mxu0 %vm8189_vm6, %v19066_v58  ;;  %14469 = vmatmul.mubr.msk.bf16.vlgmr.msra.gmra.mrb[160].mxu1 %vm8189_vm6, %v19253_v27  ;;  %v19278_v58 = vld [vmem:[%s20680_s9 + $0x80] sm:$0xff]  }
 0xa33   : > { %14481 = vmatpush3.bf16.msra.mxu1 %v9861_v21  ;;  %8819 = vmatprep.mubr.bf16.mxu0 %v20828_v38  ;;  %v19290_v35 = vpop.permute.xlu1 %10441  ;;  %v19297_v21 = vpop.permute.xlu0 %10443 }
 0xa34   : > { %14482 = vmatprep.subr.bf16.mxu1 %v20754_v14  ;;  %14472 = vmatprep.mubr.msk.bf16.mxu1 %vm15769_vm5, %v20754_v14 }
 0xa37   : > { %14483 = vmatpush3.bf16.msra.mxu1 %v9894_v1  ;;  %v8970_v1 = vsel %vm2820_vm8, %v18891_v28, %v18889_v3  ;;  %v10142_v28 = vpop.permute.xlu0 %10141 }
 0xa38   : > { %14496 = vmatprep.subr.bf16.mxu1 %v20754_v14  ;;  %v8994_v20 = vsel %vm4651_vm11, %v8970_v1, 0 }
 0xa3a   : > { %13979 = vmatmul.mubr.msk.bf16.gmra.mrb[160].mxu0 %vm8189_vm6, %v19087_v60  ;;  %14473 = vmatmul.mubr.msk.bf16.gmra.mrb[164].mxu1 %vm8189_vm6, %v19278_v58  ;;  %v19299_v60 = vpop.permute.xlu1 %10445 }
 0xa3b   : > { %9034 = vmatprep.mubr.bf16.mxu0 %v20828_v38  ;;  %14476 = vmatprep.mubr.msk.bf16.mxu1 %vm15769_vm5, %v20754_v14  ;;  %20838 = vst [vmem:[#allocation12_spill] sm:$0xff] %v19299_v60  ;;  %v8971_v14 = vsel %vm2820_vm8, %v18889_v3, %v18917_v18  ;;  %v20839_v60 = vmov 0.0   ;;  %v9262_v3 = vsel %vm3546_vm10, %v18900_v54, %v18929_v34 }
 0xa3e   : > { %v10154_v18 = vpop.permute.xlu1 %10153 }
 0xa42   : > { %13993 = vmatmul.mubr.msk.bf16.vlgmr.msra.gmra.mrb[140].mxu0 %vm8189_vm6, %v19118_v7  ;;  %14477 = vmatmul.mubr.msk.bf16.gmra.mrb[168].mxu1 %vm8189_vm6, %v19295_v51 }
 0xa43   : > { %9066 = vmatpush1.bf16.msra.mxu0 %v8965_v33  ;;  %9044 = vmatprep.mubr.bf16.mxu0 %v20828_v38  ;;  %v10164_v33 = vsel %vm7119_vm1, %v19233_v47, %v10154_v18  ;;  %v19360_v18 = vld [vmem:[%s20680_s9 + $0xa0] sm:$0xff]  }
 0xa44   : > { %13996 = vmatprep.subr.msk.bf16.mxu0 %vm4651_vm11, %v8971_v14  ;;  %14484 = vmatprep.mubr.msk.bf16.mxu1 %vm15769_vm5, %v20839_v60  ;;  %v10159_v14 = vsel %vm7119_vm1, %v19221_v63, %v10142_v28  ;;  %v10192_v1 = vsel %vm4651_vm11, %v10164_v33, 0  ;;  %v19350_v28 = vpop.permute.xlu0 %10435  ;;  %v9261_v33 = vsel %vm3546_vm10, %v18914_v19, %v18900_v54  ;;  %v19387_v19 = vld [vmem:[%s20680_s9 + $0xa8] sm:$0xff]  }
 0xa45   : > { %20840 = vst [vmem:[#allocation13_spill] sm:$0xff] %v19350_v28  ;;  %v9266_v28 = vsel %vm3546_vm10, %v18940_v4, %v18925_v29 }
 0xa46   : > { %v9286_v54 = vsel %vm4651_vm11, %v9266_v28, 0 }
 0xa47   : > { %9068 = vmatpush1.bf16.msra.mxu0 %v8994_v20  ;;  %v19343_v20 = vld [vmem:[%s20680_s9 + $0x98] sm:$0xff]  }
 0xa48   : > { %9300 = vmatprep.subr.bf16.mxu0 %v9262_v3  ;;  %v19355_v3 = vpop.permute.xlu1 %10437 }
 0xa4a   : > { %13994 = vmatmul.mubr.msk.bf16.gmra.mrb[144].mxu0 %vm8189_vm6, %v19144_v22  ;;  %14485 = vmatmul.mubr.msk.bf16.vlgmr.msra.gmra.mrb[172].mxu1 %vm8189_vm6, %v19322_v10 }
 0xa4b   : > { %14497 = vmatpush3.bf16.msra.mxu1 %v10159_v14  ;;  %9054 = vmatprep.mubr.bf16.mxu0 %v20828_v38  ;;  %v19362_v14 = vpop.permute.xlu0 %10447 }
 0xa4c   : > { %14498 = vmatprep.subr.bf16.mxu1 %v20839_v60  ;;  %14488 = vmatprep.mubr.msk.bf16.mxu1 %vm15769_vm5, %v20839_v60  ;;  %20841 = vst [vmem:[#allocation14_spill] sm:$0xff] %v19362_v14  ;;  %v9267_v14 = vsel %vm3546_vm10, %v18925_v29, %v18952_v8  ;;  %v9264_v29 = vsel %vm3546_vm10, %v18938_v42, %v18969_v59 }
 0xa4f   : > { %14499 = vmatpush3.bf16.msra.mxu1 %v10192_v1  ;;  %v19367_v1 = vpop.permute.xlu1 %10449  ;;  %v10440_v4 = vpop.permute.xlu0 %10439 }
 0xa50   : > { %14512 = vmatprep.subr.bf16.mxu1 %v20839_v60  ;;  %v10457_v28 = vsel %vm7440_vm3, %v19355_v3, %v10440_v4  ;;  %v9269_v4 = vsel %vm3546_vm10, %v18949_v17, %v18982_v25 }
 0xa52   : > { %13995 = vmatmul.mubr.msk.bf16.gmra.mrb[148].mxu0 %vm8189_vm6, %v19161_v15  ;;  %14489 = vmatmul.mubr.msk.bf16.gmra.mrb[176].mxu1 %vm8189_vm6, %v19343_v20 }
 0xa53   : > { %9097 = vmatprep.mubr.bf16.mxu0 %v20828_v38  ;;  %14492 = vmatprep.mubr.msk.bf16.mxu1 %vm15769_vm5, %v20839_v60 }
 0xa5a   : > { %13997 = vmatmul.mubr.msk.bf16.vlgmr.msra.gmra.mrb[152].mxu0 %vm8189_vm6, %v19118_v7  ;;  %14493 = vmatmul.mubr.msk.bf16.gmra.mrb[180].mxu1 %vm8189_vm6, %v19360_v18  ;;  %v10452_v7 = vpop.permute.xlu1 %10451 }
 0xa5b   : > { %9301 = vmatpush1.bf16.msra.mxu0 %v9261_v33  ;;  %9107 = vmatprep.mubr.bf16.mxu0 %v20828_v38  ;;  %v19420_v33 = vld [vmem:[%s20680_s9 + $0xb8] sm:$0xff]  }
 0xa5c   : > { %14012 = vmatprep.subr.msk.bf16.mxu0 %vm4651_vm11, %v9267_v14  ;;  %14500 = vmatprep.mubr.msk.bf16.mxu1 %vm15769_vm5, %v20839_v60  ;;  %v10462_v14 = vsel %vm7440_vm3, %v19367_v1, %v10452_v7 }
 0xa5d   : > { %v10490_v59 = vsel %vm4651_vm11, %v10462_v14, 0 }
 0xa5f   : > { %9303 = vmatpush1.bf16.msra.mxu0 %v9286_v54  ;;  %v9268_v54 = vsel %vm3546_vm10, %v18952_v8, %v18949_v17  ;;  %v9560_v8 = vsel %vm6477_vm15, %v18964_v40, %v18996_v39  ;;  %v19458_v17 = vld [vmem:[%s20680_s9 + $0xc8] sm:$0xff]  }
 0xa60   : > { %9363 = vmatprep.subr.bf16.mxu0 %v9264_v29  ;;  %v19472_v29 = vld [vmem:[%s20680_s9 + $0xd0] sm:$0xff]  }
 0xa62   : > { %13998 = vmatmul.mubr.msk.bf16.gmra.mrb[156].mxu0 %vm8189_vm6, %v19144_v22  ;;  %14501 = vmatmul.mubr.msk.bf16.vlgmr.msra.gmra.mrb[184].mxu1 %vm8189_vm6, %v19387_v19  ;;  %v19408_v22 = vld [vmem:[%s20680_s9 + $0xb0] sm:$0xff]  }
 0xa63   : > { %14513 = vmatpush3.bf16.msra.mxu1 %v10457_v28  ;;  %9117 = vmatprep.mubr.bf16.mxu0 %v20828_v38 }
 0xa64   : > { %14514 = vmatprep.subr.bf16.mxu1 %v20839_v60  ;;  %14504 = vmatprep.mubr.msk.bf16.mxu1 %vm15769_vm5, %v20839_v60 }
 0xa67   : > { %14515 = vmatpush3.bf16.msra.mxu1 %v10490_v59  ;;  %v9559_v59 = vsel %vm6477_vm15, %v18974_v62, %v18964_v40 }
 0xa6a   : > { %13999 = vmatmul.mubr.msk.bf16.gmra.mrb[160].mxu0 %vm8189_vm6, %v19161_v15  ;;  %14505 = vmatmul.mubr.msk.bf16.gmra.mrb[188].mxu1 %vm8189_vm6, %v19408_v22  ;;  %v9263_v15 = vsel %vm3546_vm10, %v18929_v34, %v18938_v42  ;;  %v9292_v34 = vsel %vm4651_vm11, %v9268_v54, 0  ;;  %v19443_v42 = vld [vmem:[%s20680_s9 + $0xc0] sm:$0xff]   ;;  %v9565_v54 = vsel %vm6477_vm15, %v18991_v2, %v19013_v61  ;;  %vm13463_vm10 = vcmask 344064  }
 0xa6b   : > { %9332 = vmatprep.mubr.bf16.mxu0 %v20828_v38  ;;  %14508 = vmatprep.mubr.msk.bf16.mxu1 %vm15769_vm5, %v20839_v60 }
 0xa72   : > { %14013 = vmatmul.mubr.msk.bf16.vlgmr.msra.gmra.mrb[140].mxu0 %vm8189_vm6, %v19188_v45  ;;  %14509 = vmatmul.mubr.msk.bf16.gmra.mrb[192].mxu1 %vm8189_vm6, %v19420_v33 }
 0xa73   : > { %9364 = vmatpush1.bf16.msra.mxu0 %v9263_v15  ;;  %9342 = vmatprep.mubr.bf16.mxu0 %v20828_v38  ;;  %v9564_v15 = vsel %vm6477_vm15, %v19004_v31, %v18991_v2  ;;  %v9562_v31 = vsel %vm6477_vm15, %v19001_v44, %v19020_v13  ;;  %v9561_v13 = vsel %vm6477_vm15, %v18996_v39, %v19001_v44 }
 0xa74   : > { %14016 = vmatprep.subr.msk.bf16.mxu0 %vm4651_vm11, %v9269_v4  ;;  %14516 = vmatprep.mubr.msk.bf16.mxu1 %vm15769_vm5, %v20839_v60  ;;  %v9584_v62 = vsel %vm4651_vm11, %v9564_v15, 0  ;;  %v9858_v39 = vsel %vm6798_vm0, %v19023_v53, %v19049_v26  ;;  %v9857_v44 = vsel %vm6798_vm0, %v19030_v11, %v19023_v53  ;;  %v9860_v11 = vsel %vm6798_vm0, %v19075_v49, %v19089_v50 }
 0xa77   : > { %9366 = vmatpush1.bf16.msra.mxu0 %v9292_v34 }
 0xa78   : > { %9598 = vmatprep.subr.bf16.mxu0 %v9560_v8 }
 0xa7a   : > { %14014 = vmatmul.mubr.msk.bf16.gmra.mrb[144].mxu0 %vm8189_vm6, %v19209_v0  ;;  %14517 = vmatmul.mubr.msk.bf16.vlgmr.msra.gmra.mrb[196].mxu1 %vm8189_vm6, %v19443_v42 }
 0xa7b   : > { %9352 = vmatprep.mubr.bf16.mxu0 %v20828_v38  ;;  %14520 = vmatprep.mubr.msk.bf16.mxu1 %vm15769_vm5, %v20839_v60 }
 0xa82   : > { %14015 = vmatmul.mubr.msk.bf16.gmra.mrb[148].mxu0 %vm8189_vm6, %v19226_v46  ;;  %14521 = vmatmul.mubr.msk.bf16.gmra.mrb[200].mxu1 %vm8189_vm6, %v19458_v17 }
 0xa83   : > { %9395 = vmatprep.mubr.bf16.mxu0 %v20828_v38  ;;  %14524 = vmatprep.mubr.msk.bf16.mxu1 %vm15769_vm5, %v20839_v60 }
 0xa85   : > { %v19467_v25 = vpop.f32.mrb[164].mxu0 }
 0xa86   : > { %v14390_v7 = vpop.f32.mrb[165].mxu0 }
 0xa87   : > { %v19474_v28 = vpop.f32.mrb[166].mxu0 }
 0xa88   : > { %v14391_v14 = vpop.f32.mrb[167].mxu0 }
 0xa8a   : > { %14017 = vmatmul.mubr.msk.bf16.vlgmr.msra.gmra.mrb[152].mxu0 %vm8189_vm6, %v19188_v45  ;;  %14525 = vmatmul.mubr.msk.bf16.gmra.mrb[204].mxu1 %vm8189_vm6, %v19472_v29 }
 0xa8b   : > { %9599 = vmatpush1.bf16.msra.mxu0 %v9559_v59  ;;  %9405 = vmatprep.mubr.bf16.mxu0 %v20828_v38  ;;  %v9567_v59 = vsel %vm6477_vm15, %v19011_v23, %v19025_v9 }
 0xa8c   : > { %14032 = vmatprep.subr.msk.bf16.mxu0 %vm4651_vm11, %v9565_v54  ;;  %11326 = vmatprep.mubr.bf16.mxu1 %v20828_v38 }
 0xa8d   : > { %v19492_v40 = vpop.f32.mrb[168].mxu0 }
 0xa8e   : > { %v14394_v45 = vpop.f32.mrb[169].mxu0 }
 0xa8f   : > { %9601 = vmatpush1.bf16.msra.mxu0 %v9584_v62  ;;  %v19498_v4 = vpop.f32.mrb[170].mxu0 }
 0xa90   : > { %9661 = vmatprep.subr.bf16.mxu0 %v9562_v31  ;;  %v14395_v2 = vpop.f32.mrb[171].mxu0 }
 0xa92   : > { %14018 = vmatmul.mubr.msk.bf16.gmra.mrb[156].mxu0 %vm8189_vm6, %v19209_v0  ;;  %v9566_v0 = vsel %vm6477_vm15, %v19013_v61, %v19011_v23  ;;  %v9862_v23 = vsel %vm6798_vm0, %v19061_v16, %v19044_v56  ;;  %v9863_v61 = vsel %vm6798_vm0, %v19044_v56, %v19069_v37 }
 0xa93   : > { %9415 = vmatprep.mubr.bf16.mxu0 %v20828_v38  ;;  %v9882_v15 = vsel %vm4651_vm11, %v9862_v23, 0 }
 0xa95   : > { %v19503_v34 = vpop.f32.mrb[172].mxu0 }
 0xa96   : > { %v14398_v8 = vpop.f32.mrb[173].mxu0 }
 0xa97   : > { %v19505_v7 = vpop.f32.mrb[174].mxu0 }
 0xa98   : > { %v14399_v14 = vpop.f32.mrb[175].mxu0 }
 0xa9a   : > { %14019 = vmatmul.mubr.msk.bf16.gmra.mrb[160].mxu0 %vm8189_vm6, %v19226_v46  ;;  %v9590_v46 = vsel %vm4651_vm11, %v9566_v0, 0 }
 0xa9b   : > { %9630 = vmatprep.mubr.bf16.mxu0 %v20828_v38 }
 0xaa2   : > { %14033 = vmatmul.mubr.msk.bf16.vlgmr.msra.gmra.mrb[140].mxu0 %vm8189_vm6, %v19253_v27 }
 0xaa3   : > { %9662 = vmatpush1.bf16.msra.mxu0 %v9561_v13  ;;  %9640 = vmatprep.mubr.bf16.mxu0 %v20828_v38 }
 0xaa4   : > { %14036 = vmatprep.subr.msk.bf16.mxu0 %vm4651_vm11, %v9567_v59 }
 0xaa7   : > { %9664 = vmatpush1.bf16.msra.mxu0 %v9590_v46 }
 0xaa8   : > { %9896 = vmatprep.subr.bf16.mxu0 %v9858_v39 }
 0xaaa   : > { %14034 = vmatmul.mubr.msk.bf16.gmra.mrb[144].mxu0 %vm8189_vm6, %v19278_v58 }
 0xaab   : > { %9650 = vmatprep.mubr.bf16.mxu0 %v20828_v38 }
 0xab2   : > { %14035 = vmatmul.mubr.msk.bf16.gmra.mrb[148].mxu0 %vm8189_vm6, %v19295_v51 }
 0xab3   : > { %9693 = vmatprep.mubr.bf16.mxu0 %v20828_v38 }
 0xaba   : > { %14037 = vmatmul.mubr.msk.bf16.vlgmr.msra.gmra.mrb[152].mxu0 %vm8189_vm6, %v19253_v27 }
 0xabb   : > { %9897 = vmatpush1.bf16.msra.mxu0 %v9857_v44  ;;  %9703 = vmatprep.mubr.bf16.mxu0 %v20828_v38 }
 0xabc   : > { %14052 = vmatprep.subr.msk.bf16.mxu0 %vm4651_vm11, %v9863_v61 }
 0xabd   : > { %v8864_v9 = vpop.f32.mrb[124].mxu1 }
 0xabe   : > { %v14422_v53 = vpop.f32.mrb[125].mxu1 }
 0xabf   : > { %9899 = vmatpush1.bf16.msra.mxu0 %v9882_v15  ;;  %v8867_v27 = vpop.f32.mrb[126].mxu1 }
 0xac0   : > { %9959 = vmatprep.subr.bf16.mxu0 %v9860_v11  ;;  %v14423_v16 = vpop.f32.mrb[127].mxu1 }
 0xac2   : > { %14038 = vmatmul.mubr.msk.bf16.gmra.mrb[156].mxu0 %vm8189_vm6, %v19278_v58 }
 0xac3   : > { %9713 = vmatprep.mubr.bf16.mxu0 %v20828_v38 }
 0xac5   : > { %v8872_v56 = vpop.f32.mrb[128].mxu1 }
 0xac6   : > { %v14426_v54 = vpop.f32.mrb[129].mxu1 }
 0xac7   : > { %v8875_v62 = vpop.f32.mrb[130].mxu1 }
 0xac8   : > { %v14427_v45 = vpop.f32.mrb[131].mxu1 }
 0xaca   : > { %14039 = vmatmul.mubr.msk.bf16.gmra.mrb[160].mxu0 %vm8189_vm6, %v19295_v51  ;;  %v9859_v51 = vsel %vm6798_vm0, %v19049_v26, %v19075_v49 }
 0xacb   : > { %9928 = vmatprep.mubr.bf16.mxu0 %v20828_v38 }
 0xacd   : > { %v8596_v31 = vpop.f32.mrb[176].mxu0  ;;  %v8880_v2 = vpop.f32.mrb[132].mxu1 }
 0xace   : > { %v8597_v50 = vadd.f32 %v8596_v31, %v19467_v25  ;;  %v14406_v8 = vpop.f32.mrb[177].mxu0  ;;  %v14430_v14 = vpop.f32.mrb[133].mxu1  ;;  %v9864_v25 = vsel %vm6798_vm0, %v19069_v37, %v19092_v41 }
 0xacf   : > { %v8599_v13 = vpop.f32.mrb[178].mxu0  ;;  %v8883_v0 = vpop.f32.mrb[134].mxu1  ;;  %v9888_v53 = vsel %vm4651_vm11, %v9864_v25, 0 }
 0xad0   : > { %v8600_v58 = vadd.f32 %v8599_v13, %v19474_v28  ;;  %v14407_v59 = vpop.f32.mrb[179].mxu0  ;;  %v14431_v46 = vpop.f32.mrb[135].mxu1  ;;  %v8891_v39 = vadd.f32 %v8864_v9, %v8597_v50  ;;  %v9865_v28 = vsel %vm6798_vm0, %v19092_v41, %v19110_v30  ;;  %v10156_v41 = vsel %vm7119_vm1, %v19136_v43, %v19139_v24 }
 0xad2   : > { %14053 = vmatmul.mubr.msk.bf16.vlgmr.msra.gmra.mrb[140].mxu0 %vm8189_vm6, %v19322_v10  ;;  %v8896_v44 = vadd.f32 %v8867_v27, %v8600_v58 }
 0xad3   : > { %9960 = vmatpush1.bf16.msra.mxu0 %v9859_v51  ;;  %9938 = vmatprep.mubr.bf16.mxu0 %v20828_v38 }
 0xad4   : > { %14056 = vmatprep.subr.msk.bf16.mxu0 %vm4651_vm11, %v9865_v28 }
 0xad5   : > { %v8604_v23 = vpop.f32.mrb[180].mxu0  ;;  %v9162_v61 = vpop.f32.mrb[136].mxu1 }
 0xad6   : > { %v8605_v9 = vadd.f32 %v8604_v23, %v19492_v40  ;;  %v9189_v15 = vadd.f32 %v9162_v61, %v8891_v39  ;;  %v14410_v26 = vpop.f32.mrb[181].mxu0  ;;  %v14438_v49 = vpop.f32.mrb[137].mxu1 }
 0xad7   : > { %9962 = vmatpush1.bf16.msra.mxu0 %v9888_v53  ;;  %v8607_v37 = vpop.f32.mrb[182].mxu0  ;;  %v9165_v11 = vpop.f32.mrb[138].mxu1 }
 0xad8   : > { %v8608_v30 = vadd.f32 %v8607_v37, %v19498_v4  ;;  %v9194_v27 = vadd.f32 %v9165_v11, %v8896_v44  ;;  %10194 = vmatprep.subr.bf16.mxu0 %v10156_v41  ;;  %v14411_v16 = vpop.f32.mrb[183].mxu0  ;;  %v14439_v54 = vpop.f32.mrb[139].mxu1  ;;  %v8901_v45 = vadd.f32 %v8872_v56, %v8605_v9 }
 0xada   : > { %14054 = vmatmul.mubr.msk.bf16.gmra.mrb[144].mxu0 %vm8189_vm6, %v19343_v20  ;;  %v8906_v40 = vadd.f32 %v8875_v62, %v8608_v30 }
 0xadb   : > { %9948 = vmatprep.mubr.bf16.mxu0 %v20828_v38 }
 0xadd   : > { %v8612_v31 = vpop.f32.mrb[184].mxu0  ;;  %v9170_v50 = vpop.f32.mrb[140].mxu1 }
 0xade   : > { %v8613_v8 = vadd.f32 %v8612_v31, %v19503_v34  ;;  %v9199_v14 = vadd.f32 %v9170_v50, %v8901_v45  ;;  %v14414_v13 = vpop.f32.mrb[185].mxu0  ;;  %v14442_v58 = vpop.f32.mrb[141].mxu1  ;;  %v10162_v50 = vsel %vm7119_vm1, %v19165_v36, %v19228_v57 }
 0xadf   : > { %v8615_v59 = vpop.f32.mrb[186].mxu0  ;;  %v9173_v4 = vpop.f32.mrb[142].mxu1  ;;  %v10186_v58 = vsel %vm4651_vm11, %v10162_v50, 0 }
 0xae0   : > { %v8616_v46 = vadd.f32 %v8615_v59, %v19505_v7  ;;  %v9204_v39 = vadd.f32 %v9173_v4, %v8906_v40  ;;  %v14443_v51 = vpop.f32.mrb[143].mxu1  ;;  %v8911_v56 = vadd.f32 %v8880_v2, %v8613_v8  ;;  %v14415_v44 = vpop.f32.mrb[187].mxu0  ;;  %v10155_v7 = vsel %vm7119_vm1, %v19151_v5, %v19136_v43 }
 0xae1   : > { %v10160_v2 = vsel %vm7119_vm1, %v19156_v55, %v19163_v6  ;;  %v10158_v55 = vsel %vm7119_vm1, %v19216_v52, %v19221_v63 }
 0xae2   : > { %14055 = vmatmul.mubr.msk.bf16.gmra.mrb[148].mxu0 %vm8189_vm6, %v19360_v18  ;;  %v8916_v62 = vadd.f32 %v8883_v0, %v8616_v46  ;;  %v10161_v0 = vsel %vm7119_vm1, %v19163_v6, %v19165_v36  ;;  %v10180_v49 = vsel %vm4651_vm11, %v10160_v2, 0  ;;  %v10454_v36 = vsel %vm7440_vm3, %v19270_v32, %v19273_v48 }
 0xae3   : > { %9991 = vmatprep.mubr.bf16.mxu0 %v20828_v38 }
 0xae5   : > { %v9178_v25 = vpop.f32.mrb[144].mxu1 }
 0xae6   : > { %v9209_v28 = vadd.f32 %v9178_v25, %v8911_v56  ;;  %v14446_v34 = vpop.f32.mrb[145].mxu1 }
 0xae7   : > { %v9181_v23 = vpop.f32.mrb[146].mxu1 }
 0xae8   : > { %v9214_v61 = vadd.f32 %v9181_v23, %v8916_v62  ;;  %v14447_v9 = vpop.f32.mrb[147].mxu1  ;;  %v10453_v23 = vsel %vm7440_vm3, %v19285_v12, %v19270_v32 }
 0xae9   : > { %v20842_v9 = vld [vmem:[#allocation12_spill] sm:$0xff] }
 0xaea   : > { %14057 = vmatmul.mubr.msk.bf16.vlgmr.msra.gmra.mrb[152].mxu0 %vm8189_vm6, %v19322_v10 }
 0xaeb   : > { %10195 = vmatpush1.bf16.msra.mxu0 %v10155_v7  ;;  %10001 = vmatprep.mubr.bf16.mxu0 %v20828_v38  ;;  %v10459_v7 = vsel %vm7440_vm3, %v19297_v21, %v20842_v9 }
 0xaec   : > { %14072 = vmatprep.subr.msk.bf16.mxu0 %vm4651_vm11, %v10161_v0 }
 0xaed   : > { %v9460_v26 = vpop.f32.mrb[148].mxu1 }
 0xaee   : > { %v9487_v43 = vadd.f32 %v9460_v26, %v9189_v15  ;;  %v14454_v5 = vpop.f32.mrb[149].mxu1  ;;  %v20843_v26 = vld [vmem:[#allocation13_spill] sm:$0xff] }
 0xaef   : > { %10197 = vmatpush1.bf16.msra.mxu0 %v10180_v49  ;;  %v9463_v10 = vpop.f32.mrb[150].mxu1 }
 0xaf0   : > { %v9492_v53 = vadd.f32 %v9463_v10, %v9194_v27  ;;  %10257 = vmatprep.subr.bf16.mxu0 %v10158_v55  ;;  %v14455_v37 = vpop.f32.mrb[151].mxu1 }
 0xaf2   : > { %14058 = vmatmul.mubr.msk.bf16.gmra.mrb[156].mxu0 %vm8189_vm6, %v19343_v20  ;;  %v10157_v20 = vsel %vm7119_vm1, %v19139_v24, %v19216_v52 }
 0xaf3   : > { %10011 = vmatprep.mubr.bf16.mxu0 %v20828_v38 }
 0xaf5   : > { %v9468_v6 = vpop.f32.mrb[152].mxu1 }
 0xaf6   : > { %v9497_v11 = vadd.f32 %v9468_v6, %v9199_v14  ;;  %v14458_v41 = vpop.f32.mrb[153].mxu1 }
 0xaf7   : > { %v9471_v30 = vpop.f32.mrb[154].mxu1 }
 0xaf8   : > { %v9502_v15 = vadd.f32 %v9471_v30, %v9204_v39  ;;  %v14459_v16 = vpop.f32.mrb[155].mxu1 }
 0xaf9   : > { %v20844_v16 = vld [vmem:[#allocation14_spill] sm:$0xff] }
 0xafa   : > { %14059 = vmatmul.mubr.msk.bf16.gmra.mrb[160].mxu0 %vm8189_vm6, %v19360_v18  ;;  %v10163_v18 = vsel %vm7119_vm1, %v19228_v57, %v19233_v47 }
 0xafb   : > { %10226 = vmatprep.mubr.bf16.mxu0 %v20828_v38 }
 0xafd   : > { %v9476_v63 = vpop.f32.mrb[156].mxu1 }
 0xafe   : > { %v9507_v27 = vadd.f32 %v9476_v63, %v9209_v28  ;;  %v14462_v54 = vpop.f32.mrb[157].mxu1  ;;  %v10460_v63 = vsel %vm7440_vm3, %v20842_v9, %v20844_v16 }
 0xaff   : > { %v9479_v45 = vpop.f32.mrb[158].mxu1 }
 0xb00   : > { %v9512_v40 = vadd.f32 %v9479_v45, %v9214_v61  ;;  %v14463_v31 = vpop.f32.mrb[159].mxu1  ;;  %v10458_v61 = vsel %vm7440_vm3, %v19290_v35, %v19297_v21  ;;  %v10456_v35 = vsel %vm7440_vm3, %v20843_v26, %v19355_v3 }
 0xb01   : > { %v10478_v0 = vsel %vm4651_vm11, %v10458_v61, 0 }
 0xb02   : > { %14073 = vmatmul.mubr.msk.bf16.vlgmr.msra.gmra.mrb[140].mxu0 %vm8189_vm6, %v19387_v19 }
 0xb03   : > { %10258 = vmatpush1.bf16.msra.mxu0 %v10157_v20  ;;  %10236 = vmatprep.mubr.bf16.mxu0 %v20828_v38 }
 0xb04   : > { %14076 = vmatprep.subr.msk.bf16.mxu0 %vm4651_vm11, %v10163_v18 }
 0xb05   : > { %v9758_v8 = vpop.f32.mrb[160].mxu1 }
 0xb06   : > { %v9785_v14 = vadd.f32 %v9758_v8, %v9487_v43  ;;  %v14470_v13 = vpop.f32.mrb[161].mxu1 }
 0xb07   : > { %10260 = vmatpush1.bf16.msra.mxu0 %v10186_v58  ;;  %v9761_v24 = vpop.f32.mrb[162].mxu1 }
 0xb08   : > { %v9790_v52 = vadd.f32 %v9761_v24, %v9492_v53  ;;  %10492 = vmatprep.subr.bf16.mxu0 %v10454_v36  ;;  %v14471_v59 = vpop.f32.mrb[163].mxu1 }
 0xb0a   : > { %14074 = vmatmul.mubr.msk.bf16.gmra.mrb[144].mxu0 %vm8189_vm6, %v19408_v22 }
 0xb0b   : > { %10246 = vmatprep.mubr.bf16.mxu0 %v20828_v38 }
 0xb0d   : > { %v9766_v57 = vpop.f32.mrb[164].mxu1 }
 0xb0e   : > { %v9795_v47 = vadd.f32 %v9766_v57, %v9497_v11  ;;  %v14474_v4 = vpop.f32.mrb[165].mxu1 }
 0xb0f   : > { %v9769_v46 = vpop.f32.mrb[166].mxu1 }
 0xb10   : > { %v9800_v39 = vadd.f32 %v9769_v46, %v9502_v15  ;;  %v14475_v51 = vpop.f32.mrb[167].mxu1 }
 0xb12   : > { %14075 = vmatmul.mubr.msk.bf16.gmra.mrb[148].mxu0 %vm8189_vm6, %v19420_v33 }
 0xb13   : > { %10289 = vmatprep.mubr.bf16.mxu0 %v20828_v38 }
 0xb15   : > { %v9774_v56 = vpop.f32.mrb[168].mxu1 }
 0xb16   : > { %v9805_v44 = vadd.f32 %v9774_v56, %v9507_v27  ;;  %v14478_v62 = vpop.f32.mrb[169].mxu1 }
 0xb17   : > { %v9777_v25 = vpop.f32.mrb[170].mxu1 }
 0xb18   : > { %v9810_v28 = vadd.f32 %v9777_v25, %v9512_v40  ;;  %v14479_v34 = vpop.f32.mrb[171].mxu1  ;;  %v10484_v40 = vsel %vm4651_vm11, %v10460_v63, 0  ;;  %v19680_v25 = vpop.permute.xlu1 %10718 }
 0xb1a   : > { %14077 = vmatmul.mubr.msk.bf16.vlgmr.msra.gmra.mrb[152].mxu0 %vm8189_vm6, %v19387_v19 }
 0xb1b   : > { %10493 = vmatpush1.bf16.msra.mxu0 %v10453_v23  ;;  %10299 = vmatprep.mubr.bf16.mxu0 %v20828_v38 }
 0xb1c   : > { %14092 = vmatprep.subr.msk.bf16.mxu0 %vm4651_vm11, %v10459_v7 }
 0xb1d   : > { %v10056_v2 = vpop.f32.mrb[172].mxu1 }
 0xb1e   : > { %v10083_v32 = vadd.f32 %v10056_v2, %v9785_v14  ;;  %v14486_v12 = vpop.f32.mrb[173].mxu1 }
 0xb1f   : > { %10495 = vmatpush1.bf16.msra.mxu0 %v10478_v0  ;;  %v10059_v19 = vpop.f32.mrb[174].mxu1 }
 0xb20   : > { %v10088_v49 = vadd.f32 %v10059_v19, %v9790_v52  ;;  %10555 = vmatprep.subr.bf16.mxu0 %v10456_v35  ;;  %v14487_v43 = vpop.f32.mrb[175].mxu1  ;;  %v19697_v19 = vpop.permute.xlu1 %10728 }
 0xb22   : > { %14078 = vmatmul.mubr.msk.bf16.gmra.mrb[156].mxu0 %vm8189_vm6, %v19408_v22  ;;  %v10455_v22 = vsel %vm7440_vm3, %v19273_v48, %v20843_v26 }
 0xb23   : > { %10309 = vmatprep.mubr.bf16.mxu0 %v20828_v38 }
 0xb25   : > { %v10064_v21 = vpop.f32.mrb[176].mxu1 }
 0xb26   : > { %v10093_v5 = vadd.f32 %v10064_v21, %v9795_v47  ;;  %v14490_v10 = vpop.f32.mrb[177].mxu1 }
 0xb27   : > { %v10067_v55 = vpop.f32.mrb[178].mxu1 }
 0xb28   : > { %v10098_v53 = vadd.f32 %v10067_v55, %v9800_v39  ;;  %v14491_v37 = vpop.f32.mrb[179].mxu1  ;;  %v19677_v39 = vpop.permute.xlu0 %10713 }
 0xb2a   : > { %14079 = vmatmul.mubr.msk.bf16.gmra.mrb[160].mxu0 %vm8189_vm6, %v19420_v33  ;;  %v10461_v33 = vsel %vm7440_vm3, %v20844_v16, %v19367_v1 }
 0xb2b   : > { %10524 = vmatprep.mubr.bf16.mxu0 %v20828_v38 }
 0xb2c   : > { %v19692_v7 = vpop.permute.xlu0 %10723 }
 0xb2d   : > { %v10072_v3 = vpop.f32.mrb[180].mxu1 }
 0xb2e   : > { %v10103_v6 = vadd.f32 %v10072_v3, %v9805_v44  ;;  %v14494_v11 = vpop.f32.mrb[181].mxu1  ;;  %v19712_v3 = vpop.permute.xlu1 %10738 }
 0xb2f   : > { %v10075_v41 = vpop.f32.mrb[182].mxu1 }
 0xb30   : > { %v10108_v30 = vadd.f32 %v10075_v41, %v9810_v28  ;;  %v14495_v15 = vpop.f32.mrb[183].mxu1 }
 0xb32   : > { %14093 = vmatmul.mubr.msk.bf16.vlgmr.msra.gmra.mrb[140].mxu0 %vm8189_vm6, %v19443_v42 }
 0xb33   : > { %10556 = vmatpush1.bf16.msra.mxu0 %v10455_v22  ;;  %10534 = vmatprep.mubr.bf16.mxu0 %v20828_v38 }
 0xb34   : > { %14096 = vmatprep.subr.msk.bf16.mxu0 %vm4651_vm11, %v10461_v33 }
 0xb35   : > { %v10354_v27 = vpop.f32.mrb[184].mxu1 }
 0xb36   : > { %v10381_v54 = vadd.f32 %v10354_v27, %v10083_v32  ;;  %v14502_v45 = vpop.f32.mrb[185].mxu1 }
 0xb37   : > { %10558 = vmatpush1.bf16.msra.mxu0 %v10484_v40  ;;  %v10357_v48 = vpop.f32.mrb[186].mxu1 }
 0xb38   : > { %v10386_v31 = vadd.f32 %v10357_v48, %v10088_v49  ;;  %v14503_v20 = vpop.f32.mrb[187].mxu1 }
 0xb3a   : > { %14094 = vmatmul.mubr.msk.bf16.gmra.mrb[144].mxu0 %vm8189_vm6, %v19458_v17 }
 0xb3b   : > { %10544 = vmatprep.mubr.bf16.mxu0 %v20828_v38 }
 0xb3d   : > { %v10362_v50 = vpop.f32.mrb[188].mxu1 }
 0xb3e   : > { %v10391_v1 = vadd.f32 %v10362_v50, %v10093_v5  ;;  %v14506_v18 = vpop.f32.mrb[189].mxu1  ;;  %v19707_v5 = vpop.permute.xlu0 %10733 }
 0xb3f   : > { %v10365_v8 = vpop.f32.mrb[190].mxu1 }
 0xb40   : > { %v10396_v14 = vadd.f32 %v10365_v8, %v10098_v53  ;;  %v14507_v13 = vpop.f32.mrb[191].mxu1 }
 0xb42   : > { %14095 = vmatmul.mubr.msk.bf16.gmra.mrb[148].mxu0 %vm8189_vm6, %v19472_v29 }
 0xb43   : > { %10587 = vmatprep.mubr.bf16.mxu0 %v20828_v38 }
 0xb45   : > { %v10370_v58 = vpop.f32.mrb[192].mxu1 }
 0xb46   : > { %v10401_v24 = vadd.f32 %v10370_v58, %v10103_v6  ;;  %v14510_v36 = vpop.f32.mrb[193].mxu1 }
 0xb47   : > { %v10373_v52 = vpop.f32.mrb[194].mxu1 }
 0xb48   : > { %v10406_v59 = vadd.f32 %v10373_v52, %v10108_v30  ;;  %v14511_v57 = vpop.f32.mrb[195].mxu1 }
 0xb4a   : > { %14097 = vmatmul.mubr.msk.bf16.vlgmr.msra.gmra.mrb[152].mxu0 %vm8189_vm6, %v19443_v42 }
 0xb4b   : > { %10597 = vmatprep.mubr.bf16.mxu0 %v20828_v38 }
 0xb4d   : > { %v10652_v47 = vpop.f32.mrb[196].mxu1 }
 0xb4e   : > { %v10679_v4 = vadd.f32 %v10652_v47, %v10381_v54  ;;  %v14518_v46 = vpop.f32.mrb[197].mxu1 }
 0xb4f   : > { %v10655_v51 = vpop.f32.mrb[198].mxu1 }
 0xb50   : > { %v10745_v56 = vadd.f32 %v19677_v39, %v10679_v4  ;;  %v10684_v44 = vadd.f32 %v10655_v51, %v10386_v31  ;;  %v14519_v62 = vpop.f32.mrb[199].mxu1 }
 0xb52   : > { %v19682_v28 = vmax.f32 %v10745_v56, 0.0  ;;  %v19685_v34 = vadd.f32 %v19680_v25, %v10684_v44  ;;  %14098 = vmatmul.mubr.msk.bf16.gmra.mrb[156].mxu0 %vm8189_vm6, %v19458_v17 }
 0xb53   : > { %10607 = vmatprep.mubr.bf16.mxu0 %v20828_v38 }
 0xb54   : > { %10805 = vst [vmem:[#allocation2 + $0x20] sm:$0xff] %v19682_v28  ;;  %v20783_v42 = vmax.f32 %v19685_v34, 0.0 }
 0xb55   : > { %v10660_v23 = vpop.f32.mrb[200].mxu1 }
 0xb56   : > { %v10689_v61 = vadd.f32 %v10660_v23, %v10391_v1  ;;  %v14522_v9 = vpop.f32.mrb[201].mxu1 }
 0xb57   : > { %v10663_v2 = vpop.f32.mrb[202].mxu1 }
 0xb58   : > { %v19695_v0 = vadd.f32 %v19692_v7, %v10689_v61  ;;  %v10694_v32 = vadd.f32 %v10663_v2, %v10396_v14  ;;  %v14523_v12 = vpop.f32.mrb[203].mxu1 }
 0xb5a   : > { %v20763_v17 = vmax.f32 %v19695_v0, 0.0  ;;  %v19701_v26 = vadd.f32 %v19697_v19, %v10694_v32  ;;  %14099 = vmatmul.mubr.msk.bf16.gmra.mrb[160].mxu0 %vm8189_vm6, %v19472_v29 }
 0xb5b   : > { %12713 = vmatprep.mubr.bf16.mxu0 %v20828_v38 }
 0xb5c   : > { %v20760_v35 = vmax.f32 %v19701_v26, 0.0 }
 0xb5d   : > { %v10668_v49 = vpop.f32.mrb[204].mxu1 }
 0xb5e   : > { %v10699_v43 = vadd.f32 %v10668_v49, %v10401_v24  ;;  %v14526_v21 = vpop.f32.mrb[205].mxu1 }
 0xb5f   : > { %v10671_v10 = vpop.f32.mrb[206].mxu1 }
 0xb60   : > { %v19710_v55 = vadd.f32 %v19707_v5, %v10699_v43  ;;  %v10704_v53 = vadd.f32 %v10671_v10, %v10406_v59  ;;  %v14527_v37 = vpop.f32.mrb[207].mxu1 }
 0xb62   : > { %v20766_v6 = vmax.f32 %v19710_v55, 0.0  ;;  %v19716_v29 = vadd.f32 %v19712_v3, %v10704_v53 }
 0xb64   : > { %v20764_v11 = vmax.f32 %v19716_v29, 0.0 }
 0xc05   : > { %v10526_v41 = vpop.f32.mrb[140].mxu0 }
 0xc06   : > { %v19720_v30 = vadd.f32 %v19677_v39, %v10526_v41  ;;  %v10528_v15 = vpop.f32.mrb[141].mxu0 }
 0xc07   : > { %v10530_v22 = vpop.f32.mrb[142].mxu0  ;;  %v19724_v63 = vadd.f32 %v19677_v39, %v10528_v15 }
 0xc08   : > { %v10771_v16 = vmax.f32 %v19720_v30, 0.0  ;;  %v19727_v33 = vadd.f32 %v19680_v25, %v10530_v22  ;;  %v10532_v27 = vpop.f32.mrb[143].mxu0 }
 0xc09   : > { %v19731_v45 = vadd.f32 %v19680_v25, %v10532_v27  ;;  %v10772_v40 = vmax.f32 %v19724_v63, 0.0 }
 0xc0a   : > { %v20781_v54 = vmax.f32 %v19727_v33, 0.0  ;;  %10891 = vrot.lane.b32.xlu0 %v10771_v16, %s20829_s4 }
 0xc0b   : > { %v20780_v31 = vmax.f32 %v19731_v45, 0.0 }
 0xc0c   : > { %10901 = vrot.lane.b32.xlu1 %v20781_v54, %s20829_s4 }
 0xc0d   : > { %v10536_v48 = vpop.f32.mrb[144].mxu0 }
 0xc0e   : > { %v19742_v20 = vadd.f32 %v19692_v7, %v10536_v48  ;;  %v10538_v50 = vpop.f32.mrb[145].mxu0  ;;  %10893 = vrot.lane.b32.xlu0 %v10772_v40, %s20829_s4 }
 0xc0f   : > { %v10540_v1 = vpop.f32.mrb[146].mxu0  ;;  %v19749_v8 = vadd.f32 %v19692_v7, %v10538_v50 }
 0xc10   : > { %v10781_v18 = vmax.f32 %v19742_v20, 0.0  ;;  %v19752_v14 = vadd.f32 %v19697_v19, %v10540_v1  ;;  %v10542_v13 = vpop.f32.mrb[147].mxu0  ;;  %10903 = vrot.lane.b32.xlu1 %v20780_v31, %s20829_s4 }
 0xc11   : > { %v19759_v24 = vadd.f32 %v19697_v19, %v10542_v13  ;;  %v20776_v36 = vmax.f32 %v19749_v8, 0.0 }
 0xc12   : > { %v20779_v58 = vmax.f32 %v19752_v14, 0.0  ;;  %10911 = vrot.lane.b32.xlu0 %v10781_v18, %s20829_s4 }
 0xc13   : > { %v20774_v59 = vmax.f32 %v19759_v24, 0.0 }
 0xc14   : > { %10921 = vrot.lane.b32.xlu1 %v20779_v58, %s20829_s4 }
 0xc15   : > { %v10546_v52 = vpop.f32.mrb[148].mxu0 }
 0xc16   : > { %v19770_v57 = vadd.f32 %v19707_v5, %v10546_v52  ;;  %v10548_v47 = vpop.f32.mrb[149].mxu0  ;;  %10913 = vrot.lane.b32.xlu0 %v20776_v36, %s20829_s4 }
 0xc17   : > { %v19776_v4 = vadd.f32 %v19707_v5, %v10548_v47  ;;  %v10550_v46 = vpop.f32.mrb[150].mxu0 }
 0xc18   : > { %v10791_v51 = vmax.f32 %v19770_v57, 0.0  ;;  %v19780_v56 = vadd.f32 %v19712_v3, %v10550_v46  ;;  %v10552_v44 = vpop.f32.mrb[151].mxu0  ;;  %10923 = vrot.lane.b32.xlu1 %v20774_v59, %s20829_s4 }
 0xc19   : > { %v20772_v62 = vmax.f32 %v19776_v4, 0.0  ;;  %v19787_v23 = vadd.f32 %v19712_v3, %v10552_v44 }
 0xc1a   : > { %v20777_v61 = vmax.f32 %v19780_v56, 0.0 }
 0xc1b   : > { %v20770_v9 = vmax.f32 %v19787_v23, 0.0  ;;  %10933 = vrot.lane.b32.xlu0 %v20772_v62, %s20829_s4 }
 0xc1d   : > { %v10589_v2 = vpop.f32.mrb[152].mxu0  ;;  %10943 = vrot.lane.b32.xlu1 %v20770_v9, %s20829_s4 }
 0xc1e   : > { %v19798_v32 = vadd.f32 %v19677_v39, %v10589_v2  ;;  %v10591_v12 = vpop.f32.mrb[153].mxu0 }
 0xc1f   : > { %v19801_v49 = vadd.f32 %v19677_v39, %v10591_v12  ;;  %v10593_v43 = vpop.f32.mrb[154].mxu0 }
 0xc20   : > { %v20775_v21 = vmax.f32 %v19798_v32, 0.0  ;;  %v10595_v10 = vpop.f32.mrb[155].mxu0  ;;  %v19806_v37 = vadd.f32 %v19680_v25, %v10593_v43 }
 0xc21   : > { %v20782_v53 = vmax.f32 %v19801_v49, 0.0  ;;  %v19809_v41 = vadd.f32 %v19680_v25, %v10595_v10 }
 0xc22   : > { %10895 = vrot.lane.b32.xlu1 %v20775_v21, %s20829_s4  ;;  %v20773_v39 = vmax.f32 %v19806_v37, 0.0 }
 0xc23   : > { %v20778_v15 = vmax.f32 %v19809_v41, 0.0  ;;  %10897 = vrot.lane.b32.xlu0 %v20782_v53, %s20829_s4 }
 0xc25   : > { %v10599_v22 = vpop.f32.mrb[156].mxu0 }
 0xc26   : > { %v19820_v27 = vadd.f32 %v19692_v7, %v10599_v22  ;;  %v10601_v48 = vpop.f32.mrb[157].mxu0  ;;  %10907 = vrot.lane.b32.xlu1 %v20778_v15, %s20829_s4 }
 0xc27   : > { %v19826_v25 = vadd.f32 %v19692_v7, %v10601_v48  ;;  %v10603_v50 = vpop.f32.mrb[158].mxu0  ;;  %10905 = vrot.lane.b32.xlu0 %v20773_v39, %s20829_s4 }
 0xc28   : > { %v20771_v1 = vmax.f32 %v19820_v27, 0.0  ;;  %v19833_v13 = vadd.f32 %v19697_v19, %v10603_v50  ;;  %v10605_v52 = vpop.f32.mrb[159].mxu0 }
 0xc29   : > { %v20768_v47 = vmax.f32 %v19826_v25, 0.0  ;;  %v19837_v46 = vadd.f32 %v19697_v19, %v10605_v52 }
 0xc2a   : > { %v20769_v44 = vmax.f32 %v19833_v13, 0.0  ;;  %10915 = vrot.lane.b32.xlu1 %v20771_v1, %s20829_s4 }
 0xc2b   : > { %v20759_v7 = vmax.f32 %v19837_v46, 0.0  ;;  %10917 = vrot.lane.b32.xlu0 %v20768_v47, %s20829_s4 }
 0xc2d   : > { %v10609_v2 = vpop.f32.mrb[160].mxu0 }
 0xc2e   : > { %v19848_v12 = vadd.f32 %v19707_v5, %v10609_v2  ;;  %v10611_v43 = vpop.f32.mrb[161].mxu0  ;;  %10927 = vrot.lane.b32.xlu1 %v20759_v7, %s20829_s4 }
 0xc2f   : > { %v19854_v19 = vadd.f32 %v19707_v5, %v10611_v43  ;;  %v10613_v10 = vpop.f32.mrb[162].mxu0  ;;  %10925 = vrot.lane.b32.xlu0 %v20769_v44, %s20829_s4 }
 0xc30   : > { %v20767_v22 = vmax.f32 %v19848_v12, 0.0  ;;  %v19861_v48 = vadd.f32 %v19712_v3, %v10613_v10  ;;  %v10615_v50 = vpop.f32.mrb[163].mxu0 }
 0xc31   : > { %v20762_v52 = vmax.f32 %v19854_v19, 0.0  ;;  %v19865_v2 = vadd.f32 %v19712_v3, %v10615_v50 }
 0xc32   : > { %v20765_v7 = vmax.f32 %v19861_v48, 0.0  ;;  %10935 = vrot.lane.b32.xlu1 %v20767_v22, %s20829_s4 }
 0xc33   : > { %v20761_v5 = vmax.f32 %v19865_v2, 0.0  ;;  %10937 = vrot.lane.b32.xlu0 %v20762_v52, %s20829_s4 }
 0xc36   : > { %10947 = vrot.lane.b32.xlu1 %v20761_v5, %s20829_s4 }
 0xc37   : > { %10945 = vrot.lane.b32.xlu0 %v20765_v7, %s20829_s4 }
 0xc3a   : > { %10941 = vrot.lane.b32.xlu1 %v20777_v61, %s20829_s4 }
 0xc3b   : > { %10931 = vrot.lane.b32.xlu0 %v10791_v51, %s20829_s4 }
 0xc3e   : > { %10909 = vrot.lane.b32.xlu1 %v20783_v42, %s20829_s4 }
 0xc3f   : > { %10899 = vrot.lane.b32.xlu0 %v19682_v28, %s20829_s4 }
 0xc42   : > { %10929 = vrot.lane.b32.xlu1 %v20760_v35, %s20829_s4 }
 0xc43   : > { %10919 = vrot.lane.b32.xlu0 %v20763_v17, %s20829_s4 }
 0xc46   : > { %10949 = vrot.lane.b32.xlu1 %v20764_v11, %s20829_s4 }
 0xc47   : > { %10939 = vrot.lane.b32.xlu0 %v20766_v6, %s20829_s4  ;;  %s15695_s4 = scalar_lea.vmem %s15694_s22, 32 }
 0xc7c   : > { %v10892_v3 = vpop.permute.xlu0 %10891 }
 0xc7e   : > { %v10902_v43 = vpop.permute.xlu1 %10901 }
 0xc80   : > { %v10894_v10 = vpop.permute.xlu0 %10893 }
 0xc81   : > { %v10952_v50 = vsel %vm1368_vm4, %v10892_v3, %v10894_v10 }
 0xc82   : > { %v19907_v35 = vmax.f32 %v10771_v16, %v10952_v50  ;;  %v10904_v5 = vpop.permute.xlu1 %10903 }
 0xc84   : > { %v10912_v52 = vpop.permute.xlu0 %10911  ;;  %11066 = vrot.lane.b32.xlu0 %v19907_v35, %s20830_s30 }
 0xc86   : > { %v10922_v17 = vpop.permute.xlu1 %10921 }
 0xc88   : > { %v10914_v11 = vpop.permute.xlu0 %10913 }
 0xc89   : > { %v10960_v7 = vsel %vm1368_vm4, %v10912_v52, %v10914_v11 }
 0xc8a   : > { %v19914_v6 = vmax.f32 %v10781_v18, %v10960_v7  ;;  %v10924_v22 = vpop.permute.xlu1 %10923 }
 0xc8c   : > { %11086 = vrot.lane.b32.xlu0 %v19914_v6, %s20830_s30 }
 0xc8d   : > { %v10934_v16 = vpop.permute.xlu0 %10933 }
 0xc8f   : > { %v10944_v30 = vpop.permute.xlu1 %10943 }
 0xc94   : > { %v10896_v3 = vpop.permute.xlu1 %10895 }
 0xc95   : > { %v10898_v50 = vpop.permute.xlu0 %10897  ;;  %v10953_v15 = vsel %vm1368_vm4, %v10894_v10, %v10896_v3 }
 0xc96   : > { %v19939_v54 = vmax.f32 %v10772_v40, %v10953_v15  ;;  %v20847_v40 = vmax.f32 %v19727_v33, 0.0 }
 0xc98   : > { %v10908_v47 = vpop.permute.xlu1 %10907 }
 0xc99   : > { %v10906_v44 = vpop.permute.xlu0 %10905 }
 0xc9a   : > { %v10957_v63 = vsel %vm1368_vm4, %v10904_v5, %v10906_v44 }
 0xc9c   : > { %v10916_v9 = vpop.permute.xlu1 %10915 }
 0xc9d   : > { %v10918_v1 = vpop.permute.xlu0 %10917 }
 0xca0   : > { %v19918_v62 = vpop.permute.xlu1 %10927 }
 0xca1   : > { %v10926_v39 = vpop.permute.xlu0 %10925 }
 0xca4   : > { %v19920_v52 = vpop.permute.xlu1 %10935 }
 0xca5   : > { %v19922_v20 = vpop.permute.xlu0 %10937 }
 0xca8   : > { %v19924_v18 = vpop.permute.xlu1 %10947 }
 0xca9   : > { %v19926_v7 = vpop.permute.xlu0 %10945 }
 0xcac   : > { %v10942_v59 = vpop.permute.xlu1 %10941 }
 0xcad   : > { %v10932_v21 = vpop.permute.xlu0 %10931  ;;  %v10972_v33 = vsel %vm1368_vm4, %v10942_v59, %v10944_v30  ;;  %v20852_v59 = vmax.f32 %v19749_v8, 0.0  ;;  %v10969_v8 = vsel %vm1368_vm4, %v10934_v16, %v19920_v52 }
 0xcae   : > { %v10968_v36 = vsel %vm1368_vm4, %v10932_v21, %v10934_v16  ;;  %v20846_v21 = vmax.f32 %v19801_v49, 0.0  ;;  %v20849_v49 = vmax.f32 %v19752_v14, 0.0  ;;  %v10954_v14 = vsel %vm1368_vm4, %v10896_v3, %v10898_v50 }
 0xcaf   : > { %v19931_v61 = vmax.f32 %v10791_v51, %v10968_v36  ;;  %v20845_v36 = vmax.f32 %v19685_v34, 0.0  ;;  %v10956_v51 = vsel %vm1368_vm4, %v10902_v43, %v10904_v5  ;;  %v10964_v34 = vsel %vm1368_vm4, %v10922_v17, %v10924_v22 }
 0xcb0   : > { %v10910_v53 = vpop.permute.xlu1 %10909  ;;  %v19972_v5 = vmax.f32 %v20849_v49, %v10964_v34  ;;  %v20850_v17 = vmax.f32 %v19809_v41, 0.0  ;;  %v10965_v41 = vsel %vm1368_vm4, %v10924_v22, %v10926_v39  ;;  %v20854_v3 = vmax.f32 %v19759_v24, 0.0 }
 0xcb1   : > { %11106 = vrot.lane.b32.xlu0 %v19931_v61, %s20830_s30  ;;  %v10900_v58 = vpop.permute.xlu0 %10899  ;;  %v11031_v57 = vmax.f32 %v20845_v36, %v10910_v53  ;;  %v20855_v22 = vmax.f32 %v19806_v37, 0.0  ;;  %v20857_v37 = vmax.f32 %v19820_v27, 0.0  ;;  %v20859_v27 = vmax.f32 %v19833_v13, 0.0 }
 0xcb2   : > { %v11030_v31 = vmax.f32 %v19682_v28, %v10900_v58  ;;  %v10955_v42 = vsel %vm1368_vm4, %v10898_v50, %v10900_v58  ;;  %v20848_v58 = vmax.f32 %v19731_v45, 0.0  ;;  %v10961_v45 = vsel %vm1368_vm4, %v10914_v11, %v10916_v9 }
 0xcb3   : > { %v19950_v28 = vmax.f32 %v20846_v21, %v10955_v42  ;;  %v10959_v42 = vsel %vm1368_vm4, %v10908_v47, %v10910_v53  ;;  %v20851_v53 = vmax.f32 %v19780_v56, 0.0  ;;  %v19991_v36 = vmax.f32 %v20852_v59, %v10961_v45 }
 0xcb4   : > { %11074 = vrot.lane.b32.xlu1 %v11030_v31, %s20830_s30  ;;  %v19958_v31 = vmax.f32 %v20847_v40, %v10956_v51  ;;  %v19963_v15 = vmax.f32 %v20848_v58, %v10957_v63  ;;  %v19977_v43 = vmax.f32 %v20850_v17, %v10959_v42  ;;  %v20853_v11 = vmax.f32 %v19798_v32, 0.0  ;;  %v10930_v40 = vpop.permute.xlu1 %10929 }
 0xcb5   : > { %11068 = vrot.lane.b32.xlu0 %v19939_v54, %s20830_s30  ;;  %v19986_v10 = vmax.f32 %v20851_v53, %v10972_v33  ;;  %v10958_v56 = vsel %vm1368_vm4, %v10906_v44, %v10908_v47  ;;  %v20005_v50 = vmax.f32 %v20854_v3, %v10965_v41  ;;  %v10962_v51 = vsel %vm1368_vm4, %v10916_v9, %v10918_v1  ;;  %v10920_v16 = vpop.permute.xlu0 %10919  ;;  %v11262_v41 = vld [vmem:[%s20683_s12] sm:$0xff]  ;;  %v11263_v3 = vld [vmem:[%s20683_s12 + $0x8] sm:$0xff] }
 0xcb6   : > { %v20015_v32 = vmax.f32 %v20855_v22, %v10958_v56  ;;  %v20856_v47 = vmax.f32 %v19776_v4, 0.0  ;;  %v10973_v44 = vsel %vm1368_vm4, %v10944_v30, %v19926_v7  ;;  %v20030_v21 = vmax.f32 %v20857_v37, %v10962_v51 }
 0xcb7   : > { %v10966_v9 = vsel %vm1368_vm4, %v10926_v39, %v19918_v62  ;;  %v20858_v4 = vmax.f32 %v19787_v23, 0.0  ;;  %v10963_v30 = vsel %vm1368_vm4, %v10918_v1, %v10920_v16  ;;  %v10970_v39 = vsel %vm1368_vm4, %v19920_v52, %v19922_v20 }
 0xcb8   : > { %11084 = vrot.lane.b32.xlu1 %v11031_v57, %s20830_s30  ;;  %v20000_v57 = vmax.f32 %v20853_v11, %v10954_v14  ;;  %v20020_v24 = vmax.f32 %v20856_v47, %v10969_v8  ;;  %v20045_v34 = vmax.f32 %v20859_v27, %v10966_v9  ;;  %v20860_v23 = vmax.f32 %v19826_v25, 0.0  ;;  %v10950_v17 = vpop.permute.xlu1 %10949  ;;  %v11264_v11 = vld [vmem:[%s20683_s12 + $0x10] sm:$0xff] }
 0xcb9   : > { %11072 = vrot.lane.b32.xlu0 %v19950_v28, %s20830_s30  ;;  %v20036_v63 = vmax.f32 %v20858_v4, %v10973_v44  ;;  %v10967_v1 = vsel %vm1368_vm4, %v19918_v62, %v10930_v40  ;;  %v10940_v42 = vpop.permute.xlu0 %10939  ;;  %v20861_v13 = vmax.f32 %v19848_v12, 0.0  ;;  %v10974_v25 = vsel %vm1368_vm4, %v19926_v7, %v19924_v18 }
 0xcba   : > { %v20052_v58 = vmax.f32 %v20860_v23, %v10963_v30  ;;  %v20862_v52 = vmax.f32 %v19837_v46, 0.0  ;;  %v10971_v62 = vsel %vm1368_vm4, %v19922_v20, %v10940_v42  ;;  %v20863_v12 = vmax.f32 %v19861_v48, 0.0 }
 0xcbb   : > { %v20062_v49 = vmax.f32 %v20861_v13, %v10970_v39  ;;  %v20864_v7 = vmax.f32 %v19854_v19, 0.0  ;;  %v10975_v46 = vsel %vm1368_vm4, %v19924_v18, %v10950_v17  ;;  %v20865_v20 = vmax.f32 %v19695_v0, 0.0 }
 0xcbc   : > { %11076 = vrot.lane.b32.xlu1 %v19958_v31, %s20830_s30  ;;  %v20069_v33 = vmax.f32 %v20862_v52, %v10967_v1  ;;  %v20079_v45 = vmax.f32 %v20863_v12, %v10974_v25  ;;  %v20866_v48 = vmax.f32 %v19865_v2, 0.0  ;;  %v20867_v19 = vmax.f32 %v19701_v26, 0.0 }
 0xcbd   : > { %11078 = vrot.lane.b32.xlu0 %v19963_v15, %s20830_s30  ;;  %v20083_v53 = vmax.f32 %v20864_v7, %v10971_v62  ;;  %v11032_v14 = vmax.f32 %v20865_v20, %v10920_v16  ;;  %v20868_v0 = vmax.f32 %v19710_v55, 0.0  ;;  %v20869_v26 = vmax.f32 %v19716_v29, 0.0 }
 0xcbe   : > { %v20095_v59 = vmax.f32 %v20866_v48, %v10975_v46  ;;  %v11033_v18 = vmax.f32 %v20867_v19, %v10930_v40  ;;  %vm11680_vm4 = vcmask 982016  }
 0xcbf   : > { %v11034_v2 = vmax.f32 %v20868_v0, %v10940_v42  ;;  %v11035_v56 = vmax.f32 %v20869_v26, %v10950_v17 }
 0xcc0   : > { %11096 = vrot.lane.b32.xlu1 %v19972_v5, %s20830_s30 }
 0xcc1   : > { %11082 = vrot.lane.b32.xlu0 %v19977_v43, %s20830_s30 }
 0xcc4   : > { %11116 = vrot.lane.b32.xlu1 %v19986_v10, %s20830_s30 }
 0xcc5   : > { %11088 = vrot.lane.b32.xlu0 %v19991_v36, %s20830_s30 }
 0xcc8   : > { %11070 = vrot.lane.b32.xlu1 %v20000_v57, %s20830_s30 }
 0xcc9   : > { %11098 = vrot.lane.b32.xlu0 %v20005_v50, %s20830_s30 }
 0xccc   : > { %11080 = vrot.lane.b32.xlu1 %v20015_v32, %s20830_s30 }
 0xccd   : > { %11108 = vrot.lane.b32.xlu0 %v20020_v24, %s20830_s30 }
 0xcd0   : > { %11090 = vrot.lane.b32.xlu1 %v20030_v21, %s20830_s30 }
 0xcd1   : > { %11118 = vrot.lane.b32.xlu0 %v20036_v63, %s20830_s30 }
 0xcd4   : > { %11100 = vrot.lane.b32.xlu1 %v20045_v34, %s20830_s30 }
 0xcd5   : > { %11092 = vrot.lane.b32.xlu0 %v20052_v58, %s20830_s30 }
 0xcd8   : > { %11110 = vrot.lane.b32.xlu1 %v20062_v49, %s20830_s30 }
 0xcd9   : > { %11102 = vrot.lane.b32.xlu0 %v20069_v33, %s20830_s30 }
 0xcdc   : > { %11120 = vrot.lane.b32.xlu1 %v20079_v45, %s20830_s30 }
 0xcdd   : > { %11112 = vrot.lane.b32.xlu0 %v20083_v53, %s20830_s30 }
 0xce0   : > { %11094 = vrot.lane.b32.xlu1 %v11032_v14, %s20830_s30 }
 0xce1   : > { %11122 = vrot.lane.b32.xlu0 %v20095_v59, %s20830_s30 }
 0xce4   : > { %11104 = vrot.lane.b32.xlu1 %v11033_v18, %s20830_s30 }
 0xce5   : > { %11267 = vperm.xlu0 %15505, %v11262_v41  }
 0xce8   : > { %11114 = vrot.lane.b32.xlu1 %v11034_v2, %s20830_s30 }
 0xce9   : > { %11277 = vperm.xlu0 %15505, %v11264_v11  }
 0xcec   : > { %11124 = vrot.lane.b32.xlu1 %v11035_v56, %s20830_s30 }
 0xcf0   : > { %11272 = vperm.xlu1 %15506, %v11263_v3  }
 0xcf6   : > { %v11067_v8 = vpop.permute.xlu0 %11066 }
 0xcfe   : > { %v11087_v55 = vpop.permute.xlu0 %11086 }
 0xd23   : > { %v11107_v22 = vpop.permute.xlu0 %11106 }
 0xd26   : > { %v11075_v51 = vpop.permute.xlu1 %11074 }
 0xd27   : > { %v11069_v47 = vpop.permute.xlu0 %11068 }
 0xd28   : > { %v11127_v12 = vsel %vm2820_vm8, %v11067_v8, %v11069_v47 }
 0xd29   : > { %v11175_v0 = vmax.f32 %v19907_v35, %v11127_v12 }
 0xd2a   : > { %v11085_v44 = vpop.permute.xlu1 %11084 }
 0xd2b   : > { %v11073_v16 = vpop.permute.xlu0 %11072 }
 0xd2c   : > { %v20119_v37 = vsel %vm2820_vm8, %v11073_v16, %v11075_v51 }
 0xd2d   : > { %v11178_v29 = vmax.f32 %v19950_v28, %v20119_v37 }
 0xd2e   : > { %v11077_v9 = vpop.permute.xlu1 %11076 }
 0xd2f   : > { %v11079_v4 = vpop.permute.xlu0 %11078 }
 0xd30   : > { %v11131_v52 = vsel %vm2820_vm8, %v11077_v9, %v11079_v4 }
 0xd31   : > { %v11179_v46 = vmax.f32 %v19958_v31, %v11131_v52 }
 0xd32   : > { %v11097_v30 = vpop.permute.xlu1 %11096 }
 0xd33   : > { %v11083_v40 = vpop.permute.xlu0 %11082  ;;  %v11250_v56 = vpack.c.bf16 %v11179_v46, %v11175_v0 }
 0xd34   : > { %v20124_v27 = vsel %vm2820_vm8, %v11083_v40, %v11085_v44 }
 0xd35   : > { %v11182_v39 = vmax.f32 %v19977_v43, %v20124_v27 }
 0xd36   : > { %v11117_v23 = vpop.permute.xlu1 %11116 }
 0xd37   : > { %v11089_v1 = vpop.permute.xlu0 %11088 }
 0xd38   : > { %v11135_v8 = vsel %vm2820_vm8, %v11087_v55, %v11089_v1 }
 0xd3a   : > { %v11071_v42 = vpop.permute.xlu1 %11070 }
 0xd3b   : > { %v20129_v13 = vsel %vm2820_vm8, %v11071_v42, %v11073_v16  ;;  %v11099_v25 = vpop.permute.xlu0 %11098  ;;  %v11128_v17 = vsel %vm2820_vm8, %v11069_v47, %v11071_v42  ;;  %v11183_v16 = vmax.f32 %v19914_v6, %v11135_v8 }
 0xd3c   : > { %v11177_v62 = vmax.f32 %v20000_v57, %v20129_v13  ;;  %v11176_v19 = vmax.f32 %v19939_v54, %v11128_v17  ;;  %v11139_v3 = vsel %vm2820_vm8, %v11097_v30, %v11099_v25  ;;  %v15633_v57 = vld [vmem:[%s20682_s11 + $0x8] ss:$0 sps:$4 sm:$0xff]  }
 0xd3d   : > { %v11187_v54 = vmax.f32 %v19972_v5, %v11139_v3 }
 0xd3e   : > { %v11081_v7 = vpop.permute.xlu1 %11080 }
 0xd3f   : > { %v11132_v20 = vsel %vm2820_vm8, %v11079_v4, %v11081_v7  ;;  %v11133_v14 = vsel %vm2820_vm8, %v11081_v7, %v11083_v40  ;;  %v11109_v48 = vpop.permute.xlu0 %11108  ;;  %v11254_v40 = vpack.c.bf16 %v11187_v54, %v11183_v16 }
 0xd40   : > { %v11180_v18 = vmax.f32 %v19963_v15, %v11132_v20  ;;  %v11181_v41 = vmax.f32 %v20015_v32, %v11133_v14  ;;  %v11143_v42 = vsel %vm2820_vm8, %v11107_v22, %v11109_v48 }
 0xd41   : > { %v11191_v7 = vmax.f32 %v19931_v61, %v11143_v42  ;;  %v11253_v61 = vpack.c.bf16 %v11182_v39, %v11178_v29 }
 0xd42   : > { %v11091_v2 = vpop.permute.xlu1 %11090  ;;  %v11251_v11 = vpack.c.bf16 %v11180_v18, %v11176_v19  ;;  %v11252_v28 = vpack.c.bf16 %v11181_v41, %v11177_v62 }
 0xd43   : > { %v11119_v26 = vpop.permute.xlu0 %11118  ;;  %v11136_v31 = vsel %vm2820_vm8, %v11089_v1, %v11091_v2 }
 0xd44   : > { %11294 = vmatprep.subr.bf16.mxu1 %v11251_v11  ;;  %v11184_v35 = vmax.f32 %v19991_v36, %v11136_v31  ;;  %v11147_v5 = vsel %vm2820_vm8, %v11117_v23, %v11119_v26 }
 0xd45   : > { %11295 = vmatpush1.bf16.msra.mxu1 %v11250_v56 }
 0xd46   : > { %v11101_v51 = vpop.permute.xlu1 %11100 }
 0xd47   : > { %v11140_v15 = vsel %vm2820_vm8, %v11099_v25, %v11101_v51  ;;  %v11093_v32 = vpop.permute.xlu0 %11092 }
 0xd48   : > { %v11188_v47 = vmax.f32 %v20005_v50, %v11140_v15  ;;  %v11137_v44 = vsel %vm2820_vm8, %v11091_v2, %v11093_v32 }
 0xd49   : > { %v11185_v9 = vmax.f32 %v20030_v21, %v11137_v44  ;;  %v11195_v21 = vmax.f32 %v19986_v10, %v11147_v5 }
 0xd4a   : > { %v11111_v4 = vpop.permute.xlu1 %11110  ;;  %v11255_v30 = vpack.c.bf16 %v11188_v47, %v11184_v35 }
 0xd4b   : > { %11209 = vst [vmem:[#allocation3 + $0xa0] sm:$0xff] %v11185_v9  ;;  %v11103_v55 = vpop.permute.xlu0 %11102  ;;  %v11144_v36 = vsel %vm2820_vm8, %v11109_v48, %v11111_v4  ;;  %v11258_v48 = vpack.c.bf16 %v11195_v21, %v11191_v7 }
 0xd4c   : > { %v11141_v1 = vsel %vm2820_vm8, %v11101_v51, %v11103_v55  ;;  %11296 = vmatprep.subr.bf16.mxu1 %v11255_v30  ;;  %v11192_v17 = vmax.f32 %v20020_v24, %v11144_v36  ;;  %v15632_v24 = vld [vmem:[%s20682_s11] sm:$0xff]  }
 0xd4d   : > { %v11189_v50 = vmax.f32 %v20045_v34, %v11141_v1  ;;  %11297 = vmatpush1.bf16.msra.mxu1 %v11254_v40 }
 0xd4e   : > { %v11121_v6 = vpop.permute.xlu1 %11120 }
 0xd4f   : > { %v11148_v25 = vsel %vm2820_vm8, %v11119_v26, %v11121_v6  ;;  %v11113_v52 = vpop.permute.xlu0 %11112  ;;  %v11256_v27 = vpack.c.bf16 %v11189_v50, %v11185_v9 }
 0xd50   : > { %v11196_v23 = vmax.f32 %v20036_v63, %v11148_v25  ;;  %v11145_v12 = vsel %vm2820_vm8, %v11111_v4, %v11113_v52 }
 0xd51   : > { %v11193_v46 = vmax.f32 %v20062_v49, %v11145_v12 }
 0xd52   : > { %v11095_v34 = vpop.permute.xlu1 %11094  ;;  %v11259_v20 = vpack.c.bf16 %v11196_v23, %v11192_v17 }
 0xd53   : > { %v11138_v22 = vsel %vm2820_vm8, %v11093_v32, %v11095_v34  ;;  %v11123_v14 = vpop.permute.xlu0 %11122 }
 0xd54   : > { %v11186_v10 = vmax.f32 %v20052_v58, %v11138_v22  ;;  %v11149_v19 = vsel %vm2820_vm8, %v11121_v6, %v11123_v14  ;;  %11298 = vmatprep.subr.bf16.mxu1 %v11259_v20  ;;  %v12559_v22 = vld [vmem:[%s20685_s14] sm:$0xff] }
 0xd55   : > { %v11197_v63 = vmax.f32 %v20079_v45, %v11149_v19  ;;  %11299 = vmatpush1.bf16.msra.mxu1 %v11258_v48  ;;  %v12563_v48 = vld [vmem:[%s20685_s14 + $0x20] sm:$0xff]  ;;  %v12560_v19 = vld [vmem:[%s20685_s14 + $0x8] sm:$0xff] }
 0xd56   : > { %11210 = vst [vmem:[#allocation3 + $0xa8] sm:$0xff] %v11186_v10  ;;  %v11105_v49 = vpop.permute.xlu1 %11104  ;;  %11345 = vmatprep.subr.bf16.mxu1 %v11253_v61  ;;  %v12643_v61 = vld [vmem:[%s20687_s16 + $0x10] sm:$0xff] }
 0xd57   : > { %v11142_v58 = vsel %vm2820_vm8, %v11103_v55, %v11105_v49  ;;  %v11260_v41 = vpack.c.bf16 %v11197_v63, %v11193_v46  ;;  %v12564_v63 = vld [vmem:[%s20685_s14 + $0x28] sm:$0xff] }
 0xd58   : > { %v11190_v37 = vmax.f32 %v20069_v33, %v11142_v58  ;;  %14105 = vmatmul.mubr.msk.bf16.vlgmr.msra.gmra.mrb[208].mxu1 %vm7902_vm2, %v15632_v24  ;;  %v12642_v49 = vld [vmem:[%s20687_s16 + $0x8] sm:$0xff]  ;;  %v12644_v58 = vld [vmem:[%s20687_s16 + $0x18] sm:$0xff] }
 0xd59   : > { %11346 = vmatpush1.bf16.msra.mxu1 %v11252_v28  ;;  %11336 = vmatprep.mubr.bf16.mxu1 %v20828_v38 }
 0xd5a   : > { %v11115_v43 = vpop.permute.xlu1 %11114  ;;  %v11257_v29 = vpack.c.bf16 %v11190_v37, %v11186_v10  ;;  %v12641_v10 = vld [vmem:[%s20687_s16] sm:$0xff] }
 0xd5b   : > { %v11146_v45 = vsel %vm2820_vm8, %v11113_v52, %v11115_v43 }
 0xd5c   : > { %v11194_v39 = vmax.f32 %v20083_v53, %v11146_v45  ;;  %11347 = vmatprep.subr.bf16.mxu1 %v11257_v29 }
 0xd5d   : > { %11348 = vmatpush1.bf16.msra.mxu1 %v11256_v27 }
 0xd5e   : > { %v11125_v13 = vpop.permute.xlu1 %11124 }
 0xd5f   : > { %v11150_v33 = vsel %vm2820_vm8, %v11123_v14, %v11125_v13  ;;  %v12561_v14 = vld [vmem:[%s20685_s14 + $0x10] sm:$0xff]  ;;  %vm12332_vm8 = vcmask 97280  }
 0xd60   : > { %v11198_v62 = vmax.f32 %v20095_v59, %v11150_v33  ;;  %14106 = vmatmul.mubr.msk.bf16.gmra.mrb[212].mxu1 %vm7902_vm2, %v15633_v57 }
 0xd61   : > { %11377 = vmatprep.mubr.bf16.mxu1 %v20828_v38 }
 0xd62   : > { %v11261_v18 = vpack.c.bf16 %v11198_v62, %v11194_v39 }
 0xd64   : > { %11349 = vmatprep.subr.bf16.mxu1 %v11261_v18  ;;  %v11268_v0 = vpop.permute.xlu0 %11267  ;;  %v15634_v18 = vld [vmem:[%s20684_s13 + $0x18] sm:$0xff]  }
 0xd65   : > { %11350 = vmatpush1.bf16.msra.mxu1 %v11260_v41 }
 0xd68   : > { %14107 = vmatmul.mubr.msk.bf16.vlgmr.msra.gmra.mrb[216].mxu1 %vm7902_vm2, %v15632_v24  ;;  %v11278_v15 = vpop.permute.xlu0 %11277  ;;  %v12562_v24 = vld [vmem:[%s20685_s14 + $0x18] sm:$0xff] }
 0xd69   : > { %11387 = vmatprep.mubr.bf16.mxu1 %v20828_v38 }
 0xd6f   : > { %v11273_v59 = vpop.permute.xlu1 %11272 }
 0xd70   : > { %14108 = vmatmul.mubr.msk.bf16.gmra.mrb[220].mxu1 %vm7902_vm2, %v15633_v57 }
 0xd71   : > { %11522 = vmatprep.mubr.bf16.mxu1 %v20828_v38 }
 0xe2b   : > { %v11328_v53 = vpop.f32.mrb[208].mxu1 }
 0xe2c   : > { %v11330_v2 = vpop.f32.mrb[209].mxu1  ;;  %v11329_v26 = vadd.f32 %v11328_v53, %v11268_v0 }
 0xe2d   : > { %v11332_v11 = vpop.f32.mrb[210].mxu1  ;;  %v11331_v31 = vadd.f32 %v11330_v2, %v11268_v0  ;;  %v15635_v2 = vld [vmem:[%s20684_s13 + $0x20] sm:$0xff]  }
 0xe2e   : > { %v11333_v56 = vadd.f32 %v11332_v11, %v11273_v59  ;;  %v11334_v3 = vpop.f32.mrb[211].mxu1  ;;  %v15636_v11 = vld [vmem:[%s20684_s13 + $0x28] sm:$0xff]  }
 0xe2f   : > { %v11335_v8 = vadd.f32 %v11334_v3, %v11273_v59 }
 0xe30   : > { %v20198_v51 = vpack.c.bf16 %v11333_v56, %v11329_v26 }
 0xe31   : > { %v20200_v54 = vpack.c.bf16 %v11335_v8, %v11331_v31  ;;  %v15637_v31 = vld [vmem:[%s20684_s13] sm:$0xff]  }
 0xe32   : > { %11457 = vrot.lane.b32.xlu1 %v20198_v51, %s20833_s1 }
 0xe33   : > { %v11338_v32 = vpop.f32.mrb[212].mxu1 }
 0xe34   : > { %v11339_v35 = vadd.f32 %v11338_v32, %v11278_v15  ;;  %v11340_v47 = vpop.f32.mrb[213].mxu1 }
 0xe35   : > { %v11341_v44 = vadd.f32 %v11340_v47, %v11278_v15  ;;  %v11342_v16 = vpop.f32.mrb[214].mxu1 }
 0xe36   : > { %v11343_v9 = vpop.f32.mrb[215].mxu1  ;;  %11459 = vrot.lane.b32.xlu1 %v20200_v54, %s20833_s1  ;;  %v20206_v4 = vpack.c.bf16 %v11339_v35, %v11339_v35  ;;  %v15638_v16 = vld [vmem:[%s20684_s13 + $0x8] sm:$0xff]  }
 0xe37   : > { %v20208_v30 = vpack.c.bf16 %v11341_v44, %v11341_v44 }
 0xe38   : > { %11463 = vrot.lane.b32.xlu0 %v20206_v4, %s20833_s1 }
 0xe3a   : > { %11465 = vrot.lane.b32.xlu1 %v20208_v30, %s20833_s1 }
 0xe3b   : > { %v11379_v55 = vpop.f32.mrb[216].mxu1 }
 0xe3c   : > { %v11380_v40 = vadd.f32 %v11379_v55, %v11268_v0  ;;  %v11381_v5 = vpop.f32.mrb[217].mxu1 }
 0xe3d   : > { %v11382_v1 = vadd.f32 %v11381_v5, %v11268_v0  ;;  %v11383_v36 = vpop.f32.mrb[218].mxu1  ;;  %v11578_v0 = vsel %vm4651_vm11, %v20206_v4, 0 }
 0xe3e   : > { %11398 = vst [vmem:[#allocation2 + $0x10] sm:$0xff] %v11380_v40  ;;  %v11384_v50 = vadd.f32 %v11383_v36, %v11273_v59  ;;  %v11385_v42 = vpop.f32.mrb[219].mxu1  ;;  %11670 = vrot.lane.b32.xlu1 %v20200_v54, %s15770_s24 }
 0xe3f   : > { %11399 = vst [vmem:[#allocation2 + $0x18] sm:$0xff] %v11382_v1  ;;  %v11386_v6 = vadd.f32 %v11385_v42, %v11273_v59 }
 0xe40   : > { %v20215_v21 = vpack.c.bf16 %v11384_v50, %v11380_v40 }
 0xe41   : > { %v12157_v25 = vpack.c.bf16 %v11386_v6, %v11382_v1  ;;  %v15640_v1 = vld [vmem:[%s20684_s13 + $0x30] sm:$0xff]  }
 0xe42   : > { %11461 = vrot.lane.b32.xlu0 %v20215_v21, %s20833_s1  ;;  %11668 = vrot.lane.b32.xlu1 %v20198_v51, %s15770_s24 }
 0xe43   : > { %v11389_v52 = vpop.f32.mrb[220].mxu1 }
 0xe44   : > { %v11390_v17 = vadd.f32 %v11389_v52, %v11278_v15  ;;  %v11391_v23 = vpop.f32.mrb[221].mxu1 }
 0xe45   : > { %v11392_v12 = vadd.f32 %v11391_v23, %v11278_v15  ;;  %v11393_v7 = vpop.f32.mrb[222].mxu1  ;;  %v15641_v23 = vld [vmem:[%s20684_s13 + $0x38] sm:$0xff]  }
 0xe46   : > { %11676 = vrot.lane.b32.xlu1 %v20208_v30, %s15770_s24  ;;  %v11394_v46 = vpop.f32.mrb[223].mxu1  ;;  %v20221_v34 = vpack.c.bf16 %v11390_v17, %v11390_v17  ;;  %v15642_v7 = vld [vmem:[%s20684_s13 + $0x40] sm:$0xff]  }
 0xe47   : > { %v12160_v20 = vpack.c.bf16 %v11392_v12, %v11392_v12 }
 0xe48   : > { %11467 = vrot.lane.b32.xlu0 %v20221_v34, %s20833_s1  ;;  %s15771_s1 = smov 16  }
 0xe4a   : > { %11801 = vrot.lane.b32.xlu1 %v20200_v54, %s20835_s23 }
 0xe4c   : > { %11672 = vrot.lane.b32.xlu0 %v20215_v21, %s15770_s24 }
 0xe4e   : > { %11799 = vrot.lane.b32.xlu1 %v20198_v51, %s20835_s23 }
 0xe50   : > { %11674 = vrot.lane.b32.xlu0 %v20206_v4, %s15770_s24 }
 0xe52   : > { %11807 = vrot.lane.b32.xlu1 %v20208_v30, %s20835_s23 }
 0xe54   : > { %11678 = vrot.lane.b32.xlu0 %v20221_v34, %s15770_s24 }
 0xe56   : > { %11931 = vrot.lane.b32.xlu1 %v20200_v54, %s20837_s29 }
 0xe58   : > { %11803 = vrot.lane.b32.xlu0 %v20215_v21, %s20835_s23 }
 0xe5a   : > { %11929 = vrot.lane.b32.xlu1 %v20198_v51, %s20837_s29 }
 0xe5c   : > { %11805 = vrot.lane.b32.xlu0 %v20206_v4, %s20835_s23 }
 0xe5e   : > { %11937 = vrot.lane.b32.xlu1 %v20208_v30, %s20837_s29 }
 0xe60   : > { %11809 = vrot.lane.b32.xlu0 %v20221_v34, %s20835_s23 }
 0xe62   : > { %12191 = vrot.lane.b32.xlu1 %v20215_v21, %s15771_s1 }
 0xe64   : > { %11933 = vrot.lane.b32.xlu0 %v20215_v21, %s20837_s29 }
 0xe66   : > { %12189 = vrot.lane.b32.xlu1 %v20200_v54, %s15771_s1 }
 0xe68   : > { %11935 = vrot.lane.b32.xlu0 %v20206_v4, %s20837_s29  ;;  %v15639_v4 = vld [vmem:[%s20684_s13 + $0x10] sm:$0xff]  }
 0xe6a   : > { %12197 = vrot.lane.b32.xlu1 %v20221_v34, %s15771_s1 }
 0xe6c   : > { %11939 = vrot.lane.b32.xlu0 %v20221_v34, %s20837_s29 }
 0xe6e   : > { %12322 = vrot.lane.b32.xlu1 %v20215_v21, %s15772_s2 }
 0xe70   : > { %12193 = vrot.lane.b32.xlu0 %v12157_v25, %s15771_s1 }
 0xe72   : > { %12320 = vrot.lane.b32.xlu1 %v20200_v54, %s15772_s2 }
 0xe74   : > { %12195 = vrot.lane.b32.xlu0 %v20208_v30, %s15771_s1 }
 0xe76   : > { %12328 = vrot.lane.b32.xlu1 %v20221_v34, %s15772_s2 }
 0xe78   : > { %12199 = vrot.lane.b32.xlu0 %v12160_v20, %s15771_s1 }
 0xe7a   : > { %12453 = vrot.lane.b32.xlu1 %v20215_v21, %s20835_s23 }
 0xe7c   : > { %12324 = vrot.lane.b32.xlu0 %v12157_v25, %s15772_s2 }
 0xe7e   : > { %12451 = vrot.lane.b32.xlu1 %v20200_v54, %s20835_s23 }
 0xe80   : > { %12326 = vrot.lane.b32.xlu0 %v20208_v30, %s15772_s2 }
 0xe82   : > { %12459 = vrot.lane.b32.xlu1 %v20221_v34, %s20835_s23 }
 0xe84   : > { %12330 = vrot.lane.b32.xlu0 %v12160_v20, %s15772_s2 }
 0xe86   : > { %12567 = vperm.xlu1 %15506, %v12559_v22   ;;  %v15643_v22 = vld [vmem:[%s20684_s13 + $0x48] sm:$0xff]  }
 0xe88   : > { %12455 = vrot.lane.b32.xlu0 %v12157_v25, %s20835_s23 }
 0xe8a   : > { %12577 = vperm.xlu1 %15506, %v12561_v14  }
 0xe8c   : > { %12457 = vrot.lane.b32.xlu0 %v20208_v30, %s20835_s23 }
 0xe8e   : > { %12587 = vperm.xlu1 %15506, %v12563_v48  }
 0xe90   : > { %12461 = vrot.lane.b32.xlu0 %v12160_v20, %s20835_s23  ;;  %s647_s23 = sand.u32 1, %s15743_s25  }
 0xe91   : > { %s648_s24 = scalar_lea.vmem [#allocation4], %s647_s23  ;;  %s13478_s0 = scalar_lea.sflag [#allocation5], %s647_s23 }
 0xe92   : > { %12647 = vperm.xlu1 %15506, %v12641_v10   ;;  %s13490_s1 = sshll.u32 %s648_s24, 4  ;;  %s20630_s1 = int_to_ptr.vmem [resolvable:$true] %s13490_s1 }
 0xe93   : > { %s15689_s30 = scalar_lea.vmem %s20630_s1, 16  ;;  %p15696_p0 = scmp.lt.s32.totalorder %s20630_s1, %s15694_s22 }
 0xe94   : > { %12572 = vperm.xlu0 %15505, %v12560_v19   ;;  %p15690_p11 = scmp.ne.s32.totalorder %s20630_s1, %s15689_s30  ;;  %p15697_p1 = scmp.lt.s32.totalorder %s15695_s4, %s15689_s30 }
 0xe96   : > { %12657 = vperm.xlu1 %15506, %v12643_v61   ;;  %p15691_p12 = pnand %p15690_p11, %p15922_p5  ;;  %p15698_p2 = por %p15697_p1, %p15696_p0 }
 0xe98   : > { %12582 = vperm.xlu0 %15505, %v12562_v24   ;;  %p15692_p13 = pneg %p15691_p12 }
 0xe9a   : > { %p15699_p3 = pnand %p15698_p2, %p15692_p13 }
 0xe9c   : > { %12592 = vperm.xlu0 %15505, %v12564_v63   ;;  %v15644_v63 = vld [vmem:[%s20684_s13 + $0x50] sm:$0xff]  }
 0xea0   : > { %12652 = vperm.xlu0 %15505, %v12642_v49   ;;  %v15645_v49 = vld [vmem:[%s20684_s13 + $0x58] sm:$0xff]  }
 0xea4   : > { %12662 = vperm.xlu0 %15505, %v12644_v58   ;;  %v11458_v28 = vpop.permute.xlu1 %11457  ;;  %v15646_v58 = vld [vmem:[%s20684_s13 + $0x60] sm:$0xff]  }
 0xea8   : > { %v11460_v37 = vpop.permute.xlu1 %11459 }
 0xea9   : > { %v11469_v27 = vsel %vm5516_vm14, %v11458_v28, %v11460_v37 }
 0xeaa   : > { %v11464_v43 = vpop.permute.xlu0 %11463 }
 0xeac   : > { %v11466_v39 = vpop.permute.xlu1 %11465 }
 0xead   : > { %v11471_v57 = vsel %vm5516_vm14, %v11464_v43, %v11466_v39  ;;  %v15647_v43 = vld [vmem:[%s20684_s13 + $0x68] sm:$0xff]  }
 0xeae   : > { %v11485_v62 = vsel %vm4651_vm11, %v11471_v57, 0 }
 0xeb0   : > { %v11671_v53 = vpop.permute.xlu1 %11670 }
 0xeb4   : > { %v11462_v29 = vpop.permute.xlu0 %11461  ;;  %v11669_v56 = vpop.permute.xlu1 %11668 }
 0xeb5   : > { %v11470_v45 = vsel %vm5516_vm14, %v11460_v37, %v11462_v29  ;;  %v11581_v37 = vsel %vm4651_vm11, %v20208_v30, 0 }
 0xeb6   : > { %11490 = vmatprep.subr.bf16.mxu1 %v11470_v45 }
 0xeb7   : > { %11491 = vmatpush1.bf16.msra.mxu1 %v11469_v27  ;;  %v15649_v27 = vld [vmem:[%s20684_s13 + $0x78] sm:$0xff]  }
 0xeb8   : > { %v11677_v8 = vpop.permute.xlu1 %11676 }
 0xeba   : > { %v11468_v13 = vpop.permute.xlu0 %11467 }
 0xebb   : > { %v11472_v33 = vsel %vm5516_vm14, %v11466_v39, %v11468_v13 }
 0xebc   : > { %14118 = vmatprep.subr.msk.bf16.mxu1 %vm4651_vm11, %v11472_v33  ;;  %v11802_v47 = vpop.permute.xlu1 %11801 }
 0xebd   : > { %11493 = vmatpush1.bf16.msra.mxu1 %v11485_v62 }
 0xebe   : > { %11583 = vmatprep.subr.bf16.mxu1 %v20200_v54  ;;  %v11673_v41 = vpop.permute.xlu0 %11672 }
 0xebf   : > { %v11682_v59 = vsel %vm11680_vm4, %v11671_v53, %v11673_v41 }
 0xec0   : > { %14119 = vmatmul.mubr.msk.bf16.vlgmr.msra.gmra.mrb[224].mxu1 %vm8189_vm6, %v15634_v18  ;;  %v11800_v40 = vpop.permute.xlu1 %11799 }
 0xec1   : > { %11584 = vmatpush1.bf16.msra.mxu1 %v20198_v51  ;;  %11532 = vmatprep.mubr.bf16.mxu1 %v20828_v38  ;;  %v11681_v51 = vsel %vm11680_vm4, %v11669_v56, %v11671_v53  ;;  %v11811_v50 = vsel %vm6798_vm0, %v11800_v40, %v11802_v47  ;;  %v15650_v53 = vld [vmem:[%s20684_s13 + $0x80] sm:$0xff]   ;;  %v15652_v56 = vld [vmem:[%s20684_s13 + $0x90] sm:$0xff]  }
 0xec2   : > { %14125 = vmatprep.subr.msk.bf16.mxu1 %vm4651_vm11, %v20208_v30  ;;  %v11675_v26 = vpop.permute.xlu0 %11674 }
 0xec3   : > { %v11683_v15 = vsel %vm11680_vm4, %v11675_v26, %v11677_v8 }
 0xec4   : > { %v11697_v44 = vsel %vm4651_vm11, %v11683_v15, 0  ;;  %v11808_v36 = vpop.permute.xlu1 %11807 }
 0xec5   : > { %11586 = vmatpush1.bf16.msra.mxu1 %v11578_v0 }
 0xec6   : > { %11702 = vmatprep.subr.bf16.mxu1 %v11682_v59  ;;  %v11679_v3 = vpop.permute.xlu0 %11678 }
 0xec7   : > { %v11684_v32 = vsel %vm11680_vm4, %v11677_v8, %v11679_v3 }
 0xec8   : > { %14120 = vmatmul.mubr.msk.bf16.gmra.mrb[228].mxu1 %vm8189_vm6, %v15635_v2  ;;  %v11932_v52 = vpop.permute.xlu1 %11931  ;;  %v15651_v2 = vld [vmem:[%s20684_s13 + $0x88] sm:$0xff]  }
 0xec9   : > { %11542 = vmatprep.mubr.bf16.mxu1 %v20828_v38 }
 0xeca   : > { %v11804_v35 = vpop.permute.xlu0 %11803 }
 0xecb   : > { %v11812_v9 = vsel %vm6798_vm0, %v11802_v47, %v11804_v35  ;;  %v15653_v47 = vld [vmem:[%s20684_s13 + $0x98] sm:$0xff]  }
 0xecc   : > { %v11930_v20 = vpop.permute.xlu1 %11929 }
 0xecd   : > { %v11941_v48 = vsel %vm7440_vm3, %v11930_v20, %v11932_v52 }
 0xece   : > { %v11806_v55 = vpop.permute.xlu0 %11805 }
 0xecf   : > { %v11813_v42 = vsel %vm6798_vm0, %v11806_v55, %v11808_v36  ;;  %v15655_v55 = vld [vmem:[%s20684_s13 + $0xa8] sm:$0xff]  }
 0xed0   : > { %14121 = vmatmul.mubr.msk.bf16.gmra.mrb[232].mxu1 %vm8189_vm6, %v15636_v11  ;;  %v11827_v17 = vsel %vm4651_vm11, %v11813_v42, 0  ;;  %v11938_v10 = vpop.permute.xlu1 %11937 }
 0xed1   : > { %11615 = vmatprep.mubr.bf16.mxu1 %v20828_v38 }
 0xed2   : > { %v11810_v5 = vpop.permute.xlu0 %11809 }
 0xed3   : > { %v11814_v6 = vsel %vm6798_vm0, %v11808_v36, %v11810_v5 }
 0xed4   : > { %v12192_v28 = vpop.permute.xlu1 %12191 }
 0xed6   : > { %v11934_v25 = vpop.permute.xlu0 %11933 }
 0xed7   : > { %v11942_v12 = vsel %vm7440_vm3, %v11932_v52, %v11934_v25  ;;  %v15657_v25 = vld [vmem:[%s20684_s13 + $0xb8] sm:$0xff]   ;;  %v15658_v52 = vld [vmem:[%s20684_s13 + $0xc0] sm:$0xff]  }
 0xed8   : > { %14126 = vmatmul.mubr.msk.bf16.vlgmr.msra.gmra.mrb[224].mxu1 %vm8189_vm6, %v15637_v31  ;;  %v12190_v45 = vpop.permute.xlu1 %12189 }
 0xed9   : > { %11703 = vmatpush1.bf16.msra.mxu1 %v11681_v51  ;;  %11625 = vmatprep.mubr.bf16.mxu1 %v20828_v38  ;;  %v12202_v57 = vsel %vm12201_vm7, %v12190_v45, %v12192_v28 }
 0xeda   : > { %14138 = vmatprep.subr.msk.bf16.mxu1 %vm4651_vm11, %v11684_v32  ;;  %v11936_v46 = vpop.permute.xlu0 %11935 }
 0xedb   : > { %v11943_v19 = vsel %vm7440_vm3, %v11936_v46, %v11938_v10 }
 0xedc   : > { %v11957_v24 = vsel %vm4651_vm11, %v11943_v19, 0  ;;  %v12198_v39 = vpop.permute.xlu1 %12197 }
 0xedd   : > { %11705 = vmatpush1.bf16.msra.mxu1 %v11697_v44 }
 0xede   : > { %11832 = vmatprep.subr.bf16.mxu1 %v11812_v9  ;;  %v11940_v14 = vpop.permute.xlu0 %11939 }
 0xedf   : > { %v11944_v61 = vsel %vm7440_vm3, %v11938_v10, %v11940_v14 }
 0xee0   : > { %14127 = vmatmul.mubr.msk.bf16.gmra.mrb[228].mxu1 %vm8189_vm6, %v15638_v16  ;;  %v12323_v18 = vpop.permute.xlu1 %12322  ;;  %v15654_v16 = vld [vmem:[%s20684_s13 + $0xa0] sm:$0xff]  }
 0xee1   : > { %11635 = vmatprep.mubr.bf16.mxu1 %v20828_v38 }
 0xee4   : > { %v12321_v11 = vpop.permute.xlu1 %12320 }
 0xee5   : > { %v12333_v31 = vsel %vm12332_vm8, %v12321_v11, %v12323_v18 }
 0xee8   : > { %14128 = vmatmul.mubr.msk.bf16.gmra.mrb[232].mxu1 %vm8189_vm6, %v15639_v4  ;;  %v12329_v3 = vpop.permute.xlu1 %12328 }
 0xee9   : > { %11734 = vmatprep.mubr.bf16.mxu1 %v20828_v38 }
 0xeec   : > { %v12454_v32 = vpop.permute.xlu1 %12453 }
 0xef0   : > { %14139 = vmatmul.mubr.msk.bf16.vlgmr.msra.gmra.mrb[224].mxu1 %vm8189_vm6, %v15640_v1  ;;  %v12452_v4 = vpop.permute.xlu1 %12451 }
 0xef1   : > { %11833 = vmatpush1.bf16.msra.mxu1 %v11811_v50  ;;  %11744 = vmatprep.mubr.bf16.mxu1 %v20828_v38  ;;  %v12463_v5 = vsel %vm6798_vm0, %v12452_v4, %v12454_v32 }
 0xef2   : > { %14151 = vmatprep.subr.msk.bf16.mxu1 %vm4651_vm11, %v11814_v6  ;;  %v15656_v6 = vld [vmem:[%s20684_s13 + $0xb0] sm:$0xff]  }
 0xef4   : > { %v12460_v1 = vpop.permute.xlu1 %12459 }
 0xef5   : > { %11835 = vmatpush1.bf16.msra.mxu1 %v11827_v17  ;;  %v15659_v17 = vld [vmem:[%s20684_s13 + $0xc8] sm:$0xff]  }
 0xef6   : > { %11962 = vmatprep.subr.bf16.mxu1 %v11942_v12 }
 0xef8   : > { %14140 = vmatmul.mubr.msk.bf16.gmra.mrb[228].mxu1 %vm8189_vm6, %v15641_v23  ;;  %v15660_v23 = vld [vmem:[%s20684_s13 + $0xd0] sm:$0xff]  }
 0xef9   : > { %11754 = vmatprep.mubr.bf16.mxu1 %v20828_v38 }
 0xf00   : > { %14141 = vmatmul.mubr.msk.bf16.gmra.mrb[232].mxu1 %vm8189_vm6, %v15642_v7 }
 0xf01   : > { %11864 = vmatprep.mubr.bf16.mxu1 %v20828_v38 }
 0xf05   : > { %v12568_v12 = vpop.permute.xlu1 %12567 }
 0xf08   : > { %14152 = vmatmul.mubr.msk.bf16.vlgmr.msra.gmra.mrb[224].mxu1 %vm8189_vm6, %v15643_v22 }
 0xf09   : > { %11963 = vmatpush1.bf16.msra.mxu1 %v11941_v48  ;;  %11874 = vmatprep.mubr.bf16.mxu1 %v20828_v38 }
 0xf0a   : > { %14164 = vmatprep.subr.msk.bf16.mxu1 %vm4651_vm11, %v11944_v61 }
 0xf0d   : > { %11965 = vmatpush1.bf16.msra.mxu1 %v11957_v24 }
 0xf0e   : > { %12071 = vmatprep.subr.bf16.mxu1 %v20215_v21  ;;  %v12194_v21 = vpop.permute.xlu0 %12193 }
 0xf0f   : > { %v12203_v29 = vsel %vm12201_vm7, %v12192_v28, %v12194_v21 }
 0xf10   : > { %14153 = vmatmul.mubr.msk.bf16.gmra.mrb[228].mxu1 %vm8189_vm6, %v15644_v63 }
 0xf11   : > { %11884 = vmatprep.mubr.bf16.mxu1 %v20828_v38 }
 0xf18   : > { %14154 = vmatmul.mubr.msk.bf16.gmra.mrb[232].mxu1 %vm8189_vm6, %v15645_v49  ;;  %v12578_v49 = vpop.permute.xlu1 %12577 }
 0xf19   : > { %11994 = vmatprep.mubr.bf16.mxu1 %v20828_v38 }
 0xf20   : > { %14165 = vmatmul.mubr.msk.bf16.vlgmr.msra.gmra.mrb[224].mxu1 %vm8189_vm6, %v15646_v58 }
 0xf21   : > { %12072 = vmatpush1.bf16.msra.mxu1 %v20200_v54  ;;  %12004 = vmatprep.mubr.bf16.mxu1 %v20828_v38  ;;  %v15648_v54 = vld [vmem:[%s20684_s13 + $0x70] sm:$0xff]  }
 0xf22   : > { %14177 = vmatprep.subr.msk.bf16.mxu1 %vm4651_vm11, %v20221_v34  ;;  %v12196_v34 = vpop.permute.xlu0 %12195 }
 0xf23   : > { %v12204_v13 = vsel %vm12201_vm7, %v12196_v34, %v12198_v39 }
 0xf24   : > { %v12218_v41 = vsel %vm4651_vm11, %v12204_v13, 0 }
 0xf25   : > { %12074 = vmatpush1.bf16.msra.mxu1 %v11581_v37 }
 0xf26   : > { %12223 = vmatprep.subr.bf16.mxu1 %v12203_v29  ;;  %v12200_v30 = vpop.permute.xlu0 %12199 }
 0xf27   : > { %v12205_v33 = vsel %vm12201_vm7, %v12198_v39, %v12200_v30  ;;  %v12588_v39 = vpop.permute.xlu1 %12587 }
 0xf28   : > { %14166 = vmatmul.mubr.msk.bf16.gmra.mrb[228].mxu1 %vm8189_vm6, %v15647_v43 }
 0xf29   : > { %12014 = vmatprep.mubr.bf16.mxu1 %v20828_v38 }
 0xf2a   : > { %v12325_v62 = vpop.permute.xlu0 %12324 }
 0xf2b   : > { %v12334_v0 = vsel %vm12332_vm8, %v12323_v18, %v12325_v62 }
 0xf2e   : > { %v12327_v59 = vpop.permute.xlu0 %12326 }
 0xf2f   : > { %v12335_v8 = vsel %vm12332_vm8, %v12327_v59, %v12329_v3 }
 0xf30   : > { %14167 = vmatmul.mubr.msk.bf16.gmra.mrb[232].mxu1 %vm8189_vm6, %v15648_v54  ;;  %v12349_v35 = vsel %vm4651_vm11, %v12335_v8, 0 }
 0xf31   : > { %12103 = vmatprep.mubr.bf16.mxu1 %v20828_v38 }
 0xf32   : > { %v12331_v26 = vpop.permute.xlu0 %12330 }
 0xf33   : > { %v12336_v51 = vsel %vm12332_vm8, %v12329_v3, %v12331_v26  ;;  %v15661_v26 = vld [vmem:[%s20686_s15] sm:$0xff]   ;;  %v12648_v3 = vpop.permute.xlu1 %12647 }
 0xf36   : > { %v12456_v15 = vpop.permute.xlu0 %12455 }
 0xf37   : > { %v12464_v44 = vsel %vm6798_vm0, %v12454_v32, %v12456_v15  ;;  %v12658_v4 = vpop.permute.xlu1 %12657 }
 0xf38   : > { %14178 = vmatmul.mubr.msk.bf16.vlgmr.msra.gmra.mrb[224].mxu1 %vm8189_vm6, %v15649_v27 }
 0xf39   : > { %12224 = vmatpush1.bf16.msra.mxu1 %v12202_v57  ;;  %12113 = vmatprep.mubr.bf16.mxu1 %v20828_v38 }
 0xf3a   : > { %14190 = vmatprep.subr.msk.bf16.mxu1 %vm4651_vm11, %v12205_v33  ;;  %v12458_v9 = vpop.permute.xlu0 %12457 }
 0xf3b   : > { %v12465_v36 = vsel %vm6798_vm0, %v12458_v9, %v12460_v1 }
 0xf3c   : > { %v12479_v42 = vsel %vm4651_vm11, %v12465_v36, 0 }
 0xf3d   : > { %12226 = vmatpush1.bf16.msra.mxu1 %v12218_v41 }
 0xf3e   : > { %12354 = vmatprep.subr.bf16.mxu1 %v12334_v0  ;;  %v12462_v40 = vpop.permute.xlu0 %12461 }
 0xf3f   : > { %v12466_v50 = vsel %vm6798_vm0, %v12460_v1, %v12462_v40  ;;  %v15663_v1 = vld [vmem:[%s20688_s17 + $0x10] sm:$0xff]  }
 0xf40   : > { %14179 = vmatmul.mubr.msk.bf16.gmra.mrb[228].mxu1 %vm8189_vm6, %v15650_v53 }
 0xf41   : > { %12123 = vmatprep.mubr.bf16.mxu1 %v20828_v38 }
 0xf42   : > { %v12573_v22 = vpop.permute.xlu0 %12572 }
 0xf46   : > { %v12583_v37 = vpop.permute.xlu0 %12582 }
 0xf48   : > { %14180 = vmatmul.mubr.msk.bf16.gmra.mrb[232].mxu1 %vm8189_vm6, %v15651_v2 }
 0xf49   : > { %12255 = vmatprep.mubr.bf16.mxu1 %v20828_v38 }
 0xf4a   : > { %v12593_v62 = vpop.permute.xlu0 %12592 }
 0xf4e   : > { %v12653_v15 = vpop.permute.xlu0 %12652 }
 0xf50   : > { %14191 = vmatmul.mubr.msk.bf16.vlgmr.msra.gmra.mrb[224].mxu1 %vm8189_vm6, %v15652_v56  ;;  %v15662_v56 = vld [vmem:[%s20686_s15 + $0x8] sm:$0xff]  }
 0xf51   : > { %12355 = vmatpush1.bf16.msra.mxu1 %v12333_v31  ;;  %12265 = vmatprep.mubr.bf16.mxu1 %v20828_v38 }
 0xf52   : > { %14203 = vmatprep.subr.msk.bf16.mxu1 %vm4651_vm11, %v12336_v51  ;;  %v12663_v36 = vpop.permute.xlu0 %12662 }
 0xf55   : > { %12357 = vmatpush1.bf16.msra.mxu1 %v12349_v35 }
 0xf56   : > { %12484 = vmatprep.subr.bf16.mxu1 %v12464_v44 }
 0xf58   : > { %14192 = vmatmul.mubr.msk.bf16.gmra.mrb[228].mxu1 %vm8189_vm6, %v15653_v47 }
 0xf59   : > { %12275 = vmatprep.mubr.bf16.mxu1 %v20828_v38 }
 0xf60   : > { %14193 = vmatmul.mubr.msk.bf16.gmra.mrb[232].mxu1 %vm8189_vm6, %v15654_v16 }
 0xf61   : > { %12386 = vmatprep.mubr.bf16.mxu1 %v20828_v38 }
 0xf68   : > { %14204 = vmatmul.mubr.msk.bf16.vlgmr.msra.gmra.mrb[224].mxu1 %vm8189_vm6, %v15655_v55 }
 0xf69   : > { %12485 = vmatpush1.bf16.msra.mxu1 %v12463_v5  ;;  %12396 = vmatprep.mubr.bf16.mxu1 %v20828_v38 }
 0xf6a   : > { %14216 = vmatprep.subr.msk.bf16.mxu1 %vm4651_vm11, %v12466_v50 }
 0xf6d   : > { %12487 = vmatpush1.bf16.msra.mxu1 %v12479_v42 }
 0xf70   : > { %14205 = vmatmul.mubr.msk.bf16.gmra.mrb[228].mxu1 %vm8189_vm6, %v15656_v6 }
 0xf71   : > { %12406 = vmatprep.mubr.bf16.mxu1 %v20828_v38 }
 0xf78   : > { %14206 = vmatmul.mubr.msk.bf16.gmra.mrb[232].mxu1 %vm8189_vm6, %v15657_v25 }
 0xf79   : > { %12516 = vmatprep.mubr.bf16.mxu1 %v20828_v38 }
 0xf80   : > { %14217 = vmatmul.mubr.msk.bf16.vlgmr.msra.gmra.mrb[224].mxu1 %vm8189_vm6, %v15658_v52 }
 0xf81   : > { %12526 = vmatprep.mubr.bf16.mxu1 %v20828_v38 }
 0xf88   : > { %14218 = vmatmul.mubr.msk.bf16.gmra.mrb[228].mxu1 %vm8189_vm6, %v15659_v17 }
 0xf89   : > { %12536 = vmatprep.mubr.bf16.mxu1 %v20828_v38 }
 0xf90   : > { %14219 = vmatmul.mubr.msk.bf16.gmra.mrb[232].mxu1 %vm8189_vm6, %v15660_v23  ;;  %v15664_v23 = vld [vmem:[%s20688_s17 + $0x18] sm:$0xff]  }
0x1053   : > { %v12518_v7 = vpop.f32.mrb[224].mxu1 }
0x1054   : > { %v12595_v46 = vadd.f32 %v12568_v12, %v12518_v7  ;;  %v12520_v20 = vpop.f32.mrb[225].mxu1 }
0x1055   : > { %v12596_v14 = vadd.f32 %v12568_v12, %v12520_v20  ;;  %v12522_v48 = vpop.f32.mrb[226].mxu1 }
0x1056   : > { %v12597_v10 = vadd.f32 %v12573_v22, %v12522_v48  ;;  %v12524_v19 = vpop.f32.mrb[227].mxu1 }
0x1057   : > { %v12598_v61 = vadd.f32 %v12573_v22, %v12524_v19 }
0x1058   : > { %v12635_v24 = vpack.c.bf16 %v12597_v10, %v12595_v46  ;;  %v15665_v10 = vld [vmem:[%s20688_s17] sm:$0xff]  }
0x1059   : > { %v12636_v63 = vpack.c.bf16 %v12598_v61, %v12596_v14 }
0x105b   : > { %v12528_v58 = vpop.f32.mrb[228].mxu1  ;;  %12681 = vmatprep.subr.bf16.mxu0 %v12636_v63 }
0x105c   : > { %v12599_v21 = vadd.f32 %v12578_v49, %v12528_v58  ;;  %v12530_v28 = vpop.f32.mrb[229].mxu1  ;;  %12682 = vmatpush1.bf16.msra.mxu0 %v12635_v24  ;;  %v15666_v24 = vld [vmem:[%s20688_s17 + $0x8] sm:$0xff]  }
0x105d   : > { %v12600_v43 = vadd.f32 %v12578_v49, %v12530_v28  ;;  %v12532_v29 = vpop.f32.mrb[230].mxu1  ;;  %v15667_v49 = vld [vmem:[%s20688_s17 + $0x20] sm:$0xff]   ;;  %v15668_v28 = vld [vmem:[%s20688_s17 + $0x28] sm:$0xff]  }
0x105e   : > { %12611 = vst [vmem:[#allocation3 + $0x90] sm:$0xff] %v12599_v21  ;;  %v12601_v54 = vadd.f32 %v12583_v37, %v12532_v29  ;;  %v12534_v34 = vpop.f32.mrb[231].mxu1 }
0x105f   : > { %12612 = vst [vmem:[#allocation3 + $0x98] sm:$0xff] %v12600_v43  ;;  %v12602_v45 = vadd.f32 %v12583_v37, %v12534_v34  ;;  %v15670_v34 = vld [vmem:[%s20688_s17 + $0x38] sm:$0xff]  }
0x1060   : > { %v12637_v30 = vpack.c.bf16 %v12601_v54, %v12599_v21 }
0x1061   : > { %v12638_v27 = vpack.c.bf16 %v12602_v45, %v12600_v43  ;;  %v15669_v43 = vld [vmem:[%s20688_s17 + $0x30] sm:$0xff]  }
0x1063   : > { %v12538_v57 = vpop.f32.mrb[232].mxu1  ;;  %12683 = vmatprep.subr.bf16.mxu0 %v12638_v27 }
0x1064   : > { %v12603_v13 = vadd.f32 %v12588_v39, %v12538_v57  ;;  %v12540_v33 = vpop.f32.mrb[233].mxu1  ;;  %12684 = vmatpush1.bf16.msra.mxu0 %v12637_v30 }
0x1065   : > { %v12604_v18 = vadd.f32 %v12588_v39, %v12540_v33  ;;  %v12542_v41 = vpop.f32.mrb[234].mxu1 }
0x1066   : > { %v12605_v53 = vadd.f32 %v12593_v62, %v12542_v41  ;;  %v12544_v0 = vpop.f32.mrb[235].mxu1  ;;  %v15671_v41 = vld [vmem:[%s20688_s17 + $0x40] sm:$0xff]  }
0x1067   : > { %v12606_v2 = vadd.f32 %v12593_v62, %v12544_v0 }
0x1068   : > { %v12639_v59 = vpack.c.bf16 %v12605_v53, %v12603_v13 }
0x1069   : > { %v12640_v11 = vpack.c.bf16 %v12606_v2, %v12604_v18  ;;  %v15672_v2 = vld [vmem:[%s20688_s17 + $0x48] sm:$0xff]  }
0x106b   : > { %12685 = vmatprep.subr.bf16.mxu0 %v12640_v11  ;;  %v15673_v11 = vld [vmem:[%s20688_s17 + $0x50] sm:$0xff]  }
0x106c   : > { %12686 = vmatpush1.bf16.msra.mxu0 %v12639_v59 }
0x106d   : > { %14528 = vmatprep.subr.bf16.mxu0 %v20839_v60 }
0x106f   : > { %14222 = vmatmul.mubr.msk.bf16.vlgmr.msra.gmra.mrb[188].mxu0 %vm7902_vm2, %v15661_v26 }
0x1070   : > { %12723 = vmatprep.mubr.bf16.mxu0 %v20828_v38  ;;  %14529 = vmatpush3.bf16.msra.mxu0 %v15663_v1  ;;  %v15684_v1 = vld [vmem:[%s20690_s19 + $0x18] sm:$0xff]  }
0x1071   : > { %14530 = vmatprep.subr.bf16.mxu0 %v20839_v60 }
0x1074   : > { %14531 = vmatpush3.bf16.msra.mxu0 %v15664_v23 }
0x1075   : > { %14536 = vmatprep.subr.bf16.mxu0 %v20839_v60 }
0x1077   : > { %14223 = vmatmul.mubr.msk.bf16.gmra.mrb[192].mxu0 %vm7902_vm2, %v15662_v56  ;;  %v15674_v56 = vld [vmem:[%s20688_s17 + $0x58] sm:$0xff]  }
0x1078   : > { %14532 = vmatprep.mubr.msk.bf16.mxu0 %vm15769_vm5, %v20839_v60 }
0x1142   : > { %v12715_v31 = vpop.f32.mrb[188].mxu0 }
0x1143   : > { %v12716_v8 = vadd.f32 %v12715_v31, %v12648_v3  ;;  %v12717_v51 = vpop.f32.mrb[189].mxu0 }
0x1144   : > { %v12718_v32 = vadd.f32 %v12717_v51, %v12648_v3  ;;  %v12719_v35 = vpop.f32.mrb[190].mxu0  ;;  %v15675_v3 = vld [vmem:[%s20688_s17 + $0x60] sm:$0xff]  }
0x1145   : > { %12734 = vst [vmem:[#allocation2] sm:$0xff] %v12716_v8  ;;  %v12720_v47 = vadd.f32 %v12719_v35, %v12653_v15  ;;  %v12721_v44 = vpop.f32.mrb[191].mxu0 }
0x1146   : > { %12735 = vst [vmem:[#allocation2 + $0x8] sm:$0xff] %v12718_v32  ;;  %v12722_v38 = vadd.f32 %v12721_v44, %v12653_v15  ;;  %v15507_v16 = vpack.i.bf16 %v12718_v32, %v12716_v8  ;;  %v15676_v8 = vld [vmem:[%s20688_s17 + $0x68] sm:$0xff]   ;;  %v15677_v15 = vld [vmem:[%s20688_s17 + $0x70] sm:$0xff]  }
0x1148   : > { %15508 = vxpose.xlu1.b32.start [1/4] (short) %v15507_v16, 128  ;;  %v15509_v9 = vpack.i.bf16 %v12722_v38, %v12720_v47  ;;  %v15678_v47 = vld [vmem:[%s20688_s17 + $0x78] sm:$0xff]   ;;  %v15679_v38 = vld [vmem:[%s20688_s17 + $0x80] sm:$0xff]  }
0x114a   : > { %v12725_v55 = vpop.f32.mrb[192].mxu0 }
0x114b   : > { %v12726_v40 = vadd.f32 %v12725_v55, %v12658_v4  ;;  %v12727_v5 = vpop.f32.mrb[193].mxu0  ;;  %v15681_v55 = vld [vmem:[%s20690_s19] sm:$0xff]  }
0x114c   : > { %v12728_v50 = vadd.f32 %v12727_v5, %v12658_v4  ;;  %v12729_v42 = vpop.f32.mrb[194].mxu0  ;;  %15510 = vxpose.xlu1.b32.cont [2/4] (short) %v15509_v9, 128  ;;  %v15680_v9 = vld [vmem:[%s20688_s17 + $0x88] sm:$0xff]   ;;  %v15683_v5 = vld [vmem:[%s20690_s19 + $0x10] sm:$0xff]  }
0x114d   : > { %v12730_v6 = vadd.f32 %v12729_v42, %v12663_v36  ;;  %v12731_v25 = vpop.f32.mrb[195].mxu0 }
0x114e   : > { %v12732_v52 = vadd.f32 %v12731_v25, %v12663_v36  ;;  %v15511_v17 = vpack.i.bf16 %v12728_v50, %v12726_v40  ;;  %v15682_v40 = vld [vmem:[%s20690_s19 + $0x8] sm:$0xff]  }
0x1150   : > { %15512 = vxpose.xlu1.b32.cont [3/4] (short) %v15511_v17, 128  ;;  %v15513_v12 = vpack.i.bf16 %v12732_v52, %v12730_v6 }
0x1154   : > { %15514 = vxpose.xlu1.b32.end [4/4] (short) %v15513_v12, 128 }
0x11c8   : > { %v15515_v7 = vpop.trf.xlu1 }
0x11c9   : > { %v15516_v22 = vunpack.i.l.bf16 %v15515_v7  ;;  %v15519_v0 = vunpack.i.h.bf16 %v15515_v7 }
0x11cb   : > { %v12814_v58 = vpack.c.bf16 %v15516_v22, %v15516_v22  ;;  %v13126_v31 = vpack.c.bf16 %v15519_v0, %v15519_v0 }
0x11cc   : > { %v15520_v46 = vpop.trf.xlu1 }
0x11cd   : > { %v15521_v20 = vunpack.i.l.bf16 %v15520_v46 }
0x11cf   : > { %v12819_v14 = vpack.c.bf16 %v15521_v20, %v15516_v22  ;;  %v12938_v29 = vpack.c.bf16 %v15521_v20, %v15521_v20 }
0x11d0   : > { %v15523_v48 = vpop.trf.xlu1 }
0x11d1   : > { %v12826_v19 = vrot.slane %v12819_v14, 2 }
0x11d3   : > { %14533 = vmatmul.mubr.msk.bf16.vlgmr.msra.gmra.mrb[196].mxu0 %vm12839_vm9, %v12826_v19 }
0x11d4   : > { %v15524_v61 = vpop.trf.xlu1  ;;  %14537 = vmatpush3.bf16.msra.mxu0 %v15665_v10  ;;  %14540 = vmatprep.mubr.msk.bf16.mxu0 %vm15769_vm5, %v20839_v60 }
0x11d5   : > { %14538 = vmatprep.subr.bf16.mxu0 %v20839_v60 }
0x11d8   : > { %v15525_v63 = vpop.trf.xlu1  ;;  %14539 = vmatpush3.bf16.msra.mxu0 %v15666_v24 }
0x11d9   : > { %14544 = vmatprep.subr.bf16.mxu0 %v20839_v60 }
0x11db   : > { %14541 = vmatmul.mubr.msk.bf16.vlgmr.msra.gmra.mrb[200].mxu0 %vm12839_vm9, %v12814_v58 }
0x11dc   : > { %v15526_v21 = vpop.trf.xlu1  ;;  %14545 = vmatpush3.bf16.msra.mxu0 %v15667_v49  ;;  %14548 = vmatprep.mubr.msk.bf16.mxu0 %vm15769_vm5, %v20839_v60 }
0x11dd   : > { %14546 = vmatprep.subr.bf16.mxu0 %v20839_v60 }
0x11e0   : > { %v15527_v37 = vpop.trf.xlu1  ;;  %14547 = vmatpush3.bf16.msra.mxu0 %v15668_v28 }
0x11e1   : > { %14552 = vmatprep.subr.bf16.mxu0 %v20839_v60 }
0x11e3   : > { %14549 = vmatmul.mubr.msk.bf16.vlgmr.msra.gmra.mrb[204].mxu0 %vm12839_vm9, %v12938_v29 }
0x11e4   : > { %v15528_v54 = vpop.trf.xlu1  ;;  %14553 = vmatpush3.bf16.msra.mxu0 %v15669_v43  ;;  %14556 = vmatprep.mubr.msk.bf16.mxu0 %vm15769_vm5, %v20839_v60 }
0x11e5   : > { %14554 = vmatprep.subr.bf16.mxu0 %v20839_v60 }
0x11e8   : > { %v15529_v45 = vpop.trf.xlu1  ;;  %14555 = vmatpush3.bf16.msra.mxu0 %v15670_v34 }
0x11e9   : > { %14560 = vmatprep.subr.bf16.mxu0 %v20839_v60 }
0x11ec   : > { %v15530_v30 = vpop.trf.xlu1 }
0x11f0   : > { %v15531_v27 = vpop.trf.xlu1 }
0x11f4   : > { %v15532_v39 = vpop.trf.xlu1 }
0x11f8   : > { %v15533_v57 = vpop.trf.xlu1 }
0x11fc   : > { %v15534_v13 = vpop.trf.xlu1 }
0x1200   : > { %v15535_v33 = vpop.trf.xlu1 }
0x1201   : > { %v15537_v51 = vunpack.i.h.bf16 %v15535_v33 }
0x1203   : > { %v13188_v32 = vpack.c.bf16 %v15537_v51, %v15537_v51 }
0x1204   : > { %v15538_v62 = vpop.trf.xlu1 }
0x1205   : > { %v15539_v18 = vunpack.i.l.bf16 %v15538_v62  ;;  %v15542_v35 = vunpack.i.h.bf16 %v15538_v62 }
0x1207   : > { %v13000_v53 = vpack.c.bf16 %v15539_v18, %v15539_v18  ;;  %v13062_v59 = vpack.c.bf16 %v15519_v0, %v15539_v18  ;;  %v13250_v44 = vpack.c.bf16 %v15542_v35, %v15537_v51  ;;  %v13314_v4 = vpack.c.bf16 %v15542_v35, %v15542_v35 }
0x1209   : > { %14557 = vmatmul.mubr.msk.bf16.vlgmr.msra.gmra.mrb[208].mxu0 %vm12839_vm9, %v13000_v53  ;;  %v13069_v26 = vrot.slane %v13062_v59, 2  ;;  %v13257_v16 = vrot.slane %v13250_v44, 2  ;;  %v14283_v53 = vld [vmem:[%s20689_s18] ss:$0 sm:$0xff] }
0x120a   : > { %14561 = vmatpush3.bf16.msra.mxu0 %v15671_v41  ;;  %14564 = vmatprep.mubr.msk.bf16.mxu0 %vm15769_vm5, %v20839_v60 }
0x120b   : > { %14562 = vmatprep.subr.bf16.mxu0 %v20839_v60 }
0x120e   : > { %14563 = vmatpush3.bf16.msra.mxu0 %v15672_v2 }
0x120f   : > { %14568 = vmatprep.subr.bf16.mxu0 %v20839_v60 }
0x1211   : > { %14565 = vmatmul.mubr.msk.bf16.vlgmr.msra.gmra.mrb[212].mxu0 %vm12839_vm9, %v13069_v26 }
0x1212   : > { %14569 = vmatpush3.bf16.msra.mxu0 %v15673_v11  ;;  %14572 = vmatprep.mubr.msk.bf16.mxu0 %vm15769_vm5, %v20839_v60 }
0x1213   : > { %14570 = vmatprep.subr.bf16.mxu0 %v20839_v60 }
0x1216   : > { %14571 = vmatpush3.bf16.msra.mxu0 %v15674_v56 }
0x1217   : > { %14576 = vmatprep.subr.bf16.mxu0 %v20839_v60 }
0x1219   : > { %14573 = vmatmul.mubr.msk.bf16.vlgmr.msra.gmra.mrb[216].mxu0 %vm12839_vm9, %v13126_v31  ;;  %v13394_v31 = vld [vmem:[%s20691_s20] sm:$0x1] }
0x121a   : > { %14577 = vmatpush3.bf16.msra.mxu0 %v15675_v3  ;;  %14580 = vmatprep.mubr.msk.bf16.mxu0 %vm15769_vm5, %v20839_v60 }
0x121b   : > { %14578 = vmatprep.subr.bf16.mxu0 %v20839_v60 }
0x121e   : > { %14579 = vmatpush3.bf16.msra.mxu0 %v15676_v8 }
0x121f   : > { %14584 = vmatprep.subr.bf16.mxu0 %v20839_v60 }
0x1221   : > { %14581 = vmatmul.mubr.msk.bf16.vlgmr.msra.gmra.mrb[220].mxu0 %vm12839_vm9, %v13188_v32 }
0x1222   : > { %14585 = vmatpush3.bf16.msra.mxu0 %v15677_v15  ;;  %14588 = vmatprep.mubr.msk.bf16.mxu0 %vm15769_vm5, %v20839_v60 }
0x1223   : > { %14586 = vmatprep.subr.bf16.mxu0 %v20839_v60 }
0x1226   : > { %14587 = vmatpush3.bf16.msra.mxu0 %v15678_v47 }
0x1227   : > { %14592 = vmatprep.subr.bf16.mxu0 %v20839_v60 }
0x1229   : > { %14589 = vmatmul.mubr.msk.bf16.vlgmr.msra.gmra.mrb[224].mxu0 %vm12839_vm9, %v13257_v16 }
0x122a   : > { %14593 = vmatpush3.bf16.msra.mxu0 %v15679_v38  ;;  %14596 = vmatprep.mubr.msk.bf16.mxu0 %vm15769_vm5, %v20839_v60 }
0x122b   : > { %14594 = vmatprep.subr.bf16.mxu0 %v20839_v60 }
0x122e   : > { %14595 = vmatpush3.bf16.msra.mxu0 %v15680_v9 }
0x122f   : > { %14600 = vmatprep.subr.bf16.mxu0 %v20839_v60 }
0x1231   : > { %14597 = vmatmul.mubr.msk.bf16.vlgmr.msra.gmra.mrb[228].mxu0 %vm12839_vm9, %v13314_v4 }
0x1232   : > { %14608 = vmatprep.mubr.msk.bf16.mxu0 %vm15769_vm5, %v20839_v60  ;;  %14601 = vmatpush3.bf16.msra.mxu0 %v15681_v55 }
0x1233   : > { %14602 = vmatprep.subr.bf16.mxu0 %v20839_v60 }
0x1236   : > { %14603 = vmatpush3.bf16.msra.mxu0 %v15682_v40 }
0x1237   : > { %14604 = vmatprep.subr.bf16.mxu0 %v20839_v60 }
0x123a   : > { %14605 = vmatpush3.bf16.msra.mxu0 %v15683_v5 }
0x123b   : > { %14606 = vmatprep.subr.bf16.mxu0 %v20839_v60 }
0x123e   : > { %14607 = vmatpush3.bf16.msra.mxu0 %v15684_v1 }
0x12a6   : > { %v12877_v36 = vpop.f32.mrb[196].mxu0 }
0x12a7   : > { %v14534_v50 = vpop.f32.mrb[197].mxu0 }
0x12a8   : > { %v12880_v42 = vpop.f32.mrb[198].mxu0 }
0x12a9   : > { %v14535_v6 = vpop.f32.mrb[199].mxu0 }
0x12ae   : > { %v12932_v25 = vpop.f32.mrb[200].mxu0 }
0x12af   : > { %v12933_v52 = vadd.f32 %v12932_v25, %v12877_v36  ;;  %v14542_v17 = vpop.f32.mrb[201].mxu0 }
0x12b0   : > { %v12935_v23 = vpop.f32.mrb[202].mxu0 }
0x12b1   : > { %v14543_v12 = vpop.f32.mrb[203].mxu0 }
0x12b6   : > { %v12993_v7 = vpop.f32.mrb[204].mxu0 }
0x12b7   : > { %v12999_v46 = vadd.f32 %v12993_v7, %v12933_v52  ;;  %v14550_v20 = vpop.f32.mrb[205].mxu0 }
0x12b8   : > { %v12996_v22 = vpop.f32.mrb[206].mxu0 }
0x12b9   : > { %v14551_v14 = vpop.f32.mrb[207].mxu0 }
0x12dc   : > { %v13055_v60 = vpop.f32.mrb[208].mxu0 }
0x12dd   : > { %v13061_v48 = vadd.f32 %v13055_v60, %v12999_v46  ;;  %v14558_v10 = vpop.f32.mrb[209].mxu0 }
0x12de   : > { %v13058_v19 = vpop.f32.mrb[210].mxu0 }
0x12df   : > { %v14559_v61 = vpop.f32.mrb[211].mxu0 }
0x12e4   : > { %v13119_v24 = vpop.f32.mrb[212].mxu0 }
0x12e5   : > { %v13125_v63 = vadd.f32 %v13119_v24, %v13061_v48  ;;  %v14566_v49 = vpop.f32.mrb[213].mxu0 }
0x12e6   : > { %v13122_v58 = vpop.f32.mrb[214].mxu0 }
0x12e7   : > { %v14567_v21 = vpop.f32.mrb[215].mxu0 }
0x12ec   : > { %v13181_v28 = vpop.f32.mrb[216].mxu0 }
0x12ed   : > { %v13187_v37 = vadd.f32 %v13181_v28, %v13125_v63  ;;  %v14574_v43 = vpop.f32.mrb[217].mxu0 }
0x12ee   : > { %v13184_v29 = vpop.f32.mrb[218].mxu0 }
0x12ef   : > { %v14575_v54 = vpop.f32.mrb[219].mxu0 }
0x12f4   : > { %v13243_v34 = vpop.f32.mrb[220].mxu0 }
0x12f5   : > { %v13249_v45 = vadd.f32 %v13243_v34, %v13187_v37  ;;  %v14582_v30 = vpop.f32.mrb[221].mxu0 }
0x12f6   : > { %v13246_v27 = vpop.f32.mrb[222].mxu0 }
0x12f7   : > { %v14583_v39 = vpop.f32.mrb[223].mxu0 }
0x12fc   : > { %v13307_v57 = vpop.f32.mrb[224].mxu0 }
0x12fd   : > { %v13313_v13 = vadd.f32 %v13307_v57, %v13249_v45  ;;  %v14590_v33 = vpop.f32.mrb[225].mxu0 }
0x12fe   : > { %v13310_v62 = vpop.f32.mrb[226].mxu0 }
0x12ff   : > { %v14591_v18 = vpop.f32.mrb[227].mxu0 }
0x1304   : > { %v13369_v41 = vpop.f32.mrb[228].mxu0 }
0x1305   : > { %v13375_v0 = vadd.f32 %v13369_v41, %v13313_v13  ;;  %v14598_v2 = vpop.f32.mrb[229].mxu0 }
0x1306   : > { %v13372_v59 = vpop.f32.mrb[230].mxu0 }
0x1307   : > { %v13383_v11 = vadd.f32 %v14283_v53, %v13375_v0  ;;  %v14599_v26 = vpop.f32.mrb[231].mxu0 }
0x1309   : > { %v13384_v56 = vmax.f32 %v13383_v11, 0.0 }
0x130b   : > { %v13385_v3 = vpack.c.bf16 %v13384_v56, %v13384_v56 }
0x130d   : > { %14609 = vmatmul.mubr.msk.bf16.vlgmr.msra.gmra.mrb[232].mxu0 %vm6477_vm15, %v13385_v3 }
0x13e0   : > { %v13457_v8 = vpop.f32.mrb[232].mxu0 }
0x13e1   : > { %v13458_v51 = vadd.f32 %v13457_v8, %v13394_v31  ;;  %v14610_v15 = vpop.f32.mrb[233].mxu0 }
0x13e2   : > { %v13460_v32 = vpop.f32.mrb[234].mxu0 }
0x13e3   : > { %v14611_v35 = vpop.f32.mrb[235].mxu0  ;;  %v13464_v47 = vsel %vm13463_vm10, %v13458_v51, -inf }
0x13e4   : > { %13465 = vmax.xlane.f32.xlu0 %v13464_v47 }
0x1471   : > { %v13466_v44 = vpop.xlane.xlu0 %13465 }
0x1472   : > { %v13467_v38 = vsub.f32 %v13458_v51, %v13466_v44 }
0x1474   : > { %v13468_v16 = vmul.f32 1.442695, %v13467_v38 }
0x1476   : > { %15685 = vpow2.f32 %v13468_v16 }
0x1480   : > { %v15686_v9 = vpop.eup %15685 }
0x1481   : > { %v13470_v4 = vsel %vm13463_vm10, %v15686_v9, 0.0 }
0x1482   : > { %13471 = vadd.xlane.f32.xlu0 %v13470_v4 }
0x150f   : > { %v13472_v55 = vpop.xlane.xlu0 %13471 }
0x1510   : > { %15687 = vlog2.f32 %v13472_v55 }
0x151a   : > { %v15688_v40 = vpop.eup %15687 }
0x151b   : > { %v13474_v5 = vmul.f32 0.6931472, %v15688_v40 }
0x151d   : > { %v13475_v1 = vsub.f32 %v13467_v38, %v13474_v5 }
0x151f   : > { %13476 = vst.msk [vmem:[%s648_s24] sm:$0x1] %vm13463_vm10, %v13475_v1 }
0x1520   : > { %15702 = shalt.err (!%p15699_p3)
}
0x1521   : > { %s15703_s23 = scalar_lea.hbm %s20628_s28, 16  ;;  %s15707_s2 = scalar_lea.hbm %s20692_s21, 32 }
0x1522   : > { %p15704_p4 = scmp.ne.s32.totalorder %s20628_s28, %s15703_s23  ;;  %p15708_p9 = scmp.lt.u32.totalorder %s20628_s28, %s20692_s21 }
0x1523   : > { %p15709_p10 = scmp.lt.u32.totalorder %s15707_s2, %s15703_s23  ;;  %p15711_p12 = scmp.lt.u32.totalorder %s15703_s23, %s20628_s28 }
0x1524   : > { %p15705_p7 = pnand %p15704_p4, %p15922_p5 }
0x1525   : > { %p15710_p11 = por %p15709_p10, %p15708_p9 }
0x1526   : > { %p15706_p8 = pneg %p15705_p7 }
0x1527   : > { %p15712_p13 = por %p15711_p12, %p15710_p11 }
0x1529   : > { %p15713_p0 = pnand %p15712_p13, %p15706_p8 }
0x152b   : > { %15716 = shalt.err (!%p15713_p0)
}
0x152c   : > { %15446 = dma.vmem_to_hbm [thread:$0]  (%p15922_p5), %s20630_s1, 16, %s20628_s28, %s13478_s0  }
0x152d PF: > { %s20870_s30 = sld [smem:[#allocation7_spill]]  ;;  %p15452_p1 = scmp.ge.s32.totalorder %s15751_s27, 2 }
0x152f   : > { %p15449_p2 = pnand %p15452_p1, %p15926_p6 }
0x1533   : > { %s13502_s4 = sand.u32 1, %s20870_s30  }
0x1534   : > { %s13503_s26 = scalar_lea.sflag [#allocation5], %s13502_s4 }
0x1535   : > { %15734 = dma.done.wait (!%p15449_p2), %s13503_s26, 16  }
0x1536   : > { %15736 = vsyncadd (!%p15449_p2), %s13503_s26, 4294967280  ;;  %s20872_s27 = sld [smem:[#allocation9_spill]]  ;;  %s20873_s23 = sld [smem:[#allocation8_spill]] }
0x1537   : > { %s20874_s26 = sld [smem:[#allocation10_spill]]  ;;  %s20875_s2 = smov %s15743_s25 }
0x153c   : > { %p31_p3 = scmp.ge.s32.totalorder %s20872_s27, 4   ;;  %s20876_s25 = smov %s20873_s23 }
0x153e   :  { %33 = sbr.rel (!%p31_p3) target bundleno = 10 (0xa), region = 179 }
0x1545   :  { %13507 = vsyncpa [#allocation5], 1 }
0x1546   :  { %13509 = vsyncpa [#allocation5 + $0x1], 1 }

</bundles_post_ra>
